<compile_context>
chip_gen: v5e
topology: v5e:2x2
jax: 0.10.0
libtpu: 0.0.40
codegen_flags: <defaults>
</compile_context>

<pallas_src>
import numpy as np
import jax
import jax.numpy as jnp
from jax.experimental import pallas as pl
from jax.experimental.pallas import tpu as pltpu


# ----------------------------------------------------------------------------
# Minimal in-script NNF node classes (same semantics as the PyTorch module:
# LiteralNodeModule -> x[:, lit] or 1-x[:, lit], ANDNode -> product of
# children, ORNode -> sum of children).
# ----------------------------------------------------------------------------
class LiteralNode:
    def __init__(self, literal, negated=False):
        self.literal = literal          # 1-based literal id
        self.negated = negated


class AndNode:
    def __init__(self, children):
        self.children = children


class OrNode:
    def __init__(self, children):
        self.children = children


def eval_ref(node, x):
    """Pure-JAX reference evaluator (same semantics as the torch module)."""
    if isinstance(node, LiteralNode):
        v = x[:, node.literal - 1]
        return 1.0 - v if node.negated else v
    vals = [eval_ref(c, x) for c in node.children]
    out = vals[0]
    for v in vals[1:]:
        out = out * v if isinstance(node, AndNode) else out + v
    return out


# ----------------------------------------------------------------------------
# Compile the NNF circuit into dense layered tensors.
#   state slot 0 : constant 1.0   (neutral element for AND fan-in padding)
#   state slot 1 : constant 0.0   (neutral element for OR  fan-in padding)
#   slots 2..2+n_vars-1            : positive literal values  x_i
#   slots 2+n_vars..2+2*n_vars-1   : negated  literal values  1 - x_i
#   remaining slots                : internal AND/OR node values
# Selectors for the K children of every layer-l node are concatenated on the
# lane axis into one (W, K*W) int8 one-hot weight.
# ----------------------------------------------------------------------------
def compile_circuit(root, n_vars, W=128, K=4, LB=8):
    CONST_ONE, CONST_ZERO = 0, 1

    def lit_slot(lit, neg):
        return 2 + (n_vars if neg else 0) + (lit - 1)

    next_slot = 2 + 2 * n_vars
    layers = {}  # level -> list of (slot, is_and, child_slots)

    def visit(node):
        nonlocal next_slot
        if isinstance(node, LiteralNode):
            return lit_slot(node.literal, node.negated), 0
        child = [visit(c) for c in node.children]
        level = max(l for _, l in child) + 1
        slot = next_slot
        next_slot += 1
        layers.setdefault(level, []).append(
            (slot, isinstance(node, AndNode), [s for s, _ in child]))
        return slot, level

    root_slot, root_level = visit(root)
    assert next_slot <= W, "circuit too large for W=128 state vector"
    L = max(root_level, 1)

    LB = max(1, min(LB, L))                     # layer-chunk size
    L_pad = ((L + LB - 1) // LB) * LB           # padded layers are identities

    sel = np.zeros((L_pad, W, K * W), np.int8)   # one-hot child gather (0/1)
    isand = np.zeros((L_pad, 1, W), np.float32)  # 1.0 where layer-l node is AND
    mask = np.zeros((L_pad, 1, W), np.float32)   # 1.0 where slot is a layer-l node
    for level in range(1, root_level + 1):
        li = level - 1
        for slot, is_and, children in layers.get(level, []):
            assert len(children) <= K, "fan-in exceeds K"
            mask[li, 0, slot] = 1.0
            isand[li, 0, slot] = 1.0 if is_and else 0.0
            for k in range(K):
                if k < len(children):
                    sel[li, children[k], k * W + slot] = 1
                else:
                    sel[li, CONST_ONE if is_and else CONST_ZERO, k * W + slot] = 1

    # Initial projection: state = x_pad @ P + c  (consts, x_i and 1-x_i)
    P = np.zeros((W, W), np.float32)
    c = np.zeros((1, W), np.float32)
    c[0, CONST_ONE] = 1.0
    for i in range(n_vars):
        P[i, 2 + i] = 1.0
        P[i, 2 + n_vars + i] = -1.0
        c[0, 2 + n_vars + i] = 1.0
    return (jnp.asarray(P), jnp.asarray(c), jnp.asarray(sel),
            jnp.asarray(isand), jnp.asarray(mask), root_slot, L_pad, LB, K)


# ----------------------------------------------------------------------------
# Pallas kernel: one grid step = one batch tile x one chunk of LB layers.
# The circuit state lives in the resident output block across the layer axis.
# ----------------------------------------------------------------------------
def circuit_kernel(x_ref, p_ref, c_ref, sel_ref, isand_ref, mask_ref, out_ref):
    LB = sel_ref.shape[0]
    W = out_ref.shape[1]
    K = sel_ref.shape[2] // W

    # First layer chunk: build the initial state (consts + +/- literal values).
    @pl.when(pl.program_id(1) == 0)
    def _():
        out_ref[...] = (jnp.dot(x_ref[...], p_ref[...],
                                preferred_element_type=jnp.float32)
                        + c_ref[...])

    v = out_ref[...]
    for l in range(LB):                               # small static unroll
        w = sel_ref[l].astype(jnp.float32)            # (W, K*W) exact 0/1
        g = jnp.dot(v, w, preferred_element_type=jnp.float32)   # (Bt, K*W)
        and_val = g[:, :W]
        or_val = g[:, :W]
        for k in range(1, K):
            gk = g[:, k * W:(k + 1) * W]
            and_val = and_val * gk                    # AND: product of children
            or_val = or_val + gk                      # OR : sum of children
        combined = or_val + isand_ref[l] * (and_val - or_val)
        v = v + mask_ref[l] * (combined - v)          # write layer nodes only
    out_ref[...] = v


def nnf_to_nn_forward(x, root, n_vars, *, b_tile=128, lb=8):
    """Equivalent to NNFToNN.forward: x (B, n_vars) -> (B,) circuit value."""
    B = x.shape[0]
    W = 128
    P, c, sel, isand, mask, root_slot, L_pad, LB, K = compile_circuit(
        root, n_vars, W=W, K=4, LB=lb)

    B_pad = ((B + b_tile - 1) // b_tile) * b_tile     # no silent clipping
    x_pad = jnp.zeros((B_pad, W), jnp.float32)
    x_pad = x_pad.at[:B, :n_vars].set(x.astype(jnp.float32))

    n_b = B_pad // b_tile
    n_l = L_pad // LB

    out = pl.pallas_call(
        circuit_kernel,
        out_shape=jax.ShapeDtypeStruct((B_pad, W), jnp.float32),
        grid=(n_b, n_l),
        in_specs=[
            pl.BlockSpec((b_tile, W), lambda b, l: (b, 0)),        # x
            pl.BlockSpec((W, W), lambda b, l: (0, 0)),             # P
            pl.BlockSpec((1, W), lambda b, l: (0, 0)),             # c
            pl.BlockSpec((LB, W, K * W), lambda b, l: (l, 0, 0)),  # sel (int8)
            pl.BlockSpec((LB, 1, W), lambda b, l: (l, 0, 0)),      # isand
            pl.BlockSpec((LB, 1, W), lambda b, l: (l, 0, 0)),      # mask
        ],
        out_specs=pl.BlockSpec((b_tile, W), lambda b, l: (b, 0)),  # state
        compiler_params=pltpu.CompilerParams(
            dimension_semantics=("parallel", "arbitrary")),
    )(x_pad, P, c, sel, isand, mask)
    return out[:B, root_slot]


if __name__ == "__main__":
    n_vars = 10
    B = 2

    # Deterministic synthetic NNF circuit (plays the role of `root`).
    L = LiteralNode
    root = OrNode([
        AndNode([L(1), L(2), L(3, negated=True)]),
        AndNode([L(1, negated=True), OrNode([L(4), L(5)]), L(6)]),
        AndNode([L(7), L(8, negated=True), OrNode([L(9), L(10, negated=True)])]),
    ])
    # Deepen the circuit so the layer-tiled grid (multiple LB chunks + padded
    # identity layers) is actually exercised.
    node = root
    for d in range(6):
        if d % 2 == 0:
            node = AndNode([node, L(1 + (d % n_vars))])
        else:
            node = OrNode([node, AndNode([L(2), L(3, negated=True)])])
    root = node

    key = jax.random.PRNGKey(0)
    x = jax.random.uniform(key, (B, n_vars), dtype=jnp.float32)

    y = nnf_to_nn_forward(x, root, n_vars)
    y = jax.block_until_ready(y)

    y_ref = eval_ref(root, x)
    np.testing.assert_allclose(np.asarray(y), np.asarray(y_ref),
                               rtol=1e-5, atol=1e-5)
    print("KERNEL_OK")
</pallas_src>

<mosaic_0001>
module attributes {stable_mosaic.version = 11 : i64} {
  func.func @circuit_kernel(%arg0: i32, %arg1: i32, %arg2: memref<128x128xf32, #tpu.memory_space<vmem>>, %arg3: memref<128x128xf32, #tpu.memory_space<vmem>>, %arg4: memref<1x128xf32, #tpu.memory_space<vmem>>, %arg5: memref<8x128x512xi8, #tpu.memory_space<vmem>>, %arg6: memref<8x1x128xf32, #tpu.memory_space<vmem>>, %arg7: memref<8x1x128xf32, #tpu.memory_space<vmem>>, %arg8: memref<128x128xf32, #tpu.memory_space<vmem>>) attributes {dimension_semantics = [#tpu.dimension_semantics<parallel>, #tpu.dimension_semantics<arbitrary>], iteration_bounds = array<i64: 1, 2>, scalar_prefetch = 0 : i64, scratch_operands = 0 : i64, tpu.core_type = #tpu.core_type<tc>, window_params = [{transform_indices = @transform_0, window_bounds = array<i64: 128, 128>}, {pipeline_mode = #tpu.pipeline_mode<synchronous>, transform_indices = @transform_1, window_bounds = array<i64: 128, 128>}, {pipeline_mode = #tpu.pipeline_mode<synchronous>, transform_indices = @transform_2, window_bounds = array<i64: 1, 128>}, {transform_indices = @transform_3, window_bounds = array<i64: 8, 128, 512>}, {transform_indices = @transform_4, window_bounds = array<i64: 8, 1, 128>}, {transform_indices = @transform_5, window_bounds = array<i64: 8, 1, 128>}, {transform_indices = @transform_6, window_bounds = array<i64: 128, 128>}]} {
    %c0_i32 = arith.constant 0 : i32
    %0 = arith.cmpi eq, %arg1, %c0_i32 : i32
    %1 = arith.extui %0 : i1 to i32
    %c0_i32_0 = arith.constant 0 : i32
    %2 = arith.cmpi ne, %1, %c0_i32_0 : i32
    scf.if %2 {
      %c0_76 = arith.constant 0 : index
      %c0_77 = arith.constant 0 : index
      %221 = vector.load %arg2[%c0_76, %c0_77] : memref<128x128xf32, #tpu.memory_space<vmem>>, vector<128x128xf32>
      %c0_78 = arith.constant 0 : index
      %c0_79 = arith.constant 0 : index
      %222 = vector.load %arg3[%c0_78, %c0_79] : memref<128x128xf32, #tpu.memory_space<vmem>>, vector<128x128xf32>
      %cst_80 = arith.constant dense<0.000000e+00> : vector<128x128xf32>
      %223 = tpu.matmul %221, %222, %cst_80 {dimension_numbers = #tpu.dot_dimension_numbers<[1], [0], [0], [1], [0, 0, 1, 1], [], []>} : vector<128x128xf32>, vector<128x128xf32>, vector<128x128xf32> -> vector<128x128xf32>
      %c0_81 = arith.constant 0 : index
      %c0_82 = arith.constant 0 : index
      %224 = vector.load %arg4[%c0_81, %c0_82] : memref<1x128xf32, #tpu.memory_space<vmem>>, vector<1x128xf32>
      %225 = vector.broadcast %224 : vector<1x128xf32> to vector<128x128xf32>
      %226 = arith.addf %223, %225 : vector<128x128xf32>
      %c0_83 = arith.constant 0 : index
      %c0_84 = arith.constant 0 : index
      %227 = vector.load %arg8[%c0_83, %c0_84] : memref<128x128xf32, #tpu.memory_space<vmem>>, vector<128x128xf32>
      tpu.vector_store %arg8[%c0_83, %c0_84], %226 {strides = array<i32>} : memref<128x128xf32, #tpu.memory_space<vmem>>, vector<128x128xf32>,
    } else {
    }
    %c0 = arith.constant 0 : index
    %c0_1 = arith.constant 0 : index
    %3 = vector.load %arg8[%c0, %c0_1] : memref<128x128xf32, #tpu.memory_space<vmem>>, vector<128x128xf32>
    %c0_2 = arith.constant 0 : index
    %c0_3 = arith.constant 0 : index
    %c0_4 = arith.constant 0 : index
    %4 = vector.load %arg5[%c0_2, %c0_3, %c0_4] : memref<8x128x512xi8, #tpu.memory_space<vmem>>, vector<1x128x512xi8>
    %5 = vector.shape_cast %4 : vector<1x128x512xi8> to vector<128x512xi8>
    %6 = arith.sitofp %5 : vector<128x512xi8> to vector<128x512xf32>
    %cst = arith.constant dense<0.000000e+00> : vector<128x512xf32>
    %7 = tpu.matmul %3, %6, %cst {dimension_numbers = #tpu.dot_dimension_numbers<[1], [0], [0], [1], [0, 0, 1, 1], [], []>} : vector<128x128xf32>, vector<128x512xf32>, vector<128x512xf32> -> vector<128x512xf32>
    %8 = vector.extract_strided_slice %7 {offsets = [0, 0], sizes = [128, 128], strides = [1, 1]} : vector<128x512xf32> to vector<128x128xf32>
    %9 = vector.extract_strided_slice %7 {offsets = [0, 0], sizes = [128, 128], strides = [1, 1]} : vector<128x512xf32> to vector<128x128xf32>
    %10 = vector.extract_strided_slice %7 {offsets = [0, 128], sizes = [128, 128], strides = [1, 1]} : vector<128x512xf32> to vector<128x128xf32>
    %11 = arith.mulf %8, %10 : vector<128x128xf32>
    %12 = arith.addf %9, %10 : vector<128x128xf32>
    %13 = vector.extract_strided_slice %7 {offsets = [0, 256], sizes = [128, 128], strides = [1, 1]} : vector<128x512xf32> to vector<128x128xf32>
    %14 = arith.mulf %11, %13 : vector<128x128xf32>
    %15 = arith.addf %12, %13 : vector<128x128xf32>
    %16 = vector.extract_strided_slice %7 {offsets = [0, 384], sizes = [128, 128], strides = [1, 1]} : vector<128x512xf32> to vector<128x128xf32>
    %17 = arith.mulf %14, %16 : vector<128x128xf32>
    %18 = arith.addf %15, %16 : vector<128x128xf32>
    %c0_5 = arith.constant 0 : index
    %c0_6 = arith.constant 0 : index
    %c0_7 = arith.constant 0 : index
    %19 = vector.load %arg6[%c0_5, %c0_6, %c0_7] : memref<8x1x128xf32, #tpu.memory_space<vmem>>, vector<1x1x128xf32>
    %20 = vector.shape_cast %19 : vector<1x1x128xf32> to vector<1x128xf32>
    %21 = arith.subf %17, %18 : vector<128x128xf32>
    %22 = vector.broadcast %20 : vector<1x128xf32> to vector<128x128xf32>
    %23 = arith.mulf %22, %21 : vector<128x128xf32>
    %24 = arith.addf %18, %23 : vector<128x128xf32>
    %c0_8 = arith.constant 0 : index
    %c0_9 = arith.constant 0 : index
    %c0_10 = arith.constant 0 : index
    %25 = vector.load %arg7[%c0_8, %c0_9, %c0_10] : memref<8x1x128xf32, #tpu.memory_space<vmem>>, vector<1x1x128xf32>
    %26 = vector.shape_cast %25 : vector<1x1x128xf32> to vector<1x128xf32>
    %27 = arith.subf %24, %3 : vector<128x128xf32>
    %28 = vector.broadcast %26 : vector<1x128xf32> to vector<128x128xf32>
    %29 = arith.mulf %28, %27 : vector<128x128xf32>
    %30 = arith.addf %3, %29 : vector<128x128xf32>
    %c1 = arith.constant 1 : index
    %c0_11 = arith.constant 0 : index
    %c0_12 = arith.constant 0 : index
    %31 = vector.load %arg5[%c1, %c0_11, %c0_12] : memref<8x128x512xi8, #tpu.memory_space<vmem>>, vector<1x128x512xi8>
    %32 = vector.shape_cast %31 : vector<1x128x512xi8> to vector<128x512xi8>
    %33 = arith.sitofp %32 : vector<128x512xi8> to vector<128x512xf32>
    %cst_13 = arith.constant dense<0.000000e+00> : vector<128x512xf32>
    %34 = tpu.matmul %30, %33, %cst_13 {dimension_numbers = #tpu.dot_dimension_numbers<[1], [0], [0], [1], [0, 0, 1, 1], [], []>} : vector<128x128xf32>, vector<128x512xf32>, vector<128x512xf32> -> vector<128x512xf32>
    %35 = vector.extract_strided_slice %34 {offsets = [0, 0], sizes = [128, 128], strides = [1, 1]} : vector<128x512xf32> to vector<128x128xf32>
    %36 = vector.extract_strided_slice %34 {offsets = [0, 0], sizes = [128, 128], strides = [1, 1]} : vector<128x512xf32> to vector<128x128xf32>
    %37 = vector.extract_strided_slice %34 {offsets = [0, 128], sizes = [128, 128], strides = [1, 1]} : vector<128x512xf32> to vector<128x128xf32>
    %38 = arith.mulf %35, %37 : vector<128x128xf32>
    %39 = arith.addf %36, %37 : vector<128x128xf32>
    %40 = vector.extract_strided_slice %34 {offsets = [0, 256], sizes = [128, 128], strides = [1, 1]} : vector<128x512xf32> to vector<128x128xf32>
    %41 = arith.mulf %38, %40 : vector<128x128xf32>
    %42 = arith.addf %39, %40 : vector<128x128xf32>
    %43 = vector.extract_strided_slice %34 {offsets = [0, 384], sizes = [128, 128], strides = [1, 1]} : vector<128x512xf32> to vector<128x128xf32>
    %44 = arith.mulf %41, %43 : vector<128x128xf32>
    %45 = arith.addf %42, %43 : vector<128x128xf32>
    %c1_14 = arith.constant 1 : index
    %c0_15 = arith.constant 0 : index
    %c0_16 = arith.constant 0 : index
    %46 = vector.load %arg6[%c1_14, %c0_15, %c0_16] : memref<8x1x128xf32, #tpu.memory_space<vmem>>, vector<1x1x128xf32>
    %47 = vector.shape_cast %46 : vector<1x1x128xf32> to vector<1x128xf32>
    %48 = arith.subf %44, %45 : vector<128x128xf32>
    %49 = vector.broadcast %47 : vector<1x128xf32> to vector<128x128xf32>
    %50 = arith.mulf %49, %48 : vector<128x128xf32>
    %51 = arith.addf %45, %50 : vector<128x128xf32>
    %c1_17 = arith.constant 1 : index
    %c0_18 = arith.constant 0 : index
    %c0_19 = arith.constant 0 : index
    %52 = vector.load %arg7[%c1_17, %c0_18, %c0_19] : memref<8x1x128xf32, #tpu.memory_space<vmem>>, vector<1x1x128xf32>
    %53 = vector.shape_cast %52 : vector<1x1x128xf32> to vector<1x128xf32>
    %54 = arith.subf %51, %30 : vector<128x128xf32>
    %55 = vector.broadcast %53 : vector<1x128xf32> to vector<128x128xf32>
    %56 = arith.mulf %55, %54 : vector<128x128xf32>
    %57 = arith.addf %30, %56 : vector<128x128xf32>
    %c2 = arith.constant 2 : index
    %c0_20 = arith.constant 0 : index
    %c0_21 = arith.constant 0 : index
    %58 = vector.load %arg5[%c2, %c0_20, %c0_21] : memref<8x128x512xi8, #tpu.memory_space<vmem>>, vector<1x128x512xi8>
    %59 = vector.shape_cast %58 : vector<1x128x512xi8> to vector<128x512xi8>
    %60 = arith.sitofp %59 : vector<128x512xi8> to vector<128x512xf32>
    %cst_22 = arith.constant dense<0.000000e+00> : vector<128x512xf32>
    %61 = tpu.matmul %57, %60, %cst_22 {dimension_numbers = #tpu.dot_dimension_numbers<[1], [0], [0], [1], [0, 0, 1, 1], [], []>} : vector<128x128xf32>, vector<128x512xf32>, vector<128x512xf32> -> vector<128x512xf32>
    %62 = vector.extract_strided_slice %61 {offsets = [0, 0], sizes = [128, 128], strides = [1, 1]} : vector<128x512xf32> to vector<128x128xf32>
    %63 = vector.extract_strided_slice %61 {offsets = [0, 0], sizes = [128, 128], strides = [1, 1]} : vector<128x512xf32> to vector<128x128xf32>
    %64 = vector.extract_strided_slice %61 {offsets = [0, 128], sizes = [128, 128], strides = [1, 1]} : vector<128x512xf32> to vector<128x128xf32>
    %65 = arith.mulf %62, %64 : vector<128x128xf32>
    %66 = arith.addf %63, %64 : vector<128x128xf32>
    %67 = vector.extract_strided_slice %61 {offsets = [0, 256], sizes = [128, 128], strides = [1, 1]} : vector<128x512xf32> to vector<128x128xf32>
    %68 = arith.mulf %65, %67 : vector<128x128xf32>
    %69 = arith.addf %66, %67 : vector<128x128xf32>
    %70 = vector.extract_strided_slice %61 {offsets = [0, 384], sizes = [128, 128], strides = [1, 1]} : vector<128x512xf32> to vector<128x128xf32>
    %71 = arith.mulf %68, %70 : vector<128x128xf32>
    %72 = arith.addf %69, %70 : vector<128x128xf32>
    %c2_23 = arith.constant 2 : index
    %c0_24 = arith.constant 0 : index
    %c0_25 = arith.constant 0 : index
    %73 = vector.load %arg6[%c2_23, %c0_24, %c0_25] : memref<8x1x128xf32, #tpu.memory_space<vmem>>, vector<1x1x128xf32>
    %74 = vector.shape_cast %73 : vector<1x1x128xf32> to vector<1x128xf32>
    %75 = arith.subf %71, %72 : vector<128x128xf32>
    %76 = vector.broadcast %74 : vector<1x128xf32> to vector<128x128xf32>
    %77 = arith.mulf %76, %75 : vector<128x128xf32>
    %78 = arith.addf %72, %77 : vector<128x128xf32>
    %c2_26 = arith.constant 2 : index
    %c0_27 = arith.constant 0 : index
    %c0_28 = arith.constant 0 : index
    %79 = vector.load %arg7[%c2_26, %c0_27, %c0_28] : memref<8x1x128xf32, #tpu.memory_space<vmem>>, vector<1x1x128xf32>
    %80 = vector.shape_cast %79 : vector<1x1x128xf32> to vector<1x128xf32>
    %81 = arith.subf %78, %57 : vector<128x128xf32>
    %82 = vector.broadcast %80 : vector<1x128xf32> to vector<128x128xf32>
    %83 = arith.mulf %82, %81 : vector<128x128xf32>
    %84 = arith.addf %57, %83 : vector<128x128xf32>
    %c3 = arith.constant 3 : index
    %c0_29 = arith.constant 0 : index
    %c0_30 = arith.constant 0 : index
    %85 = vector.load %arg5[%c3, %c0_29, %c0_30] : memref<8x128x512xi8, #tpu.memory_space<vmem>>, vector<1x128x512xi8>
    %86 = vector.shape_cast %85 : vector<1x128x512xi8> to vector<128x512xi8>
    %87 = arith.sitofp %86 : vector<128x512xi8> to vector<128x512xf32>
    %cst_31 = arith.constant dense<0.000000e+00> : vector<128x512xf32>
    %88 = tpu.matmul %84, %87, %cst_31 {dimension_numbers = #tpu.dot_dimension_numbers<[1], [0], [0], [1], [0, 0, 1, 1], [], []>} : vector<128x128xf32>, vector<128x512xf32>, vector<128x512xf32> -> vector<128x512xf32>
    %89 = vector.extract_strided_slice %88 {offsets = [0, 0], sizes = [128, 128], strides = [1, 1]} : vector<128x512xf32> to vector<128x128xf32>
    %90 = vector.extract_strided_slice %88 {offsets = [0, 0], sizes = [128, 128], strides = [1, 1]} : vector<128x512xf32> to vector<128x128xf32>
    %91 = vector.extract_strided_slice %88 {offsets = [0, 128], sizes = [128, 128], strides = [1, 1]} : vector<128x512xf32> to vector<128x128xf32>
    %92 = arith.mulf %89, %91 : vector<128x128xf32>
    %93 = arith.addf %90, %91 : vector<128x128xf32>
    %94 = vector.extract_strided_slice %88 {offsets = [0, 256], sizes = [128, 128], strides = [1, 1]} : vector<128x512xf32> to vector<128x128xf32>
    %95 = arith.mulf %92, %94 : vector<128x128xf32>
    %96 = arith.addf %93, %94 : vector<128x128xf32>
    %97 = vector.extract_strided_slice %88 {offsets = [0, 384], sizes = [128, 128], strides = [1, 1]} : vector<128x512xf32> to vector<128x128xf32>
    %98 = arith.mulf %95, %97 : vector<128x128xf32>
    %99 = arith.addf %96, %97 : vector<128x128xf32>
    %c3_32 = arith.constant 3 : index
    %c0_33 = arith.constant 0 : index
    %c0_34 = arith.constant 0 : index
    %100 = vector.load %arg6[%c3_32, %c0_33, %c0_34] : memref<8x1x128xf32, #tpu.memory_space<vmem>>, vector<1x1x128xf32>
    %101 = vector.shape_cast %100 : vector<1x1x128xf32> to vector<1x128xf32>
    %102 = arith.subf %98, %99 : vector<128x128xf32>
    %103 = vector.broadcast %101 : vector<1x128xf32> to vector<128x128xf32>
    %104 = arith.mulf %103, %102 : vector<128x128xf32>
    %105 = arith.addf %99, %104 : vector<128x128xf32>
    %c3_35 = arith.constant 3 : index
    %c0_36 = arith.constant 0 : index
    %c0_37 = arith.constant 0 : index
    %106 = vector.load %arg7[%c3_35, %c0_36, %c0_37] : memref<8x1x128xf32, #tpu.memory_space<vmem>>, vector<1x1x128xf32>
    %107 = vector.shape_cast %106 : vector<1x1x128xf32> to vector<1x128xf32>
    %108 = arith.subf %105, %84 : vector<128x128xf32>
    %109 = vector.broadcast %107 : vector<1x128xf32> to vector<128x128xf32>
    %110 = arith.mulf %109, %108 : vector<128x128xf32>
    %111 = arith.addf %84, %110 : vector<128x128xf32>
    %c4 = arith.constant 4 : index
    %c0_38 = arith.constant 0 : index
    %c0_39 = arith.constant 0 : index
    %112 = vector.load %arg5[%c4, %c0_38, %c0_39] : memref<8x128x512xi8, #tpu.memory_space<vmem>>, vector<1x128x512xi8>
    %113 = vector.shape_cast %112 : vector<1x128x512xi8> to vector<128x512xi8>
    %114 = arith.sitofp %113 : vector<128x512xi8> to vector<128x512xf32>
    %cst_40 = arith.constant dense<0.000000e+00> : vector<128x512xf32>
    %115 = tpu.matmul %111, %114, %cst_40 {dimension_numbers = #tpu.dot_dimension_numbers<[1], [0], [0], [1], [0, 0, 1, 1], [], []>} : vector<128x128xf32>, vector<128x512xf32>, vector<128x512xf32> -> vector<128x512xf32>
    %116 = vector.extract_strided_slice %115 {offsets = [0, 0], sizes = [128, 128], strides = [1, 1]} : vector<128x512xf32> to vector<128x128xf32>
    %117 = vector.extract_strided_slice %115 {offsets = [0, 0], sizes = [128, 128], strides = [1, 1]} : vector<128x512xf32> to vector<128x128xf32>
    %118 = vector.extract_strided_slice %115 {offsets = [0, 128], sizes = [128, 128], strides = [1, 1]} : vector<128x512xf32> to vector<128x128xf32>
    %119 = arith.mulf %116, %118 : vector<128x128xf32>
    %120 = arith.addf %117, %118 : vector<128x128xf32>
    %121 = vector.extract_strided_slice %115 {offsets = [0, 256], sizes = [128, 128], strides = [1, 1]} : vector<128x512xf32> to vector<128x128xf32>
    %122 = arith.mulf %119, %121 : vector<128x128xf32>
    %123 = arith.addf %120, %121 : vector<128x128xf32>
    %124 = vector.extract_strided_slice %115 {offsets = [0, 384], sizes = [128, 128], strides = [1, 1]} : vector<128x512xf32> to vector<128x128xf32>
    %125 = arith.mulf %122, %124 : vector<128x128xf32>
    %126 = arith.addf %123, %124 : vector<128x128xf32>
    %c4_41 = arith.constant 4 : index
    %c0_42 = arith.constant 0 : index
    %c0_43 = arith.constant 0 : index
    %127 = vector.load %arg6[%c4_41, %c0_42, %c0_43] : memref<8x1x128xf32, #tpu.memory_space<vmem>>, vector<1x1x128xf32>
    %128 = vector.shape_cast %127 : vector<1x1x128xf32> to vector<1x128xf32>
    %129 = arith.subf %125, %126 : vector<128x128xf32>
    %130 = vector.broadcast %128 : vector<1x128xf32> to vector<128x128xf32>
    %131 = arith.mulf %130, %129 : vector<128x128xf32>
    %132 = arith.addf %126, %131 : vector<128x128xf32>
    %c4_44 = arith.constant 4 : index
    %c0_45 = arith.constant 0 : index
    %c0_46 = arith.constant 0 : index
    %133 = vector.load %arg7[%c4_44, %c0_45, %c0_46] : memref<8x1x128xf32, #tpu.memory_space<vmem>>, vector<1x1x128xf32>
    %134 = vector.shape_cast %133 : vector<1x1x128xf32> to vector<1x128xf32>
    %135 = arith.subf %132, %111 : vector<128x128xf32>
    %136 = vector.broadcast %134 : vector<1x128xf32> to vector<128x128xf32>
    %137 = arith.mulf %136, %135 : vector<128x128xf32>
    %138 = arith.addf %111, %137 : vector<128x128xf32>
    %c5 = arith.constant 5 : index
    %c0_47 = arith.constant 0 : index
    %c0_48 = arith.constant 0 : index
    %139 = vector.load %arg5[%c5, %c0_47, %c0_48] : memref<8x128x512xi8, #tpu.memory_space<vmem>>, vector<1x128x512xi8>
    %140 = vector.shape_cast %139 : vector<1x128x512xi8> to vector<128x512xi8>
    %141 = arith.sitofp %140 : vector<128x512xi8> to vector<128x512xf32>
    %cst_49 = arith.constant dense<0.000000e+00> : vector<128x512xf32>
    %142 = tpu.matmul %138, %141, %cst_49 {dimension_numbers = #tpu.dot_dimension_numbers<[1], [0], [0], [1], [0, 0, 1, 1], [], []>} : vector<128x128xf32>, vector<128x512xf32>, vector<128x512xf32> -> vector<128x512xf32>
    %143 = vector.extract_strided_slice %142 {offsets = [0, 0], sizes = [128, 128], strides = [1, 1]} : vector<128x512xf32> to vector<128x128xf32>
    %144 = vector.extract_strided_slice %142 {offsets = [0, 0], sizes = [128, 128], strides = [1, 1]} : vector<128x512xf32> to vector<128x128xf32>
    %145 = vector.extract_strided_slice %142 {offsets = [0, 128], sizes = [128, 128], strides = [1, 1]} : vector<128x512xf32> to vector<128x128xf32>
    %146 = arith.mulf %143, %145 : vector<128x128xf32>
    %147 = arith.addf %144, %145 : vector<128x128xf32>
    %148 = vector.extract_strided_slice %142 {offsets = [0, 256], sizes = [128, 128], strides = [1, 1]} : vector<128x512xf32> to vector<128x128xf32>
    %149 = arith.mulf %146, %148 : vector<128x128xf32>
    %150 = arith.addf %147, %148 : vector<128x128xf32>
    %151 = vector.extract_strided_slice %142 {offsets = [0, 384], sizes = [128, 128], strides = [1, 1]} : vector<128x512xf32> to vector<128x128xf32>
    %152 = arith.mulf %149, %151 : vector<128x128xf32>
    %153 = arith.addf %150, %151 : vector<128x128xf32>
    %c5_50 = arith.constant 5 : index
    %c0_51 = arith.constant 0 : index
    %c0_52 = arith.constant 0 : index
    %154 = vector.load %arg6[%c5_50, %c0_51, %c0_52] : memref<8x1x128xf32, #tpu.memory_space<vmem>>, vector<1x1x128xf32>
    %155 = vector.shape_cast %154 : vector<1x1x128xf32> to vector<1x128xf32>
    %156 = arith.subf %152, %153 : vector<128x128xf32>
    %157 = vector.broadcast %155 : vector<1x128xf32> to vector<128x128xf32>
    %158 = arith.mulf %157, %156 : vector<128x128xf32>
    %159 = arith.addf %153, %158 : vector<128x128xf32>
    %c5_53 = arith.constant 5 : index
    %c0_54 = arith.constant 0 : index
    %c0_55 = arith.constant 0 : index
    %160 = vector.load %arg7[%c5_53, %c0_54, %c0_55] : memref<8x1x128xf32, #tpu.memory_space<vmem>>, vector<1x1x128xf32>
    %161 = vector.shape_cast %160 : vector<1x1x128xf32> to vector<1x128xf32>
    %162 = arith.subf %159, %138 : vector<128x128xf32>
    %163 = vector.broadcast %161 : vector<1x128xf32> to vector<128x128xf32>
    %164 = arith.mulf %163, %162 : vector<128x128xf32>
    %165 = arith.addf %138, %164 : vector<128x128xf32>
    %c6 = arith.constant 6 : index
    %c0_56 = arith.constant 0 : index
    %c0_57 = arith.constant 0 : index
    %166 = vector.load %arg5[%c6, %c0_56, %c0_57] : memref<8x128x512xi8, #tpu.memory_space<vmem>>, vector<1x128x512xi8>
    %167 = vector.shape_cast %166 : vector<1x128x512xi8> to vector<128x512xi8>
    %168 = arith.sitofp %167 : vector<128x512xi8> to vector<128x512xf32>
    %cst_58 = arith.constant dense<0.000000e+00> : vector<128x512xf32>
    %169 = tpu.matmul %165, %168, %cst_58 {dimension_numbers = #tpu.dot_dimension_numbers<[1], [0], [0], [1], [0, 0, 1, 1], [], []>} : vector<128x128xf32>, vector<128x512xf32>, vector<128x512xf32> -> vector<128x512xf32>
    %170 = vector.extract_strided_slice %169 {offsets = [0, 0], sizes = [128, 128], strides = [1, 1]} : vector<128x512xf32> to vector<128x128xf32>
    %171 = vector.extract_strided_slice %169 {offsets = [0, 0], sizes = [128, 128], strides = [1, 1]} : vector<128x512xf32> to vector<128x128xf32>
    %172 = vector.extract_strided_slice %169 {offsets = [0, 128], sizes = [128, 128], strides = [1, 1]} : vector<128x512xf32> to vector<128x128xf32>
    %173 = arith.mulf %170, %172 : vector<128x128xf32>
    %174 = arith.addf %171, %172 : vector<128x128xf32>
    %175 = vector.extract_strided_slice %169 {offsets = [0, 256], sizes = [128, 128], strides = [1, 1]} : vector<128x512xf32> to vector<128x128xf32>
    %176 = arith.mulf %173, %175 : vector<128x128xf32>
    %177 = arith.addf %174, %175 : vector<128x128xf32>
    %178 = vector.extract_strided_slice %169 {offsets = [0, 384], sizes = [128, 128], strides = [1, 1]} : vector<128x512xf32> to vector<128x128xf32>
    %179 = arith.mulf %176, %178 : vector<128x128xf32>
    %180 = arith.addf %177, %178 : vector<128x128xf32>
    %c6_59 = arith.constant 6 : index
    %c0_60 = arith.constant 0 : index
    %c0_61 = arith.constant 0 : index
    %181 = vector.load %arg6[%c6_59, %c0_60, %c0_61] : memref<8x1x128xf32, #tpu.memory_space<vmem>>, vector<1x1x128xf32>
    %182 = vector.shape_cast %181 : vector<1x1x128xf32> to vector<1x128xf32>
    %183 = arith.subf %179, %180 : vector<128x128xf32>
    %184 = vector.broadcast %182 : vector<1x128xf32> to vector<128x128xf32>
    %185 = arith.mulf %184, %183 : vector<128x128xf32>
    %186 = arith.addf %180, %185 : vector<128x128xf32>
    %c6_62 = arith.constant 6 : index
    %c0_63 = arith.constant 0 : index
    %c0_64 = arith.constant 0 : index
    %187 = vector.load %arg7[%c6_62, %c0_63, %c0_64] : memref<8x1x128xf32, #tpu.memory_space<vmem>>, vector<1x1x128xf32>
    %188 = vector.shape_cast %187 : vector<1x1x128xf32> to vector<1x128xf32>
    %189 = arith.subf %186, %165 : vector<128x128xf32>
    %190 = vector.broadcast %188 : vector<1x128xf32> to vector<128x128xf32>
    %191 = arith.mulf %190, %189 : vector<128x128xf32>
    %192 = arith.addf %165, %191 : vector<128x128xf32>
    %c7 = arith.constant 7 : index
    %c0_65 = arith.constant 0 : index
    %c0_66 = arith.constant 0 : index
    %193 = vector.load %arg5[%c7, %c0_65, %c0_66] : memref<8x128x512xi8, #tpu.memory_space<vmem>>, vector<1x128x512xi8>
    %194 = vector.shape_cast %193 : vector<1x128x512xi8> to vector<128x512xi8>
    %195 = arith.sitofp %194 : vector<128x512xi8> to vector<128x512xf32>
    %cst_67 = arith.constant dense<0.000000e+00> : vector<128x512xf32>
    %196 = tpu.matmul %192, %195, %cst_67 {dimension_numbers = #tpu.dot_dimension_numbers<[1], [0], [0], [1], [0, 0, 1, 1], [], []>} : vector<128x128xf32>, vector<128x512xf32>, vector<128x512xf32> -> vector<128x512xf32>
    %197 = vector.extract_strided_slice %196 {offsets = [0, 0], sizes = [128, 128], strides = [1, 1]} : vector<128x512xf32> to vector<128x128xf32>
    %198 = vector.extract_strided_slice %196 {offsets = [0, 0], sizes = [128, 128], strides = [1, 1]} : vector<128x512xf32> to vector<128x128xf32>
    %199 = vector.extract_strided_slice %196 {offsets = [0, 128], sizes = [128, 128], strides = [1, 1]} : vector<128x512xf32> to vector<128x128xf32>
    %200 = arith.mulf %197, %199 : vector<128x128xf32>
    %201 = arith.addf %198, %199 : vector<128x128xf32>
    %202 = vector.extract_strided_slice %196 {offsets = [0, 256], sizes = [128, 128], strides = [1, 1]} : vector<128x512xf32> to vector<128x128xf32>
    %203 = arith.mulf %200, %202 : vector<128x128xf32>
    %204 = arith.addf %201, %202 : vector<128x128xf32>
    %205 = vector.extract_strided_slice %196 {offsets = [0, 384], sizes = [128, 128], strides = [1, 1]} : vector<128x512xf32> to vector<128x128xf32>
    %206 = arith.mulf %203, %205 : vector<128x128xf32>
    %207 = arith.addf %204, %205 : vector<128x128xf32>
    %c7_68 = arith.constant 7 : index
    %c0_69 = arith.constant 0 : index
    %c0_70 = arith.constant 0 : index
    %208 = vector.load %arg6[%c7_68, %c0_69, %c0_70] : memref<8x1x128xf32, #tpu.memory_space<vmem>>, vector<1x1x128xf32>
    %209 = vector.shape_cast %208 : vector<1x1x128xf32> to vector<1x128xf32>
    %210 = arith.subf %206, %207 : vector<128x128xf32>
    %211 = vector.broadcast %209 : vector<1x128xf32> to vector<128x128xf32>
    %212 = arith.mulf %211, %210 : vector<128x128xf32>
    %213 = arith.addf %207, %212 : vector<128x128xf32>
    %c7_71 = arith.constant 7 : index
    %c0_72 = arith.constant 0 : index
    %c0_73 = arith.constant 0 : index
    %214 = vector.load %arg7[%c7_71, %c0_72, %c0_73] : memref<8x1x128xf32, #tpu.memory_space<vmem>>, vector<1x1x128xf32>
    %215 = vector.shape_cast %214 : vector<1x1x128xf32> to vector<1x128xf32>
    %216 = arith.subf %213, %192 : vector<128x128xf32>
    %217 = vector.broadcast %215 : vector<1x128xf32> to vector<128x128xf32>
    %218 = arith.mulf %217, %216 : vector<128x128xf32>
    %219 = arith.addf %192, %218 : vector<128x128xf32>
    %c0_74 = arith.constant 0 : index
    %c0_75 = arith.constant 0 : index
    %220 = vector.load %arg8[%c0_74, %c0_75] : memref<128x128xf32, #tpu.memory_space<vmem>>, vector<128x128xf32>
    tpu.vector_store %arg8[%c0_74, %c0_75], %219 {strides = array<i32>} : memref<128x128xf32, #tpu.memory_space<vmem>>, vector<128x128xf32>,
    return
  }
  func.func @transform_0(%arg0: i32, %arg1: i32) -> (i32, i32) {
    %c0_i32 = arith.constant 0 : i32
    %c0_i32_0 = arith.constant 0 : i32
    return %arg0, %c0_i32 : i32, i32
  }
  func.func @transform_1(%arg0: i32, %arg1: i32) -> (i32, i32) {
    %c0_i32 = arith.constant 0 : i32
    %c0_i32_0 = arith.constant 0 : i32
    %c0_i32_1 = arith.constant 0 : i32
    return %c0_i32, %c0_i32_0 : i32, i32
  }
  func.func @transform_2(%arg0: i32, %arg1: i32) -> (i32, i32) {
    %c0_i32 = arith.constant 0 : i32
    %c0_i32_0 = arith.constant 0 : i32
    %c0_i32_1 = arith.constant 0 : i32
    return %c0_i32, %c0_i32_0 : i32, i32
  }
  func.func @transform_3(%arg0: i32, %arg1: i32) -> (i32, i32, i32) {
    %c0_i32 = arith.constant 0 : i32
    %c0_i32_0 = arith.constant 0 : i32
    %c0_i32_1 = arith.constant 0 : i32
    return %arg1, %c0_i32, %c0_i32_0 : i32, i32, i32
  }
  func.func @transform_4(%arg0: i32, %arg1: i32) -> (i32, i32, i32) {
    %c0_i32 = arith.constant 0 : i32
    %c0_i32_0 = arith.constant 0 : i32
    %c0_i32_1 = arith.constant 0 : i32
    return %arg1, %c0_i32, %c0_i32_0 : i32, i32, i32
  }
  func.func @transform_5(%arg0: i32, %arg1: i32) -> (i32, i32, i32) {
    %c0_i32 = arith.constant 0 : i32
    %c0_i32_0 = arith.constant 0 : i32
    %c0_i32_1 = arith.constant 0 : i32
    return %arg1, %c0_i32, %c0_i32_0 : i32, i32, i32
  }
  func.func @transform_6(%arg0: i32, %arg1: i32) -> (i32, i32) {
    %c0_i32 = arith.constant 0 : i32
    %c0_i32_0 = arith.constant 0 : i32
    return %arg0, %c0_i32 : i32, i32
  }
}

</mosaic_0001>

<bundles_post_ra>
// kernel: tpu_custom_call.1
= control target key start
LH: loop header
LB: loop body
LE: loop exit
PB: predicated region body
PF: predicated region fallthrough
CT: control target
= control target key end

     0   :  { %s8432_s0 = inlined_call_operand.hbm [shape: f32[128,128], index: 0, kind: input, shape index: {}]   ;;  %s8433_s1 = inlined_call_operand.hbm [shape: f32[128,128], index: 1, kind: input, shape index: {}]   ;;  %s8434_s2 = inlined_call_operand.vmem [shape: f32[1,128], index: 2, kind: input, shape index: {}]   ;;  %s8435_s3 = inlined_call_operand.hbm [shape: s8[16,128,512], index: 3, kind: input, shape index: {}]   ;;  %s8436_s4 = inlined_call_operand.hbm [shape: f32[16,1,128], index: 4, kind: input, shape index: {}]   ;;  %s8437_s5 = inlined_call_operand.hbm [shape: f32[16,1,128], index: 5, kind: input, shape index: {}]   ;;  %s8438_s6 = inlined_call_operand.hbm [shape: f32[128,128], index: 6, kind: output, shape index: {}]  }
   0x1   :  { %8444 = sst [smem:[#allocation19_spill]] %s8432_s0 }
   0x2   :  { %8445 = sst [smem:[#allocation20_spill]] %s8435_s3 }
   0x3   :  { %11 = vsyncpa [#allocation3], 0 }
   0x4   :  { %12 = vsyncpa [#allocation6], 0 }
   0x5   :  { %13 = vsyncpa [#allocation4], 0  ;;  %s6149_s21 = smov 0   ;;  %s6151_s22 = smov 0  }
   0x6   :  { %s6153_s23 = smov 0   ;;  %s6155_s24 = smov 0  }
   0x7   :  { %s6157_s25 = smov 0   ;;  %s6159_s26 = smov 0  }
   0x8 LB: > { %8446 = sst [smem:[#allocation15_spill]] %s6089_s23  ;;  %s6178_s27 = sadd.s32 4294967295, %s6101_s26   ;;  %s6101_s26 = sphi %s6159_s26, %s19_s26   ;;  %s6097_s25 = sphi %s6157_s25, %s8466_s25   ;;  %s6093_s24 = sphi %s6155_s24, %s8465_s24   ;;  %s6089_s23 = sphi %s6153_s23, %s8461_s23   ;;  %s6085_s22 = sphi %s6151_s22, %s8464_s22   ;;  %s6081_s21 = sphi %s6149_s21, %s8463_s21  }
   0x9   : > { %8447 = sst [smem:[#allocation16_spill]] %s6101_s26  ;;  %p119_p0 = scmp.ne.s32.totalorder %s6085_s22, %s6081_s21 }
   0xa   : > { %p120_p1 = scmp.eq.s32.totalorder %s6178_s27, 0  ;;  %p5541_p2 = scmp.ge.s32.totalorder %s6101_s26, 1 }
   0xb   : > { %p208_p3 = scmp.lt.s32.totalorder %s6101_s26, 3  ;;  %s8449_s0 = sld [smem:[#allocation19_spill]] }
   0xc   : > { %p6186_p4 = por %p120_p1, %p119_p0  ;;  %s6103_s9 = smov [#allocation2]  }
   0xd   : > { %p6193_p5 = pnand %p5541_p2, %p208_p3  ;;  %s224_s10 = sshll.u32 %s6103_s9, 4  ;;  %s225_s10 = int_to_ptr.vmem [resolvable:$true] %s224_s10 }
   0xe   : > { %s8439_s12 = smov 128   ;;  %s8440_s13 = smov 8  }
   0xf   : > { %p5758_p6 = pneg %p6193_p5  ;;  %s28_s14 = sadd.s32 1, %s6097_s25 }
  0x10   : > { %p29_p8 = scmp.ge.s32.totalorder %s28_s14, 2  ;;  %s106_s15 = sadd.s32 1, %s6089_s23 }
  0x11   : > { %s222_s7 = sshll.u32 %s8449_s0, 4  ;;  %p6201_p7 = pnand %p5758_p6, %p120_p1  ;;  %s223_s7 = int_to_ptr.hbm [resolvable:$true] %s222_s7 }
  0x12   : > { %p113_p9 = scmp.ne.s32.totalorder %s6089_s23, %s6085_s22  ;;  %p114_p10 = scmp.eq.s32.totalorder %s6101_s26, 0 }
  0x13   : > { %5761 = dma.hbm_to_vmem [thread:$0]  (!%p6201_p7), %s223_s7, 2048, %s225_s10, [#allocation3], %s8439_s12, %s8439_s12, %s8440_s13  }
  0x14   : > { %s8468_s14 = smov (%p29_p8, %s28_s14), 0  ;;  %p6217_p11 = por %p114_p10, %p113_p9 }
  0x15   : > { %8452 = sst [smem:[#allocation17_spill]] %s8468_s14  ;;  %p5777_p12 = scmp.lt.s32.totalorder %s6101_s26, 2 }
  0x16   : > { %s103_s17 = ssub.s32 %s6097_s25, %s8468_s14  ;;  %s255_s18 = sand.u32 1, %s6101_s26  }
  0x17   : > { %p104_p13 = scmp.eq.s32.totalorder %s103_s17, 0  ;;  %s257_s19 = sand.u32 1, %s6089_s23  }
  0x18   : > { %s5691_s20 = sshll.u32 %s6097_s25, 10  ;;  %s5545_s29 = sshll.u32 %s257_s19, 10 }
  0x19   : > { %s6228_s21 = scalar_select %p104_p13, %s6089_s23, %s106_s15  }
  0x1a   : > { %s8455_s3 = sld [smem:[#allocation20_spill]]  ;;  %s259_s12 = scalar_lea.vmem [#allocation7], %s5545_s29 }
  0x1b   : > { %8454 = sst [smem:[#allocation18_spill]] %s6228_s21  ;;  %s268_s13 = sshll.u32 %s259_s12, 4  ;;  %s269_s13 = int_to_ptr.vmem [resolvable:$true] %s268_s13 }
  0x1c   : > { %p6237_p0 = pnand %p5777_p12, %p6217_p11  ;;  %s5549_s15 = sshll.u32 %s257_s19, 3 }
  0x1d   : > { %s6241_s17 = scalar_lea.sflag [#allocation3], %s255_s18  ;;  %s6106_s30 = smov 512  }
  0x1e   : > { %s5550_s29 = sshll.u32 %s6097_s25, 3  ;;  %s236_s21 = sshll.u32 %s8433_s1, 4  ;;  %s237_s21 = int_to_ptr.hbm [resolvable:$true] %s236_s21 }
  0x1f   : > { %s286_s16 = scalar_lea.hbm %s8436_s4, %s5550_s29  ;;  %s6108_s23 = smov 16  }
  0x20   : > { %s265_s9 = scalar_lea.hbm %s8455_s3, %s5691_s20  ;;  %s6107_s20 = smov 32  }
  0x21   : > { %s266_s10 = sshll.u32 %s265_s9, 4  ;;  %s282_s9 = scalar_lea.vmem [#allocation8], %s5549_s15  ;;  %s267_s10 = int_to_ptr.hbm [resolvable:$true] %s266_s10 }
  0x22   : > { %5768 = dma.hbm_to_vmem [thread:$0]  (!%p6237_p0), %s267_s10, 16384, %s269_s13, %s6241_s17, %s6106_s30, %s6106_s30, %s6107_s20  }
  0x23   : > { %s289_s3 = sshll.u32 %s282_s9, 4  ;;  %s287_s14 = sshll.u32 %s286_s16, 4  ;;  %s290_s3 = int_to_ptr.vmem [resolvable:$true] %s289_s3  ;;  %s288_s14 = int_to_ptr.hbm [resolvable:$true] %s287_s14 }
  0x24   : > { %s6109_s26 = smov 1   ;;  %s6110_s13 = smov [#allocation5]  }
  0x25   : > { %5771 = dma.hbm_to_vmem [thread:$0]  (!%p6237_p0), %s288_s14, 128, %s290_s3, %s6241_s17, %s6108_s23, %s6108_s23, %s6109_s26  }
  0x26   : > { %s238_s10 = sshll.u32 %s6110_s13, 4  ;;  %s307_s12 = scalar_lea.hbm %s8437_s5, %s5550_s29  ;;  %s239_s10 = int_to_ptr.vmem [resolvable:$true] %s238_s10 }
  0x27   : > { %s8457_s7 = smov 8   ;;  %s8458_s16 = smov 128  }
  0x28   : > { %5764 = dma.hbm_to_vmem [thread:$0]  (!%p6201_p7), %s237_s21, 2048, %s239_s10, [#allocation6], %s8458_s16, %s8458_s16, %s8457_s7  }
  0x29   : > { %s308_s9 = sshll.u32 %s307_s12, 4  ;;  %s303_s19 = scalar_lea.vmem [#allocation9], %s5549_s15  ;;  %s309_s9 = int_to_ptr.hbm [resolvable:$true] %s308_s9 }
  0x2a   : > { %s310_s18 = sshll.u32 %s303_s19, 4  ;;  %322 = sbr.rel (%p6193_p5) target bundleno = 1604 (0x644), region = 44  ;;  %s311_s18 = int_to_ptr.vmem [resolvable:$true] %s310_s18 }
  0x2b   : > { %5774 = dma.hbm_to_vmem [thread:$0]  (!%p6237_p0), %s309_s9, 128, %s311_s18, %s6241_s17, %s6108_s23, %s6108_s23, %s6109_s26  }
  0x2f   : > { %6064 = dma.done.wait (%p120_p1), [#allocation3], 2048  }
  0x30   : > { %6066 = vsyncadd (%p120_p1), [#allocation3], 4294965248 }
  0x31   : > { %6068 = dma.done.wait (%p120_p1), [#allocation6], 2048  }
  0x32   : > { %6070 = vsyncadd (%p120_p1), [#allocation6], 4294965248  ;;  %s334_s0 = sand.u32 1, %s6178_s27   ;;  %s336_s3 = sand.u32 1, %s6085_s22  }
  0x33   : > { %s5556_s23 = sshll.u32 %s336_s3, 10  ;;  %s335_s26 = scalar_lea.sflag [#allocation3], %s334_s0 }
  0x34   : > { %s6279_s8 = scalar_lea.vmem [#allocation7], %s5556_s23 }
  0x35   : > { %6072 = dma.done.wait (%p6186_p4), %s335_s26, 16640  }
  0x36   : > { %6074 = vsyncadd (%p6186_p4), %s335_s26, 4294950656  ;;  %s5557_s11 = sshll.u32 %s336_s3, 3  ;;  %p5559_p1 = scmp.ne.s32.totalorder %s6093_s24, 0 }
  0x37   : > { %s6285_s14 = scalar_lea.vmem [#allocation8], %s5557_s11  ;;  %s6287_s21 = scalar_lea.vmem [#allocation9], %s5557_s11 }
  0x38   : > { %401 = sbr.rel (%p5559_p1) target bundleno = 253 (0xfd), region = 68 }
  0x3d   : > { %v433_v0 = vld [vmem:[#allocation5 + $0x78] sm:$0xff]  ;;  %v432_v1 = vld [vmem:[#allocation5 + $0x70] sm:$0xff]  ;;  %v431_v2 = vld [vmem:[#allocation5 + $0x68] sm:$0xff] }
  0x3e   : > { %5693 = vmatpush.msra.mxu2 %v433_v0  ;;  %5694 = vmatpush.msra.mxu3 %v433_v0  ;;  %v430_v3 = vld [vmem:[#allocation5 + $0x60] sm:$0xff]  ;;  %v429_v4 = vld [vmem:[#allocation5 + $0x58] sm:$0xff]  ;;  %v428_v5 = vld [vmem:[#allocation5 + $0x50] sm:$0xff] }
  0x3f   : > { %438 = vmatpush.msra.mxu0 %v433_v0  ;;  %5692 = vmatpush.msra.mxu1 %v433_v0  ;;  %v427_v6 = vld [vmem:[#allocation5 + $0x48] sm:$0xff]  ;;  %v426_v7 = vld [vmem:[#allocation5 + $0x40] sm:$0xff]  ;;  %v425_v8 = vld [vmem:[#allocation5 + $0x38] sm:$0xff] }
  0x40   : > { %5696 = vmatpush.msra.mxu2 %v432_v1  ;;  %5697 = vmatpush.msra.mxu3 %v432_v1  ;;  %v424_v9 = vld [vmem:[#allocation5 + $0x30] sm:$0xff]  ;;  %v423_v10 = vld [vmem:[#allocation5 + $0x28] sm:$0xff]  ;;  %v422_v11 = vld [vmem:[#allocation5 + $0x20] sm:$0xff] }
  0x41   : > { %439 = vmatpush.msra.mxu0 %v432_v1  ;;  %5695 = vmatpush.msra.mxu1 %v432_v1  ;;  %v421_v12 = vld [vmem:[#allocation5 + $0x18] sm:$0xff]  ;;  %v420_v13 = vld [vmem:[#allocation5 + $0x10] sm:$0xff]  ;;  %v419_v14 = vld [vmem:[#allocation5 + $0x8] sm:$0xff] }
  0x42   : > { %5699 = vmatpush.msra.mxu2 %v431_v2  ;;  %5700 = vmatpush.msra.mxu3 %v431_v2  ;;  %v418_v15 = vld [vmem:[#allocation5] sm:$0xff]  ;;  %v411_v20 = vld [vmem:[#allocation2 + $0x48] sm:$0xff]  ;;  %v412_v24 = vld [vmem:[#allocation2 + $0x50] sm:$0xff] }
  0x43   : > { %440 = vmatpush.msra.mxu0 %v431_v2  ;;  %5698 = vmatpush.msra.mxu1 %v431_v2  ;;  %v410_v16 = vld [vmem:[#allocation2 + $0x40] sm:$0xff]  ;;  %v415_v21 = vld [vmem:[#allocation2 + $0x68] sm:$0xff]  ;;  %v416_v25 = vld [vmem:[#allocation2 + $0x70] sm:$0xff] }
  0x44   : > { %5702 = vmatpush.msra.mxu2 %v430_v3  ;;  %5703 = vmatpush.msra.mxu3 %v430_v3  ;;  %v414_v17 = vld [vmem:[#allocation2 + $0x60] sm:$0xff]  ;;  %v403_v22 = vld [vmem:[#allocation2 + $0x8] sm:$0xff]  ;;  %v404_v26 = vld [vmem:[#allocation2 + $0x10] sm:$0xff] }
  0x45   : > { %441 = vmatpush.msra.mxu0 %v430_v3  ;;  %5701 = vmatpush.msra.mxu1 %v430_v3  ;;  %v402_v18 = vld [vmem:[#allocation2] sm:$0xff]  ;;  %v407_v23 = vld [vmem:[#allocation2 + $0x28] sm:$0xff]  ;;  %v408_v27 = vld [vmem:[#allocation2 + $0x30] sm:$0xff] }
  0x46   : > { %5705 = vmatpush.msra.mxu2 %v429_v4  ;;  %5706 = vmatpush.msra.mxu3 %v429_v4  ;;  %v406_v19 = vld [vmem:[#allocation2 + $0x20] sm:$0xff]  ;;  %v413_v28 = vld [vmem:[#allocation2 + $0x58] sm:$0xff] }
  0x47   : > { %442 = vmatpush.msra.mxu0 %v429_v4  ;;  %5704 = vmatpush.msra.mxu1 %v429_v4  ;;  %v417_v29 = vld [vmem:[#allocation2 + $0x78] sm:$0xff]  ;;  %v5841_v32 = vld [vmem:[%s8434_s2] ss:$0 sm:$0xff] }
  0x48   : > { %5708 = vmatpush.msra.mxu2 %v428_v5  ;;  %5709 = vmatpush.msra.mxu3 %v428_v5  ;;  %v405_v30 = vld [vmem:[#allocation2 + $0x18] sm:$0xff] }
  0x49   : > { %443 = vmatpush.msra.mxu0 %v428_v5  ;;  %5707 = vmatpush.msra.mxu1 %v428_v5  ;;  %v409_v31 = vld [vmem:[#allocation2 + $0x38] sm:$0xff] }
  0x4a   : > { %5711 = vmatpush.msra.mxu2 %v427_v6  ;;  %5712 = vmatpush.msra.mxu3 %v427_v6 }
  0x4b   : > { %444 = vmatpush.msra.mxu0 %v427_v6  ;;  %5710 = vmatpush.msra.mxu1 %v427_v6 }
  0x4c   : > { %5714 = vmatpush.msra.mxu2 %v426_v7  ;;  %5715 = vmatpush.msra.mxu3 %v426_v7 }
  0x4d   : > { %445 = vmatpush.msra.mxu0 %v426_v7  ;;  %5713 = vmatpush.msra.mxu1 %v426_v7 }
  0x4e   : > { %5717 = vmatpush.msra.mxu2 %v425_v8  ;;  %5718 = vmatpush.msra.mxu3 %v425_v8 }
  0x4f   : > { %446 = vmatpush.msra.mxu0 %v425_v8  ;;  %5716 = vmatpush.msra.mxu1 %v425_v8 }
  0x50   : > { %5720 = vmatpush.msra.mxu2 %v424_v9  ;;  %5721 = vmatpush.msra.mxu3 %v424_v9 }
  0x51   : > { %447 = vmatpush.msra.mxu0 %v424_v9  ;;  %5719 = vmatpush.msra.mxu1 %v424_v9 }
  0x52   : > { %5723 = vmatpush.msra.mxu2 %v423_v10  ;;  %5724 = vmatpush.msra.mxu3 %v423_v10 }
  0x53   : > { %448 = vmatpush.msra.mxu0 %v423_v10  ;;  %5722 = vmatpush.msra.mxu1 %v423_v10 }
  0x54   : > { %5726 = vmatpush.msra.mxu2 %v422_v11  ;;  %5727 = vmatpush.msra.mxu3 %v422_v11 }
  0x55   : > { %449 = vmatpush.msra.mxu0 %v422_v11  ;;  %5725 = vmatpush.msra.mxu1 %v422_v11 }
  0x56   : > { %5729 = vmatpush.msra.mxu2 %v421_v12  ;;  %5730 = vmatpush.msra.mxu3 %v421_v12 }
  0x57   : > { %450 = vmatpush.msra.mxu0 %v421_v12  ;;  %5728 = vmatpush.msra.mxu1 %v421_v12 }
  0x58   : > { %5732 = vmatpush.msra.mxu2 %v420_v13  ;;  %5733 = vmatpush.msra.mxu3 %v420_v13 }
  0x59   : > { %451 = vmatpush.msra.mxu0 %v420_v13  ;;  %5731 = vmatpush.msra.mxu1 %v420_v13 }
  0x5a   : > { %5735 = vmatpush.msra.mxu2 %v419_v14  ;;  %5736 = vmatpush.msra.mxu3 %v419_v14 }
  0x5b   : > { %452 = vmatpush.msra.mxu0 %v419_v14  ;;  %5734 = vmatpush.msra.mxu1 %v419_v14 }
  0x5c   : > { %5738 = vmatpush.msra.mxu2 %v418_v15  ;;  %5739 = vmatpush.msra.mxu3 %v418_v15 }
  0x5d   : > { %478 = vmatmul.f32.vlgmr.msra.gmra.mxu2 %v410_v16  ;;  %490 = vmatmul.f32.vlgmr.msra.gmra.mxu3 %v414_v17 }
  0x5e   : > { %453 = vmatpush.msra.mxu0 %v418_v15  ;;  %5737 = vmatpush.msra.mxu1 %v418_v15 }
  0x5f   : > { %454 = vmatmul.f32.vlgmr.msra.gmra.mxu0 %v402_v18  ;;  %466 = vmatmul.f32.vlgmr.msra.gmra.mxu1 %v406_v19 }
  0x65   : > { %481 = vmatmul.f32.gmra.mxu2 %v411_v20  ;;  %493 = vmatmul.f32.gmra.mxu3 %v415_v21 }
  0x67   : > { %457 = vmatmul.f32.gmra.mxu0 %v403_v22  ;;  %469 = vmatmul.f32.gmra.mxu1 %v407_v23 }
  0x6d   : > { %484 = vmatmul.f32.gmra.mxu2 %v412_v24  ;;  %496 = vmatmul.f32.gmra.mxu3 %v416_v25 }
  0x6f   : > { %460 = vmatmul.f32.gmra.mxu0 %v404_v26  ;;  %472 = vmatmul.f32.gmra.mxu1 %v408_v27 }
  0x75   : > { %487 = vmatmul.f32.gmra.mxu2 %v413_v28  ;;  %499 = vmatmul.f32.gmra.mxu3 %v417_v29 }
  0x77   : > { %463 = vmatmul.f32.gmra.mxu0 %v405_v30  ;;  %475 = vmatmul.f32.gmra.mxu1 %v409_v31 }
  0xdc   : > { %v455_v33 = vpop.f32.mrf.mxu0  ;;  %v467_v34 = vpop.f32.mrf.mxu1 }
  0xdd   : > { %v456_v35 = vadd.f32 %v5841_v32, %v455_v33  ;;  %v468_v36 = vadd.f32 %v5841_v32, %v467_v34 }
  0xdf   : > { %503 = vst [vmem:[#allocation10] sm:$0xff] %v456_v35 }
  0xe0   : > { %507 = vst [vmem:[#allocation10 + $0x20] sm:$0xff] %v468_v36  ;;  %v479_v37 = vpop.f32.mrf.mxu2  ;;  %v491_v38 = vpop.f32.mrf.mxu3 }
  0xe1   : > { %v480_v39 = vadd.f32 %v5841_v32, %v479_v37  ;;  %v492_v40 = vadd.f32 %v5841_v32, %v491_v38 }
  0xe3   : > { %511 = vst [vmem:[#allocation10 + $0x40] sm:$0xff] %v480_v39 }
  0xe4   : > { %515 = vst [vmem:[#allocation10 + $0x60] sm:$0xff] %v492_v40  ;;  %v458_v41 = vpop.f32.mrf.mxu0  ;;  %v470_v42 = vpop.f32.mrf.mxu1 }
  0xe5   : > { %v459_v43 = vadd.f32 %v5841_v32, %v458_v41  ;;  %v471_v44 = vadd.f32 %v5841_v32, %v470_v42 }
  0xe7   : > { %504 = vst [vmem:[#allocation10 + $0x8] sm:$0xff] %v459_v43 }
  0xe8   : > { %508 = vst [vmem:[#allocation10 + $0x28] sm:$0xff] %v471_v44  ;;  %v482_v45 = vpop.f32.mrf.mxu2  ;;  %v494_v46 = vpop.f32.mrf.mxu3 }
  0xe9   : > { %v483_v47 = vadd.f32 %v5841_v32, %v482_v45  ;;  %v495_v48 = vadd.f32 %v5841_v32, %v494_v46 }
  0xeb   : > { %512 = vst [vmem:[#allocation10 + $0x48] sm:$0xff] %v483_v47 }
  0xec   : > { %516 = vst [vmem:[#allocation10 + $0x68] sm:$0xff] %v495_v48  ;;  %v461_v49 = vpop.f32.mrf.mxu0  ;;  %v473_v50 = vpop.f32.mrf.mxu1 }
  0xed   : > { %v462_v51 = vadd.f32 %v5841_v32, %v461_v49  ;;  %v474_v52 = vadd.f32 %v5841_v32, %v473_v50 }
  0xef   : > { %505 = vst [vmem:[#allocation10 + $0x10] sm:$0xff] %v462_v51 }
  0xf0   : > { %509 = vst [vmem:[#allocation10 + $0x30] sm:$0xff] %v474_v52  ;;  %v485_v53 = vpop.f32.mrf.mxu2  ;;  %v497_v54 = vpop.f32.mrf.mxu3 }
  0xf1   : > { %v486_v55 = vadd.f32 %v5841_v32, %v485_v53  ;;  %v498_v56 = vadd.f32 %v5841_v32, %v497_v54 }
  0xf3   : > { %513 = vst [vmem:[#allocation10 + $0x50] sm:$0xff] %v486_v55 }
  0xf4   : > { %517 = vst [vmem:[#allocation10 + $0x70] sm:$0xff] %v498_v56  ;;  %v464_v57 = vpop.f32.mrf.mxu0  ;;  %v476_v58 = vpop.f32.mrf.mxu1 }
  0xf5   : > { %v465_v59 = vadd.f32 %v5841_v32, %v464_v57  ;;  %v477_v60 = vadd.f32 %v5841_v32, %v476_v58 }
  0xf7   : > { %506 = vst [vmem:[#allocation10 + $0x18] sm:$0xff] %v465_v59 }
  0xf8   : > { %510 = vst [vmem:[#allocation10 + $0x38] sm:$0xff] %v477_v60  ;;  %v488_v61 = vpop.f32.mrf.mxu2  ;;  %v500_v62 = vpop.f32.mrf.mxu3 }
  0xf9   : > { %v489_v63 = vadd.f32 %v5841_v32, %v488_v61  ;;  %v501_v0 = vadd.f32 %v5841_v32, %v500_v62 }
  0xfb   : > { %514 = vst [vmem:[#allocation10 + $0x58] sm:$0xff] %v489_v63 }
  0xfc   : > { %518 = vst [vmem:[#allocation10 + $0x78] sm:$0xff] %v501_v0 }
  0xfd PF: > { %v549_v1 = vld [vmem:[%s6279_s8 + $0x70] sm:$0xff]  ;;  %v550_v2 = vld [vmem:[%s6279_s8 + $0x78] sm:$0xff]  ;;  %v547_v3 = vld [vmem:[%s6279_s8 + $0x60] sm:$0xff]  ;;  %s6111_s15 = smov [#allocation10]   ;;  %s5414_s10 = sshll.u32 %s8438_s6, 4  ;;  %s5415_s10 = int_to_ptr.hbm [resolvable:$true] %s5414_s10 }
  0xfe   : > { %v613_v4 = vunpack.c.3.s8 %v549_v1  ;;  %v609_v5 = vunpack.c.2.s8 %v549_v1  ;;  %v614_v6 = vunpack.c.3.s8 %v550_v2  ;;  %v611_v7 = vunpack.c.3.s8 %v547_v3  ;;  %v548_v8 = vld [vmem:[%s6279_s8 + $0x68] sm:$0xff]  ;;  %v6298_v17 = vld [vmem:[%s6279_s8 + $0x50] sm:$0xff]  ;;  %v6301_v26 = vld [vmem:[%s6279_s8 + $0x58] sm:$0xff]  ;;  %s5412_s17 = sshll.u32 %s6111_s15, 4  ;;  %p5780_p2 = scmp.eq.s32.totalorder %s6178_s27, 1  ;;  %s5413_s17 = int_to_ptr.vmem [resolvable:$true] %s5412_s17 }
  0xff   : > { %v612_v9 = vunpack.c.3.s8 %v548_v8  ;;  %v605_v10 = vunpack.c.1.s8 %v549_v1  ;;  %v610_v11 = vunpack.c.2.s8 %v550_v2  ;;  %v607_v12 = vunpack.c.2.s8 %v547_v3  ;;  %v6304_v27 = vld [vmem:[%s6279_s8 + $0x40] sm:$0xff]  ;;  %v6308_v36 = vld [vmem:[%s6279_s8 + $0x48] sm:$0xff]  ;;  %v6318_v53 = vld [vmem:[%s6279_s8 + $0x30] sm:$0xff]  ;;  %s6112_s30 = smov 128   ;;  %s6113_s20 = smov 8  }
 0x100   : > { %v677_v13 = vcvt.s32.f32 %v613_v4  ;;  %v673_v14 = vcvt.s32.f32 %v609_v5  ;;  %v678_v15 = vcvt.s32.f32 %v614_v6  ;;  %v675_v16 = vcvt.s32.f32 %v611_v7 }
 0x101   : > { %v676_v18 = vcvt.s32.f32 %v612_v9  ;;  %v669_v19 = vcvt.s32.f32 %v605_v10  ;;  %v674_v20 = vcvt.s32.f32 %v610_v11  ;;  %v671_v21 = vcvt.s32.f32 %v607_v12 }
 0x102   : > { %809 = vmatpush.msra.mxu2 %v677_v13  ;;  %874 = vmatpush.msra.mxu3 %v678_v15  ;;  %v608_v22 = vunpack.c.2.s8 %v548_v8  ;;  %v601_v23 = vunpack.c.0.s8 %v549_v1  ;;  %v606_v24 = vunpack.c.1.s8 %v550_v2  ;;  %v603_v25 = vunpack.c.1.s8 %v547_v3 }
 0x103   : > { %679 = vmatpush.msra.mxu0 %v675_v16  ;;  %744 = vmatpush.msra.mxu1 %v676_v18  ;;  %v604_v28 = vunpack.c.1.s8 %v548_v8  ;;  %v597_v29 = vunpack.c.3.s8 %v6298_v17  ;;  %v602_v30 = vunpack.c.0.s8 %v550_v2  ;;  %v599_v31 = vunpack.c.0.s8 %v547_v3  ;;  %v6329_v2 = vld [vmem:[%s6279_s8 + $0x38] sm:$0xff]  ;;  %v6332_v3 = vld [vmem:[%s6279_s8 + $0x20] sm:$0xff] }
 0x104   : > { %810 = vmatpush.msra.mxu2 %v673_v14  ;;  %875 = vmatpush.msra.mxu3 %v674_v20  ;;  %v672_v32 = vcvt.s32.f32 %v608_v22  ;;  %v665_v33 = vcvt.s32.f32 %v601_v23  ;;  %v670_v34 = vcvt.s32.f32 %v606_v24  ;;  %v667_v35 = vcvt.s32.f32 %v603_v25  ;;  %v6346_v25 = vld [vmem:[%s6279_s8 + $0x10] sm:$0xff] }
 0x105   : > { %680 = vmatpush.msra.mxu0 %v671_v21  ;;  %v668_v37 = vcvt.s32.f32 %v604_v28  ;;  %v661_v38 = vcvt.s32.f32 %v597_v29  ;;  %v666_v39 = vcvt.s32.f32 %v602_v30  ;;  %v663_v40 = vcvt.s32.f32 %v599_v31 }
 0x106   : > { %811 = vmatpush.msra.mxu2 %v669_v19  ;;  %745 = vmatpush.msra.mxu1 %v672_v32  ;;  %v600_v41 = vunpack.c.0.s8 %v548_v8  ;;  %v593_v42 = vunpack.c.2.s8 %v6298_v17  ;;  %v598_v43 = vunpack.c.3.s8 %v6301_v26  ;;  %v595_v44 = vunpack.c.3.s8 %v6304_v27  ;;  %v6335_v8 = vld [vmem:[%s6279_s8 + $0x28] sm:$0xff] }
 0x107   : > { %876 = vmatpush.msra.mxu3 %v670_v34  ;;  %681 = vmatpush.msra.mxu0 %v667_v35  ;;  %v596_v45 = vunpack.c.3.s8 %v6308_v36  ;;  %v589_v46 = vunpack.c.1.s8 %v6298_v17  ;;  %v594_v47 = vunpack.c.2.s8 %v6301_v26  ;;  %v591_v48 = vunpack.c.2.s8 %v6304_v27 }
 0x108   : > { %812 = vmatpush.msra.mxu2 %v665_v33  ;;  %746 = vmatpush.msra.mxu1 %v668_v37  ;;  %v664_v49 = vcvt.s32.f32 %v600_v41  ;;  %v657_v50 = vcvt.s32.f32 %v593_v42  ;;  %v662_v51 = vcvt.s32.f32 %v598_v43  ;;  %v659_v52 = vcvt.s32.f32 %v595_v44  ;;  %v6363_v44 = vld [vmem:[%s6279_s8 + $0x8] sm:$0xff] }
 0x109   : > { %877 = vmatpush.msra.mxu3 %v666_v39  ;;  %682 = vmatpush.msra.mxu0 %v663_v40  ;;  %v660_v54 = vcvt.s32.f32 %v596_v45  ;;  %v653_v55 = vcvt.s32.f32 %v589_v46  ;;  %v658_v56 = vcvt.s32.f32 %v594_v47  ;;  %v655_v57 = vcvt.s32.f32 %v591_v48  ;;  %v6360_v39 = vld [vmem:[%s6279_s8] sm:$0xff] }
 0x10a   : > { %813 = vmatpush.msra.mxu2 %v661_v38  ;;  %747 = vmatpush.msra.mxu1 %v664_v49  ;;  %v592_v58 = vunpack.c.2.s8 %v6308_v36  ;;  %v585_v59 = vunpack.c.0.s8 %v6298_v17  ;;  %v590_v60 = vunpack.c.1.s8 %v6301_v26  ;;  %v587_v61 = vunpack.c.1.s8 %v6304_v27  ;;  %v6357_v38 = vld [vmem:[%s6279_s8 + $0x18] sm:$0xff] }
 0x10b   : > { %878 = vmatpush.msra.mxu3 %v662_v51  ;;  %683 = vmatpush.msra.mxu0 %v659_v52  ;;  %v588_v62 = vunpack.c.1.s8 %v6308_v36  ;;  %v581_v63 = vunpack.c.3.s8 %v6318_v53  ;;  %v586_v0 = vunpack.c.0.s8 %v6301_v26  ;;  %v583_v1 = vunpack.c.0.s8 %v6304_v27 }
 0x10c   : > { %814 = vmatpush.msra.mxu2 %v657_v50  ;;  %748 = vmatpush.msra.mxu1 %v660_v54  ;;  %v656_v4 = vcvt.s32.f32 %v592_v58  ;;  %v649_v5 = vcvt.s32.f32 %v585_v59  ;;  %v654_v6 = vcvt.s32.f32 %v590_v60  ;;  %v651_v7 = vcvt.s32.f32 %v587_v61 }
 0x10d   : > { %879 = vmatpush.msra.mxu3 %v658_v56  ;;  %684 = vmatpush.msra.mxu0 %v655_v57  ;;  %v652_v9 = vcvt.s32.f32 %v588_v62  ;;  %v645_v10 = vcvt.s32.f32 %v581_v63  ;;  %v650_v11 = vcvt.s32.f32 %v586_v0  ;;  %v647_v12 = vcvt.s32.f32 %v583_v1 }
 0x10e   : > { %815 = vmatpush.msra.mxu2 %v653_v55  ;;  %749 = vmatpush.msra.mxu1 %v656_v4  ;;  %v584_v13 = vunpack.c.0.s8 %v6308_v36  ;;  %v577_v14 = vunpack.c.2.s8 %v6318_v53  ;;  %v582_v15 = vunpack.c.3.s8 %v6329_v2  ;;  %v579_v16 = vunpack.c.3.s8 %v6332_v3 }
 0x10f   : > { %880 = vmatpush.msra.mxu3 %v654_v6  ;;  %685 = vmatpush.msra.mxu0 %v651_v7  ;;  %v580_v17 = vunpack.c.3.s8 %v6335_v8  ;;  %v573_v18 = vunpack.c.1.s8 %v6318_v53  ;;  %v578_v19 = vunpack.c.2.s8 %v6329_v2  ;;  %v575_v20 = vunpack.c.2.s8 %v6332_v3 }
 0x110   : > { %816 = vmatpush.msra.mxu2 %v649_v5  ;;  %750 = vmatpush.msra.mxu1 %v652_v9  ;;  %v648_v21 = vcvt.s32.f32 %v584_v13  ;;  %v641_v22 = vcvt.s32.f32 %v577_v14  ;;  %v646_v23 = vcvt.s32.f32 %v582_v15  ;;  %v643_v24 = vcvt.s32.f32 %v579_v16  ;;  %v6378_v5 = vld [vmem:[%s6279_s8 + $0xf0] sm:$0xff] }
 0x111   : > { %881 = vmatpush.msra.mxu3 %v650_v11  ;;  %686 = vmatpush.msra.mxu0 %v647_v12  ;;  %v644_v26 = vcvt.s32.f32 %v580_v17  ;;  %v637_v27 = vcvt.s32.f32 %v573_v18  ;;  %v642_v28 = vcvt.s32.f32 %v578_v19  ;;  %v639_v29 = vcvt.s32.f32 %v575_v20  ;;  %v6388_v11 = vld [vmem:[%s6279_s8 + $0xe0] sm:$0xff]  ;;  %v6391_v12 = vld [vmem:[%s6279_s8 + $0xe8] sm:$0xff] }
 0x112   : > { %817 = vmatpush.msra.mxu2 %v645_v10  ;;  %751 = vmatpush.msra.mxu1 %v648_v21  ;;  %v576_v30 = vunpack.c.2.s8 %v6335_v8  ;;  %v569_v31 = vunpack.c.0.s8 %v6318_v53  ;;  %v574_v32 = vunpack.c.1.s8 %v6329_v2  ;;  %v571_v33 = vunpack.c.1.s8 %v6332_v3  ;;  %v6385_v10 = vld [vmem:[%s6279_s8 + $0xf8] sm:$0xff]  ;;  %v6393_v20 = vld [vmem:[#allocation10] sm:$0xff] }
 0x113   : > { %882 = vmatpush.msra.mxu3 %v646_v23  ;;  %687 = vmatpush.msra.mxu0 %v643_v24  ;;  %v572_v34 = vunpack.c.1.s8 %v6335_v8  ;;  %v565_v35 = vunpack.c.3.s8 %v6346_v25  ;;  %v570_v36 = vunpack.c.0.s8 %v6329_v2  ;;  %v567_v37 = vunpack.c.0.s8 %v6332_v3 }
 0x114   : > { %818 = vmatpush.msra.mxu2 %v641_v22  ;;  %752 = vmatpush.msra.mxu1 %v644_v26  ;;  %v640_v40 = vcvt.s32.f32 %v576_v30  ;;  %v633_v41 = vcvt.s32.f32 %v569_v31  ;;  %v638_v42 = vcvt.s32.f32 %v574_v32  ;;  %v635_v43 = vcvt.s32.f32 %v571_v33 }
 0x115   : > { %883 = vmatpush.msra.mxu3 %v642_v28  ;;  %688 = vmatpush.msra.mxu0 %v639_v29  ;;  %v636_v45 = vcvt.s32.f32 %v572_v34  ;;  %v629_v46 = vcvt.s32.f32 %v565_v35  ;;  %v634_v47 = vcvt.s32.f32 %v570_v36  ;;  %v631_v48 = vcvt.s32.f32 %v567_v37 }
 0x116   : > { %819 = vmatpush.msra.mxu2 %v637_v27  ;;  %753 = vmatpush.msra.mxu1 %v640_v40  ;;  %v568_v49 = vunpack.c.0.s8 %v6335_v8  ;;  %v561_v50 = vunpack.c.2.s8 %v6346_v25  ;;  %v566_v51 = vunpack.c.3.s8 %v6357_v38  ;;  %v563_v52 = vunpack.c.3.s8 %v6360_v39  ;;  %v6409_v40 = vld [vmem:[#allocation10 + $0x8] sm:$0xff] }
 0x117   : > { %884 = vmatpush.msra.mxu3 %v638_v42  ;;  %689 = vmatpush.msra.mxu0 %v635_v43  ;;  %v564_v53 = vunpack.c.3.s8 %v6363_v44  ;;  %v557_v54 = vunpack.c.1.s8 %v6346_v25  ;;  %v562_v55 = vunpack.c.2.s8 %v6357_v38  ;;  %v559_v56 = vunpack.c.2.s8 %v6360_v39 }
 0x118   : > { %820 = vmatpush.msra.mxu2 %v633_v41  ;;  %754 = vmatpush.msra.mxu1 %v636_v45  ;;  %v632_v57 = vcvt.s32.f32 %v568_v49  ;;  %v625_v58 = vcvt.s32.f32 %v561_v50  ;;  %v630_v59 = vcvt.s32.f32 %v566_v51  ;;  %v627_v60 = vcvt.s32.f32 %v563_v52  ;;  %v6419_v49 = vld [vmem:[#allocation10 + $0x10] sm:$0xff] }
 0x119   : > { %885 = vmatpush.msra.mxu3 %v634_v47  ;;  %690 = vmatpush.msra.mxu0 %v631_v48  ;;  %v628_v61 = vcvt.s32.f32 %v564_v53  ;;  %v621_v62 = vcvt.s32.f32 %v557_v54  ;;  %v626_v63 = vcvt.s32.f32 %v562_v55  ;;  %v623_v0 = vcvt.s32.f32 %v559_v56  ;;  %v5570_v56 = vld [vmem:[%s6279_s8 + $0xd0] sm:$0xff] }
 0x11a   : > { %821 = vmatpush.msra.mxu2 %v629_v46  ;;  %755 = vmatpush.msra.mxu1 %v632_v57  ;;  %v560_v1 = vunpack.c.2.s8 %v6363_v44  ;;  %v553_v2 = vunpack.c.0.s8 %v6346_v25  ;;  %v558_v3 = vunpack.c.1.s8 %v6357_v38  ;;  %v555_v4 = vunpack.c.1.s8 %v6360_v39  ;;  %v5571_v57 = vld [vmem:[%s6279_s8 + $0xd8] sm:$0xff] }
 0x11b   : > { %886 = vmatpush.msra.mxu3 %v630_v59  ;;  %691 = vmatpush.msra.mxu0 %v627_v60  ;;  %v556_v6 = vunpack.c.1.s8 %v6363_v44  ;;  %v554_v7 = vunpack.c.0.s8 %v6357_v38  ;;  %v551_v8 = vunpack.c.0.s8 %v6360_v39  ;;  %v552_v9 = vunpack.c.0.s8 %v6363_v44  ;;  %v6429_v60 = vld [vmem:[#allocation10 + $0x18] sm:$0xff] }
 0x11c   : > { %822 = vmatpush.msra.mxu2 %v625_v58  ;;  %756 = vmatpush.msra.mxu1 %v628_v61  ;;  %v624_v13 = vcvt.s32.f32 %v560_v1  ;;  %v617_v14 = vcvt.s32.f32 %v553_v2  ;;  %v622_v15 = vcvt.s32.f32 %v558_v3  ;;  %v619_v16 = vcvt.s32.f32 %v555_v4 }
 0x11d   : > { %887 = vmatpush.msra.mxu3 %v626_v63  ;;  %692 = vmatpush.msra.mxu0 %v623_v0  ;;  %v620_v17 = vcvt.s32.f32 %v556_v6  ;;  %v618_v18 = vcvt.s32.f32 %v554_v7  ;;  %v615_v19 = vcvt.s32.f32 %v551_v8  ;;  %v1218_v21 = vunpack.c.3.s8 %v6378_v5  ;;  %v5568_v63 = vld [vmem:[%s6279_s8 + $0xc0] sm:$0xff]  ;;  %v5569_v0 = vld [vmem:[%s6279_s8 + $0xc8] sm:$0xff] }
 0x11e   : > { %823 = vmatpush.msra.mxu2 %v621_v62  ;;  %757 = vmatpush.msra.mxu1 %v624_v13  ;;  %v1219_v22 = vunpack.c.3.s8 %v6385_v10  ;;  %v1216_v23 = vunpack.c.3.s8 %v6388_v11  ;;  %v1217_v24 = vunpack.c.3.s8 %v6391_v12  ;;  %v616_v25 = vcvt.s32.f32 %v552_v9  ;;  %v6437_v7 = vld [vmem:[#allocation10 + $0x20] sm:$0xff] }
 0x11f   : > { %888 = vmatpush.msra.mxu3 %v622_v15  ;;  %693 = vmatpush.msra.mxu0 %v619_v16  ;;  %v1214_v26 = vunpack.c.2.s8 %v6378_v5  ;;  %v1215_v27 = vunpack.c.2.s8 %v6385_v10  ;;  %v1282_v28 = vcvt.s32.f32 %v1218_v21  ;;  %v1212_v31 = vunpack.c.2.s8 %v6388_v11  ;;  %v6443_v16 = vld [vmem:[#allocation10 + $0x28] sm:$0xff] }
 0x120   : > { %824 = vmatpush.msra.mxu2 %v617_v14  ;;  %758 = vmatpush.msra.mxu1 %v620_v17  ;;  %v1283_v29 = vcvt.s32.f32 %v1219_v22  ;;  %v1280_v30 = vcvt.s32.f32 %v1216_v23  ;;  %v1213_v32 = vunpack.c.2.s8 %v6391_v12  ;;  %v1281_v33 = vcvt.s32.f32 %v1217_v24 }
 0x121   : > { %825 = vmatmul.f32.vlgmr.msra.gmra.mxu2 %v6393_v20  ;;  %889 = vmatpush.msra.mxu3 %v618_v18  ;;  %v1278_v34 = vcvt.s32.f32 %v1214_v26  ;;  %v1279_v35 = vcvt.s32.f32 %v1215_v27  ;;  %v1276_v36 = vcvt.s32.f32 %v1212_v31  ;;  %v1210_v38 = vunpack.c.1.s8 %v6378_v5  ;;  %v6449_v26 = vld [vmem:[#allocation10 + $0x30] sm:$0xff] }
 0x122   : > { %890 = vmatmul.f32.vlgmr.msra.gmra.mxu3 %v6393_v20  ;;  %694 = vmatpush.msra.mxu0 %v615_v19  ;;  %v1277_v37 = vcvt.s32.f32 %v1213_v32  ;;  %v1211_v39 = vunpack.c.1.s8 %v6385_v10  ;;  %v1208_v43 = vunpack.c.1.s8 %v6388_v11  ;;  %v1209_v44 = vunpack.c.1.s8 %v6391_v12 }
 0x123   : > { %759 = vmatpush.msra.mxu1 %v616_v25  ;;  %695 = vmatmul.f32.vlgmr.msra.gmra.mxu0 %v6393_v20  ;;  %v1274_v41 = vcvt.s32.f32 %v1210_v38  ;;  %v1206_v47 = vunpack.c.0.s8 %v6378_v5  ;;  %v1207_v48 = vunpack.c.0.s8 %v6385_v10  ;;  %v1204_v52 = vunpack.c.0.s8 %v6388_v11 }
 0x124   : > { %760 = vmatmul.f32.vlgmr.msra.gmra.mxu1 %v6393_v20  ;;  %1414 = vmatpush.msrb.mxu2 %v1282_v28  ;;  %v1275_v42 = vcvt.s32.f32 %v1211_v39  ;;  %v1272_v45 = vcvt.s32.f32 %v1208_v43  ;;  %v1273_v46 = vcvt.s32.f32 %v1209_v44  ;;  %v1205_v53 = vunpack.c.0.s8 %v6391_v12 }
 0x125   : > { %1479 = vmatpush.msrb.mxu3 %v1283_v29  ;;  %1284 = vmatpush.msrb.mxu0 %v1280_v30  ;;  %v1270_v50 = vcvt.s32.f32 %v1206_v47  ;;  %v1271_v51 = vcvt.s32.f32 %v1207_v48  ;;  %v1268_v54 = vcvt.s32.f32 %v1204_v52  ;;  %v1202_v58 = vunpack.c.3.s8 %v5570_v56 }
 0x126   : > { %1349 = vmatpush.msrb.mxu1 %v1281_v33  ;;  %1415 = vmatpush.msrb.mxu2 %v1278_v34  ;;  %v1269_v55 = vcvt.s32.f32 %v1205_v53  ;;  %v1203_v59 = vunpack.c.3.s8 %v5571_v57  ;;  %v1200_v1 = vunpack.c.3.s8 %v5568_v63  ;;  %v1201_v2 = vunpack.c.3.s8 %v5569_v0  ;;  %v5566_v33 = vld [vmem:[%s6279_s8 + $0xb0] sm:$0xff]  ;;  %v5567_v34 = vld [vmem:[%s6279_s8 + $0xb8] sm:$0xff] }
 0x127   : > { %1480 = vmatpush.msrb.mxu3 %v1279_v35  ;;  %1285 = vmatpush.msrb.mxu0 %v1276_v36  ;;  %v1266_v61 = vcvt.s32.f32 %v1202_v58  ;;  %v1198_v5 = vunpack.c.2.s8 %v5570_v56  ;;  %v1199_v6 = vunpack.c.2.s8 %v5571_v57  ;;  %v1196_v10 = vunpack.c.2.s8 %v5568_v63 }
 0x128   : > { %1350 = vmatpush.msrb.mxu1 %v1277_v37  ;;  %1416 = vmatpush.msrb.mxu2 %v1274_v41  ;;  %v1267_v62 = vcvt.s32.f32 %v1203_v59  ;;  %v1264_v3 = vcvt.s32.f32 %v1200_v1  ;;  %v1265_v4 = vcvt.s32.f32 %v1201_v2  ;;  %v1197_v11 = vunpack.c.2.s8 %v5569_v0  ;;  %v6457_v37 = vld [vmem:[#allocation10 + $0x38] sm:$0xff]  ;;  %v5564_v41 = vld [vmem:[%s6279_s8 + $0xa0] sm:$0xff]  ;;  %v6471_v59 = vld [vmem:[#allocation10 + $0x48] sm:$0xff] }
 0x129   : > { %828 = vmatmul.f32.gmra.mxu2 %v6409_v40  ;;  %1481 = vmatpush.msrb.mxu3 %v1275_v42  ;;  %v1262_v8 = vcvt.s32.f32 %v1198_v5  ;;  %v1263_v9 = vcvt.s32.f32 %v1199_v6  ;;  %v1260_v12 = vcvt.s32.f32 %v1196_v10  ;;  %v1194_v14 = vunpack.c.1.s8 %v5570_v56  ;;  %v5565_v42 = vld [vmem:[%s6279_s8 + $0xa8] sm:$0xff]  ;;  %v6477_v5 = vld [vmem:[#allocation10 + $0x50] sm:$0xff] }
 0x12a   : > { %893 = vmatmul.f32.gmra.mxu3 %v6409_v40  ;;  %1286 = vmatpush.msrb.mxu0 %v1272_v45  ;;  %v1261_v13 = vcvt.s32.f32 %v1197_v11  ;;  %v1195_v15 = vunpack.c.1.s8 %v5571_v57  ;;  %v1192_v19 = vunpack.c.1.s8 %v5568_v63  ;;  %v1193_v21 = vunpack.c.1.s8 %v5569_v0 }
 0x12b   : > { %698 = vmatmul.f32.gmra.mxu0 %v6409_v40  ;;  %1351 = vmatpush.msrb.mxu1 %v1273_v46  ;;  %v1258_v17 = vcvt.s32.f32 %v1194_v14  ;;  %v1190_v24 = vunpack.c.0.s8 %v5570_v56  ;;  %v1191_v25 = vunpack.c.0.s8 %v5571_v57  ;;  %v1188_v29 = vunpack.c.0.s8 %v5568_v63  ;;  %v6485_v14 = vld [vmem:[%s6279_s8 + $0x98] sm:$0xff] }
 0x12c   : > { %763 = vmatmul.f32.gmra.mxu1 %v6409_v40  ;;  %1417 = vmatpush.msrb.mxu2 %v1270_v50  ;;  %v1259_v18 = vcvt.s32.f32 %v1195_v15  ;;  %v1256_v22 = vcvt.s32.f32 %v1192_v19  ;;  %v1257_v23 = vcvt.s32.f32 %v1193_v21  ;;  %v1189_v30 = vunpack.c.0.s8 %v5569_v0  ;;  %v6465_v50 = vld [vmem:[#allocation10 + $0x40] sm:$0xff] }
 0x12d   : > { %1482 = vmatpush.msrb.mxu3 %v1271_v51  ;;  %1287 = vmatpush.msrb.mxu0 %v1268_v54  ;;  %v1254_v27 = vcvt.s32.f32 %v1190_v24  ;;  %v1255_v28 = vcvt.s32.f32 %v1191_v25  ;;  %v1252_v31 = vcvt.s32.f32 %v1188_v29  ;;  %v1186_v35 = vunpack.c.3.s8 %v5566_v33 }
 0x12e   : > { %1352 = vmatpush.msrb.mxu1 %v1269_v55  ;;  %1418 = vmatpush.msrb.mxu2 %v1266_v61  ;;  %v1253_v32 = vcvt.s32.f32 %v1189_v30  ;;  %v1187_v36 = vunpack.c.3.s8 %v5567_v34  ;;  %v1184_v43 = vunpack.c.3.s8 %v5564_v41  ;;  %v1185_v44 = vunpack.c.3.s8 %v5565_v42 }
 0x12f   : > { %1483 = vmatpush.msrb.mxu3 %v1267_v62  ;;  %1288 = vmatpush.msrb.mxu0 %v1264_v3  ;;  %v1250_v38 = vcvt.s32.f32 %v1186_v35  ;;  %v1182_v47 = vunpack.c.2.s8 %v5566_v33  ;;  %v1183_v48 = vunpack.c.2.s8 %v5567_v34  ;;  %v1180_v53 = vunpack.c.2.s8 %v5564_v41 }
 0x130   : > { %1353 = vmatpush.msrb.mxu1 %v1265_v4  ;;  %1419 = vmatpush.msrb.mxu2 %v1262_v8  ;;  %v1251_v39 = vcvt.s32.f32 %v1187_v36  ;;  %v1248_v45 = vcvt.s32.f32 %v1184_v43  ;;  %v1249_v46 = vcvt.s32.f32 %v1185_v44  ;;  %v1181_v54 = vunpack.c.2.s8 %v5565_v42  ;;  %v533_v43 = vld [vmem:[#allocation10 + $0x70] sm:$0xff] }
 0x131   : > { %831 = vmatmul.f32.gmra.mxu2 %v6419_v49  ;;  %1484 = vmatpush.msrb.mxu3 %v1263_v9  ;;  %v1246_v51 = vcvt.s32.f32 %v1182_v47  ;;  %v1247_v52 = vcvt.s32.f32 %v1183_v48  ;;  %v1244_v55 = vcvt.s32.f32 %v1180_v53  ;;  %v1178_v57 = vunpack.c.1.s8 %v5566_v33 }
 0x132   : > { %896 = vmatmul.f32.gmra.mxu3 %v6419_v49  ;;  %1289 = vmatpush.msrb.mxu0 %v1260_v12  ;;  %v1245_v56 = vcvt.s32.f32 %v1181_v54  ;;  %v1179_v58 = vunpack.c.1.s8 %v5567_v34  ;;  %v1176_v63 = vunpack.c.1.s8 %v5564_v41  ;;  %v1177_v0 = vunpack.c.1.s8 %v5565_v42 }
 0x133   : > { %701 = vmatmul.f32.gmra.mxu0 %v6419_v49  ;;  %1354 = vmatpush.msrb.mxu1 %v1261_v13  ;;  %v1242_v61 = vcvt.s32.f32 %v1178_v57  ;;  %v1174_v3 = vunpack.c.0.s8 %v5566_v33  ;;  %v1175_v4 = vunpack.c.0.s8 %v5567_v34  ;;  %v1172_v9 = vunpack.c.0.s8 %v5564_v41  ;;  %v5562_v13 = vld [vmem:[%s6279_s8 + $0x90] sm:$0xff]  ;;  %v6497_v33 = vld [vmem:[#allocation10 + $0x60] sm:$0xff]  ;;  %v6503_v41 = vld [vmem:[#allocation10 + $0x68] sm:$0xff] }
 0x134   : > { %766 = vmatmul.f32.gmra.mxu1 %v6419_v49  ;;  %1420 = vmatpush.msrb.mxu2 %v1258_v17  ;;  %v1243_v62 = vcvt.s32.f32 %v1179_v58  ;;  %v1240_v1 = vcvt.s32.f32 %v1176_v63  ;;  %v1241_v2 = vcvt.s32.f32 %v1177_v0  ;;  %v1173_v10 = vunpack.c.0.s8 %v5565_v42 }
 0x135   : > { %1485 = vmatpush.msrb.mxu3 %v1259_v18  ;;  %1290 = vmatpush.msrb.mxu0 %v1256_v22  ;;  %v1238_v6 = vcvt.s32.f32 %v1174_v3  ;;  %v1239_v8 = vcvt.s32.f32 %v1175_v4  ;;  %v1236_v11 = vcvt.s32.f32 %v1172_v9  ;;  %v1170_v15 = vunpack.c.3.s8 %v5562_v13  ;;  %v6488_v18 = vld [vmem:[#allocation10 + $0x58] sm:$0xff]  ;;  %v5560_v22 = vld [vmem:[%s6279_s8 + $0x80] sm:$0xff] }
 0x136   : > { %1355 = vmatpush.msrb.mxu1 %v1257_v23  ;;  %1421 = vmatpush.msrb.mxu2 %v1254_v27  ;;  %v1237_v12 = vcvt.s32.f32 %v1173_v10  ;;  %v1171_v17 = vunpack.c.3.s8 %v6485_v14  ;;  %v5561_v23 = vld [vmem:[%s6279_s8 + $0x88] sm:$0xff]  ;;  %v1168_v24 = vunpack.c.3.s8 %v5560_v22  ;;  %v1166_v29 = vunpack.c.2.s8 %v5562_v13 }
 0x137   : > { %1486 = vmatpush.msrb.mxu3 %v1255_v28  ;;  %1291 = vmatpush.msrb.mxu0 %v1252_v31  ;;  %v1234_v19 = vcvt.s32.f32 %v1170_v15  ;;  %v1169_v25 = vunpack.c.3.s8 %v5561_v23  ;;  %v1167_v30 = vunpack.c.2.s8 %v6485_v14  ;;  %v1164_v31 = vunpack.c.2.s8 %v5560_v22 }
 0x138   : > { %1356 = vmatpush.msrb.mxu1 %v1253_v32  ;;  %1422 = vmatpush.msrb.mxu2 %v1250_v38  ;;  %v1235_v21 = vcvt.s32.f32 %v1171_v17  ;;  %v1232_v27 = vcvt.s32.f32 %v1168_v24  ;;  %v1165_v32 = vunpack.c.2.s8 %v5561_v23  ;;  %v1230_v34 = vcvt.s32.f32 %v1166_v29 }
 0x139   : > { %834 = vmatmul.f32.gmra.mxu2 %v6429_v60  ;;  %1487 = vmatpush.msrb.mxu3 %v1251_v39  ;;  %v1233_v28 = vcvt.s32.f32 %v1169_v25  ;;  %v1231_v35 = vcvt.s32.f32 %v1167_v30  ;;  %v1228_v36 = vcvt.s32.f32 %v1164_v31  ;;  %v1162_v39 = vunpack.c.1.s8 %v5562_v13 }
 0x13a   : > { %899 = vmatmul.f32.gmra.mxu3 %v6429_v60  ;;  %1292 = vmatpush.msrb.mxu0 %v1248_v45  ;;  %v1229_v38 = vcvt.s32.f32 %v1165_v32  ;;  %v1163_v44 = vunpack.c.1.s8 %v6485_v14  ;;  %v1160_v45 = vunpack.c.1.s8 %v5560_v22  ;;  %v1159_v53 = vunpack.c.0.s8 %v6485_v14 }
 0x13b   : > { %704 = vmatmul.f32.gmra.mxu0 %v6429_v60  ;;  %1357 = vmatpush.msrb.mxu1 %v1249_v46  ;;  %v1226_v42 = vcvt.s32.f32 %v1162_v39  ;;  %v1161_v46 = vunpack.c.1.s8 %v5561_v23  ;;  %v1156_v54 = vunpack.c.0.s8 %v5560_v22 }
 0x13c   : > { %769 = vmatmul.f32.gmra.mxu1 %v6429_v60  ;;  %1423 = vmatpush.msrb.mxu2 %v1246_v51  ;;  %v1227_v47 = vcvt.s32.f32 %v1163_v44  ;;  %v1224_v48 = vcvt.s32.f32 %v1160_v45  ;;  %v1158_v51 = vunpack.c.0.s8 %v5562_v13  ;;  %v1223_v57 = vcvt.s32.f32 %v1159_v53  ;;  %v6528_v44 = vld [vmem:[%s6279_s8 + $0x178] sm:$0xff]  ;;  %v6531_v45 = vld [vmem:[%s6279_s8 + $0x160] sm:$0xff] }
 0x13d   : > { %1488 = vmatpush.msrb.mxu3 %v1247_v52  ;;  %1293 = vmatpush.msrb.mxu0 %v1244_v55  ;;  %v1225_v52 = vcvt.s32.f32 %v1161_v46  ;;  %v1157_v55 = vunpack.c.0.s8 %v5561_v23  ;;  %v1220_v58 = vcvt.s32.f32 %v1156_v54  ;;  %v6516_v23 = vld [vmem:[%s6287_s21] ss:$0 sm:$0xff] }
 0x13e   : > { %1358 = vmatpush.msrb.mxu1 %v1245_v56  ;;  %1424 = vmatpush.msrb.mxu2 %v1242_v61  ;;  %v1222_v56 = vcvt.s32.f32 %v1158_v51  ;;  %v1823_v51 = vunpack.c.3.s8 %v6531_v45 }
 0x13f   : > { %1489 = vmatpush.msrb.mxu3 %v1243_v62  ;;  %1294 = vmatpush.msrb.mxu0 %v1240_v1  ;;  %v1221_v61 = vcvt.s32.f32 %v1157_v55  ;;  %v534_v62 = vld [vmem:[#allocation10 + $0x78] sm:$0xff] }
 0x140   : > { %1359 = vmatpush.msrb.mxu1 %v1241_v2  ;;  %1425 = vmatpush.msrb.mxu2 %v1238_v6 }
 0x141   : > { %837 = vmatmul.f32.gmra.mxu2 %v6437_v7  ;;  %1490 = vmatpush.msrb.mxu3 %v1239_v8 }
 0x142   : > { %902 = vmatmul.f32.gmra.mxu3 %v6437_v7  ;;  %1295 = vmatpush.msrb.mxu0 %v1236_v11  ;;  %v6512_v11 = vld [vmem:[%s6285_s14] ss:$0 sm:$0xff] }
 0x143   : > { %707 = vmatmul.f32.gmra.mxu0 %v6437_v7  ;;  %1360 = vmatpush.msrb.mxu1 %v1237_v12 }
 0x144   : > { %772 = vmatmul.f32.gmra.mxu1 %v6437_v7  ;;  %1491 = vmatpush.msrb.mxu3 %v1235_v21 }
 0x145   : > { %1426 = vmatpush.msrb.mxu2 %v1234_v19  ;;  %1296 = vmatpush.msrb.mxu0 %v1232_v27 }
 0x146   : > { %1361 = vmatpush.msrb.mxu1 %v1233_v28  ;;  %1492 = vmatpush.msrb.mxu3 %v1231_v35 }
 0x147   : > { %1427 = vmatpush.msrb.mxu2 %v1230_v34  ;;  %1297 = vmatpush.msrb.mxu0 %v1228_v36 }
 0x148   : > { %1362 = vmatpush.msrb.mxu1 %v1229_v38  ;;  %1493 = vmatpush.msrb.mxu3 %v1227_v47 }
 0x149   : > { %840 = vmatmul.f32.gmra.mxu2 %v6443_v16  ;;  %1298 = vmatpush.msrb.mxu0 %v1224_v48  ;;  %v1826_v48 = vunpack.c.3.s8 %v6528_v44 }
 0x14a   : > { %905 = vmatmul.f32.gmra.mxu3 %v6443_v16  ;;  %1428 = vmatpush.msrb.mxu2 %v1226_v42 }
 0x14b   : > { %710 = vmatmul.f32.gmra.mxu0 %v6443_v16  ;;  %1363 = vmatpush.msrb.mxu1 %v1225_v52  ;;  %v6537_v52 = vld [vmem:[%s6279_s8 + $0x168] sm:$0xff] }
 0x14c   : > { %775 = vmatmul.f32.gmra.mxu1 %v6443_v16  ;;  %1429 = vmatpush.msrb.mxu2 %v1222_v56  ;;  %v1824_v56 = vunpack.c.3.s8 %v6537_v52 }
 0x14d   : > { %1494 = vmatpush.msrb.mxu3 %v1223_v57  ;;  %1299 = vmatpush.msrb.mxu0 %v1220_v58  ;;  %v1890_v58 = vcvt.s32.f32 %v1826_v48 }
 0x14e   : > { %1364 = vmatpush.msrb.mxu1 %v1221_v61  ;;  %v1887_v61 = vcvt.s32.f32 %v1823_v51 }
 0x14f   : > { %2086 = vmatpush.msra.mxu3 %v1890_v58 }
 0x150   : > { %1891 = vmatpush.msra.mxu0 %v1887_v61 }
 0x151   : > { %843 = vmatmul.f32.gmra.mxu2 %v6449_v26 }
 0x152   : > { %908 = vmatmul.f32.gmra.mxu3 %v6449_v26 }
 0x153   : > { %713 = vmatmul.f32.gmra.mxu0 %v6449_v26 }
 0x154   : > { %778 = vmatmul.f32.gmra.mxu1 %v6449_v26 }
 0x159   : > { %846 = vmatmul.f32.gmra.mxu2 %v6457_v37 }
 0x15a   : > { %911 = vmatmul.f32.gmra.mxu3 %v6457_v37 }
 0x15b   : > { %716 = vmatmul.f32.gmra.mxu0 %v6457_v37 }
 0x15c   : > { %781 = vmatmul.f32.gmra.mxu1 %v6457_v37 }
 0x161   : > { %849 = vmatmul.f32.gmra.mxu2 %v6465_v50 }
 0x162   : > { %914 = vmatmul.f32.gmra.mxu3 %v6465_v50 }
 0x163   : > { %719 = vmatmul.f32.gmra.mxu0 %v6465_v50 }
 0x164   : > { %784 = vmatmul.f32.gmra.mxu1 %v6465_v50 }
 0x169   : > { %852 = vmatmul.f32.gmra.mxu2 %v6471_v59 }
 0x16a   : > { %917 = vmatmul.f32.gmra.mxu3 %v6471_v59 }
 0x16b   : > { %722 = vmatmul.f32.gmra.mxu0 %v6471_v59 }
 0x16c   : > { %787 = vmatmul.f32.gmra.mxu1 %v6471_v59 }
 0x171   : > { %855 = vmatmul.f32.gmra.mxu2 %v6477_v5 }
 0x172   : > { %920 = vmatmul.f32.gmra.mxu3 %v6477_v5 }
 0x173   : > { %725 = vmatmul.f32.gmra.mxu0 %v6477_v5 }
 0x174   : > { %790 = vmatmul.f32.gmra.mxu1 %v6477_v5 }
 0x179   : > { %858 = vmatmul.f32.gmra.mxu2 %v6488_v18 }
 0x17a   : > { %923 = vmatmul.f32.gmra.mxu3 %v6488_v18 }
 0x17b   : > { %728 = vmatmul.f32.gmra.mxu0 %v6488_v18 }
 0x17c   : > { %793 = vmatmul.f32.gmra.mxu1 %v6488_v18 }
 0x181   : > { %861 = vmatmul.f32.gmra.mxu2 %v6497_v33 }
 0x182   : > { %926 = vmatmul.f32.gmra.mxu3 %v6497_v33 }
 0x183   : > { %731 = vmatmul.f32.gmra.mxu0 %v6497_v33 }
 0x184   : > { %796 = vmatmul.f32.gmra.mxu1 %v6497_v33 }
 0x189   : > { %864 = vmatmul.f32.gmra.mxu2 %v6503_v41 }
 0x18a   : > { %929 = vmatmul.f32.gmra.mxu3 %v6503_v41 }
 0x18b   : > { %734 = vmatmul.f32.gmra.mxu0 %v6503_v41 }
 0x18c   : > { %799 = vmatmul.f32.gmra.mxu1 %v6503_v41 }
 0x191   : > { %867 = vmatmul.f32.gmra.mxu2 %v533_v43 }
 0x192   : > { %932 = vmatmul.f32.gmra.mxu3 %v533_v43 }
 0x193   : > { %737 = vmatmul.f32.gmra.mxu0 %v533_v43 }
 0x194   : > { %802 = vmatmul.f32.gmra.mxu1 %v533_v43  ;;  %v6525_v43 = vld [vmem:[%s6279_s8 + $0x170] sm:$0xff] }
 0x195   : > { %v1825_v47 = vunpack.c.3.s8 %v6525_v43  ;;  %v1817_v51 = vunpack.c.1.s8 %v6525_v43 }
 0x197   : > { %v1889_v57 = vcvt.s32.f32 %v1825_v47  ;;  %v1881_v61 = vcvt.s32.f32 %v1817_v51  ;;  %v6596_v51 = vld [vmem:[%s6279_s8 + $0x158] sm:$0xff] }
 0x199   : > { %870 = vmatmul.f32.gmra.mxu2 %v534_v62 }
 0x19a   : > { %935 = vmatmul.f32.gmra.mxu3 %v534_v62  ;;  %2021 = vmatpush.msra.mxu2 %v1889_v57 }
 0x19b   : > { %740 = vmatmul.f32.gmra.mxu0 %v534_v62 }
 0x19c   : > { %805 = vmatmul.f32.gmra.mxu1 %v534_v62 }
 0x1a0   : > { %v696_v63 = vpop.f32.mrf.mxu0 }
 0x1a1   : > { %v761_v0 = vpop.f32.mrf.mxu1 }
 0x1a2   : > { %v939_v1 = vmul.f32 %v761_v0, %v696_v63  ;;  %v955_v2 = vadd.f32 %v761_v0, %v696_v63 }
 0x1a4   : > { %v826_v3 = vpop.f32.mrf.mxu2 }
 0x1a5   : > { %v971_v4 = vmul.f32 %v939_v1, %v826_v3  ;;  %v987_v6 = vadd.f32 %v955_v2, %v826_v3  ;;  %v891_v8 = vpop.f32.mrf.mxu3  ;;  %v1888_v1 = vcvt.s32.f32 %v1824_v56 }
 0x1a7   : > { %v1003_v9 = vmul.f32 %v971_v4, %v891_v8  ;;  %v1019_v10 = vadd.f32 %v987_v6, %v891_v8  ;;  %1956 = vmatpush.msra.mxu1 %v1888_v1 }
 0x1a8   : > { %v699_v12 = vpop.f32.mrf.mxu0 }
 0x1a9   : > { %v1036_v13 = vsub.f32 %v1003_v9, %v1019_v10  ;;  %v764_v14 = vpop.f32.mrf.mxu1 }
 0x1aa   : > { %v940_v15 = vmul.f32 %v764_v14, %v699_v12  ;;  %v956_v17 = vadd.f32 %v764_v14, %v699_v12  ;;  %v1822_v14 = vunpack.c.2.s8 %v6528_v44 }
 0x1ab   : > { %v1055_v19 = vmul.f32 %v6512_v11, %v1036_v13  ;;  %v1821_v13 = vunpack.c.2.s8 %v6525_v43 }
 0x1ac   : > { %v829_v21 = vpop.f32.mrf.mxu2 }
 0x1ad   : > { %v1071_v22 = vadd.f32 %v1055_v19, %v1019_v10  ;;  %v972_v24 = vmul.f32 %v940_v15, %v829_v21  ;;  %v988_v25 = vadd.f32 %v956_v17, %v829_v21  ;;  %v894_v27 = vpop.f32.mrf.mxu3  ;;  %v1819_v17 = vunpack.c.2.s8 %v6531_v45 }
 0x1ae   : > { %v1820_v19 = vunpack.c.2.s8 %v6537_v52 }
 0x1af   : > { %v1088_v28 = vsub.f32 %v1071_v22, %v6393_v20  ;;  %v1004_v29 = vmul.f32 %v972_v24, %v894_v27  ;;  %v1020_v30 = vadd.f32 %v988_v25, %v894_v27  ;;  %v1885_v25 = vcvt.s32.f32 %v1821_v13 }
 0x1b0   : > { %v702_v31 = vpop.f32.mrf.mxu0  ;;  %v1886_v27 = vcvt.s32.f32 %v1822_v14 }
 0x1b1   : > { %v1107_v32 = vmul.f32 %v6516_v23, %v1088_v28  ;;  %v1037_v34 = vsub.f32 %v1004_v29, %v1020_v30  ;;  %v767_v35 = vpop.f32.mrf.mxu1  ;;  %v1883_v28 = vcvt.s32.f32 %v1819_v17  ;;  %v1884_v29 = vcvt.s32.f32 %v1820_v19  ;;  %2022 = vmatpush.msra.mxu2 %v1885_v25 }
 0x1b2   : > { %v941_v36 = vmul.f32 %v767_v35, %v702_v31  ;;  %v957_v38 = vadd.f32 %v767_v35, %v702_v31  ;;  %2087 = vmatpush.msra.mxu3 %v1886_v27  ;;  %v1813_v17 = vunpack.c.0.s8 %v6525_v43  ;;  %v1814_v19 = vunpack.c.0.s8 %v6528_v44 }
 0x1b3   : > { %v6521_v39 = vadd.f32 %v1107_v32, %v6393_v20  ;;  %v1056_v42 = vmul.f32 %v6512_v11, %v1037_v34  ;;  %1892 = vmatpush.msra.mxu0 %v1883_v28  ;;  %1957 = vmatpush.msra.mxu1 %v1884_v29 }
 0x1b4   : > { %v832_v46 = vpop.f32.mrf.mxu2  ;;  %2023 = vmatpush.msra.mxu2 %v1881_v61  ;;  %v1877_v28 = vcvt.s32.f32 %v1813_v17  ;;  %v1878_v43 = vcvt.s32.f32 %v1814_v19 }
 0x1b5   : > { %v1072_v53 = vadd.f32 %v1056_v42, %v1020_v30  ;;  %v973_v20 = vmul.f32 %v941_v36, %v832_v46  ;;  %v989_v54 = vadd.f32 %v957_v38, %v832_v46  ;;  %1300 = vmatmul.f32.vlgmr.msrb.gmra.mxu0 %v6521_v39  ;;  %1365 = vmatmul.f32.vlgmr.msrb.gmra.mxu1 %v6521_v39  ;;  %v897_v55 = vpop.f32.mrf.mxu3 }
 0x1b6   : > { %1430 = vmatmul.f32.vlgmr.msrb.gmra.mxu2 %v6521_v39  ;;  %1495 = vmatmul.f32.vlgmr.msrb.gmra.mxu3 %v6521_v39 }
 0x1b7   : > { %v1089_v62 = vsub.f32 %v1072_v53, %v6409_v40  ;;  %v1005_v63 = vmul.f32 %v973_v20, %v897_v55  ;;  %v1021_v0 = vadd.f32 %v989_v54, %v897_v55  ;;  %v1818_v53 = vunpack.c.1.s8 %v6528_v44  ;;  %2024 = vmatpush.msra.mxu2 %v1877_v28 }
 0x1b8   : > { %v705_v2 = vpop.f32.mrf.mxu0  ;;  %v1815_v54 = vunpack.c.1.s8 %v6531_v45  ;;  %v1816_v55 = vunpack.c.1.s8 %v6537_v52 }
 0x1b9   : > { %v1108_v3 = vmul.f32 %v6516_v23, %v1089_v62  ;;  %v1038_v4 = vsub.f32 %v1005_v63, %v1021_v0  ;;  %v770_v6 = vpop.f32.mrf.mxu1  ;;  %v1882_v62 = vcvt.s32.f32 %v1818_v53  ;;  %v6599_v53 = vld [vmem:[%s6279_s8 + $0x140] sm:$0xff] }
 0x1ba   : > { %v942_v8 = vmul.f32 %v770_v6, %v705_v2  ;;  %v958_v9 = vadd.f32 %v770_v6, %v705_v2  ;;  %v1879_v63 = vcvt.s32.f32 %v1815_v54 }
 0x1bb   : > { %v6547_v10 = vadd.f32 %v1108_v3, %v6409_v40  ;;  %v1057_v12 = vmul.f32 %v6512_v11, %v1038_v4  ;;  %2088 = vmatpush.msra.mxu3 %v1882_v62 }
 0x1bc   : > { %v835_v15 = vpop.f32.mrf.mxu2  ;;  %1893 = vmatpush.msra.mxu0 %v1879_v63 }
 0x1bd   : > { %v1073_v21 = vadd.f32 %v1057_v12, %v1021_v0  ;;  %v974_v22 = vmul.f32 %v942_v8, %v835_v15  ;;  %v990_v24 = vadd.f32 %v958_v9, %v835_v15  ;;  %1303 = vmatmul.f32.gmra.mxu0 %v6547_v10  ;;  %1368 = vmatmul.f32.gmra.mxu1 %v6547_v10  ;;  %v900_v40 = vpop.f32.mrf.mxu3  ;;  %v1880_v0 = vcvt.s32.f32 %v1816_v55 }
 0x1be   : > { %1433 = vmatmul.f32.gmra.mxu2 %v6547_v10  ;;  %1498 = vmatmul.f32.gmra.mxu3 %v6547_v10  ;;  %v1810_v55 = vunpack.c.3.s8 %v6596_v51 }
 0x1bf   : > { %v1090_v30 = vsub.f32 %v1073_v21, %v6419_v49  ;;  %v1006_v31 = vmul.f32 %v974_v22, %v900_v40  ;;  %v1022_v32 = vadd.f32 %v990_v24, %v900_v40  ;;  %1958 = vmatpush.msra.mxu1 %v1880_v0  ;;  %v1811_v22 = vunpack.c.0.s8 %v6531_v45  ;;  %2089 = vmatpush.msra.mxu3 %v1878_v43 }
 0x1c0   : > { %v708_v34 = vpop.f32.mrf.mxu0  ;;  %v1812_v24 = vunpack.c.0.s8 %v6537_v52  ;;  %v1874_v0 = vcvt.s32.f32 %v1810_v55 }
 0x1c1   : > { %v1109_v35 = vmul.f32 %v6516_v23, %v1090_v30  ;;  %v1039_v36 = vsub.f32 %v1006_v31, %v1022_v32  ;;  %v773_v38 = vpop.f32.mrf.mxu1  ;;  %v1875_v44 = vcvt.s32.f32 %v1811_v22 }
 0x1c2   : > { %v943_v42 = vmul.f32 %v773_v38, %v708_v34  ;;  %v959_v46 = vadd.f32 %v773_v38, %v708_v34  ;;  %v1876_v29 = vcvt.s32.f32 %v1812_v24  ;;  %2090 = vmatpush.msra.mxu3 %v1874_v0  ;;  %v1806_v24 = vunpack.c.2.s8 %v6596_v51 }
 0x1c3   : > { %v6561_v47 = vadd.f32 %v1109_v35, %v6419_v49  ;;  %v1058_v48 = vmul.f32 %v6512_v11, %v1039_v36  ;;  %1894 = vmatpush.msra.mxu0 %v1875_v44 }
 0x1c4   : > { %v838_v20 = vpop.f32.mrf.mxu2  ;;  %1959 = vmatpush.msra.mxu1 %v1876_v29  ;;  %v1870_v29 = vcvt.s32.f32 %v1806_v24 }
 0x1c5   : > { %v1074_v56 = vadd.f32 %v1058_v48, %v1022_v32  ;;  %v975_v57 = vmul.f32 %v943_v42, %v838_v20  ;;  %v991_v58 = vadd.f32 %v959_v46, %v838_v20  ;;  %1306 = vmatmul.f32.gmra.mxu0 %v6561_v47  ;;  %1371 = vmatmul.f32.gmra.mxu1 %v6561_v47  ;;  %v903_v49 = vpop.f32.mrf.mxu3  ;;  %v6593_v48 = vld [vmem:[%s6279_s8 + $0x150] sm:$0xff] }
 0x1c6   : > { %1436 = vmatmul.f32.gmra.mxu2 %v6561_v47  ;;  %1501 = vmatmul.f32.gmra.mxu3 %v6561_v47  ;;  %v1809_v54 = vunpack.c.3.s8 %v6593_v48  ;;  %v1805_v22 = vunpack.c.2.s8 %v6593_v48 }
 0x1c7   : > { %v1091_v1 = vsub.f32 %v1074_v56, %v6429_v60  ;;  %v1007_v2 = vmul.f32 %v975_v57, %v903_v49  ;;  %v1023_v3 = vadd.f32 %v991_v58, %v903_v49  ;;  %v1807_v56 = vunpack.c.3.s8 %v6599_v53  ;;  %v6605_v57 = vld [vmem:[%s6279_s8 + $0x148] sm:$0xff]  ;;  %2091 = vmatpush.msra.mxu3 %v1870_v29 }
 0x1c8   : > { %v711_v4 = vpop.f32.mrf.mxu0  ;;  %v1808_v62 = vunpack.c.3.s8 %v6605_v57  ;;  %v1873_v63 = vcvt.s32.f32 %v1809_v54  ;;  %v1869_v44 = vcvt.s32.f32 %v1805_v22 }
 0x1c9   : > { %v1110_v6 = vmul.f32 %v6516_v23, %v1091_v1  ;;  %v1040_v8 = vsub.f32 %v1007_v2, %v1023_v3  ;;  %v776_v9 = vpop.f32.mrf.mxu1  ;;  %v1871_v1 = vcvt.s32.f32 %v1807_v56  ;;  %v1801_v56 = vunpack.c.1.s8 %v6593_v48 }
 0x1ca   : > { %v944_v12 = vmul.f32 %v776_v9, %v711_v4  ;;  %v960_v13 = vadd.f32 %v776_v9, %v711_v4  ;;  %2025 = vmatpush.msra.mxu2 %v1873_v63 }
 0x1cb   : > { %v6575_v14 = vadd.f32 %v1110_v6, %v6429_v60  ;;  %v1059_v15 = vmul.f32 %v6512_v11, %v1040_v8  ;;  %v1872_v6 = vcvt.s32.f32 %v1808_v62  ;;  %1895 = vmatpush.msra.mxu0 %v1871_v1  ;;  %v1865_v1 = vcvt.s32.f32 %v1801_v56  ;;  %v6664_v56 = vld [vmem:[%s6279_s8 + $0x138] sm:$0xff] }
 0x1cc   : > { %v841_v21 = vpop.f32.mrf.mxu2  ;;  %2026 = vmatpush.msra.mxu2 %v1869_v44 }
 0x1cd   : > { %v1075_v40 = vadd.f32 %v1059_v15, %v1023_v3  ;;  %v976_v25 = vmul.f32 %v944_v12, %v841_v21  ;;  %v992_v27 = vadd.f32 %v960_v13, %v841_v21  ;;  %1309 = vmatmul.f32.gmra.mxu0 %v6575_v14  ;;  %1374 = vmatmul.f32.gmra.mxu1 %v6575_v14  ;;  %v906_v60 = vpop.f32.mrf.mxu3 }
 0x1ce   : > { %1439 = vmatmul.f32.gmra.mxu2 %v6575_v14  ;;  %1504 = vmatmul.f32.gmra.mxu3 %v6575_v14 }
 0x1cf   : > { %v1092_v45 = vsub.f32 %v1075_v40, %v6437_v7  ;;  %v1008_v52 = vmul.f32 %v976_v25, %v906_v60  ;;  %v1024_v30 = vadd.f32 %v992_v27, %v906_v60  ;;  %1960 = vmatpush.msra.mxu1 %v1872_v6  ;;  %v1803_v25 = vunpack.c.2.s8 %v6599_v53  ;;  %2027 = vmatpush.msra.mxu2 %v1865_v1 }
 0x1d0   : > { %v714_v31 = vpop.f32.mrf.mxu0  ;;  %v1804_v27 = vunpack.c.2.s8 %v6605_v57 }
 0x1d1   : > { %v1111_v32 = vmul.f32 %v6516_v23, %v1092_v45  ;;  %v1041_v34 = vsub.f32 %v1008_v52, %v1024_v30  ;;  %v779_v35 = vpop.f32.mrf.mxu1  ;;  %v1867_v45 = vcvt.s32.f32 %v1803_v25  ;;  %v1797_v25 = vunpack.c.0.s8 %v6593_v48 }
 0x1d2   : > { %v945_v36 = vmul.f32 %v779_v35, %v714_v31  ;;  %v961_v38 = vadd.f32 %v779_v35, %v714_v31  ;;  %v1868_v52 = vcvt.s32.f32 %v1804_v27  ;;  %v1798_v27 = vunpack.c.0.s8 %v6596_v51 }
 0x1d3   : > { %v6589_v42 = vadd.f32 %v1111_v32, %v6437_v7  ;;  %v1060_v46 = vmul.f32 %v6512_v11, %v1041_v34  ;;  %1896 = vmatpush.msra.mxu0 %v1867_v45  ;;  %v1861_v45 = vcvt.s32.f32 %v1797_v25 }
 0x1d4   : > { %v844_v20 = vpop.f32.mrf.mxu2  ;;  %1961 = vmatpush.msra.mxu1 %v1868_v52  ;;  %v1862_v48 = vcvt.s32.f32 %v1798_v27 }
 0x1d5   : > { %v1076_v58 = vadd.f32 %v1060_v46, %v1024_v30  ;;  %v977_v7 = vmul.f32 %v945_v36, %v844_v20  ;;  %v993_v49 = vadd.f32 %v961_v38, %v844_v20  ;;  %1312 = vmatmul.f32.gmra.mxu0 %v6589_v42  ;;  %1377 = vmatmul.f32.gmra.mxu1 %v6589_v42  ;;  %v909_v61 = vpop.f32.mrf.mxu3 }
 0x1d6   : > { %1442 = vmatmul.f32.gmra.mxu2 %v6589_v42  ;;  %1507 = vmatmul.f32.gmra.mxu3 %v6589_v42 }
 0x1d7   : > { %v1093_v2 = vsub.f32 %v1076_v58, %v6443_v16  ;;  %v1009_v3 = vmul.f32 %v977_v7, %v909_v61  ;;  %v1025_v4 = vadd.f32 %v993_v49, %v909_v61  ;;  %v1802_v58 = vunpack.c.1.s8 %v6596_v51  ;;  %2028 = vmatpush.msra.mxu2 %v1861_v45 }
 0x1d8   : > { %v717_v8 = vpop.f32.mrf.mxu0  ;;  %v1799_v49 = vunpack.c.1.s8 %v6599_v53  ;;  %v1800_v61 = vunpack.c.1.s8 %v6605_v57 }
 0x1d9   : > { %v1112_v9 = vmul.f32 %v6516_v23, %v1093_v2  ;;  %v1042_v12 = vsub.f32 %v1009_v3, %v1025_v4  ;;  %v782_v13 = vpop.f32.mrf.mxu1  ;;  %v1866_v2 = vcvt.s32.f32 %v1802_v58  ;;  %v6667_v58 = vld [vmem:[%s6279_s8 + $0x120] sm:$0xff] }
 0x1da   : > { %v946_v15 = vmul.f32 %v782_v13, %v717_v8  ;;  %v962_v17 = vadd.f32 %v782_v13, %v717_v8  ;;  %v1863_v3 = vcvt.s32.f32 %v1799_v49 }
 0x1db   : > { %v6615_v19 = vadd.f32 %v1112_v9, %v6443_v16  ;;  %v1061_v21 = vmul.f32 %v6512_v11, %v1042_v12  ;;  %2092 = vmatpush.msra.mxu3 %v1866_v2 }
 0x1dc   : > { %v847_v40 = vpop.f32.mrf.mxu2  ;;  %1897 = vmatpush.msra.mxu0 %v1863_v3 }
 0x1dd   : > { %v1077_v60 = vadd.f32 %v1061_v21, %v1025_v4  ;;  %v978_v28 = vmul.f32 %v946_v15, %v847_v40  ;;  %v994_v43 = vadd.f32 %v962_v17, %v847_v40  ;;  %1315 = vmatmul.f32.gmra.mxu0 %v6615_v19  ;;  %1380 = vmatmul.f32.gmra.mxu1 %v6615_v19  ;;  %v912_v16 = vpop.f32.mrf.mxu3  ;;  %v1864_v4 = vcvt.s32.f32 %v1800_v61 }
 0x1de   : > { %1445 = vmatmul.f32.gmra.mxu2 %v6615_v19  ;;  %1510 = vmatmul.f32.gmra.mxu3 %v6615_v19  ;;  %v1794_v61 = vunpack.c.3.s8 %v6664_v56 }
 0x1df   : > { %v1094_v30 = vsub.f32 %v1077_v60, %v6449_v26  ;;  %v1010_v31 = vmul.f32 %v978_v28, %v912_v16  ;;  %v1026_v32 = vadd.f32 %v994_v43, %v912_v16  ;;  %1962 = vmatpush.msra.mxu1 %v1864_v4  ;;  %v1795_v28 = vunpack.c.0.s8 %v6599_v53  ;;  %2093 = vmatpush.msra.mxu3 %v1862_v48 }
 0x1e0   : > { %v720_v34 = vpop.f32.mrf.mxu0  ;;  %v1796_v43 = vunpack.c.0.s8 %v6605_v57  ;;  %v1858_v4 = vcvt.s32.f32 %v1794_v61 }
 0x1e1   : > { %v1113_v35 = vmul.f32 %v6516_v23, %v1094_v30  ;;  %v1043_v36 = vsub.f32 %v1010_v31, %v1026_v32  ;;  %v785_v38 = vpop.f32.mrf.mxu1  ;;  %v1859_v51 = vcvt.s32.f32 %v1795_v28 }
 0x1e2   : > { %v947_v46 = vmul.f32 %v785_v38, %v720_v34  ;;  %v963_v20 = vadd.f32 %v785_v38, %v720_v34  ;;  %v1860_v52 = vcvt.s32.f32 %v1796_v43  ;;  %2094 = vmatpush.msra.mxu3 %v1858_v4  ;;  %v1790_v43 = vunpack.c.2.s8 %v6664_v56 }
 0x1e3   : > { %v6629_v54 = vadd.f32 %v1113_v35, %v6449_v26  ;;  %v1062_v55 = vmul.f32 %v6512_v11, %v1043_v36  ;;  %1898 = vmatpush.msra.mxu0 %v1859_v51 }
 0x1e4   : > { %v850_v7 = vpop.f32.mrf.mxu2  ;;  %1963 = vmatpush.msra.mxu1 %v1860_v52  ;;  %v1854_v52 = vcvt.s32.f32 %v1790_v43 }
 0x1e5   : > { %v1078_v62 = vadd.f32 %v1062_v55, %v1026_v32  ;;  %v979_v63 = vmul.f32 %v947_v46, %v850_v7  ;;  %v995_v0 = vadd.f32 %v963_v20, %v850_v7  ;;  %1318 = vmatmul.f32.gmra.mxu0 %v6629_v54  ;;  %1383 = vmatmul.f32.gmra.mxu1 %v6629_v54  ;;  %v915_v26 = vpop.f32.mrf.mxu3  ;;  %v6661_v55 = vld [vmem:[%s6279_s8 + $0x130] sm:$0xff] }
 0x1e6   : > { %1448 = vmatmul.f32.gmra.mxu2 %v6629_v54  ;;  %1513 = vmatmul.f32.gmra.mxu3 %v6629_v54  ;;  %v1793_v49 = vunpack.c.3.s8 %v6661_v55  ;;  %v1789_v28 = vunpack.c.2.s8 %v6661_v55 }
 0x1e7   : > { %v1095_v6 = vsub.f32 %v1078_v62, %v6457_v37  ;;  %v1011_v8 = vmul.f32 %v979_v63, %v915_v26  ;;  %v1027_v9 = vadd.f32 %v995_v0, %v915_v26  ;;  %v1791_v62 = vunpack.c.3.s8 %v6667_v58  ;;  %v6673_v63 = vld [vmem:[%s6279_s8 + $0x128] sm:$0xff]  ;;  %2095 = vmatpush.msra.mxu3 %v1854_v52 }
 0x1e8   : > { %v723_v12 = vpop.f32.mrf.mxu0  ;;  %v1792_v2 = vunpack.c.3.s8 %v6673_v63  ;;  %v1857_v3 = vcvt.s32.f32 %v1793_v49  ;;  %v1853_v51 = vcvt.s32.f32 %v1789_v28 }
 0x1e9   : > { %v1114_v13 = vmul.f32 %v6516_v23, %v1095_v6  ;;  %v1044_v15 = vsub.f32 %v1011_v8, %v1027_v9  ;;  %v788_v17 = vpop.f32.mrf.mxu1  ;;  %v1855_v6 = vcvt.s32.f32 %v1791_v62  ;;  %v1785_v62 = vunpack.c.1.s8 %v6661_v55 }
 0x1ea   : > { %v948_v21 = vmul.f32 %v788_v17, %v723_v12  ;;  %v964_v22 = vadd.f32 %v788_v17, %v723_v12  ;;  %2029 = vmatpush.msra.mxu2 %v1857_v3 }
 0x1eb   : > { %v6643_v24 = vadd.f32 %v1114_v13, %v6457_v37  ;;  %v1063_v40 = vmul.f32 %v6512_v11, %v1044_v15  ;;  %v1856_v13 = vcvt.s32.f32 %v1792_v2  ;;  %1899 = vmatpush.msra.mxu0 %v1855_v6  ;;  %v1849_v6 = vcvt.s32.f32 %v1785_v62 }
 0x1ec   : > { %v853_v60 = vpop.f32.mrf.mxu2  ;;  %2030 = vmatpush.msra.mxu2 %v1853_v51  ;;  %v1780_v51 = vunpack.c.0.s8 %v6673_v63 }
 0x1ed   : > { %v1079_v16 = vadd.f32 %v1063_v40, %v1027_v9  ;;  %v980_v44 = vmul.f32 %v948_v21, %v853_v60  ;;  %v996_v29 = vadd.f32 %v964_v22, %v853_v60  ;;  %1321 = vmatmul.f32.gmra.mxu0 %v6643_v24  ;;  %1386 = vmatmul.f32.gmra.mxu1 %v6643_v24  ;;  %v918_v37 = vpop.f32.mrf.mxu3 }
 0x1ee   : > { %1451 = vmatmul.f32.gmra.mxu2 %v6643_v24  ;;  %1516 = vmatmul.f32.gmra.mxu3 %v6643_v24 }
 0x1ef   : > { %v1096_v53 = vsub.f32 %v1079_v16, %v6465_v50  ;;  %v1012_v57 = vmul.f32 %v980_v44, %v918_v37  ;;  %v1028_v30 = vadd.f32 %v996_v29, %v918_v37  ;;  %1964 = vmatpush.msra.mxu1 %v1856_v13  ;;  %v1787_v44 = vunpack.c.2.s8 %v6667_v58  ;;  %2031 = vmatpush.msra.mxu2 %v1849_v6 }
 0x1f0   : > { %v726_v31 = vpop.f32.mrf.mxu0  ;;  %v1788_v29 = vunpack.c.2.s8 %v6673_v63 }
 0x1f1   : > { %v1115_v32 = vmul.f32 %v6516_v23, %v1096_v53  ;;  %v1045_v34 = vsub.f32 %v1012_v57, %v1028_v30  ;;  %v791_v35 = vpop.f32.mrf.mxu1  ;;  %v1851_v53 = vcvt.s32.f32 %v1787_v44  ;;  %v1781_v44 = vunpack.c.0.s8 %v6661_v55 }
 0x1f2   : > { %v949_v36 = vmul.f32 %v791_v35, %v726_v31  ;;  %v965_v38 = vadd.f32 %v791_v35, %v726_v31  ;;  %v1852_v57 = vcvt.s32.f32 %v1788_v29  ;;  %v1782_v29 = vunpack.c.0.s8 %v6664_v56 }
 0x1f3   : > { %v6657_v46 = vadd.f32 %v1115_v32, %v6465_v50  ;;  %v1064_v20 = vmul.f32 %v6512_v11, %v1045_v34  ;;  %1900 = vmatpush.msra.mxu0 %v1851_v53 }
 0x1f4   : > { %v856_v7 = vpop.f32.mrf.mxu2  ;;  %1965 = vmatpush.msra.mxu1 %v1852_v57 }
 0x1f5   : > { %v1080_v0 = vadd.f32 %v1064_v20, %v1028_v30  ;;  %v981_v50 = vmul.f32 %v949_v36, %v856_v7  ;;  %v997_v26 = vadd.f32 %v965_v38, %v856_v7  ;;  %1324 = vmatmul.f32.gmra.mxu0 %v6657_v46  ;;  %1389 = vmatmul.f32.gmra.mxu1 %v6657_v46  ;;  %v921_v1 = vpop.f32.mrf.mxu3 }
 0x1f6   : > { %1454 = vmatmul.f32.gmra.mxu2 %v6657_v46  ;;  %1519 = vmatmul.f32.gmra.mxu3 %v6657_v46 }
 0x1f7   : > { %v1097_v8 = vsub.f32 %v1080_v0, %v6471_v59  ;;  %v1013_v9 = vmul.f32 %v981_v50, %v921_v1  ;;  %v1029_v12 = vadd.f32 %v997_v26, %v921_v1  ;;  %v1786_v0 = vunpack.c.1.s8 %v6664_v56 }
 0x1f8   : > { %v729_v15 = vpop.f32.mrf.mxu0  ;;  %v1783_v26 = vunpack.c.1.s8 %v6667_v58  ;;  %v1784_v1 = vunpack.c.1.s8 %v6673_v63 }
 0x1f9   : > { %v1116_v17 = vmul.f32 %v6516_v23, %v1097_v8  ;;  %v1046_v21 = vsub.f32 %v1013_v9, %v1029_v12  ;;  %v794_v22 = vpop.f32.mrf.mxu1  ;;  %v1850_v8 = vcvt.s32.f32 %v1786_v0 }
 0x1fa   : > { %v950_v40 = vmul.f32 %v794_v22, %v729_v15  ;;  %v966_v25 = vadd.f32 %v794_v22, %v729_v15  ;;  %v1847_v9 = vcvt.s32.f32 %v1783_v26 }
 0x1fb   : > { %v6683_v27 = vadd.f32 %v1116_v17, %v6471_v59  ;;  %v1065_v60 = vmul.f32 %v6512_v11, %v1046_v21  ;;  %2096 = vmatpush.msra.mxu3 %v1850_v8 }
 0x1fc   : > { %v859_v16 = vpop.f32.mrf.mxu2  ;;  %1901 = vmatpush.msra.mxu0 %v1847_v9 }
 0x1fd   : > { %v1081_v37 = vadd.f32 %v1065_v60, %v1029_v12  ;;  %v982_v45 = vmul.f32 %v950_v40, %v859_v16  ;;  %v998_v48 = vadd.f32 %v966_v25, %v859_v16  ;;  %1327 = vmatmul.f32.gmra.mxu0 %v6683_v27  ;;  %1392 = vmatmul.f32.gmra.mxu1 %v6683_v27  ;;  %v924_v59 = vpop.f32.mrf.mxu3  ;;  %v1848_v12 = vcvt.s32.f32 %v1784_v1 }
 0x1fe   : > { %1457 = vmatmul.f32.gmra.mxu2 %v6683_v27  ;;  %1522 = vmatmul.f32.gmra.mxu3 %v6683_v27 }
 0x1ff   : > { %v1098_v30 = vsub.f32 %v1081_v37, %v6477_v5  ;;  %v1014_v31 = vmul.f32 %v982_v45, %v924_v59  ;;  %v1030_v32 = vadd.f32 %v998_v48, %v924_v59  ;;  %1966 = vmatpush.msra.mxu1 %v1848_v12  ;;  %v6717_v37 = vld [vmem:[%s6279_s8 + $0x110] sm:$0xff]  ;;  %v6720_v45 = vld [vmem:[%s6279_s8 + $0x118] sm:$0xff]  ;;  %v1779_v59 = vunpack.c.0.s8 %v6667_v58 }
 0x200   : > { %v732_v34 = vpop.f32.mrf.mxu0  ;;  %v1777_v52 = vunpack.c.3.s8 %v6717_v37  ;;  %v1846_v58 = vcvt.s32.f32 %v1782_v29 }
 0x201   : > { %v1117_v35 = vmul.f32 %v6516_v23, %v1098_v30  ;;  %v1047_v36 = vsub.f32 %v1014_v31, %v1030_v32  ;;  %v797_v38 = vpop.f32.mrf.mxu1  ;;  %v1845_v30 = vcvt.s32.f32 %v1781_v44  ;;  %v1843_v63 = vcvt.s32.f32 %v1779_v59 }
 0x202   : > { %v951_v20 = vmul.f32 %v797_v38, %v732_v34  ;;  %v967_v7 = vadd.f32 %v797_v38, %v732_v34  ;;  %v1844_v31 = vcvt.s32.f32 %v1780_v51  ;;  %v6731_v34 = vld [vmem:[%s6279_s8 + $0x100] sm:$0xff]  ;;  %2097 = vmatpush.msra.mxu3 %v1846_v58 }
 0x203   : > { %v6697_v49 = vadd.f32 %v1117_v35, %v6477_v5  ;;  %v1066_v61 = vmul.f32 %v6512_v11, %v1047_v36  ;;  %v6734_v35 = vld [vmem:[%s6279_s8 + $0x108] sm:$0xff]  ;;  %2032 = vmatpush.msra.mxu2 %v1845_v30  ;;  %1902 = vmatpush.msra.mxu0 %v1843_v63  ;;  %v1775_v62 = vunpack.c.3.s8 %v6731_v34 }
 0x204   : > { %v862_v50 = vpop.f32.mrf.mxu2  ;;  %v1776_v0 = vunpack.c.3.s8 %v6734_v35  ;;  %1967 = vmatpush.msra.mxu1 %v1844_v31 }
 0x205   : > { %v1082_v2 = vadd.f32 %v1066_v61, %v1030_v32  ;;  %v983_v3 = vmul.f32 %v951_v20, %v862_v50  ;;  %v999_v4 = vadd.f32 %v967_v7, %v862_v50  ;;  %1330 = vmatmul.f32.gmra.mxu0 %v6697_v49  ;;  %1395 = vmatmul.f32.gmra.mxu1 %v6697_v49  ;;  %v927_v5 = vpop.f32.mrf.mxu3  ;;  %v1841_v32 = vcvt.s32.f32 %v1777_v52 }
 0x206   : > { %1460 = vmatmul.f32.gmra.mxu2 %v6697_v49  ;;  %1525 = vmatmul.f32.gmra.mxu3 %v6697_v49  ;;  %v1773_v50 = vunpack.c.2.s8 %v6717_v37  ;;  %v1840_v6 = vcvt.s32.f32 %v1776_v0 }
 0x207   : > { %v1099_v13 = vsub.f32 %v1082_v2, %v6488_v18  ;;  %v1015_v15 = vmul.f32 %v983_v3, %v927_v5  ;;  %v1031_v17 = vadd.f32 %v999_v4, %v927_v5  ;;  %2033 = vmatpush.msra.mxu2 %v1841_v32  ;;  %v1839_v5 = vcvt.s32.f32 %v1775_v62 }
 0x208   : > { %v735_v21 = vpop.f32.mrf.mxu0  ;;  %v1837_v12 = vcvt.s32.f32 %v1773_v50  ;;  %1968 = vmatpush.msra.mxu1 %v1840_v6 }
 0x209   : > { %v1118_v22 = vmul.f32 %v6516_v23, %v1099_v13  ;;  %v1048_v40 = vsub.f32 %v1015_v15, %v1031_v17  ;;  %v800_v25 = vpop.f32.mrf.mxu1  ;;  %v1774_v13 = vunpack.c.2.s8 %v6720_v45  ;;  %1903 = vmatpush.msra.mxu0 %v1839_v5 }
 0x20a   : > { %v952_v60 = vmul.f32 %v800_v25, %v735_v21  ;;  %v968_v28 = vadd.f32 %v800_v25, %v735_v21  ;;  %v1772_v21 = vunpack.c.2.s8 %v6734_v35  ;;  %2034 = vmatpush.msra.mxu2 %v1837_v12 }
 0x20b   : > { %v6711_v43 = vadd.f32 %v1118_v22, %v6488_v18  ;;  %v1067_v16 = vmul.f32 %v6512_v11, %v1048_v40  ;;  %v1778_v18 = vunpack.c.3.s8 %v6720_v45 }
 0x20c   : > { %v865_v48 = vpop.f32.mrf.mxu2 }
 0x20d   : > { %v1083_v53 = vadd.f32 %v1067_v16, %v1031_v17  ;;  %v984_v57 = vmul.f32 %v952_v60, %v865_v48  ;;  %v1000_v55 = vadd.f32 %v968_v28, %v865_v48  ;;  %1333 = vmatmul.f32.gmra.mxu0 %v6711_v43  ;;  %1398 = vmatmul.f32.gmra.mxu1 %v6711_v43  ;;  %v930_v56 = vpop.f32.mrf.mxu3  ;;  %v1842_v7 = vcvt.s32.f32 %v1778_v18 }
 0x20e   : > { %1463 = vmatmul.f32.gmra.mxu2 %v6711_v43  ;;  %1528 = vmatmul.f32.gmra.mxu3 %v6711_v43  ;;  %v1771_v17 = vunpack.c.2.s8 %v6731_v34  ;;  %v1838_v60 = vcvt.s32.f32 %v1774_v13  ;;  %v1836_v16 = vcvt.s32.f32 %v1772_v21  ;;  %v1766_v13 = vunpack.c.0.s8 %v6720_v45 }
 0x20f   : > { %v1100_v36 = vsub.f32 %v1083_v53, %v6497_v33  ;;  %v1016_v38 = vmul.f32 %v984_v57, %v930_v56  ;;  %v1032_v20 = vadd.f32 %v1000_v55, %v930_v56  ;;  %2098 = vmatpush.msra.mxu3 %v1842_v7  ;;  %v5858_v55 = vld [vmem:[#allocation10 + $0x68] sm:$0xff] }
 0x210   : > { %v738_v61 = vpop.f32.mrf.mxu0  ;;  %v1835_v28 = vcvt.s32.f32 %v1771_v17  ;;  %1969 = vmatpush.msra.mxu1 %v1836_v16  ;;  %v5860_v17 = vld [vmem:[#allocation10 + $0x78] sm:$0xff] }
 0x211   : > { %v1119_v26 = vmul.f32 %v6516_v23, %v1100_v36  ;;  %v1049_v1 = vsub.f32 %v1016_v38, %v1032_v20  ;;  %v803_v2 = vpop.f32.mrf.mxu1  ;;  %2099 = vmatpush.msra.mxu3 %v1838_v60  ;;  %v5859_v36 = vld [vmem:[#allocation10 + $0x70] sm:$0xff] }
 0x212   : > { %v953_v3 = vmul.f32 %v803_v2, %v738_v61  ;;  %v969_v4 = vadd.f32 %v803_v2, %v738_v61  ;;  %1904 = vmatpush.msra.mxu0 %v1835_v28  ;;  %v1767_v2 = vunpack.c.1.s8 %v6731_v34 }
 0x213   : > { %v6742_v8 = vadd.f32 %v1119_v26, %v6497_v33  ;;  %v1068_v9 = vmul.f32 %v6512_v11, %v1049_v1  ;;  %v1769_v26 = vunpack.c.1.s8 %v6717_v37  ;;  %v1770_v1 = vunpack.c.1.s8 %v6720_v45 }
 0x214   : > { %v868_v15 = vpop.f32.mrf.mxu2 }
 0x215   : > { %v1084_v22 = vadd.f32 %v1068_v9, %v1032_v20  ;;  %v985_v40 = vmul.f32 %v953_v3, %v868_v15  ;;  %v1001_v25 = vadd.f32 %v969_v4, %v868_v15  ;;  %1336 = vmatmul.f32.gmra.mxu0 %v6742_v8  ;;  %1401 = vmatmul.f32.gmra.mxu1 %v6742_v8  ;;  %v933_v33 = vpop.f32.mrf.mxu3  ;;  %v1768_v3 = vunpack.c.1.s8 %v6734_v35 }
 0x216   : > { %1466 = vmatmul.f32.gmra.mxu2 %v6742_v8  ;;  %1531 = vmatmul.f32.gmra.mxu3 %v6742_v8  ;;  %v1833_v5 = vcvt.s32.f32 %v1769_v26  ;;  %v1834_v6 = vcvt.s32.f32 %v1770_v1  ;;  %v1765_v9 = vunpack.c.0.s8 %v6717_v37  ;;  %v1763_v15 = vunpack.c.0.s8 %v6731_v34 }
 0x217   : > { %v1101_v44 = vsub.f32 %v1084_v22, %v6503_v41  ;;  %v1017_v29 = vmul.f32 %v985_v40, %v933_v33  ;;  %v1033_v48 = vadd.f32 %v1001_v25, %v933_v33  ;;  %v1832_v12 = vcvt.s32.f32 %v1768_v3 }
 0x218   : > { %v741_v59 = vpop.f32.mrf.mxu0  ;;  %2035 = vmatpush.msra.mxu2 %v1833_v5  ;;  %2100 = vmatpush.msra.mxu3 %v1834_v6  ;;  %v1829_v22 = vcvt.s32.f32 %v1765_v9  ;;  %v1764_v40 = vunpack.c.0.s8 %v6734_v35  ;;  %v1830_v37 = vcvt.s32.f32 %v1766_v13  ;;  %v1827_v25 = vcvt.s32.f32 %v1763_v15  ;;  %v6798_v6 = vld [vmem:[%s6279_s8 + $0x1f0] sm:$0xff]  ;;  %v6801_v9 = vld [vmem:[%s6279_s8 + $0x1f8] sm:$0xff] }
 0x219   : > { %v1120_v51 = vmul.f32 %v6516_v23, %v1101_v44  ;;  %v1050_v52 = vsub.f32 %v1017_v29, %v1033_v48  ;;  %v806_v18 = vpop.f32.mrf.mxu1  ;;  %1970 = vmatpush.msra.mxu1 %v1832_v12  ;;  %v2432_v13 = vunpack.c.3.s8 %v6798_v6  ;;  %v2433_v15 = vunpack.c.3.s8 %v6801_v9 }
 0x21a   : > { %v954_v53 = vmul.f32 %v806_v18, %v741_v59  ;;  %v970_v57 = vadd.f32 %v806_v18, %v741_v59  ;;  %2036 = vmatpush.msra.mxu2 %v1829_v22  ;;  %v1828_v60 = vcvt.s32.f32 %v1764_v40  ;;  %2101 = vmatpush.msra.mxu3 %v1830_v37 }
 0x21b   : > { %v6754_v56 = vadd.f32 %v5858_v55, %v1120_v51  ;;  %v1069_v30 = vmul.f32 %v6512_v11, %v1050_v52  ;;  %v2496_v37 = vcvt.s32.f32 %v2432_v13 }
 0x21c   : > { %v871_v58 = vpop.f32.mrf.mxu2  ;;  %1971 = vmatpush.msra.mxu1 %v1828_v60 }
 0x21d   : > { %v1085_v41 = vadd.f32 %v1069_v30, %v1033_v48  ;;  %v986_v63 = vmul.f32 %v954_v53, %v871_v58  ;;  %v1002_v31 = vadd.f32 %v970_v57, %v871_v58  ;;  %1339 = vmatmul.f32.gmra.mxu0 %v6754_v56  ;;  %1404 = vmatmul.f32.gmra.mxu1 %v6754_v56  ;;  %v936_v32 = vpop.f32.mrf.mxu3  ;;  %v6785_v53 = vld [vmem:[%s6285_s14 + $0x1] ss:$0 sm:$0xff] }
 0x21e   : > { %1469 = vmatmul.f32.gmra.mxu2 %v6754_v56  ;;  %1534 = vmatmul.f32.gmra.mxu3 %v6754_v56 }
 0x21f   : > { %v1102_v38 = vsub.f32 %v1085_v41, %v5859_v36  ;;  %v1018_v20 = vmul.f32 %v986_v63, %v936_v32  ;;  %v1034_v7 = vadd.f32 %v1002_v31, %v936_v32  ;;  %v6789_v32 = vld [vmem:[%s6287_s21 + $0x1] ss:$0 sm:$0xff]  ;;  %2628 = vmatpush.msrb.mxu2 %v2496_v37 }
 0x221   : > { %v1121_v61 = vmul.f32 %v6516_v23, %v1102_v38  ;;  %v1051_v62 = vsub.f32 %v1018_v20, %v1034_v7 }
 0x223   : > { %v6762_v0 = vadd.f32 %v5859_v36, %v1121_v61  ;;  %v1070_v50 = vmul.f32 %v6512_v11, %v1051_v62  ;;  %v1831_v11 = vcvt.s32.f32 %v1767_v2 }
 0x225   : > { %v1086_v4 = vadd.f32 %v1070_v50, %v1034_v7  ;;  %1342 = vmatmul.f32.gmra.mxu0 %v6762_v0  ;;  %1407 = vmatmul.f32.gmra.mxu1 %v6762_v0 }
 0x226   : > { %1472 = vmatmul.f32.gmra.mxu2 %v6762_v0  ;;  %1537 = vmatmul.f32.gmra.mxu3 %v6762_v0 }
 0x227   : > { %v1103_v21 = vsub.f32 %v1086_v4, %v5860_v17  ;;  %1905 = vmatpush.msra.mxu0 %v1831_v11 }
 0x229   : > { %v1122_v33 = vmul.f32 %v6516_v23, %v1103_v21  ;;  %1906 = vmatpush.msra.mxu0 %v1827_v25  ;;  %v2497_v25 = vcvt.s32.f32 %v2433_v15 }
 0x22b   : > { %v6778_v45 = vadd.f32 %v5860_v17, %v1122_v33  ;;  %2693 = vmatpush.msrb.mxu3 %v2497_v25 }
 0x22d   : > { %1345 = vmatmul.f32.gmra.mxu0 %v6778_v45  ;;  %1410 = vmatmul.f32.gmra.mxu1 %v6778_v45 }
 0x22e   : > { %1475 = vmatmul.f32.gmra.mxu2 %v6778_v45  ;;  %1540 = vmatmul.f32.gmra.mxu3 %v6778_v45 }
 0x232   : > { %v1301_v34 = vpop.f32.mrf.mxu0  ;;  %v1366_v35 = vpop.f32.mrf.mxu1 }
 0x233   : > { %v1544_v28 = vmul.f32 %v1366_v35, %v1301_v34  ;;  %v1560_v23 = vadd.f32 %v1366_v35, %v1301_v34 }
 0x239   : > { %v1431_v16 = vpop.f32.mrf.mxu2  ;;  %v1496_v44 = vpop.f32.mrf.mxu3 }
 0x23a   : > { %v1576_v29 = vmul.f32 %v1544_v28, %v1431_v16  ;;  %v1592_v48 = vadd.f32 %v1560_v23, %v1431_v16  ;;  %v1304_v59 = vpop.f32.mrf.mxu0  ;;  %v1369_v51 = vpop.f32.mrf.mxu1 }
 0x23b   : > { %v1545_v30 = vmul.f32 %v1369_v51, %v1304_v59  ;;  %v1561_v58 = vadd.f32 %v1369_v51, %v1304_v59  ;;  %v6819_v59 = vld [vmem:[%s6279_s8 + $0x1e8] sm:$0xff]  ;;  %v2428_v51 = vunpack.c.2.s8 %v6798_v6 }
 0x23c   : > { %v1608_v52 = vmul.f32 %v1576_v29, %v1496_v44  ;;  %v1624_v18 = vadd.f32 %v1592_v48, %v1496_v44  ;;  %v6816_v48 = vld [vmem:[%s6279_s8 + $0x1e0] sm:$0xff]  ;;  %v2427_v13 = vunpack.c.2.s8 %v6819_v59 }
 0x23e   : > { %v1642_v57 = vsub.f32 %v1608_v52, %v1624_v18  ;;  %v2429_v52 = vunpack.c.2.s8 %v6801_v9 }
 0x240   : > { %v1661_v55 = vmul.f32 %v6785_v53, %v1642_v57 }
 0x241   : > { %v1434_v41 = vpop.f32.mrf.mxu2  ;;  %v1499_v63 = vpop.f32.mrf.mxu3 }
 0x242   : > { %v1677_v31 = vadd.f32 %v1661_v55, %v1624_v18  ;;  %v1577_v36 = vmul.f32 %v1545_v30, %v1434_v41  ;;  %v1593_v38 = vadd.f32 %v1561_v58, %v1434_v41  ;;  %v1307_v20 = vpop.f32.mrf.mxu0  ;;  %v1372_v7 = vpop.f32.mrf.mxu1  ;;  %v2430_v55 = vunpack.c.3.s8 %v6816_v48 }
 0x243   : > { %v1546_v4 = vmul.f32 %v1372_v7, %v1307_v20  ;;  %v1562_v5 = vadd.f32 %v1372_v7, %v1307_v20  ;;  %v2431_v30 = vunpack.c.3.s8 %v6819_v59 }
 0x244   : > { %v1695_v61 = vsub.f32 %v1677_v31, %v6521_v39  ;;  %v1609_v62 = vmul.f32 %v1577_v36, %v1499_v63  ;;  %v1625_v50 = vadd.f32 %v1593_v38, %v1499_v63  ;;  %v2492_v36 = vcvt.s32.f32 %v2428_v51 }
 0x245   : > { %v2494_v38 = vcvt.s32.f32 %v2430_v55  ;;  %v2495_v20 = vcvt.s32.f32 %v2431_v30  ;;  %v2422_v30 = vunpack.c.1.s8 %v6816_v48 }
 0x246   : > { %v1714_v26 = vmul.f32 %v6789_v32, %v1695_v61  ;;  %v1643_v1 = vsub.f32 %v1609_v62, %v1625_v50  ;;  %2629 = vmatpush.msrb.mxu2 %v2492_v36 }
 0x247   : > { %2498 = vmatpush.msrb.mxu0 %v2494_v38  ;;  %2563 = vmatpush.msrb.mxu1 %v2495_v20 }
 0x248   : > { %v6794_v2 = vadd.f32 %v1714_v26, %v6521_v39  ;;  %v1662_v3 = vmul.f32 %v6785_v53, %v1643_v1 }
 0x249   : > { %v1437_v11 = vpop.f32.mrf.mxu2  ;;  %v1502_v12 = vpop.f32.mrf.mxu3 }
 0x24a   : > { %v1678_v17 = vadd.f32 %v1662_v3, %v1625_v50  ;;  %v1578_v21 = vmul.f32 %v1546_v4, %v1437_v11  ;;  %v1594_v22 = vadd.f32 %v1562_v5, %v1437_v11  ;;  %1907 = vmatmul.f32.vlgmr.msra.gmra.mxu0 %v6794_v2  ;;  %1972 = vmatmul.f32.vlgmr.msra.gmra.mxu1 %v6794_v2  ;;  %v1310_v39 = vpop.f32.mrf.mxu0  ;;  %v1375_v40 = vpop.f32.mrf.mxu1  ;;  %v2493_v50 = vcvt.s32.f32 %v2429_v52 }
 0x24b   : > { %2037 = vmatmul.f32.vlgmr.msra.gmra.mxu2 %v6794_v2  ;;  %2102 = vmatmul.f32.vlgmr.msra.gmra.mxu3 %v6794_v2  ;;  %v1547_v23 = vmul.f32 %v1375_v40, %v1310_v39  ;;  %v1563_v16 = vadd.f32 %v1375_v40, %v1310_v39 }
 0x24c   : > { %v1696_v33 = vsub.f32 %v1678_v17, %v6547_v10  ;;  %v1610_v60 = vmul.f32 %v1578_v21, %v1502_v12  ;;  %v1626_v34 = vadd.f32 %v1594_v22, %v1502_v12  ;;  %2694 = vmatpush.msrb.mxu3 %v2493_v50  ;;  %v2426_v12 = vunpack.c.2.s8 %v6816_v48 }
 0x24d   : > { %v2424_v21 = vunpack.c.1.s8 %v6798_v6  ;;  %v2425_v22 = vunpack.c.1.s8 %v6801_v9 }
 0x24e   : > { %v1715_v35 = vmul.f32 %v6789_v32, %v1696_v33  ;;  %v1644_v28 = vsub.f32 %v1610_v60, %v1626_v34  ;;  %v2490_v33 = vcvt.s32.f32 %v2426_v12  ;;  %v2491_v60 = vcvt.s32.f32 %v2427_v13 }
 0x250   : > { %v6812_v44 = vadd.f32 %v1715_v35, %v6547_v10  ;;  %v1663_v29 = vmul.f32 %v6785_v53, %v1644_v28  ;;  %2499 = vmatpush.msrb.mxu0 %v2490_v33  ;;  %2564 = vmatpush.msrb.mxu1 %v2491_v60 }
 0x251   : > { %v1440_v18 = vpop.f32.mrf.mxu2  ;;  %v1505_v57 = vpop.f32.mrf.mxu3 }
 0x252   : > { %v1679_v58 = vadd.f32 %v1663_v29, %v1626_v34  ;;  %v1579_v41 = vmul.f32 %v1547_v23, %v1440_v18  ;;  %v1595_v10 = vadd.f32 %v1563_v16, %v1440_v18  ;;  %1910 = vmatmul.f32.gmra.mxu0 %v6812_v44  ;;  %1975 = vmatmul.f32.gmra.mxu1 %v6812_v44  ;;  %v1313_v63 = vpop.f32.mrf.mxu0  ;;  %v1378_v31 = vpop.f32.mrf.mxu1  ;;  %v2488_v34 = vcvt.s32.f32 %v2424_v21 }
 0x253   : > { %2040 = vmatmul.f32.gmra.mxu2 %v6812_v44  ;;  %2105 = vmatmul.f32.gmra.mxu3 %v6812_v44  ;;  %v1548_v3 = vmul.f32 %v1378_v31, %v1313_v63  ;;  %v1564_v4 = vadd.f32 %v1378_v31, %v1313_v63  ;;  %v2489_v16 = vcvt.s32.f32 %v2425_v22  ;;  %v2420_v63 = vunpack.c.0.s8 %v6798_v6  ;;  %v6866_v22 = vld [vmem:[%s6279_s8 + $0x1d0] sm:$0xff] }
 0x254   : > { %v1697_v7 = vsub.f32 %v1679_v58, %v6561_v47  ;;  %v1611_v61 = vmul.f32 %v1579_v41, %v1505_v57  ;;  %v1627_v62 = vadd.f32 %v1595_v10, %v1505_v57  ;;  %2630 = vmatpush.msrb.mxu2 %v2488_v34  ;;  %v2423_v58 = vunpack.c.1.s8 %v6819_v59 }
 0x255   : > { %2695 = vmatpush.msrb.mxu3 %v2489_v16  ;;  %v2421_v31 = vunpack.c.0.s8 %v6801_v9  ;;  %v2484_v50 = vcvt.s32.f32 %v2420_v63  ;;  %v2419_v21 = vunpack.c.0.s8 %v6819_v59  ;;  %v6887_v63 = vld [vmem:[%s6279_s8 + $0x1c8] sm:$0xff] }
 0x256   : > { %v1716_v26 = vmul.f32 %v6789_v32, %v1697_v7  ;;  %v1645_v1 = vsub.f32 %v1611_v61, %v1627_v62  ;;  %v2486_v61 = vcvt.s32.f32 %v2422_v30 }
 0x257   : > { %2631 = vmatpush.msrb.mxu2 %v2484_v50 }
 0x258   : > { %v6832_v5 = vadd.f32 %v1716_v26, %v6561_v47  ;;  %v1664_v11 = vmul.f32 %v6785_v53, %v1645_v1  ;;  %2500 = vmatpush.msrb.mxu0 %v2486_v61  ;;  %v2485_v1 = vcvt.s32.f32 %v2421_v31  ;;  %v2412_v31 = vunpack.c.2.s8 %v6866_v22 }
 0x259   : > { %v1443_v15 = vpop.f32.mrf.mxu2  ;;  %v1508_v17 = vpop.f32.mrf.mxu3 }
 0x25a   : > { %v1680_v39 = vadd.f32 %v1664_v11, %v1627_v62  ;;  %v1580_v40 = vmul.f32 %v1548_v3, %v1443_v15  ;;  %v1596_v37 = vadd.f32 %v1564_v4, %v1443_v15  ;;  %1913 = vmatmul.f32.gmra.mxu0 %v6832_v5  ;;  %1978 = vmatmul.f32.gmra.mxu1 %v6832_v5  ;;  %v1316_v47 = vpop.f32.mrf.mxu0  ;;  %v1381_v25 = vpop.f32.mrf.mxu1  ;;  %v2487_v62 = vcvt.s32.f32 %v2423_v58 }
 0x25b   : > { %2043 = vmatmul.f32.gmra.mxu2 %v6832_v5  ;;  %2108 = vmatmul.f32.gmra.mxu3 %v6832_v5  ;;  %v1549_v52 = vmul.f32 %v1381_v25, %v1316_v47  ;;  %v1565_v18 = vadd.f32 %v1381_v25, %v1316_v47  ;;  %v2416_v47 = vunpack.c.3.s8 %v6866_v22 }
 0x25c   : > { %v1698_v35 = vsub.f32 %v1680_v39, %v6575_v14  ;;  %v1612_v28 = vmul.f32 %v1580_v40, %v1508_v17  ;;  %v1628_v23 = vadd.f32 %v1596_v37, %v1508_v17  ;;  %2565 = vmatpush.msrb.mxu1 %v2487_v62  ;;  %2696 = vmatpush.msrb.mxu3 %v2485_v1  ;;  %v2418_v17 = vunpack.c.0.s8 %v6816_v48  ;;  %v6869_v39 = vld [vmem:[%s6279_s8 + $0x1d8] sm:$0xff] }
 0x25d   : > { %v2417_v25 = vunpack.c.3.s8 %v6869_v39 }
 0x25e   : > { %v1717_v29 = vmul.f32 %v6789_v32, %v1698_v35  ;;  %v1646_v51 = vsub.f32 %v1612_v28, %v1628_v23  ;;  %v2482_v59 = vcvt.s32.f32 %v2418_v17  ;;  %v2483_v35 = vcvt.s32.f32 %v2419_v21 }
 0x25f   : > { %v2480_v28 = vcvt.s32.f32 %v2416_v47 }
 0x260   : > { %v6846_v57 = vadd.f32 %v1717_v29, %v6575_v14  ;;  %v1665_v55 = vmul.f32 %v6785_v53, %v1646_v51  ;;  %2501 = vmatpush.msrb.mxu0 %v2482_v59  ;;  %v2481_v51 = vcvt.s32.f32 %v2417_v25  ;;  %2566 = vmatpush.msrb.mxu1 %v2483_v35 }
 0x261   : > { %v1446_v41 = vpop.f32.mrf.mxu2  ;;  %v1511_v10 = vpop.f32.mrf.mxu3  ;;  %2632 = vmatpush.msrb.mxu2 %v2480_v28 }
 0x262   : > { %v1681_v36 = vadd.f32 %v1665_v55, %v1628_v23  ;;  %v1581_v38 = vmul.f32 %v1549_v52, %v1446_v41  ;;  %v1597_v20 = vadd.f32 %v1565_v18, %v1446_v41  ;;  %1916 = vmatmul.f32.gmra.mxu0 %v6846_v57  ;;  %1981 = vmatmul.f32.gmra.mxu1 %v6846_v57  ;;  %v1319_v14 = vpop.f32.mrf.mxu0  ;;  %v1384_v7 = vpop.f32.mrf.mxu1 }
 0x263   : > { %2046 = vmatmul.f32.gmra.mxu2 %v6846_v57  ;;  %2111 = vmatmul.f32.gmra.mxu3 %v6846_v57  ;;  %v1550_v11 = vmul.f32 %v1384_v7, %v1319_v14  ;;  %v1566_v12 = vadd.f32 %v1384_v7, %v1319_v14  ;;  %v2415_v7 = vunpack.c.3.s8 %v6887_v63 }
 0x264   : > { %v1699_v6 = vsub.f32 %v1681_v36, %v6589_v42  ;;  %v1613_v9 = vmul.f32 %v1581_v38, %v1511_v10  ;;  %v1629_v26 = vadd.f32 %v1597_v20, %v1511_v10  ;;  %2697 = vmatpush.msrb.mxu3 %v2481_v51  ;;  %v6884_v10 = vld [vmem:[%s6279_s8 + $0x1c0] sm:$0xff]  ;;  %v2413_v36 = vunpack.c.2.s8 %v6869_v39 }
 0x265   : > { %v2414_v14 = vunpack.c.3.s8 %v6884_v10  ;;  %v2479_v1 = vcvt.s32.f32 %v2415_v7  ;;  %v2410_v25 = vunpack.c.2.s8 %v6884_v10  ;;  %v2406_v7 = vunpack.c.1.s8 %v6884_v10 }
 0x266   : > { %v1718_v3 = vmul.f32 %v6789_v32, %v1699_v6  ;;  %v1647_v4 = vsub.f32 %v1613_v9, %v1629_v26  ;;  %v2476_v9 = vcvt.s32.f32 %v2412_v31 }
 0x267   : > { %2567 = vmatpush.msrb.mxu1 %v2479_v1 }
 0x268   : > { %v6860_v13 = vadd.f32 %v1718_v3, %v6589_v42  ;;  %v1666_v15 = vmul.f32 %v6785_v53, %v1647_v4  ;;  %2633 = vmatpush.msrb.mxu2 %v2476_v9 }
 0x269   : > { %v1449_v40 = vpop.f32.mrf.mxu2  ;;  %v1514_v37 = vpop.f32.mrf.mxu3 }
 0x26a   : > { %v1682_v33 = vadd.f32 %v1666_v15, %v1629_v26  ;;  %v1582_v60 = vmul.f32 %v1550_v11, %v1449_v40  ;;  %v1598_v42 = vadd.f32 %v1566_v12, %v1449_v40  ;;  %1919 = vmatmul.f32.gmra.mxu0 %v6860_v13  ;;  %1984 = vmatmul.f32.gmra.mxu1 %v6860_v13  ;;  %v1322_v48 = vpop.f32.mrf.mxu0  ;;  %v1387_v34 = vpop.f32.mrf.mxu1  ;;  %v2478_v26 = vcvt.s32.f32 %v2414_v14 }
 0x26b   : > { %2049 = vmatmul.f32.gmra.mxu2 %v6860_v13  ;;  %2114 = vmatmul.f32.gmra.mxu3 %v6860_v13  ;;  %v1551_v55 = vmul.f32 %v1387_v34, %v1322_v48  ;;  %v1567_v30 = vadd.f32 %v1387_v34, %v1322_v48  ;;  %v2477_v12 = vcvt.s32.f32 %v2413_v36  ;;  %v2408_v48 = vunpack.c.1.s8 %v6866_v22 }
 0x26c   : > { %v1700_v23 = vsub.f32 %v1682_v33, %v6615_v19  ;;  %v1614_v16 = vmul.f32 %v1582_v60, %v1514_v37  ;;  %v1630_v29 = vadd.f32 %v1598_v42, %v1514_v37  ;;  %2502 = vmatpush.msrb.mxu0 %v2478_v26  ;;  %v2411_v33 = vunpack.c.2.s8 %v6887_v63 }
 0x26d   : > { %2698 = vmatpush.msrb.mxu3 %v2477_v12  ;;  %v2409_v34 = vunpack.c.1.s8 %v6869_v39  ;;  %v2472_v51 = vcvt.s32.f32 %v2408_v48  ;;  %v2403_v48 = vunpack.c.0.s8 %v6887_v63 }
 0x26e   : > { %v1719_v52 = vmul.f32 %v6789_v32, %v1700_v23  ;;  %v1648_v18 = vsub.f32 %v1614_v16, %v1630_v29  ;;  %v2474_v16 = vcvt.s32.f32 %v2410_v25 }
 0x26f   : > { %2634 = vmatpush.msrb.mxu2 %v2472_v51 }
 0x270   : > { %v6880_v58 = vadd.f32 %v1719_v52, %v6615_v19  ;;  %v1667_v41 = vmul.f32 %v6785_v53, %v1648_v18  ;;  %2503 = vmatpush.msrb.mxu0 %v2474_v16 }
 0x271   : > { %v1452_v38 = vpop.f32.mrf.mxu2  ;;  %v1517_v20 = vpop.f32.mrf.mxu3 }
 0x272   : > { %v1683_v61 = vadd.f32 %v1667_v41, %v1630_v29  ;;  %v1583_v62 = vmul.f32 %v1551_v55, %v1452_v38  ;;  %v1599_v19 = vadd.f32 %v1567_v30, %v1452_v38  ;;  %1922 = vmatmul.f32.gmra.mxu0 %v6880_v58  ;;  %1987 = vmatmul.f32.gmra.mxu1 %v6880_v58  ;;  %v1325_v50 = vpop.f32.mrf.mxu0  ;;  %v1390_v6 = vpop.f32.mrf.mxu1  ;;  %v2475_v29 = vcvt.s32.f32 %v2411_v33 }
 0x273   : > { %2052 = vmatmul.f32.gmra.mxu2 %v6880_v58  ;;  %2117 = vmatmul.f32.gmra.mxu3 %v6880_v58  ;;  %v1552_v21 = vmul.f32 %v1390_v6, %v1325_v50  ;;  %v1568_v40 = vadd.f32 %v1390_v6, %v1325_v50  ;;  %v2473_v30 = vcvt.s32.f32 %v2409_v34  ;;  %v2404_v50 = vunpack.c.0.s8 %v6866_v22  ;;  %v6934_v34 = vld [vmem:[%s6279_s8 + $0x1b0] sm:$0xff] }
 0x274   : > { %v1701_v3 = vsub.f32 %v1683_v61, %v6629_v54  ;;  %v1615_v4 = vmul.f32 %v1583_v62, %v1517_v20  ;;  %v1631_v11 = vadd.f32 %v1599_v19, %v1517_v20  ;;  %2568 = vmatpush.msrb.mxu1 %v2475_v29  ;;  %v2407_v61 = vunpack.c.1.s8 %v6887_v63 }
 0x275   : > { %2699 = vmatpush.msrb.mxu3 %v2473_v30  ;;  %v2405_v6 = vunpack.c.0.s8 %v6869_v39  ;;  %v2468_v12 = vcvt.s32.f32 %v2404_v50  ;;  %v6955_v50 = vld [vmem:[%s6279_s8 + $0x1a8] sm:$0xff] }
 0x276   : > { %v1720_v15 = vmul.f32 %v6789_v32, %v1701_v3  ;;  %v1649_v17 = vsub.f32 %v1615_v4, %v1631_v11  ;;  %v2470_v4 = vcvt.s32.f32 %v2406_v7 }
 0x277   : > { %2635 = vmatpush.msrb.mxu2 %v2468_v12 }
 0x278   : > { %v6900_v37 = vadd.f32 %v1720_v15, %v6629_v54  ;;  %v1668_v47 = vmul.f32 %v6785_v53, %v1649_v17  ;;  %2504 = vmatpush.msrb.mxu0 %v2470_v4  ;;  %v2469_v17 = vcvt.s32.f32 %v2405_v6  ;;  %v2396_v6 = vunpack.c.2.s8 %v6934_v34 }
 0x279   : > { %v1455_v60 = vpop.f32.mrf.mxu2  ;;  %v1520_v42 = vpop.f32.mrf.mxu3 }
 0x27a   : > { %v1684_v59 = vadd.f32 %v1668_v47, %v1631_v11  ;;  %v1584_v35 = vmul.f32 %v1552_v21, %v1455_v60  ;;  %v1600_v28 = vadd.f32 %v1568_v40, %v1455_v60  ;;  %1925 = vmatmul.f32.gmra.mxu0 %v6900_v37  ;;  %1990 = vmatmul.f32.gmra.mxu1 %v6900_v37  ;;  %v1328_v54 = vpop.f32.mrf.mxu0  ;;  %v1393_v23 = vpop.f32.mrf.mxu1  ;;  %v2471_v11 = vcvt.s32.f32 %v2407_v61 }
 0x27b   : > { %2055 = vmatmul.f32.gmra.mxu2 %v6900_v37  ;;  %2120 = vmatmul.f32.gmra.mxu3 %v6900_v37  ;;  %v1553_v36 = vmul.f32 %v1393_v23, %v1328_v54  ;;  %v1569_v38 = vadd.f32 %v1393_v23, %v1328_v54  ;;  %v2400_v54 = vunpack.c.3.s8 %v6934_v34 }
 0x27c   : > { %v1702_v52 = vsub.f32 %v1684_v59, %v6643_v24  ;;  %v1616_v18 = vmul.f32 %v1584_v35, %v1520_v42  ;;  %v1632_v55 = vadd.f32 %v1600_v28, %v1520_v42  ;;  %2569 = vmatpush.msrb.mxu1 %v2471_v11  ;;  %2700 = vmatpush.msrb.mxu3 %v2469_v17  ;;  %v2402_v42 = vunpack.c.0.s8 %v6884_v10  ;;  %v6937_v59 = vld [vmem:[%s6279_s8 + $0x1b8] sm:$0xff] }
 0x27d   : > { %v2401_v23 = vunpack.c.3.s8 %v6937_v59 }
 0x27e   : > { %v1721_v41 = vmul.f32 %v6789_v32, %v1702_v52  ;;  %v1650_v31 = vsub.f32 %v1616_v18, %v1632_v55  ;;  %v2466_v63 = vcvt.s32.f32 %v2402_v42  ;;  %v2467_v52 = vcvt.s32.f32 %v2403_v48 }
 0x27f   : > { %v2464_v18 = vcvt.s32.f32 %v2400_v54 }
 0x280   : > { %v6914_v20 = vadd.f32 %v1721_v41, %v6643_v24  ;;  %v1669_v14 = vmul.f32 %v6785_v53, %v1650_v31  ;;  %2505 = vmatpush.msrb.mxu0 %v2466_v63  ;;  %v2465_v31 = vcvt.s32.f32 %v2401_v23  ;;  %2570 = vmatpush.msrb.mxu1 %v2467_v52 }
 0x281   : > { %v1458_v62 = vpop.f32.mrf.mxu2  ;;  %v1523_v19 = vpop.f32.mrf.mxu3  ;;  %2636 = vmatpush.msrb.mxu2 %v2464_v18 }
 0x282   : > { %v1685_v9 = vadd.f32 %v1669_v14, %v1632_v55  ;;  %v1585_v26 = vmul.f32 %v1553_v36, %v1458_v62  ;;  %v1601_v1 = vadd.f32 %v1569_v38, %v1458_v62  ;;  %1928 = vmatmul.f32.gmra.mxu0 %v6914_v20  ;;  %1993 = vmatmul.f32.gmra.mxu1 %v6914_v20  ;;  %v1331_v24 = vpop.f32.mrf.mxu0  ;;  %v1396_v3 = vpop.f32.mrf.mxu1 }
 0x283   : > { %2058 = vmatmul.f32.gmra.mxu2 %v6914_v20  ;;  %2123 = vmatmul.f32.gmra.mxu3 %v6914_v20  ;;  %v1554_v47 = vmul.f32 %v1396_v3, %v1331_v24  ;;  %v1570_v25 = vadd.f32 %v1396_v3, %v1331_v24  ;;  %v2399_v3 = vunpack.c.3.s8 %v6955_v50 }
 0x284   : > { %v1703_v22 = vsub.f32 %v1685_v9, %v6657_v46  ;;  %v1617_v39 = vmul.f32 %v1585_v26, %v1523_v19  ;;  %v1633_v15 = vadd.f32 %v1601_v1, %v1523_v19  ;;  %2701 = vmatpush.msrb.mxu3 %v2465_v31  ;;  %v6952_v19 = vld [vmem:[%s6279_s8 + $0x1a0] sm:$0xff]  ;;  %v2397_v9 = vunpack.c.2.s8 %v6937_v59 }
 0x285   : > { %v2398_v24 = vunpack.c.3.s8 %v6952_v19  ;;  %v2463_v17 = vcvt.s32.f32 %v2399_v3  ;;  %v2394_v23 = vunpack.c.2.s8 %v6952_v19  ;;  %v2390_v3 = vunpack.c.1.s8 %v6952_v19 }
 0x286   : > { %v1722_v21 = vmul.f32 %v6789_v32, %v1703_v22  ;;  %v1651_v40 = vsub.f32 %v1617_v39, %v1633_v15  ;;  %v2460_v39 = vcvt.s32.f32 %v2396_v6 }
 0x287   : > { %2571 = vmatpush.msrb.mxu1 %v2463_v17 }
 0x288   : > { %v6928_v33 = vadd.f32 %v1722_v21, %v6657_v46  ;;  %v1670_v60 = vmul.f32 %v6785_v53, %v1651_v40  ;;  %2637 = vmatpush.msrb.mxu2 %v2460_v39  ;;  %v2386_v39 = vunpack.c.0.s8 %v6952_v19 }
 0x289   : > { %v1461_v35 = vpop.f32.mrf.mxu2  ;;  %v1526_v28 = vpop.f32.mrf.mxu3 }
 0x28a   : > { %v1686_v16 = vadd.f32 %v1670_v60, %v1633_v15  ;;  %v1586_v29 = vmul.f32 %v1554_v47, %v1461_v35  ;;  %v1602_v46 = vadd.f32 %v1570_v25, %v1461_v35  ;;  %1931 = vmatmul.f32.gmra.mxu0 %v6928_v33  ;;  %1996 = vmatmul.f32.gmra.mxu1 %v6928_v33  ;;  %v1334_v10 = vpop.f32.mrf.mxu0  ;;  %v1399_v51 = vpop.f32.mrf.mxu1  ;;  %v2462_v15 = vcvt.s32.f32 %v2398_v24 }
 0x28b   : > { %2061 = vmatmul.f32.gmra.mxu2 %v6928_v33  ;;  %2126 = vmatmul.f32.gmra.mxu3 %v6928_v33  ;;  %v1555_v14 = vmul.f32 %v1399_v51, %v1334_v10  ;;  %v1571_v7 = vadd.f32 %v1399_v51, %v1334_v10  ;;  %v2461_v25 = vcvt.s32.f32 %v2397_v9  ;;  %v2392_v10 = vunpack.c.1.s8 %v6934_v34 }
 0x28c   : > { %v1704_v55 = vsub.f32 %v1686_v16, %v6683_v27  ;;  %v1618_v30 = vmul.f32 %v1586_v29, %v1526_v28  ;;  %v1634_v41 = vadd.f32 %v1602_v46, %v1526_v28  ;;  %2506 = vmatpush.msrb.mxu0 %v2462_v15  ;;  %v2395_v16 = vunpack.c.2.s8 %v6955_v50 }
 0x28d   : > { %2702 = vmatpush.msrb.mxu3 %v2461_v25  ;;  %v2393_v51 = vunpack.c.1.s8 %v6937_v59  ;;  %v2456_v31 = vcvt.s32.f32 %v2392_v10  ;;  %v2387_v15 = vunpack.c.0.s8 %v6955_v50  ;;  %v2454_v25 = vcvt.s32.f32 %v2390_v3 }
 0x28e   : > { %v1723_v36 = vmul.f32 %v6789_v32, %v1704_v55  ;;  %v1652_v38 = vsub.f32 %v1618_v30, %v1634_v41  ;;  %v2458_v30 = vcvt.s32.f32 %v2394_v23 }
 0x28f   : > { %2638 = vmatpush.msrb.mxu2 %v2456_v31 }
 0x290   : > { %v6948_v61 = vadd.f32 %v1723_v36, %v6683_v27  ;;  %v1671_v62 = vmul.f32 %v6785_v53, %v1652_v38  ;;  %2507 = vmatpush.msrb.mxu0 %v2458_v30 }
 0x291   : > { %v1464_v26 = vpop.f32.mrf.mxu2  ;;  %v1529_v1 = vpop.f32.mrf.mxu3 }
 0x292   : > { %v1687_v4 = vadd.f32 %v1671_v62, %v1634_v41  ;;  %v1587_v11 = vmul.f32 %v1555_v14, %v1464_v26  ;;  %v1603_v27 = vadd.f32 %v1571_v7, %v1464_v26  ;;  %1934 = vmatmul.f32.gmra.mxu0 %v6948_v61  ;;  %1999 = vmatmul.f32.gmra.mxu1 %v6948_v61  ;;  %v1337_v12 = vpop.f32.mrf.mxu0  ;;  %v1402_v22 = vpop.f32.mrf.mxu1  ;;  %v2459_v41 = vcvt.s32.f32 %v2395_v16 }
 0x293   : > { %2064 = vmatmul.f32.gmra.mxu2 %v6948_v61  ;;  %2129 = vmatmul.f32.gmra.mxu3 %v6948_v61  ;;  %v1556_v48 = vmul.f32 %v1402_v22, %v1337_v12  ;;  %v1572_v35 = vadd.f32 %v1402_v22, %v1337_v12  ;;  %v2457_v7 = vcvt.s32.f32 %v2393_v51  ;;  %v2388_v12 = vunpack.c.0.s8 %v6934_v34  ;;  %v6997_v34 = vld [vmem:[%s6279_s8 + $0x198] sm:$0xff] }
 0x294   : > { %v1705_v21 = vsub.f32 %v1687_v4, %v6697_v49  ;;  %v1619_v40 = vmul.f32 %v1587_v11, %v1529_v1  ;;  %v1635_v47 = vadd.f32 %v1603_v27, %v1529_v1  ;;  %2572 = vmatpush.msrb.mxu1 %v2459_v41  ;;  %v2391_v4 = vunpack.c.1.s8 %v6955_v50  ;;  %2508 = vmatpush.msrb.mxu0 %v2454_v25 }
 0x295   : > { %2703 = vmatpush.msrb.mxu3 %v2457_v7  ;;  %v2389_v22 = vunpack.c.0.s8 %v6937_v59  ;;  %v2452_v50 = vcvt.s32.f32 %v2388_v12  ;;  %v2385_v51 = vunpack.c.3.s8 %v6997_v34 }
 0x296   : > { %v1724_v60 = vmul.f32 %v6789_v32, %v1705_v21  ;;  %v1653_v42 = vsub.f32 %v1619_v40, %v1635_v47  ;;  %v2455_v19 = vcvt.s32.f32 %v2391_v4 }
 0x297   : > { %v2453_v16 = vcvt.s32.f32 %v2389_v22  ;;  %2639 = vmatpush.msrb.mxu2 %v2452_v50  ;;  %v2449_v41 = vcvt.s32.f32 %v2385_v51 }
 0x298   : > { %v6968_v28 = vadd.f32 %v1724_v60, %v6697_v49  ;;  %v1672_v54 = vmul.f32 %v6785_v53, %v1653_v42  ;;  %v6994_v60 = vld [vmem:[%s6279_s8 + $0x190] sm:$0xff]  ;;  %v7002_v42 = vld [vmem:[%s6279_s8 + $0x180] sm:$0xff]  ;;  %2573 = vmatpush.msrb.mxu1 %v2455_v19 }
 0x299   : > { %v1467_v29 = vpop.f32.mrf.mxu2  ;;  %v1532_v46 = vpop.f32.mrf.mxu3  ;;  %v2384_v10 = vunpack.c.3.s8 %v6994_v60  ;;  %2704 = vmatpush.msrb.mxu3 %v2453_v16  ;;  %v2380_v31 = vunpack.c.2.s8 %v6994_v60 }
 0x29a   : > { %v1688_v63 = vadd.f32 %v1672_v54, %v1635_v47  ;;  %v1588_v52 = vmul.f32 %v1556_v48, %v1467_v29  ;;  %v1604_v18 = vadd.f32 %v1572_v35, %v1467_v29  ;;  %1937 = vmatmul.f32.gmra.mxu0 %v6968_v28  ;;  %2002 = vmatmul.f32.gmra.mxu1 %v6968_v28  ;;  %v1340_v49 = vpop.f32.mrf.mxu0  ;;  %v1405_v55 = vpop.f32.mrf.mxu1  ;;  %v7005_v48 = vld [vmem:[%s6279_s8 + $0x188] sm:$0xff]  ;;  %v2450_v29 = vcvt.s32.f32 %v2386_v39 }
 0x29b   : > { %2067 = vmatmul.f32.gmra.mxu2 %v6968_v28  ;;  %2132 = vmatmul.f32.gmra.mxu3 %v6968_v28  ;;  %v1557_v9 = vmul.f32 %v1405_v55, %v1340_v49  ;;  %v1573_v26 = vadd.f32 %v1405_v55, %v1340_v49  ;;  %v2383_v49 = vunpack.c.3.s8 %v7005_v48  ;;  %v2448_v30 = vcvt.s32.f32 %v2384_v10 }
 0x29c   : > { %v1706_v36 = vsub.f32 %v1688_v63, %v6711_v43  ;;  %v1620_v38 = vmul.f32 %v1588_v52, %v1532_v46  ;;  %v1636_v14 = vadd.f32 %v1604_v18, %v1532_v46  ;;  %v2451_v46 = vcvt.s32.f32 %v2387_v15  ;;  %2509 = vmatpush.msrb.mxu0 %v2450_v29  ;;  %2705 = vmatpush.msrb.mxu3 %v2449_v41 }
 0x29d   : > { %v2382_v18 = vunpack.c.3.s8 %v7002_v42  ;;  %v2447_v7 = vcvt.s32.f32 %v2383_v49  ;;  %2640 = vmatpush.msrb.mxu2 %v2448_v30  ;;  %v2379_v3 = vunpack.c.2.s8 %v7005_v48  ;;  %v2376_v49 = vunpack.c.1.s8 %v6994_v60 }
 0x29e   : > { %v1725_v62 = vmul.f32 %v6789_v32, %v1706_v36  ;;  %v1654_v6 = vsub.f32 %v1620_v38, %v1636_v14  ;;  %2574 = vmatpush.msrb.mxu1 %v2451_v46  ;;  %v2374_v30 = vunpack.c.1.s8 %v7002_v42  ;;  %v2375_v41 = vunpack.c.1.s8 %v7005_v48 }
 0x2a0   : > { %v6982_v1 = vadd.f32 %v1725_v62, %v6711_v43  ;;  %v1673_v24 = vmul.f32 %v6785_v53, %v1654_v6  ;;  %2575 = vmatpush.msrb.mxu1 %v2447_v7  ;;  %v2439_v7 = vcvt.s32.f32 %v2375_v41 }
 0x2a1   : > { %v1470_v11 = vpop.f32.mrf.mxu2  ;;  %v1535_v27 = vpop.f32.mrf.mxu3 }
 0x2a2   : > { %v1689_v43 = vadd.f32 %v1673_v24, %v1636_v14  ;;  %v1589_v17 = vmul.f32 %v1557_v9, %v1470_v11  ;;  %v1605_v21 = vadd.f32 %v1573_v26, %v1470_v11  ;;  %1940 = vmatmul.f32.gmra.mxu0 %v6982_v1  ;;  %2005 = vmatmul.f32.gmra.mxu1 %v6982_v1  ;;  %v1343_v40 = vpop.f32.mrf.mxu0  ;;  %v1408_v47 = vpop.f32.mrf.mxu1  ;;  %v2446_v14 = vcvt.s32.f32 %v2382_v18 }
 0x2a3   : > { %2070 = vmatmul.f32.gmra.mxu2 %v6982_v1  ;;  %2135 = vmatmul.f32.gmra.mxu3 %v6982_v1  ;;  %v1558_v59 = vmul.f32 %v1408_v47, %v1343_v40  ;;  %v1574_v55 = vadd.f32 %v1408_v47, %v1343_v40  ;;  %v2444_v9 = vcvt.s32.f32 %v2380_v31  ;;  %v2381_v26 = vunpack.c.2.s8 %v6997_v34 }
 0x2a4   : > { %v1707_v35 = vsub.f32 %v1689_v43, %v6742_v8  ;;  %v1621_v54 = vmul.f32 %v1589_v17, %v1535_v27  ;;  %v1637_v23 = vadd.f32 %v1605_v21, %v1535_v27  ;;  %v2378_v24 = vunpack.c.2.s8 %v7002_v42  ;;  %2510 = vmatpush.msrb.mxu0 %v2446_v14 }
 0x2a5   : > { %v2443_v43 = vcvt.s32.f32 %v2379_v3  ;;  %2641 = vmatpush.msrb.mxu2 %v2444_v9 }
 0x2a6   : > { %v1726_v63 = vmul.f32 %v6789_v32, %v1707_v35  ;;  %v1655_v52 = vsub.f32 %v1621_v54, %v1637_v23  ;;  %v2442_v12 = vcvt.s32.f32 %v2378_v24  ;;  %v2371_v24 = vunpack.c.0.s8 %v7005_v48 }
 0x2a7   : > { %2576 = vmatpush.msrb.mxu1 %v2443_v43 }
 0x2a8   : > { %v7015_v36 = vadd.f32 %v1726_v63, %v6742_v8  ;;  %v1674_v38 = vmul.f32 %v6785_v53, %v1655_v52  ;;  %v2445_v8 = vcvt.s32.f32 %v2381_v26  ;;  %2511 = vmatpush.msrb.mxu0 %v2442_v12 }
 0x2a9   : > { %v1473_v62 = vpop.f32.mrf.mxu2  ;;  %v1538_v6 = vpop.f32.mrf.mxu3  ;;  %2577 = vmatpush.msrb.mxu1 %v2439_v7 }
 0x2aa   : > { %v1690_v4 = vadd.f32 %v1674_v38, %v1637_v23  ;;  %v1590_v11 = vmul.f32 %v1558_v59, %v1473_v62  ;;  %v1606_v27 = vadd.f32 %v1574_v55, %v1473_v62  ;;  %1943 = vmatmul.f32.gmra.mxu0 %v7015_v36  ;;  %2008 = vmatmul.f32.gmra.mxu1 %v7015_v36  ;;  %v1346_v17 = vpop.f32.mrf.mxu0  ;;  %v1411_v21 = vpop.f32.mrf.mxu1  ;;  %v2377_v55 = vunpack.c.1.s8 %v6997_v34 }
 0x2ab   : > { %2073 = vmatmul.f32.gmra.mxu2 %v7015_v36  ;;  %2138 = vmatmul.f32.gmra.mxu3 %v7015_v36  ;;  %v1559_v19 = vmul.f32 %v1411_v21, %v1346_v17  ;;  %v1575_v50 = vadd.f32 %v1411_v21, %v1346_v17  ;;  %v2440_v38 = vcvt.s32.f32 %v2376_v49  ;;  %v2373_v62 = vunpack.c.0.s8 %v6997_v34  ;;  %v7063_v21 = vld [vmem:[%s6285_s14 + $0x2] ss:$0 sm:$0xff] }
 0x2ac   : > { %v1708_v22 = vsub.f32 %v1690_v4, %v6754_v56  ;;  %v1622_v39 = vmul.f32 %v1590_v11, %v1538_v6  ;;  %v1638_v15 = vadd.f32 %v1606_v27, %v1538_v6  ;;  %2706 = vmatpush.msrb.mxu3 %v2445_v8  ;;  %v2441_v14 = vcvt.s32.f32 %v2377_v55 }
 0x2ad   : > { %v2370_v6 = vunpack.c.0.s8 %v7002_v42  ;;  %2642 = vmatpush.msrb.mxu2 %v2440_v38  ;;  %v2435_v11 = vcvt.s32.f32 %v2371_v24  ;;  %v7076_v38 = vld [vmem:[%s6279_s8 + $0x270] sm:$0xff] }
 0x2ae   : > { %v1727_v40 = vmul.f32 %v6789_v32, %v1708_v22  ;;  %v1656_v47 = vsub.f32 %v1622_v39, %v1638_v15  ;;  %2707 = vmatpush.msrb.mxu3 %v2441_v14  ;;  %v7079_v14 = vld [vmem:[%s6279_s8 + $0x278] sm:$0xff]  ;;  %v3039_v7 = vunpack.c.3.s8 %v7076_v38 }
 0x2af   : > { %v2434_v3 = vcvt.s32.f32 %v2370_v6  ;;  %2578 = vmatpush.msrb.mxu1 %v2435_v11 }
 0x2b0   : > { %v7028_v25 = vadd.f32 %v1727_v40, %v6754_v56  ;;  %v1675_v59 = vmul.f32 %v6785_v53, %v1656_v47 }
 0x2b1   : > { %v1476_v35 = vpop.f32.mrf.mxu2  ;;  %v1541_v29 = vpop.f32.mrf.mxu3 }
 0x2b2   : > { %v1691_v54 = vadd.f32 %v1675_v59, %v1638_v15  ;;  %v1591_v23 = vmul.f32 %v1559_v19, %v1476_v35  ;;  %v1607_v16 = vadd.f32 %v1575_v50, %v1476_v35  ;;  %1946 = vmatmul.f32.gmra.mxu0 %v7028_v25  ;;  %2011 = vmatmul.f32.gmra.mxu1 %v7028_v25 }
 0x2b3   : > { %2076 = vmatmul.f32.gmra.mxu2 %v7028_v25  ;;  %2141 = vmatmul.f32.gmra.mxu3 %v7028_v25 }
 0x2b4   : > { %v1709_v56 = vsub.f32 %v1691_v54, %v6762_v0  ;;  %v1623_v46 = vmul.f32 %v1591_v23, %v1541_v29  ;;  %v1639_v10 = vadd.f32 %v1607_v16, %v1541_v29  ;;  %v7067_v23 = vld [vmem:[%s6287_s21 + $0x2] ss:$0 sm:$0xff] }
 0x2b6   : > { %v1728_v51 = vmul.f32 %v6789_v32, %v1709_v56  ;;  %v1657_v63 = vsub.f32 %v1623_v46, %v1639_v10 }
 0x2b8   : > { %v7038_v52 = vadd.f32 %v1728_v51, %v6762_v0  ;;  %v1676_v18 = vmul.f32 %v6785_v53, %v1657_v63  ;;  %v2372_v0 = vunpack.c.0.s8 %v6994_v60  ;;  %v2438_v53 = vcvt.s32.f32 %v2374_v30 }
 0x2b9   : > { %v2437_v60 = vcvt.s32.f32 %v2373_v62  ;;  %v3040_v62 = vunpack.c.3.s8 %v7079_v14 }
 0x2ba   : > { %v1692_v31 = vadd.f32 %v1676_v18, %v1639_v10  ;;  %1949 = vmatmul.f32.gmra.mxu0 %v7038_v52  ;;  %2014 = vmatmul.f32.gmra.mxu1 %v7038_v52  ;;  %v2436_v26 = vcvt.s32.f32 %v2372_v0 }
 0x2bb   : > { %2079 = vmatmul.f32.gmra.mxu2 %v7038_v52  ;;  %2144 = vmatmul.f32.gmra.mxu3 %v7038_v52 }
 0x2bc   : > { %v1710_v9 = vsub.f32 %v1692_v31, %v6778_v45  ;;  %2512 = vmatpush.msrb.mxu0 %v2438_v53  ;;  %2643 = vmatpush.msrb.mxu2 %v2436_v26 }
 0x2bd   : > { %2708 = vmatpush.msrb.mxu3 %v2437_v60  ;;  %v3103_v60 = vcvt.s32.f32 %v3039_v7 }
 0x2be   : > { %v1729_v4 = vmul.f32 %v6789_v32, %v1710_v9  ;;  %2513 = vmatpush.msrb.mxu0 %v2434_v3  ;;  %v3104_v3 = vcvt.s32.f32 %v3040_v62 }
 0x2bf   : > { %3235 = vmatpush.msra.mxu2 %v3103_v60 }
 0x2c0   : > { %v7056_v34 = vadd.f32 %v1729_v4, %v6778_v45  ;;  %3300 = vmatpush.msra.mxu3 %v3104_v3 }
 0x2c2   : > { %1952 = vmatmul.f32.gmra.mxu0 %v7056_v34  ;;  %2017 = vmatmul.f32.gmra.mxu1 %v7056_v34 }
 0x2c3   : > { %2082 = vmatmul.f32.gmra.mxu2 %v7056_v34  ;;  %2147 = vmatmul.f32.gmra.mxu3 %v7056_v34 }
 0x2c7   : > { %v1908_v42 = vpop.f32.mrf.mxu0  ;;  %v1973_v48 = vpop.f32.mrf.mxu1 }
 0x2c8   : > { %v2151_v32 = vmul.f32 %v1973_v48, %v1908_v42  ;;  %v2167_v27 = vadd.f32 %v1973_v48, %v1908_v42 }
 0x2ce   : > { %v2038_v8 = vpop.f32.mrf.mxu2  ;;  %v2103_v12 = vpop.f32.mrf.mxu3 }
 0x2cf   : > { %v2183_v22 = vmul.f32 %v2151_v32, %v2038_v8  ;;  %v2199_v45 = vadd.f32 %v2167_v27, %v2038_v8  ;;  %v1911_v39 = vpop.f32.mrf.mxu0  ;;  %v1976_v15 = vpop.f32.mrf.mxu1 }
 0x2d0   : > { %v2152_v59 = vmul.f32 %v1976_v15, %v1911_v39  ;;  %v2168_v19 = vadd.f32 %v1976_v15, %v1911_v39  ;;  %v7097_v39 = vld [vmem:[%s6279_s8 + $0x268] sm:$0xff]  ;;  %v3035_v15 = vunpack.c.2.s8 %v7076_v38 }
 0x2d1   : > { %v2215_v43 = vmul.f32 %v2183_v22, %v2103_v12  ;;  %v2231_v17 = vadd.f32 %v2199_v45, %v2103_v12  ;;  %v7094_v45 = vld [vmem:[%s6279_s8 + $0x260] sm:$0xff]  ;;  %v3034_v7 = vunpack.c.2.s8 %v7097_v39 }
 0x2d3   : > { %v2249_v40 = vsub.f32 %v2215_v43, %v2231_v17  ;;  %v3036_v43 = vunpack.c.2.s8 %v7079_v14 }
 0x2d5   : > { %v2268_v47 = vmul.f32 %v7063_v21, %v2249_v40 }
 0x2d6   : > { %v2041_v50 = vpop.f32.mrf.mxu2  ;;  %v2106_v35 = vpop.f32.mrf.mxu3 }
 0x2d7   : > { %v2284_v54 = vadd.f32 %v2268_v47, %v2231_v17  ;;  %v2184_v16 = vmul.f32 %v2152_v59, %v2041_v50  ;;  %v2200_v29 = vadd.f32 %v2168_v19, %v2041_v50  ;;  %v1914_v56 = vpop.f32.mrf.mxu0  ;;  %v1979_v46 = vpop.f32.mrf.mxu1  ;;  %v3037_v47 = vunpack.c.3.s8 %v7094_v45 }
 0x2d8   : > { %v2153_v41 = vmul.f32 %v1979_v46, %v1914_v56  ;;  %v2169_v31 = vadd.f32 %v1979_v46, %v1914_v56  ;;  %v3038_v59 = vunpack.c.3.s8 %v7097_v39 }
 0x2d9   : > { %v2302_v10 = vsub.f32 %v2284_v54, %v6794_v2  ;;  %v2216_v51 = vmul.f32 %v2184_v16, %v2106_v35  ;;  %v2232_v63 = vadd.f32 %v2200_v29, %v2106_v35  ;;  %v3099_v16 = vcvt.s32.f32 %v3035_v15 }
 0x2da   : > { %v3101_v29 = vcvt.s32.f32 %v3037_v47  ;;  %v3102_v56 = vcvt.s32.f32 %v3038_v59  ;;  %v3029_v59 = vunpack.c.1.s8 %v7094_v45 }
 0x2db   : > { %v2321_v18 = vmul.f32 %v7067_v23, %v2302_v10  ;;  %v2250_v49 = vsub.f32 %v2216_v51, %v2232_v63  ;;  %3236 = vmatpush.msra.mxu2 %v3099_v16 }
 0x2dc   : > { %3105 = vmatpush.msra.mxu0 %v3101_v29  ;;  %3170 = vmatpush.msra.mxu1 %v3102_v56 }
 0x2dd   : > { %v7072_v55 = vadd.f32 %v2321_v18, %v6794_v2  ;;  %v2269_v30 = vmul.f32 %v7063_v21, %v2250_v49 }
 0x2de   : > { %v2044_v0 = vpop.f32.mrf.mxu2  ;;  %v2109_v53 = vpop.f32.mrf.mxu3 }
 0x2df   : > { %v2285_v6 = vadd.f32 %v2269_v30, %v2232_v63  ;;  %v2185_v9 = vmul.f32 %v2153_v41, %v2044_v0  ;;  %v2201_v26 = vadd.f32 %v2169_v31, %v2044_v0  ;;  %2514 = vmatmul.f32.vlgmr.msrb.gmra.mxu0 %v7072_v55  ;;  %2579 = vmatmul.f32.vlgmr.msrb.gmra.mxu1 %v7072_v55  ;;  %v1917_v2 = vpop.f32.mrf.mxu0  ;;  %v1982_v24 = vpop.f32.mrf.mxu1  ;;  %v3100_v63 = vcvt.s32.f32 %v3036_v43 }
 0x2e0   : > { %2644 = vmatmul.f32.vlgmr.msrb.gmra.mxu2 %v7072_v55  ;;  %2709 = vmatmul.f32.vlgmr.msrb.gmra.mxu3 %v7072_v55  ;;  %v2154_v27 = vmul.f32 %v1982_v24, %v1917_v2  ;;  %v2170_v8 = vadd.f32 %v1982_v24, %v1917_v2 }
 0x2e1   : > { %v2303_v4 = vsub.f32 %v2285_v6, %v6812_v44  ;;  %v2217_v11 = vmul.f32 %v2185_v9, %v2109_v53  ;;  %v2233_v42 = vadd.f32 %v2201_v26, %v2109_v53  ;;  %3301 = vmatpush.msra.mxu3 %v3100_v63  ;;  %v3033_v53 = vunpack.c.2.s8 %v7094_v45 }
 0x2e2   : > { %v3031_v9 = vunpack.c.1.s8 %v7076_v38  ;;  %v3032_v26 = vunpack.c.1.s8 %v7079_v14 }
 0x2e3   : > { %v2322_v48 = vmul.f32 %v7067_v23, %v2303_v4  ;;  %v2251_v32 = vsub.f32 %v2217_v11, %v2233_v42  ;;  %v3097_v4 = vcvt.s32.f32 %v3033_v53  ;;  %v3098_v11 = vcvt.s32.f32 %v3034_v7 }
 0x2e5   : > { %v7090_v12 = vadd.f32 %v2322_v48, %v6812_v44  ;;  %v2270_v22 = vmul.f32 %v7063_v21, %v2251_v32  ;;  %3106 = vmatpush.msra.mxu0 %v3097_v4  ;;  %3171 = vmatpush.msra.mxu1 %v3098_v11 }
 0x2e6   : > { %v2047_v17 = vpop.f32.mrf.mxu2  ;;  %v2112_v40 = vpop.f32.mrf.mxu3 }
 0x2e7   : > { %v2286_v19 = vadd.f32 %v2270_v22, %v2233_v42  ;;  %v2186_v50 = vmul.f32 %v2154_v27, %v2047_v17  ;;  %v2202_v44 = vadd.f32 %v2170_v8, %v2047_v17  ;;  %2517 = vmatmul.f32.gmra.mxu0 %v7090_v12  ;;  %2582 = vmatmul.f32.gmra.mxu1 %v7090_v12  ;;  %v1920_v35 = vpop.f32.mrf.mxu0  ;;  %v1985_v54 = vpop.f32.mrf.mxu1  ;;  %v3095_v42 = vcvt.s32.f32 %v3031_v9 }
 0x2e8   : > { %2647 = vmatmul.f32.gmra.mxu2 %v7090_v12  ;;  %2712 = vmatmul.f32.gmra.mxu3 %v7090_v12  ;;  %v2155_v30 = vmul.f32 %v1985_v54, %v1920_v35  ;;  %v2171_v41 = vadd.f32 %v1985_v54, %v1920_v35  ;;  %v3096_v8 = vcvt.s32.f32 %v3032_v26  ;;  %v3027_v35 = vunpack.c.0.s8 %v7076_v38  ;;  %v7144_v26 = vld [vmem:[%s6279_s8 + $0x250] sm:$0xff] }
 0x2e9   : > { %v2304_v46 = vsub.f32 %v2286_v19, %v6832_v5  ;;  %v2218_v10 = vmul.f32 %v2186_v50, %v2112_v40  ;;  %v2234_v51 = vadd.f32 %v2202_v44, %v2112_v40  ;;  %3237 = vmatpush.msra.mxu2 %v3095_v42  ;;  %v3030_v19 = vunpack.c.1.s8 %v7097_v39 }
 0x2ea   : > { %3302 = vmatpush.msra.mxu3 %v3096_v8  ;;  %v3028_v54 = vunpack.c.0.s8 %v7079_v14  ;;  %v3091_v63 = vcvt.s32.f32 %v3027_v35  ;;  %v3026_v9 = vunpack.c.0.s8 %v7097_v39  ;;  %v7165_v35 = vld [vmem:[%s6279_s8 + $0x248] sm:$0xff] }
 0x2eb   : > { %v2323_v18 = vmul.f32 %v7067_v23, %v2304_v46  ;;  %v2252_v49 = vsub.f32 %v2218_v10, %v2234_v51  ;;  %v3093_v10 = vcvt.s32.f32 %v3029_v59 }
 0x2ec   : > { %3238 = vmatpush.msra.mxu2 %v3091_v63 }
 0x2ed   : > { %v7110_v31 = vadd.f32 %v2323_v18, %v6832_v5  ;;  %v2271_v0 = vmul.f32 %v7063_v21, %v2252_v49  ;;  %3107 = vmatpush.msra.mxu0 %v3093_v10  ;;  %v3092_v49 = vcvt.s32.f32 %v3028_v54  ;;  %v3019_v54 = vunpack.c.2.s8 %v7144_v26 }
 0x2ee   : > { %v2050_v62 = vpop.f32.mrf.mxu2  ;;  %v2115_v6 = vpop.f32.mrf.mxu3 }
 0x2ef   : > { %v2287_v2 = vadd.f32 %v2271_v0, %v2234_v51  ;;  %v2187_v24 = vmul.f32 %v2155_v30, %v2050_v62  ;;  %v2203_v60 = vadd.f32 %v2171_v41, %v2050_v62  ;;  %2520 = vmatmul.f32.gmra.mxu0 %v7110_v31  ;;  %2585 = vmatmul.f32.gmra.mxu1 %v7110_v31  ;;  %v1923_v5 = vpop.f32.mrf.mxu0  ;;  %v1988_v3 = vpop.f32.mrf.mxu1  ;;  %v3094_v51 = vcvt.s32.f32 %v3030_v19 }
 0x2f0   : > { %2650 = vmatmul.f32.gmra.mxu2 %v7110_v31  ;;  %2715 = vmatmul.f32.gmra.mxu3 %v7110_v31  ;;  %v2156_v43 = vmul.f32 %v1988_v3, %v1923_v5  ;;  %v2172_v17 = vadd.f32 %v1988_v3, %v1923_v5  ;;  %v3023_v5 = vunpack.c.3.s8 %v7144_v26 }
 0x2f1   : > { %v2305_v48 = vsub.f32 %v2287_v2, %v6846_v57  ;;  %v2219_v32 = vmul.f32 %v2187_v24, %v2115_v6  ;;  %v2235_v27 = vadd.f32 %v2203_v60, %v2115_v6  ;;  %3172 = vmatpush.msra.mxu1 %v3094_v51  ;;  %3303 = vmatpush.msra.mxu3 %v3092_v49  ;;  %v3025_v6 = vunpack.c.0.s8 %v7094_v45  ;;  %v7147_v2 = vld [vmem:[%s6279_s8 + $0x258] sm:$0xff] }
 0x2f2   : > { %v3024_v3 = vunpack.c.3.s8 %v7147_v2 }
 0x2f3   : > { %v2324_v22 = vmul.f32 %v7067_v23, %v2305_v48  ;;  %v2253_v15 = vsub.f32 %v2219_v32, %v2235_v27  ;;  %v3089_v39 = vcvt.s32.f32 %v3025_v6  ;;  %v3090_v48 = vcvt.s32.f32 %v3026_v9 }
 0x2f4   : > { %v3087_v32 = vcvt.s32.f32 %v3023_v5 }
 0x2f5   : > { %v7124_v40 = vadd.f32 %v2324_v22, %v6846_v57  ;;  %v2272_v47 = vmul.f32 %v7063_v21, %v2253_v15  ;;  %3108 = vmatpush.msra.mxu0 %v3089_v39  ;;  %v3088_v15 = vcvt.s32.f32 %v3024_v3  ;;  %3173 = vmatpush.msra.mxu1 %v3090_v48 }
 0x2f6   : > { %v2053_v50 = vpop.f32.mrf.mxu2  ;;  %v2118_v44 = vpop.f32.mrf.mxu3  ;;  %3239 = vmatpush.msra.mxu2 %v3087_v32 }
 0x2f7   : > { %v2288_v16 = vadd.f32 %v2272_v47, %v2235_v27  ;;  %v2188_v29 = vmul.f32 %v2156_v43, %v2053_v50  ;;  %v2204_v56 = vadd.f32 %v2172_v17, %v2053_v50  ;;  %2523 = vmatmul.f32.gmra.mxu0 %v7124_v40  ;;  %2588 = vmatmul.f32.gmra.mxu1 %v7124_v40  ;;  %v1926_v57 = vpop.f32.mrf.mxu0  ;;  %v1991_v46 = vpop.f32.mrf.mxu1 }
 0x2f8   : > { %2653 = vmatmul.f32.gmra.mxu2 %v7124_v40  ;;  %2718 = vmatmul.f32.gmra.mxu3 %v7124_v40  ;;  %v2157_v0 = vmul.f32 %v1991_v46, %v1926_v57  ;;  %v2173_v53 = vadd.f32 %v1991_v46, %v1926_v57  ;;  %v3022_v46 = vunpack.c.3.s8 %v7165_v35 }
 0x2f9   : > { %v2306_v38 = vsub.f32 %v2288_v16, %v6860_v13  ;;  %v2220_v14 = vmul.f32 %v2188_v29, %v2118_v44  ;;  %v2236_v18 = vadd.f32 %v2204_v56, %v2118_v44  ;;  %3304 = vmatpush.msra.mxu3 %v3088_v15  ;;  %v7162_v44 = vld [vmem:[%s6279_s8 + $0x240] sm:$0xff]  ;;  %v3020_v16 = vunpack.c.2.s8 %v7147_v2 }
 0x2fa   : > { %v3021_v57 = vunpack.c.3.s8 %v7162_v44  ;;  %v3086_v49 = vcvt.s32.f32 %v3022_v46  ;;  %v3017_v3 = vunpack.c.2.s8 %v7162_v44  ;;  %v3013_v46 = vunpack.c.1.s8 %v7162_v44 }
 0x2fb   : > { %v2325_v30 = vmul.f32 %v7067_v23, %v2306_v38  ;;  %v2254_v41 = vsub.f32 %v2220_v14, %v2236_v18  ;;  %v3083_v14 = vcvt.s32.f32 %v3019_v54 }
 0x2fc   : > { %3174 = vmatpush.msra.mxu1 %v3086_v49 }
 0x2fd   : > { %v7138_v7 = vadd.f32 %v2325_v30, %v6860_v13  ;;  %v2273_v62 = vmul.f32 %v7063_v21, %v2254_v41  ;;  %3240 = vmatpush.msra.mxu2 %v3083_v14 }
 0x2fe   : > { %v2056_v24 = vpop.f32.mrf.mxu2  ;;  %v2121_v60 = vpop.f32.mrf.mxu3 }
 0x2ff   : > { %v2289_v4 = vadd.f32 %v2273_v62, %v2236_v18  ;;  %v2189_v11 = vmul.f32 %v2157_v0, %v2056_v24  ;;  %v2205_v13 = vadd.f32 %v2173_v53, %v2056_v24  ;;  %2526 = vmatmul.f32.gmra.mxu0 %v7138_v7  ;;  %2591 = vmatmul.f32.gmra.mxu1 %v7138_v7  ;;  %v1929_v45 = vpop.f32.mrf.mxu0  ;;  %v1994_v42 = vpop.f32.mrf.mxu1  ;;  %v3085_v18 = vcvt.s32.f32 %v3021_v57 }
 0x300   : > { %2656 = vmatmul.f32.gmra.mxu2 %v7138_v7  ;;  %2721 = vmatmul.f32.gmra.mxu3 %v7138_v7  ;;  %v2158_v47 = vmul.f32 %v1994_v42, %v1929_v45  ;;  %v2174_v59 = vadd.f32 %v1994_v42, %v1929_v45  ;;  %v3084_v53 = vcvt.s32.f32 %v3020_v16  ;;  %v3015_v45 = vunpack.c.1.s8 %v7144_v26 }
 0x301   : > { %v2307_v27 = vsub.f32 %v2289_v4, %v6880_v58  ;;  %v2221_v8 = vmul.f32 %v2189_v11, %v2121_v60  ;;  %v2237_v22 = vadd.f32 %v2205_v13, %v2121_v60  ;;  %3109 = vmatpush.msra.mxu0 %v3085_v18  ;;  %v3018_v4 = vunpack.c.2.s8 %v7165_v35 }
 0x302   : > { %3305 = vmatpush.msra.mxu3 %v3084_v53  ;;  %v3016_v42 = vunpack.c.1.s8 %v7147_v2  ;;  %v3079_v15 = vcvt.s32.f32 %v3015_v45  ;;  %v3010_v45 = vunpack.c.0.s8 %v7165_v35 }
 0x303   : > { %v2326_v43 = vmul.f32 %v7067_v23, %v2307_v27  ;;  %v2255_v17 = vsub.f32 %v2221_v8, %v2237_v22  ;;  %v3081_v8 = vcvt.s32.f32 %v3017_v3 }
 0x304   : > { %3241 = vmatpush.msra.mxu2 %v3079_v15 }
 0x305   : > { %v7158_v19 = vadd.f32 %v2326_v43, %v6880_v58  ;;  %v2274_v50 = vmul.f32 %v7063_v21, %v2255_v17  ;;  %3110 = vmatpush.msra.mxu0 %v3081_v8 }
 0x306   : > { %v2059_v29 = vpop.f32.mrf.mxu2  ;;  %v2124_v56 = vpop.f32.mrf.mxu3 }
 0x307   : > { %v2290_v10 = vadd.f32 %v2274_v50, %v2237_v22  ;;  %v2190_v51 = vmul.f32 %v2158_v47, %v2059_v29  ;;  %v2206_v58 = vadd.f32 %v2174_v59, %v2059_v29  ;;  %2529 = vmatmul.f32.gmra.mxu0 %v7158_v19  ;;  %2594 = vmatmul.f32.gmra.mxu1 %v7158_v19  ;;  %v1932_v63 = vpop.f32.mrf.mxu0  ;;  %v1997_v38 = vpop.f32.mrf.mxu1  ;;  %v3082_v22 = vcvt.s32.f32 %v3018_v4 }
 0x308   : > { %2659 = vmatmul.f32.gmra.mxu2 %v7158_v19  ;;  %2724 = vmatmul.f32.gmra.mxu3 %v7158_v19  ;;  %v2159_v9 = vmul.f32 %v1997_v38, %v1932_v63  ;;  %v2175_v24 = vadd.f32 %v1997_v38, %v1932_v63  ;;  %v3080_v59 = vcvt.s32.f32 %v3016_v42  ;;  %v3011_v63 = vunpack.c.0.s8 %v7144_v26  ;;  %v7212_v42 = vld [vmem:[%s6279_s8 + $0x230] sm:$0xff] }
 0x309   : > { %v2308_v30 = vsub.f32 %v2290_v10, %v6900_v37  ;;  %v2222_v41 = vmul.f32 %v2190_v51, %v2124_v56  ;;  %v2238_v0 = vadd.f32 %v2206_v58, %v2124_v56  ;;  %3175 = vmatpush.msra.mxu1 %v3082_v22  ;;  %v3014_v10 = vunpack.c.1.s8 %v7165_v35 }
 0x30a   : > { %3306 = vmatpush.msra.mxu3 %v3080_v59  ;;  %v3012_v38 = vunpack.c.0.s8 %v7147_v2  ;;  %v3075_v53 = vcvt.s32.f32 %v3011_v63  ;;  %v7233_v63 = vld [vmem:[%s6279_s8 + $0x228] sm:$0xff] }
 0x30b   : > { %v2327_v62 = vmul.f32 %v7067_v23, %v2308_v30  ;;  %v2256_v6 = vsub.f32 %v2222_v41, %v2238_v0  ;;  %v3077_v41 = vcvt.s32.f32 %v3013_v46 }
 0x30c   : > { %3242 = vmatpush.msra.mxu2 %v3075_v53 }
 0x30d   : > { %v7178_v60 = vadd.f32 %v2327_v62, %v6900_v37  ;;  %v2275_v5 = vmul.f32 %v7063_v21, %v2256_v6  ;;  %3111 = vmatpush.msra.mxu0 %v3077_v41  ;;  %v3076_v6 = vcvt.s32.f32 %v3012_v38  ;;  %v3003_v38 = vunpack.c.2.s8 %v7212_v42 }
 0x30e   : > { %v2062_v11 = vpop.f32.mrf.mxu2  ;;  %v2127_v13 = vpop.f32.mrf.mxu3 }
 0x30f   : > { %v2291_v39 = vadd.f32 %v2275_v5, %v2238_v0  ;;  %v2191_v48 = vmul.f32 %v2159_v9, %v2062_v11  ;;  %v2207_v32 = vadd.f32 %v2175_v24, %v2062_v11  ;;  %2532 = vmatmul.f32.gmra.mxu0 %v7178_v60  ;;  %2597 = vmatmul.f32.gmra.mxu1 %v7178_v60  ;;  %v1935_v37 = vpop.f32.mrf.mxu0  ;;  %v2000_v27 = vpop.f32.mrf.mxu1  ;;  %v3078_v0 = vcvt.s32.f32 %v3014_v10 }
 0x310   : > { %2662 = vmatmul.f32.gmra.mxu2 %v7178_v60  ;;  %2727 = vmatmul.f32.gmra.mxu3 %v7178_v60  ;;  %v2160_v16 = vmul.f32 %v2000_v27, %v1935_v37  ;;  %v2176_v29 = vadd.f32 %v2000_v27, %v1935_v37  ;;  %v3007_v37 = vunpack.c.3.s8 %v7212_v42 }
 0x311   : > { %v2309_v43 = vsub.f32 %v2291_v39, %v6914_v20  ;;  %v2223_v17 = vmul.f32 %v2191_v48, %v2127_v13  ;;  %v2239_v47 = vadd.f32 %v2207_v32, %v2127_v13  ;;  %3176 = vmatpush.msra.mxu1 %v3078_v0  ;;  %3307 = vmatpush.msra.mxu3 %v3076_v6  ;;  %v3009_v13 = vunpack.c.0.s8 %v7162_v44  ;;  %v7215_v39 = vld [vmem:[%s6279_s8 + $0x238] sm:$0xff] }
 0x312   : > { %v3008_v27 = vunpack.c.3.s8 %v7215_v39 }
 0x313   : > { %v2328_v50 = vmul.f32 %v7067_v23, %v2309_v43  ;;  %v2257_v54 = vsub.f32 %v2223_v17, %v2239_v47  ;;  %v3073_v35 = vcvt.s32.f32 %v3009_v13  ;;  %v3074_v43 = vcvt.s32.f32 %v3010_v45 }
 0x314   : > { %v3071_v17 = vcvt.s32.f32 %v3007_v37 }
 0x315   : > { %v7192_v56 = vadd.f32 %v2328_v50, %v6914_v20  ;;  %v2276_v57 = vmul.f32 %v7063_v21, %v2257_v54  ;;  %3112 = vmatpush.msra.mxu0 %v3073_v35  ;;  %v3072_v54 = vcvt.s32.f32 %v3008_v27  ;;  %3177 = vmatpush.msra.mxu1 %v3074_v43 }
 0x316   : > { %v2065_v51 = vpop.f32.mrf.mxu2  ;;  %v2130_v58 = vpop.f32.mrf.mxu3  ;;  %3243 = vmatpush.msra.mxu2 %v3071_v17 }
 0x317   : > { %v2292_v14 = vadd.f32 %v2276_v57, %v2239_v47  ;;  %v2192_v18 = vmul.f32 %v2160_v16, %v2065_v51  ;;  %v2208_v49 = vadd.f32 %v2176_v29, %v2065_v51  ;;  %2535 = vmatmul.f32.gmra.mxu0 %v7192_v56  ;;  %2600 = vmatmul.f32.gmra.mxu1 %v7192_v56  ;;  %v1938_v20 = vpop.f32.mrf.mxu0  ;;  %v2003_v30 = vpop.f32.mrf.mxu1 }
 0x318   : > { %2665 = vmatmul.f32.gmra.mxu2 %v7192_v56  ;;  %2730 = vmatmul.f32.gmra.mxu3 %v7192_v56  ;;  %v2161_v5 = vmul.f32 %v2003_v30, %v1938_v20  ;;  %v2177_v3 = vadd.f32 %v2003_v30, %v1938_v20  ;;  %v3006_v30 = vunpack.c.3.s8 %v7233_v63 }
 0x319   : > { %v2310_v26 = vsub.f32 %v2292_v14, %v6928_v33  ;;  %v2224_v2 = vmul.f32 %v2192_v18, %v2130_v58  ;;  %v2240_v62 = vadd.f32 %v2208_v49, %v2130_v58  ;;  %3308 = vmatpush.msra.mxu3 %v3072_v54  ;;  %v7230_v58 = vld [vmem:[%s6279_s8 + $0x220] sm:$0xff]  ;;  %v3004_v14 = vunpack.c.2.s8 %v7215_v39 }
 0x31a   : > { %v3005_v20 = vunpack.c.3.s8 %v7230_v58  ;;  %v3070_v6 = vcvt.s32.f32 %v3006_v30  ;;  %v3001_v27 = vunpack.c.2.s8 %v7230_v58  ;;  %v2997_v30 = vunpack.c.1.s8 %v7230_v58 }
 0x31b   : > { %v2329_v9 = vmul.f32 %v7067_v23, %v2310_v26  ;;  %v2258_v24 = vsub.f32 %v2224_v2, %v2240_v62  ;;  %v3067_v2 = vcvt.s32.f32 %v3003_v38 }
 0x31c   : > { %3178 = vmatpush.msra.mxu1 %v3070_v6 }
 0x31d   : > { %v7206_v4 = vadd.f32 %v2329_v9, %v6928_v33  ;;  %v2277_v11 = vmul.f32 %v7063_v21, %v2258_v24  ;;  %3244 = vmatpush.msra.mxu2 %v3067_v2  ;;  %v2993_v2 = vunpack.c.0.s8 %v7230_v58 }
 0x31e   : > { %v2068_v48 = vpop.f32.mrf.mxu2  ;;  %v2133_v32 = vpop.f32.mrf.mxu3 }
 0x31f   : > { %v2293_v8 = vadd.f32 %v2277_v11, %v2240_v62  ;;  %v2193_v22 = vmul.f32 %v2161_v5, %v2068_v48  ;;  %v2209_v33 = vadd.f32 %v2177_v3, %v2068_v48  ;;  %2538 = vmatmul.f32.gmra.mxu0 %v7206_v4  ;;  %2603 = vmatmul.f32.gmra.mxu1 %v7206_v4  ;;  %v1941_v44 = vpop.f32.mrf.mxu0  ;;  %v2006_v15 = vpop.f32.mrf.mxu1  ;;  %v3069_v62 = vcvt.s32.f32 %v3005_v20 }
 0x320   : > { %2668 = vmatmul.f32.gmra.mxu2 %v7206_v4  ;;  %2733 = vmatmul.f32.gmra.mxu3 %v7206_v4  ;;  %v2162_v57 = vmul.f32 %v2006_v15, %v1941_v44  ;;  %v2178_v46 = vadd.f32 %v2006_v15, %v1941_v44  ;;  %v3068_v3 = vcvt.s32.f32 %v3004_v14  ;;  %v2999_v44 = vunpack.c.1.s8 %v7212_v42 }
 0x321   : > { %v2311_v47 = vsub.f32 %v2293_v8, %v6948_v61  ;;  %v2225_v59 = vmul.f32 %v2193_v22, %v2133_v32  ;;  %v2241_v50 = vadd.f32 %v2209_v33, %v2133_v32  ;;  %3113 = vmatpush.msra.mxu0 %v3069_v62  ;;  %v3002_v8 = vunpack.c.2.s8 %v7233_v63 }
 0x322   : > { %3309 = vmatpush.msra.mxu3 %v3068_v3  ;;  %v3000_v15 = vunpack.c.1.s8 %v7215_v39  ;;  %v3063_v54 = vcvt.s32.f32 %v2999_v44  ;;  %v2994_v62 = vunpack.c.0.s8 %v7233_v63  ;;  %v3061_v3 = vcvt.s32.f32 %v2997_v30 }
 0x323   : > { %v2330_v16 = vmul.f32 %v7067_v23, %v2311_v47  ;;  %v2259_v29 = vsub.f32 %v2225_v59, %v2241_v50  ;;  %v3065_v59 = vcvt.s32.f32 %v3001_v27 }
 0x324   : > { %3245 = vmatpush.msra.mxu2 %v3063_v54 }
 0x325   : > { %v7226_v10 = vadd.f32 %v2330_v16, %v6948_v61  ;;  %v2278_v51 = vmul.f32 %v7063_v21, %v2259_v29  ;;  %3114 = vmatpush.msra.mxu0 %v3065_v59 }
 0x326   : > { %v2071_v18 = vpop.f32.mrf.mxu2  ;;  %v2136_v49 = vpop.f32.mrf.mxu3 }
 0x327   : > { %v2294_v41 = vadd.f32 %v2278_v51, %v2241_v50  ;;  %v2194_v0 = vmul.f32 %v2162_v57, %v2071_v18  ;;  %v2210_v61 = vadd.f32 %v2178_v46, %v2071_v18  ;;  %2541 = vmatmul.f32.gmra.mxu0 %v7226_v10  ;;  %2606 = vmatmul.f32.gmra.mxu1 %v7226_v10  ;;  %v1944_v53 = vpop.f32.mrf.mxu0  ;;  %v2009_v26 = vpop.f32.mrf.mxu1  ;;  %v3066_v50 = vcvt.s32.f32 %v3002_v8 }
 0x328   : > { %2671 = vmatmul.f32.gmra.mxu2 %v7226_v10  ;;  %2736 = vmatmul.f32.gmra.mxu3 %v7226_v10  ;;  %v2163_v45 = vmul.f32 %v2009_v26, %v1944_v53  ;;  %v2179_v48 = vadd.f32 %v2009_v26, %v1944_v53  ;;  %v3064_v46 = vcvt.s32.f32 %v3000_v15  ;;  %v2995_v53 = vunpack.c.0.s8 %v7212_v42  ;;  %v7275_v42 = vld [vmem:[%s6279_s8 + $0x218] sm:$0xff] }
 0x329   : > { %v2312_v9 = vsub.f32 %v2294_v41, %v6968_v28  ;;  %v2226_v24 = vmul.f32 %v2194_v0, %v2136_v49  ;;  %v2242_v5 = vadd.f32 %v2210_v61, %v2136_v49  ;;  %3179 = vmatpush.msra.mxu1 %v3066_v50  ;;  %v2998_v41 = vunpack.c.1.s8 %v7233_v63  ;;  %3115 = vmatpush.msra.mxu0 %v3061_v3 }
 0x32a   : > { %3310 = vmatpush.msra.mxu3 %v3064_v46  ;;  %v2996_v26 = vunpack.c.0.s8 %v7215_v39  ;;  %v3059_v63 = vcvt.s32.f32 %v2995_v53  ;;  %v2992_v15 = vunpack.c.3.s8 %v7275_v42 }
 0x32b   : > { %v2331_v11 = vmul.f32 %v7067_v23, %v2312_v9  ;;  %v2260_v13 = vsub.f32 %v2226_v24, %v2242_v5  ;;  %v3062_v58 = vcvt.s32.f32 %v2998_v41 }
 0x32c   : > { %v3060_v8 = vcvt.s32.f32 %v2996_v26  ;;  %3246 = vmatpush.msra.mxu2 %v3059_v63  ;;  %v3056_v50 = vcvt.s32.f32 %v2992_v15 }
 0x32d   : > { %v7246_v32 = vadd.f32 %v2331_v11, %v6968_v28  ;;  %v2279_v37 = vmul.f32 %v7063_v21, %v2260_v13  ;;  %v7272_v11 = vld [vmem:[%s6279_s8 + $0x210] sm:$0xff]  ;;  %v7280_v13 = vld [vmem:[%s6279_s8 + $0x200] sm:$0xff]  ;;  %3180 = vmatpush.msra.mxu1 %v3062_v58 }
 0x32e   : > { %v2074_v22 = vpop.f32.mrf.mxu2  ;;  %v2139_v33 = vpop.f32.mrf.mxu3  ;;  %v2991_v44 = vunpack.c.3.s8 %v7272_v11  ;;  %3311 = vmatpush.msra.mxu3 %v3060_v8  ;;  %v2987_v54 = vunpack.c.2.s8 %v7272_v11 }
 0x32f   : > { %v2295_v35 = vadd.f32 %v2279_v37, %v2242_v5  ;;  %v2195_v43 = vmul.f32 %v2163_v45, %v2074_v22  ;;  %v2211_v17 = vadd.f32 %v2179_v48, %v2074_v22  ;;  %2544 = vmatmul.f32.gmra.mxu0 %v7246_v32  ;;  %2609 = vmatmul.f32.gmra.mxu1 %v7246_v32  ;;  %v1947_v28 = vpop.f32.mrf.mxu0  ;;  %v2012_v47 = vpop.f32.mrf.mxu1  ;;  %v7283_v45 = vld [vmem:[%s6279_s8 + $0x208] sm:$0xff]  ;;  %v3057_v22 = vcvt.s32.f32 %v2993_v2 }
 0x330   : > { %2674 = vmatmul.f32.gmra.mxu2 %v7246_v32  ;;  %2739 = vmatmul.f32.gmra.mxu3 %v7246_v32  ;;  %v2164_v14 = vmul.f32 %v2012_v47, %v1947_v28  ;;  %v2180_v18 = vadd.f32 %v2012_v47, %v1947_v28  ;;  %v2990_v28 = vunpack.c.3.s8 %v7283_v45  ;;  %v3055_v59 = vcvt.s32.f32 %v2991_v44 }
 0x331   : > { %v2313_v16 = vsub.f32 %v2295_v35, %v6982_v1  ;;  %v2227_v29 = vmul.f32 %v2195_v43, %v2139_v33  ;;  %v2243_v57 = vadd.f32 %v2211_v17, %v2139_v33  ;;  %v3058_v33 = vcvt.s32.f32 %v2994_v62  ;;  %3116 = vmatpush.msra.mxu0 %v3057_v22  ;;  %3312 = vmatpush.msra.mxu3 %v3056_v50 }
 0x332   : > { %v2989_v17 = vunpack.c.3.s8 %v7280_v13  ;;  %v3054_v46 = vcvt.s32.f32 %v2990_v28  ;;  %3247 = vmatpush.msra.mxu2 %v3055_v59  ;;  %v2986_v30 = vunpack.c.2.s8 %v7283_v45  ;;  %v2983_v28 = vunpack.c.1.s8 %v7272_v11 }
 0x333   : > { %v2332_v51 = vmul.f32 %v7067_v23, %v2313_v16  ;;  %v2261_v38 = vsub.f32 %v2227_v29, %v2243_v57  ;;  %3181 = vmatpush.msra.mxu1 %v3058_v33  ;;  %v2981_v59 = vunpack.c.1.s8 %v7280_v13  ;;  %v2982_v50 = vunpack.c.1.s8 %v7283_v45 }
 0x335   : > { %v7260_v49 = vadd.f32 %v2332_v51, %v6982_v1  ;;  %v2280_v20 = vmul.f32 %v7063_v21, %v2261_v38  ;;  %3182 = vmatpush.msra.mxu1 %v3054_v46  ;;  %v3046_v46 = vcvt.s32.f32 %v2982_v50 }
 0x336   : > { %v2077_v0 = vpop.f32.mrf.mxu2  ;;  %v2142_v61 = vpop.f32.mrf.mxu3 }
 0x337   : > { %v2296_v1 = vadd.f32 %v2280_v20, %v2243_v57  ;;  %v2196_v6 = vmul.f32 %v2164_v14, %v2077_v0  ;;  %v2212_v9 = vadd.f32 %v2180_v18, %v2077_v0  ;;  %2547 = vmatmul.f32.gmra.mxu0 %v7260_v49  ;;  %2612 = vmatmul.f32.gmra.mxu1 %v7260_v49  ;;  %v1950_v24 = vpop.f32.mrf.mxu0  ;;  %v2015_v5 = vpop.f32.mrf.mxu1  ;;  %v3053_v57 = vcvt.s32.f32 %v2989_v17 }
 0x338   : > { %2677 = vmatmul.f32.gmra.mxu2 %v7260_v49  ;;  %2742 = vmatmul.f32.gmra.mxu3 %v7260_v49  ;;  %v2165_v39 = vmul.f32 %v2015_v5, %v1950_v24  ;;  %v2181_v47 = vadd.f32 %v2015_v5, %v1950_v24  ;;  %v3051_v14 = vcvt.s32.f32 %v2987_v54  ;;  %v2988_v18 = vunpack.c.2.s8 %v7275_v42 }
 0x339   : > { %v2314_v48 = vsub.f32 %v2296_v1, %v7015_v36  ;;  %v2228_v37 = vmul.f32 %v2196_v6, %v2142_v61  ;;  %v2244_v27 = vadd.f32 %v2212_v9, %v2142_v61  ;;  %v2985_v20 = vunpack.c.2.s8 %v7280_v13  ;;  %3117 = vmatpush.msra.mxu0 %v3053_v57 }
 0x33a   : > { %v3050_v1 = vcvt.s32.f32 %v2986_v30  ;;  %3248 = vmatpush.msra.mxu2 %v3051_v14 }
 0x33b   : > { %v2333_v35 = vmul.f32 %v7067_v23, %v2314_v48  ;;  %v2262_v43 = vsub.f32 %v2228_v37, %v2244_v27  ;;  %v3049_v53 = vcvt.s32.f32 %v2985_v20  ;;  %v2978_v20 = vunpack.c.0.s8 %v7283_v45 }
 0x33c   : > { %3183 = vmatpush.msra.mxu1 %v3050_v1 }
 0x33d   : > { %v7293_v16 = vadd.f32 %v2333_v35, %v7015_v36  ;;  %v2281_v29 = vmul.f32 %v7063_v21, %v2262_v43  ;;  %v3052_v36 = vcvt.s32.f32 %v2988_v18  ;;  %3118 = vmatpush.msra.mxu0 %v3049_v53 }
 0x33e   : > { %v2080_v51 = vpop.f32.mrf.mxu2  ;;  %v2145_v38 = vpop.f32.mrf.mxu3  ;;  %3184 = vmatpush.msra.mxu1 %v3046_v46 }
 0x33f   : > { %v2297_v41 = vadd.f32 %v2281_v29, %v2244_v27  ;;  %v2197_v0 = vmul.f32 %v2165_v39, %v2080_v51  ;;  %v2213_v61 = vadd.f32 %v2181_v47, %v2080_v51  ;;  %2550 = vmatmul.f32.gmra.mxu0 %v7293_v16  ;;  %2615 = vmatmul.f32.gmra.mxu1 %v7293_v16  ;;  %v1953_v6 = vpop.f32.mrf.mxu0  ;;  %v2018_v9 = vpop.f32.mrf.mxu1  ;;  %v2984_v47 = vunpack.c.1.s8 %v7275_v42 }
 0x340   : > { %2680 = vmatmul.f32.gmra.mxu2 %v7293_v16  ;;  %2745 = vmatmul.f32.gmra.mxu3 %v7293_v16  ;;  %v2166_v58 = vmul.f32 %v2018_v9, %v1953_v6  ;;  %v2182_v63 = vadd.f32 %v2018_v9, %v1953_v6  ;;  %v3047_v29 = vcvt.s32.f32 %v2983_v28  ;;  %v2980_v51 = vunpack.c.0.s8 %v7275_v42  ;;  %v7341_v9 = vld [vmem:[%s6285_s14 + $0x3] ss:$0 sm:$0xff] }
 0x341   : > { %v2315_v26 = vsub.f32 %v2297_v41, %v7028_v25  ;;  %v2229_v2 = vmul.f32 %v2197_v0, %v2145_v38  ;;  %v2245_v62 = vadd.f32 %v2213_v61, %v2145_v38  ;;  %3313 = vmatpush.msra.mxu3 %v3052_v36  ;;  %v3048_v57 = vcvt.s32.f32 %v2984_v47 }
 0x342   : > { %v2977_v38 = vunpack.c.0.s8 %v7280_v13  ;;  %3249 = vmatpush.msra.mxu2 %v3047_v29  ;;  %v3042_v0 = vcvt.s32.f32 %v2978_v20  ;;  %v7354_v29 = vld [vmem:[%s6279_s8 + $0x2f0] sm:$0xff] }
 0x343   : > { %v2334_v24 = vmul.f32 %v7067_v23, %v2315_v26  ;;  %v2263_v5 = vsub.f32 %v2229_v2, %v2245_v62  ;;  %3314 = vmatpush.msra.mxu3 %v3048_v57  ;;  %v7357_v57 = vld [vmem:[%s6279_s8 + $0x2f8] sm:$0xff]  ;;  %v3646_v46 = vunpack.c.3.s8 %v7354_v29 }
 0x344   : > { %v3041_v30 = vcvt.s32.f32 %v2977_v38  ;;  %3185 = vmatpush.msra.mxu1 %v3042_v0 }
 0x345   : > { %v7306_v3 = vadd.f32 %v2334_v24, %v7028_v25  ;;  %v2282_v39 = vmul.f32 %v7063_v21, %v2263_v5 }
 0x346   : > { %v2083_v48 = vpop.f32.mrf.mxu2  ;;  %v2148_v22 = vpop.f32.mrf.mxu3 }
 0x347   : > { %v2298_v37 = vadd.f32 %v2282_v39, %v2245_v62  ;;  %v2198_v27 = vmul.f32 %v2166_v58, %v2083_v48  ;;  %v2214_v8 = vadd.f32 %v2182_v63, %v2083_v48  ;;  %2553 = vmatmul.f32.gmra.mxu0 %v7306_v3  ;;  %2618 = vmatmul.f32.gmra.mxu1 %v7306_v3 }
 0x348   : > { %2683 = vmatmul.f32.gmra.mxu2 %v7306_v3  ;;  %2748 = vmatmul.f32.gmra.mxu3 %v7306_v3 }
 0x349   : > { %v2316_v25 = vsub.f32 %v2298_v37, %v7038_v52  ;;  %v2230_v33 = vmul.f32 %v2198_v27, %v2148_v22  ;;  %v2246_v44 = vadd.f32 %v2214_v8, %v2148_v22  ;;  %v7345_v27 = vld [vmem:[%s6287_s21 + $0x3] ss:$0 sm:$0xff] }
 0x34b   : > { %v2335_v15 = vmul.f32 %v7067_v23, %v2316_v25  ;;  %v2264_v35 = vsub.f32 %v2230_v33, %v2246_v44 }
 0x34d   : > { %v7316_v43 = vadd.f32 %v2335_v15, %v7038_v52  ;;  %v2283_v17 = vmul.f32 %v7063_v21, %v2264_v35  ;;  %v2979_v52 = vunpack.c.0.s8 %v7272_v11  ;;  %v3045_v21 = vcvt.s32.f32 %v2981_v59 }
 0x34e   : > { %v3044_v11 = vcvt.s32.f32 %v2980_v51  ;;  %v3647_v51 = vunpack.c.3.s8 %v7357_v57 }
 0x34f   : > { %v2299_v54 = vadd.f32 %v2283_v17, %v2246_v44  ;;  %2556 = vmatmul.f32.gmra.mxu0 %v7316_v43  ;;  %2621 = vmatmul.f32.gmra.mxu1 %v7316_v43  ;;  %v3043_v18 = vcvt.s32.f32 %v2979_v52 }
 0x350   : > { %2686 = vmatmul.f32.gmra.mxu2 %v7316_v43  ;;  %2751 = vmatmul.f32.gmra.mxu3 %v7316_v43 }
 0x351   : > { %v2317_v14 = vsub.f32 %v2299_v54, %v7056_v34  ;;  %3119 = vmatpush.msra.mxu0 %v3045_v21  ;;  %3250 = vmatpush.msra.mxu2 %v3043_v18 }
 0x352   : > { %3315 = vmatpush.msra.mxu3 %v3044_v11  ;;  %v3710_v11 = vcvt.s32.f32 %v3646_v46 }
 0x353   : > { %v2336_v41 = vmul.f32 %v7067_v23, %v2317_v14  ;;  %3120 = vmatpush.msra.mxu0 %v3041_v30  ;;  %v3711_v30 = vcvt.s32.f32 %v3647_v51 }
 0x354   : > { %3842 = vmatpush.msrb.mxu2 %v3710_v11 }
 0x355   : > { %v7334_v42 = vadd.f32 %v2336_v41, %v7056_v34  ;;  %3907 = vmatpush.msrb.mxu3 %v3711_v30 }
 0x357   : > { %2559 = vmatmul.f32.gmra.mxu0 %v7334_v42  ;;  %2624 = vmatmul.f32.gmra.mxu1 %v7334_v42 }
 0x358   : > { %2689 = vmatmul.f32.gmra.mxu2 %v7334_v42  ;;  %2754 = vmatmul.f32.gmra.mxu3 %v7334_v42 }
 0x35c   : > { %v2515_v13 = vpop.f32.mrf.mxu0  ;;  %v2580_v45 = vpop.f32.mrf.mxu1 }
 0x35d   : > { %v2758_v23 = vmul.f32 %v2580_v45, %v2515_v13  ;;  %v2774_v61 = vadd.f32 %v2580_v45, %v2515_v13 }
 0x363   : > { %v2645_v36 = vpop.f32.mrf.mxu2  ;;  %v2710_v53 = vpop.f32.mrf.mxu3 }
 0x364   : > { %v2790_v26 = vmul.f32 %v2758_v23, %v2645_v36  ;;  %v2806_v34 = vadd.f32 %v2774_v61, %v2645_v36  ;;  %v2518_v2 = vpop.f32.mrf.mxu0  ;;  %v2583_v62 = vpop.f32.mrf.mxu1 }
 0x365   : > { %v2759_v39 = vmul.f32 %v2583_v62, %v2518_v2  ;;  %v2775_v58 = vadd.f32 %v2583_v62, %v2518_v2  ;;  %v7375_v2 = vld [vmem:[%s6279_s8 + $0x2e8] sm:$0xff]  ;;  %v3642_v62 = vunpack.c.2.s8 %v7354_v29 }
 0x366   : > { %v2822_v1 = vmul.f32 %v2790_v26, %v2710_v53  ;;  %v2838_v6 = vadd.f32 %v2806_v34, %v2710_v53  ;;  %v7372_v34 = vld [vmem:[%s6279_s8 + $0x2e0] sm:$0xff]  ;;  %v3641_v46 = vunpack.c.2.s8 %v7375_v2 }
 0x368   : > { %v2856_v24 = vsub.f32 %v2822_v1, %v2838_v6  ;;  %v3643_v1 = vunpack.c.2.s8 %v7357_v57 }
 0x36a   : > { %v2875_v5 = vmul.f32 %v7341_v9, %v2856_v24 }
 0x36b   : > { %v2648_v63 = vpop.f32.mrf.mxu2  ;;  %v2713_v48 = vpop.f32.mrf.mxu3 }
 0x36c   : > { %v2891_v37 = vadd.f32 %v2875_v5, %v2838_v6  ;;  %v2791_v8 = vmul.f32 %v2759_v39, %v2648_v63  ;;  %v2807_v22 = vadd.f32 %v2775_v58, %v2648_v63  ;;  %v2521_v25 = vpop.f32.mrf.mxu0  ;;  %v2586_v33 = vpop.f32.mrf.mxu1  ;;  %v3644_v5 = vunpack.c.3.s8 %v7372_v34 }
 0x36d   : > { %v2760_v50 = vmul.f32 %v2586_v33, %v2521_v25  ;;  %v2776_v54 = vadd.f32 %v2586_v33, %v2521_v25  ;;  %v3645_v39 = vunpack.c.3.s8 %v7375_v2 }
 0x36e   : > { %v2909_v44 = vsub.f32 %v2891_v37, %v7072_v55  ;;  %v2823_v15 = vmul.f32 %v2791_v8, %v2713_v48  ;;  %v2839_v35 = vadd.f32 %v2807_v22, %v2713_v48  ;;  %v3706_v8 = vcvt.s32.f32 %v3642_v62 }
 0x36f   : > { %v3708_v22 = vcvt.s32.f32 %v3644_v5  ;;  %v3709_v25 = vcvt.s32.f32 %v3645_v39  ;;  %v3636_v39 = vunpack.c.1.s8 %v7372_v34 }
 0x370   : > { %v2928_v17 = vmul.f32 %v7345_v27, %v2909_v44  ;;  %v2857_v28 = vsub.f32 %v2823_v15, %v2839_v35  ;;  %3843 = vmatpush.msrb.mxu2 %v3706_v8 }
 0x371   : > { %3712 = vmatpush.msrb.mxu0 %v3708_v22  ;;  %3777 = vmatpush.msrb.mxu1 %v3709_v25 }
 0x372   : > { %v7350_v47 = vadd.f32 %v2928_v17, %v7072_v55  ;;  %v2876_v59 = vmul.f32 %v7341_v9, %v2857_v28 }
 0x373   : > { %v2651_v52 = vpop.f32.mrf.mxu2  ;;  %v2716_v21 = vpop.f32.mrf.mxu3 }
 0x374   : > { %v2892_v38 = vadd.f32 %v2876_v59, %v2839_v35  ;;  %v2792_v14 = vmul.f32 %v2760_v50, %v2651_v52  ;;  %v2808_v18 = vadd.f32 %v2776_v54, %v2651_v52  ;;  %3121 = vmatmul.f32.vlgmr.msra.gmra.mxu0 %v7350_v47  ;;  %3186 = vmatmul.f32.vlgmr.msra.gmra.mxu1 %v7350_v47  ;;  %v2524_v55 = vpop.f32.mrf.mxu0  ;;  %v2589_v20 = vpop.f32.mrf.mxu1  ;;  %v3707_v35 = vcvt.s32.f32 %v3643_v1 }
 0x375   : > { %3251 = vmatmul.f32.vlgmr.msra.gmra.mxu2 %v7350_v47  ;;  %3316 = vmatmul.f32.vlgmr.msra.gmra.mxu3 %v7350_v47  ;;  %v2761_v61 = vmul.f32 %v2589_v20, %v2524_v55  ;;  %v2777_v36 = vadd.f32 %v2589_v20, %v2524_v55 }
 0x376   : > { %v2910_v41 = vsub.f32 %v2892_v38, %v7090_v12  ;;  %v2824_v0 = vmul.f32 %v2792_v14, %v2716_v21  ;;  %v2840_v13 = vadd.f32 %v2808_v18, %v2716_v21  ;;  %3908 = vmatpush.msrb.mxu3 %v3707_v35  ;;  %v3640_v21 = vunpack.c.2.s8 %v7372_v34 }
 0x377   : > { %v3638_v14 = vunpack.c.1.s8 %v7354_v29  ;;  %v3639_v18 = vunpack.c.1.s8 %v7357_v57 }
 0x378   : > { %v2929_v45 = vmul.f32 %v7345_v27, %v2910_v41  ;;  %v2858_v23 = vsub.f32 %v2824_v0, %v2840_v13  ;;  %v3704_v41 = vcvt.s32.f32 %v3640_v21  ;;  %v3705_v0 = vcvt.s32.f32 %v3641_v46 }
 0x37a   : > { %v7368_v53 = vadd.f32 %v2929_v45, %v7090_v12  ;;  %v2877_v26 = vmul.f32 %v7341_v9, %v2858_v23  ;;  %3713 = vmatpush.msrb.mxu0 %v3704_v41  ;;  %3778 = vmatpush.msrb.mxu1 %v3705_v0 }
 0x37b   : > { %v2654_v6 = vpop.f32.mrf.mxu2  ;;  %v2719_v24 = vpop.f32.mrf.mxu3 }
 0x37c   : > { %v2893_v58 = vadd.f32 %v2877_v26, %v2840_v13  ;;  %v2793_v63 = vmul.f32 %v2761_v61, %v2654_v6  ;;  %v2809_v12 = vadd.f32 %v2777_v36, %v2654_v6  ;;  %3124 = vmatmul.f32.gmra.mxu0 %v7368_v53  ;;  %3189 = vmatmul.f32.gmra.mxu1 %v7368_v53  ;;  %v2527_v48 = vpop.f32.mrf.mxu0  ;;  %v2592_v37 = vpop.f32.mrf.mxu1  ;;  %v3702_v13 = vcvt.s32.f32 %v3638_v14 }
 0x37d   : > { %3254 = vmatmul.f32.gmra.mxu2 %v7368_v53  ;;  %3319 = vmatmul.f32.gmra.mxu3 %v7368_v53  ;;  %v2762_v59 = vmul.f32 %v2592_v37, %v2527_v48  ;;  %v2778_v50 = vadd.f32 %v2592_v37, %v2527_v48  ;;  %v3703_v36 = vcvt.s32.f32 %v3639_v18  ;;  %v3634_v48 = vunpack.c.0.s8 %v7354_v29  ;;  %v7422_v18 = vld [vmem:[%s6279_s8 + $0x2d0] sm:$0xff] }
 0x37e   : > { %v2911_v33 = vsub.f32 %v2893_v58, %v7110_v31  ;;  %v2825_v44 = vmul.f32 %v2793_v63, %v2719_v24  ;;  %v2841_v15 = vadd.f32 %v2809_v12, %v2719_v24  ;;  %3844 = vmatpush.msrb.mxu2 %v3702_v13  ;;  %v3637_v58 = vunpack.c.1.s8 %v7375_v2 }
 0x37f   : > { %3909 = vmatpush.msrb.mxu3 %v3703_v36  ;;  %v3635_v37 = vunpack.c.0.s8 %v7357_v57  ;;  %v3698_v35 = vcvt.s32.f32 %v3634_v48  ;;  %v3633_v14 = vunpack.c.0.s8 %v7375_v2  ;;  %v7443_v48 = vld [vmem:[%s6279_s8 + $0x2c8] sm:$0xff] }
 0x380   : > { %v2930_v17 = vmul.f32 %v7345_v27, %v2911_v33  ;;  %v2859_v28 = vsub.f32 %v2825_v44, %v2841_v15  ;;  %v3700_v44 = vcvt.s32.f32 %v3636_v39 }
 0x381   : > { %3845 = vmatpush.msrb.mxu2 %v3698_v35 }
 0x382   : > { %v7388_v54 = vadd.f32 %v2930_v17, %v7110_v31  ;;  %v2878_v52 = vmul.f32 %v7341_v9, %v2859_v28  ;;  %3714 = vmatpush.msrb.mxu0 %v3700_v44  ;;  %v3699_v28 = vcvt.s32.f32 %v3635_v37  ;;  %v3626_v37 = vunpack.c.2.s8 %v7422_v18 }
 0x383   : > { %v2657_v51 = vpop.f32.mrf.mxu2  ;;  %v2722_v38 = vpop.f32.mrf.mxu3 }
 0x384   : > { %v2894_v55 = vadd.f32 %v2878_v52, %v2841_v15  ;;  %v2794_v20 = vmul.f32 %v2762_v59, %v2657_v51  ;;  %v2810_v11 = vadd.f32 %v2778_v50, %v2657_v51  ;;  %3127 = vmatmul.f32.gmra.mxu0 %v7388_v54  ;;  %3192 = vmatmul.f32.gmra.mxu1 %v7388_v54  ;;  %v2530_v31 = vpop.f32.mrf.mxu0  ;;  %v2595_v30 = vpop.f32.mrf.mxu1  ;;  %v3701_v15 = vcvt.s32.f32 %v3637_v58 }
 0x385   : > { %3257 = vmatmul.f32.gmra.mxu2 %v7388_v54  ;;  %3322 = vmatmul.f32.gmra.mxu3 %v7388_v54  ;;  %v2763_v1 = vmul.f32 %v2595_v30, %v2530_v31  ;;  %v2779_v6 = vadd.f32 %v2595_v30, %v2530_v31  ;;  %v3630_v31 = vunpack.c.3.s8 %v7422_v18 }
 0x386   : > { %v2912_v45 = vsub.f32 %v2894_v55, %v7124_v40  ;;  %v2826_v23 = vmul.f32 %v2794_v20, %v2722_v38  ;;  %v2842_v61 = vadd.f32 %v2810_v11, %v2722_v38  ;;  %3779 = vmatpush.msrb.mxu1 %v3701_v15  ;;  %3910 = vmatpush.msrb.mxu3 %v3699_v28  ;;  %v3632_v38 = vunpack.c.0.s8 %v7372_v34  ;;  %v7425_v55 = vld [vmem:[%s6279_s8 + $0x2d8] sm:$0xff] }
 0x387   : > { %v3631_v30 = vunpack.c.3.s8 %v7425_v55 }
 0x388   : > { %v2931_v26 = vmul.f32 %v7345_v27, %v2912_v45  ;;  %v2860_v62 = vsub.f32 %v2826_v23, %v2842_v61  ;;  %v3696_v2 = vcvt.s32.f32 %v3632_v38  ;;  %v3697_v45 = vcvt.s32.f32 %v3633_v14 }
 0x389   : > { %v3694_v23 = vcvt.s32.f32 %v3630_v31 }
 0x38a   : > { %v7402_v24 = vadd.f32 %v2931_v26, %v7124_v40  ;;  %v2879_v5 = vmul.f32 %v7341_v9, %v2860_v62  ;;  %3715 = vmatpush.msrb.mxu0 %v3696_v2  ;;  %v3695_v62 = vcvt.s32.f32 %v3631_v30  ;;  %3780 = vmatpush.msrb.mxu1 %v3697_v45 }
 0x38b   : > { %v2660_v63 = vpop.f32.mrf.mxu2  ;;  %v2725_v12 = vpop.f32.mrf.mxu3  ;;  %3846 = vmatpush.msrb.mxu2 %v3694_v23 }
 0x38c   : > { %v2895_v8 = vadd.f32 %v2879_v5, %v2842_v61  ;;  %v2795_v22 = vmul.f32 %v2763_v1, %v2660_v63  ;;  %v2811_v25 = vadd.f32 %v2779_v6, %v2660_v63  ;;  %3130 = vmatmul.f32.gmra.mxu0 %v7402_v24  ;;  %3195 = vmatmul.f32.gmra.mxu1 %v7402_v24  ;;  %v2533_v40 = vpop.f32.mrf.mxu0  ;;  %v2598_v33 = vpop.f32.mrf.mxu1 }
 0x38d   : > { %3260 = vmatmul.f32.gmra.mxu2 %v7402_v24  ;;  %3325 = vmatmul.f32.gmra.mxu3 %v7402_v24  ;;  %v2764_v52 = vmul.f32 %v2598_v33, %v2533_v40  ;;  %v2780_v21 = vadd.f32 %v2598_v33, %v2533_v40  ;;  %v3629_v33 = vunpack.c.3.s8 %v7443_v48 }
 0x38e   : > { %v2913_v29 = vsub.f32 %v2895_v8, %v7138_v7  ;;  %v2827_v57 = vmul.f32 %v2795_v22, %v2725_v12  ;;  %v2843_v17 = vadd.f32 %v2811_v25, %v2725_v12  ;;  %3911 = vmatpush.msrb.mxu3 %v3695_v62  ;;  %v7440_v12 = vld [vmem:[%s6279_s8 + $0x2c0] sm:$0xff]  ;;  %v3627_v8 = vunpack.c.2.s8 %v7425_v55 }
 0x38f   : > { %v3628_v40 = vunpack.c.3.s8 %v7440_v12  ;;  %v3693_v28 = vcvt.s32.f32 %v3629_v33  ;;  %v3624_v30 = vunpack.c.2.s8 %v7440_v12  ;;  %v3620_v33 = vunpack.c.1.s8 %v7440_v12 }
 0x390   : > { %v2932_v59 = vmul.f32 %v7345_v27, %v2913_v29  ;;  %v2861_v50 = vsub.f32 %v2827_v57, %v2843_v17  ;;  %v3690_v57 = vcvt.s32.f32 %v3626_v37 }
 0x391   : > { %3781 = vmatpush.msrb.mxu1 %v3693_v28 }
 0x392   : > { %v7416_v46 = vadd.f32 %v2932_v59, %v7138_v7  ;;  %v2880_v51 = vmul.f32 %v7341_v9, %v2861_v50  ;;  %3847 = vmatpush.msrb.mxu2 %v3690_v57 }
 0x393   : > { %v2663_v20 = vpop.f32.mrf.mxu2  ;;  %v2728_v11 = vpop.f32.mrf.mxu3 }
 0x394   : > { %v2896_v41 = vadd.f32 %v2880_v51, %v2843_v17  ;;  %v2796_v0 = vmul.f32 %v2764_v52, %v2663_v20  ;;  %v2812_v7 = vadd.f32 %v2780_v21, %v2663_v20  ;;  %3133 = vmatmul.f32.gmra.mxu0 %v7416_v46  ;;  %3198 = vmatmul.f32.gmra.mxu1 %v7416_v46  ;;  %v2536_v34 = vpop.f32.mrf.mxu0  ;;  %v2601_v13 = vpop.f32.mrf.mxu1  ;;  %v3692_v17 = vcvt.s32.f32 %v3628_v40 }
 0x395   : > { %3263 = vmatmul.f32.gmra.mxu2 %v7416_v46  ;;  %3328 = vmatmul.f32.gmra.mxu3 %v7416_v46  ;;  %v2765_v5 = vmul.f32 %v2601_v13, %v2536_v34  ;;  %v2781_v39 = vadd.f32 %v2601_v13, %v2536_v34  ;;  %v3691_v21 = vcvt.s32.f32 %v3627_v8  ;;  %v3622_v34 = vunpack.c.1.s8 %v7422_v18 }
 0x396   : > { %v2914_v61 = vsub.f32 %v2896_v41, %v7158_v19  ;;  %v2828_v36 = vmul.f32 %v2796_v0, %v2728_v11  ;;  %v2844_v26 = vadd.f32 %v2812_v7, %v2728_v11  ;;  %3716 = vmatpush.msrb.mxu0 %v3692_v17  ;;  %v3625_v41 = vunpack.c.2.s8 %v7443_v48 }
 0x397   : > { %3912 = vmatpush.msrb.mxu3 %v3691_v21  ;;  %v3623_v13 = vunpack.c.1.s8 %v7425_v55  ;;  %v3686_v62 = vcvt.s32.f32 %v3622_v34  ;;  %v3617_v34 = vunpack.c.0.s8 %v7443_v48 }
 0x398   : > { %v2933_v1 = vmul.f32 %v7345_v27, %v2914_v61  ;;  %v2862_v6 = vsub.f32 %v2828_v36, %v2844_v26  ;;  %v3688_v36 = vcvt.s32.f32 %v3624_v30 }
 0x399   : > { %3848 = vmatpush.msrb.mxu2 %v3686_v62 }
 0x39a   : > { %v7436_v58 = vadd.f32 %v2933_v1, %v7158_v19  ;;  %v2881_v63 = vmul.f32 %v7341_v9, %v2862_v6  ;;  %3717 = vmatpush.msrb.mxu0 %v3688_v36 }
 0x39b   : > { %v2666_v22 = vpop.f32.mrf.mxu2  ;;  %v2731_v25 = vpop.f32.mrf.mxu3 }
 0x39c   : > { %v2897_v44 = vadd.f32 %v2881_v63, %v2844_v26  ;;  %v2797_v15 = vmul.f32 %v2765_v5, %v2666_v22  ;;  %v2813_v19 = vadd.f32 %v2781_v39, %v2666_v22  ;;  %3136 = vmatmul.f32.gmra.mxu0 %v7436_v58  ;;  %3201 = vmatmul.f32.gmra.mxu1 %v7436_v58  ;;  %v2539_v35 = vpop.f32.mrf.mxu0  ;;  %v2604_v29 = vpop.f32.mrf.mxu1  ;;  %v3689_v26 = vcvt.s32.f32 %v3625_v41 }
 0x39d   : > { %3266 = vmatmul.f32.gmra.mxu2 %v7436_v58  ;;  %3331 = vmatmul.f32.gmra.mxu3 %v7436_v58  ;;  %v2766_v14 = vmul.f32 %v2604_v29, %v2539_v35  ;;  %v2782_v20 = vadd.f32 %v2604_v29, %v2539_v35  ;;  %v3687_v39 = vcvt.s32.f32 %v3623_v13  ;;  %v3618_v35 = vunpack.c.0.s8 %v7422_v18  ;;  %v7490_v13 = vld [vmem:[%s6279_s8 + $0x2b0] sm:$0xff] }
 0x39e   : > { %v2915_v59 = vsub.f32 %v2897_v44, %v7178_v60  ;;  %v2829_v50 = vmul.f32 %v2797_v15, %v2731_v25  ;;  %v2845_v52 = vadd.f32 %v2813_v19, %v2731_v25  ;;  %3782 = vmatpush.msrb.mxu1 %v3689_v26  ;;  %v3621_v44 = vunpack.c.1.s8 %v7443_v48 }
 0x39f   : > { %3913 = vmatpush.msrb.mxu3 %v3687_v39  ;;  %v3619_v29 = vunpack.c.0.s8 %v7425_v55  ;;  %v3682_v21 = vcvt.s32.f32 %v3618_v35  ;;  %v7511_v35 = vld [vmem:[%s6279_s8 + $0x2a8] sm:$0xff] }
 0x3a0   : > { %v2934_v51 = vmul.f32 %v7345_v27, %v2915_v59  ;;  %v2863_v38 = vsub.f32 %v2829_v50, %v2845_v52  ;;  %v3684_v50 = vcvt.s32.f32 %v3620_v33 }
 0x3a1   : > { %3849 = vmatpush.msrb.mxu2 %v3682_v21 }
 0x3a2   : > { %v7456_v11 = vadd.f32 %v2934_v51, %v7178_v60  ;;  %v2882_v31 = vmul.f32 %v7341_v9, %v2863_v38  ;;  %3718 = vmatpush.msrb.mxu0 %v3684_v50  ;;  %v3683_v38 = vcvt.s32.f32 %v3619_v29  ;;  %v3610_v29 = vunpack.c.2.s8 %v7490_v13 }
 0x3a3   : > { %v2669_v0 = vpop.f32.mrf.mxu2  ;;  %v2734_v7 = vpop.f32.mrf.mxu3 }
 0x3a4   : > { %v2898_v2 = vadd.f32 %v2882_v31, %v2845_v52  ;;  %v2798_v45 = vmul.f32 %v2766_v14, %v2669_v0  ;;  %v2814_v23 = vadd.f32 %v2782_v20, %v2669_v0  ;;  %3139 = vmatmul.f32.gmra.mxu0 %v7456_v11  ;;  %3204 = vmatmul.f32.gmra.mxu1 %v7456_v11  ;;  %v2542_v60 = vpop.f32.mrf.mxu0  ;;  %v2607_v61 = vpop.f32.mrf.mxu1  ;;  %v3685_v52 = vcvt.s32.f32 %v3621_v44 }
 0x3a5   : > { %3269 = vmatmul.f32.gmra.mxu2 %v7456_v11  ;;  %3334 = vmatmul.f32.gmra.mxu3 %v7456_v11  ;;  %v2767_v8 = vmul.f32 %v2607_v61, %v2542_v60  ;;  %v2783_v22 = vadd.f32 %v2607_v61, %v2542_v60  ;;  %v3614_v60 = vunpack.c.3.s8 %v7490_v13 }
 0x3a6   : > { %v2916_v1 = vsub.f32 %v2898_v2, %v7192_v56  ;;  %v2830_v6 = vmul.f32 %v2798_v45, %v2734_v7  ;;  %v2846_v5 = vadd.f32 %v2814_v23, %v2734_v7  ;;  %3783 = vmatpush.msrb.mxu1 %v3685_v52  ;;  %3914 = vmatpush.msrb.mxu3 %v3683_v38  ;;  %v3616_v7 = vunpack.c.0.s8 %v7440_v12  ;;  %v7493_v2 = vld [vmem:[%s6279_s8 + $0x2b8] sm:$0xff] }
 0x3a7   : > { %v3615_v61 = vunpack.c.3.s8 %v7493_v2 }
 0x3a8   : > { %v2935_v63 = vmul.f32 %v7345_v27, %v2916_v1  ;;  %v2864_v37 = vsub.f32 %v2830_v6, %v2846_v5  ;;  %v3680_v48 = vcvt.s32.f32 %v3616_v7  ;;  %v3681_v1 = vcvt.s32.f32 %v3617_v34 }
 0x3a9   : > { %v3678_v6 = vcvt.s32.f32 %v3614_v60 }
 0x3aa   : > { %v7470_v25 = vadd.f32 %v2935_v63, %v7192_v56  ;;  %v2883_v40 = vmul.f32 %v7341_v9, %v2864_v37  ;;  %3719 = vmatpush.msrb.mxu0 %v3680_v48  ;;  %v3679_v37 = vcvt.s32.f32 %v3615_v61  ;;  %3784 = vmatpush.msrb.mxu1 %v3681_v1 }
 0x3ab   : > { %v2672_v15 = vpop.f32.mrf.mxu2  ;;  %v2737_v19 = vpop.f32.mrf.mxu3  ;;  %3850 = vmatpush.msrb.mxu2 %v3678_v6 }
 0x3ac   : > { %v2899_v57 = vadd.f32 %v2883_v40, %v2846_v5  ;;  %v2799_v17 = vmul.f32 %v2767_v8, %v2672_v15  ;;  %v2815_v28 = vadd.f32 %v2783_v22, %v2672_v15  ;;  %3142 = vmatmul.f32.gmra.mxu0 %v7470_v25  ;;  %3207 = vmatmul.f32.gmra.mxu1 %v7470_v25  ;;  %v2545_v56 = vpop.f32.mrf.mxu0  ;;  %v2610_v59 = vpop.f32.mrf.mxu1 }
 0x3ad   : > { %3272 = vmatmul.f32.gmra.mxu2 %v7470_v25  ;;  %3337 = vmatmul.f32.gmra.mxu3 %v7470_v25  ;;  %v2768_v31 = vmul.f32 %v2610_v59, %v2545_v56  ;;  %v2784_v30 = vadd.f32 %v2610_v59, %v2545_v56  ;;  %v3613_v59 = vunpack.c.3.s8 %v7511_v35 }
 0x3ae   : > { %v2917_v18 = vsub.f32 %v2899_v57, %v7206_v4  ;;  %v2831_v55 = vmul.f32 %v2799_v17, %v2737_v19  ;;  %v2847_v51 = vadd.f32 %v2815_v28, %v2737_v19  ;;  %3915 = vmatpush.msrb.mxu3 %v3679_v37  ;;  %v7508_v19 = vld [vmem:[%s6279_s8 + $0x2a0] sm:$0xff]  ;;  %v3611_v57 = vunpack.c.2.s8 %v7493_v2 }
 0x3af   : > { %v3612_v56 = vunpack.c.3.s8 %v7508_v19  ;;  %v3677_v38 = vcvt.s32.f32 %v3613_v59  ;;  %v3608_v61 = vunpack.c.2.s8 %v7508_v19  ;;  %v3604_v59 = vunpack.c.1.s8 %v7508_v19 }
 0x3b0   : > { %v2936_v14 = vmul.f32 %v7345_v27, %v2917_v18  ;;  %v2865_v20 = vsub.f32 %v2831_v55, %v2847_v51  ;;  %v3674_v55 = vcvt.s32.f32 %v3610_v29 }
 0x3b1   : > { %3785 = vmatpush.msrb.mxu1 %v3677_v38 }
 0x3b2   : > { %v7484_v41 = vadd.f32 %v2936_v14, %v7206_v4  ;;  %v2884_v0 = vmul.f32 %v7341_v9, %v2865_v20  ;;  %3851 = vmatpush.msrb.mxu2 %v3674_v55  ;;  %v3600_v55 = vunpack.c.0.s8 %v7508_v19 }
 0x3b3   : > { %v2675_v45 = vpop.f32.mrf.mxu2  ;;  %v2740_v23 = vpop.f32.mrf.mxu3 }
 0x3b4   : > { %v2900_v36 = vadd.f32 %v2884_v0, %v2847_v51  ;;  %v2800_v26 = vmul.f32 %v2768_v31, %v2675_v45  ;;  %v2816_v4 = vadd.f32 %v2784_v30, %v2675_v45  ;;  %3145 = vmatmul.f32.gmra.mxu0 %v7484_v41  ;;  %3210 = vmatmul.f32.gmra.mxu1 %v7484_v41  ;;  %v2548_v12 = vpop.f32.mrf.mxu0  ;;  %v2613_v62 = vpop.f32.mrf.mxu1  ;;  %v3676_v51 = vcvt.s32.f32 %v3612_v56 }
 0x3b5   : > { %3275 = vmatmul.f32.gmra.mxu2 %v7484_v41  ;;  %3340 = vmatmul.f32.gmra.mxu3 %v7484_v41  ;;  %v2769_v40 = vmul.f32 %v2613_v62, %v2548_v12  ;;  %v2785_v33 = vadd.f32 %v2613_v62, %v2548_v12  ;;  %v3675_v30 = vcvt.s32.f32 %v3611_v57  ;;  %v3606_v12 = vunpack.c.1.s8 %v7490_v13 }
 0x3b6   : > { %v2918_v5 = vsub.f32 %v2900_v36, %v7226_v10  ;;  %v2832_v39 = vmul.f32 %v2800_v26, %v2740_v23  ;;  %v2848_v63 = vadd.f32 %v2816_v4, %v2740_v23  ;;  %3720 = vmatpush.msrb.mxu0 %v3676_v51  ;;  %v3609_v36 = vunpack.c.2.s8 %v7511_v35 }
 0x3b7   : > { %3916 = vmatpush.msrb.mxu3 %v3675_v30  ;;  %v3607_v62 = vunpack.c.1.s8 %v7493_v2  ;;  %v3670_v37 = vcvt.s32.f32 %v3606_v12  ;;  %v3601_v51 = vunpack.c.0.s8 %v7511_v35  ;;  %v3668_v30 = vcvt.s32.f32 %v3604_v59 }
 0x3b8   : > { %v2937_v8 = vmul.f32 %v7345_v27, %v2918_v5  ;;  %v2866_v22 = vsub.f32 %v2832_v39, %v2848_v63  ;;  %v3672_v39 = vcvt.s32.f32 %v3608_v61 }
 0x3b9   : > { %3852 = vmatpush.msrb.mxu2 %v3670_v37 }
 0x3ba   : > { %v7504_v44 = vadd.f32 %v2937_v8, %v7226_v10  ;;  %v2885_v15 = vmul.f32 %v7341_v9, %v2866_v22  ;;  %3721 = vmatpush.msrb.mxu0 %v3672_v39 }
 0x3bb   : > { %v2678_v17 = vpop.f32.mrf.mxu2  ;;  %v2743_v28 = vpop.f32.mrf.mxu3 }
 0x3bc   : > { %v2901_v50 = vadd.f32 %v2885_v15, %v2848_v63  ;;  %v2801_v52 = vmul.f32 %v2769_v40, %v2678_v17  ;;  %v2817_v10 = vadd.f32 %v2785_v33, %v2678_v17  ;;  %3148 = vmatmul.f32.gmra.mxu0 %v7504_v44  ;;  %3213 = vmatmul.f32.gmra.mxu1 %v7504_v44  ;;  %v2551_v21 = vpop.f32.mrf.mxu0  ;;  %v2616_v18 = vpop.f32.mrf.mxu1  ;;  %v3673_v63 = vcvt.s32.f32 %v3609_v36 }
 0x3bd   : > { %3278 = vmatmul.f32.gmra.mxu2 %v7504_v44  ;;  %3343 = vmatmul.f32.gmra.mxu3 %v7504_v44  ;;  %v2770_v34 = vmul.f32 %v2616_v18, %v2551_v21  ;;  %v2786_v45 = vadd.f32 %v2616_v18, %v2551_v21  ;;  %v3671_v33 = vcvt.s32.f32 %v3607_v62  ;;  %v3602_v21 = vunpack.c.0.s8 %v7490_v13  ;;  %v7553_v13 = vld [vmem:[%s6279_s8 + $0x298] sm:$0xff] }
 0x3be   : > { %v2919_v14 = vsub.f32 %v2901_v50, %v7246_v32  ;;  %v2833_v20 = vmul.f32 %v2801_v52, %v2743_v28  ;;  %v2849_v31 = vadd.f32 %v2817_v10, %v2743_v28  ;;  %3786 = vmatpush.msrb.mxu1 %v3673_v63  ;;  %v3605_v50 = vunpack.c.1.s8 %v7511_v35  ;;  %3722 = vmatpush.msrb.mxu0 %v3668_v30 }
 0x3bf   : > { %3917 = vmatpush.msrb.mxu3 %v3671_v33  ;;  %v3603_v18 = vunpack.c.0.s8 %v7493_v2  ;;  %v3666_v35 = vcvt.s32.f32 %v3602_v21  ;;  %v3599_v62 = vunpack.c.3.s8 %v7553_v13 }
 0x3c0   : > { %v2938_v0 = vmul.f32 %v7345_v27, %v2919_v14  ;;  %v2867_v7 = vsub.f32 %v2833_v20, %v2849_v31  ;;  %v3669_v19 = vcvt.s32.f32 %v3605_v50 }
 0x3c1   : > { %v3667_v36 = vcvt.s32.f32 %v3603_v18  ;;  %3853 = vmatpush.msrb.mxu2 %v3666_v35  ;;  %v3663_v63 = vcvt.s32.f32 %v3599_v62 }
 0x3c2   : > { %v7524_v23 = vadd.f32 %v2938_v0, %v7246_v32  ;;  %v2886_v60 = vmul.f32 %v7341_v9, %v2867_v7  ;;  %v7550_v0 = vld [vmem:[%s6279_s8 + $0x290] sm:$0xff]  ;;  %v7558_v7 = vld [vmem:[%s6279_s8 + $0x280] sm:$0xff]  ;;  %3787 = vmatpush.msrb.mxu1 %v3669_v19 }
 0x3c3   : > { %v2681_v26 = vpop.f32.mrf.mxu2  ;;  %v2746_v4 = vpop.f32.mrf.mxu3  ;;  %v3598_v12 = vunpack.c.3.s8 %v7550_v0  ;;  %3918 = vmatpush.msrb.mxu3 %v3667_v36  ;;  %v3594_v37 = vunpack.c.2.s8 %v7550_v0 }
 0x3c4   : > { %v2902_v48 = vadd.f32 %v2886_v60, %v2849_v31  ;;  %v2802_v1 = vmul.f32 %v2770_v34, %v2681_v26  ;;  %v2818_v6 = vadd.f32 %v2786_v45, %v2681_v26  ;;  %3151 = vmatmul.f32.gmra.mxu0 %v7524_v23  ;;  %3216 = vmatmul.f32.gmra.mxu1 %v7524_v23  ;;  %v2554_v32 = vpop.f32.mrf.mxu0  ;;  %v2619_v5 = vpop.f32.mrf.mxu1  ;;  %v7561_v34 = vld [vmem:[%s6279_s8 + $0x288] sm:$0xff]  ;;  %v3664_v26 = vcvt.s32.f32 %v3600_v55 }
 0x3c5   : > { %3281 = vmatmul.f32.gmra.mxu2 %v7524_v23  ;;  %3346 = vmatmul.f32.gmra.mxu3 %v7524_v23  ;;  %v2771_v57 = vmul.f32 %v2619_v5, %v2554_v32  ;;  %v2787_v17 = vadd.f32 %v2619_v5, %v2554_v32  ;;  %v3597_v32 = vunpack.c.3.s8 %v7561_v34  ;;  %v3662_v39 = vcvt.s32.f32 %v3598_v12 }
 0x3c6   : > { %v2920_v8 = vsub.f32 %v2902_v48, %v7260_v49  ;;  %v2834_v22 = vmul.f32 %v2802_v1, %v2746_v4  ;;  %v2850_v40 = vadd.f32 %v2818_v6, %v2746_v4  ;;  %v3665_v4 = vcvt.s32.f32 %v3601_v51  ;;  %3723 = vmatpush.msrb.mxu0 %v3664_v26  ;;  %3919 = vmatpush.msrb.mxu3 %v3663_v63 }
 0x3c7   : > { %v3596_v6 = vunpack.c.3.s8 %v7558_v7  ;;  %v3661_v33 = vcvt.s32.f32 %v3597_v32  ;;  %3854 = vmatpush.msrb.mxu2 %v3662_v39  ;;  %v3593_v59 = vunpack.c.2.s8 %v7561_v34  ;;  %v3590_v32 = vunpack.c.1.s8 %v7550_v0 }
 0x3c8   : > { %v2939_v15 = vmul.f32 %v7345_v27, %v2920_v8  ;;  %v2868_v29 = vsub.f32 %v2834_v22, %v2850_v40  ;;  %3788 = vmatpush.msrb.mxu1 %v3665_v4  ;;  %v3588_v39 = vunpack.c.1.s8 %v7558_v7  ;;  %v3589_v63 = vunpack.c.1.s8 %v7561_v34 }
 0x3ca   : > { %v7538_v28 = vadd.f32 %v2939_v15, %v7260_v49  ;;  %v2887_v56 = vmul.f32 %v7341_v9, %v2868_v29  ;;  %3789 = vmatpush.msrb.mxu1 %v3661_v33  ;;  %v3653_v33 = vcvt.s32.f32 %v3589_v63 }
 0x3cb   : > { %v2684_v52 = vpop.f32.mrf.mxu2  ;;  %v2749_v10 = vpop.f32.mrf.mxu3 }
 0x3cc   : > { %v2903_v49 = vadd.f32 %v2887_v56, %v2850_v40  ;;  %v2803_v38 = vmul.f32 %v2771_v57, %v2684_v52  ;;  %v2819_v14 = vadd.f32 %v2787_v17, %v2684_v52  ;;  %3154 = vmatmul.f32.gmra.mxu0 %v7538_v28  ;;  %3219 = vmatmul.f32.gmra.mxu1 %v7538_v28  ;;  %v2557_v20 = vpop.f32.mrf.mxu0  ;;  %v2622_v31 = vpop.f32.mrf.mxu1  ;;  %v3660_v40 = vcvt.s32.f32 %v3596_v6 }
 0x3cd   : > { %3284 = vmatmul.f32.gmra.mxu2 %v7538_v28  ;;  %3349 = vmatmul.f32.gmra.mxu3 %v7538_v28  ;;  %v2772_v2 = vmul.f32 %v2622_v31, %v2557_v20  ;;  %v2788_v5 = vadd.f32 %v2622_v31, %v2557_v20  ;;  %v3658_v57 = vcvt.s32.f32 %v3594_v37  ;;  %v3595_v17 = vunpack.c.2.s8 %v7553_v13 }
 0x3ce   : > { %v2921_v45 = vsub.f32 %v2903_v49, %v7293_v16  ;;  %v2835_v60 = vmul.f32 %v2803_v38, %v2749_v10  ;;  %v2851_v61 = vadd.f32 %v2819_v14, %v2749_v10  ;;  %v3592_v56 = vunpack.c.2.s8 %v7558_v7  ;;  %3724 = vmatpush.msrb.mxu0 %v3660_v40 }
 0x3cf   : > { %v3657_v49 = vcvt.s32.f32 %v3593_v59  ;;  %3855 = vmatpush.msrb.mxu2 %v3658_v57 }
 0x3d0   : > { %v2940_v48 = vmul.f32 %v7345_v27, %v2921_v45  ;;  %v2869_v1 = vsub.f32 %v2835_v60, %v2851_v61  ;;  %v3656_v21 = vcvt.s32.f32 %v3592_v56  ;;  %v3585_v56 = vunpack.c.0.s8 %v7561_v34 }
 0x3d1   : > { %3790 = vmatpush.msrb.mxu1 %v3657_v49 }
 0x3d2   : > { %v7571_v8 = vadd.f32 %v2940_v48, %v7293_v16  ;;  %v2888_v22 = vmul.f32 %v7341_v9, %v2869_v1  ;;  %v3659_v16 = vcvt.s32.f32 %v3595_v17  ;;  %3725 = vmatpush.msrb.mxu0 %v3656_v21 }
 0x3d3   : > { %v2687_v15 = vpop.f32.mrf.mxu2  ;;  %v2752_v29 = vpop.f32.mrf.mxu3  ;;  %3791 = vmatpush.msrb.mxu1 %v3653_v33 }
 0x3d4   : > { %v2904_v50 = vadd.f32 %v2888_v22, %v2851_v61  ;;  %v2804_v52 = vmul.f32 %v2772_v2, %v2687_v15  ;;  %v2820_v10 = vadd.f32 %v2788_v5, %v2687_v15  ;;  %3157 = vmatmul.f32.gmra.mxu0 %v7571_v8  ;;  %3222 = vmatmul.f32.gmra.mxu1 %v7571_v8  ;;  %v2560_v38 = vpop.f32.mrf.mxu0  ;;  %v2625_v14 = vpop.f32.mrf.mxu1  ;;  %v3591_v5 = vunpack.c.1.s8 %v7553_v13 }
 0x3d5   : > { %3287 = vmatmul.f32.gmra.mxu2 %v7571_v8  ;;  %3352 = vmatmul.f32.gmra.mxu3 %v7571_v8  ;;  %v2773_v19 = vmul.f32 %v2625_v14, %v2560_v38  ;;  %v2789_v35 = vadd.f32 %v2625_v14, %v2560_v38  ;;  %v3654_v22 = vcvt.s32.f32 %v3590_v32  ;;  %v3587_v15 = vunpack.c.0.s8 %v7553_v13  ;;  %v7619_v14 = vld [vmem:[%s6285_s14 + $0x4] ss:$0 sm:$0xff] }
 0x3d6   : > { %v2922_v18 = vsub.f32 %v2904_v50, %v7306_v3  ;;  %v2836_v55 = vmul.f32 %v2804_v52, %v2752_v29  ;;  %v2852_v51 = vadd.f32 %v2820_v10, %v2752_v29  ;;  %3920 = vmatpush.msrb.mxu3 %v3659_v16  ;;  %v3655_v40 = vcvt.s32.f32 %v3591_v5 }
 0x3d7   : > { %v3584_v29 = vunpack.c.0.s8 %v7558_v7  ;;  %3856 = vmatpush.msrb.mxu2 %v3654_v22  ;;  %v3649_v52 = vcvt.s32.f32 %v3585_v56  ;;  %v7632_v22 = vld [vmem:[%s6279_s8 + $0x370] sm:$0xff] }
 0x3d8   : > { %v2941_v20 = vmul.f32 %v7345_v27, %v2922_v18  ;;  %v2870_v31 = vsub.f32 %v2836_v55, %v2852_v51  ;;  %3921 = vmatpush.msrb.mxu3 %v3655_v40  ;;  %v7635_v40 = vld [vmem:[%s6279_s8 + $0x378] sm:$0xff]  ;;  %v4253_v33 = vunpack.c.3.s8 %v7632_v22 }
 0x3d9   : > { %v3648_v59 = vcvt.s32.f32 %v3584_v29  ;;  %3792 = vmatpush.msrb.mxu1 %v3649_v52 }
 0x3da   : > { %v7584_v30 = vadd.f32 %v2941_v20, %v7306_v3  ;;  %v2889_v2 = vmul.f32 %v7341_v9, %v2870_v31 }
 0x3db   : > { %v2690_v45 = vpop.f32.mrf.mxu2  ;;  %v2755_v26 = vpop.f32.mrf.mxu3 }
 0x3dc   : > { %v2905_v60 = vadd.f32 %v2889_v2, %v2852_v51  ;;  %v2805_v61 = vmul.f32 %v2773_v19, %v2690_v45  ;;  %v2821_v36 = vadd.f32 %v2789_v35, %v2690_v45  ;;  %3160 = vmatmul.f32.gmra.mxu0 %v7584_v30  ;;  %3225 = vmatmul.f32.gmra.mxu1 %v7584_v30 }
 0x3dd   : > { %3290 = vmatmul.f32.gmra.mxu2 %v7584_v30  ;;  %3355 = vmatmul.f32.gmra.mxu3 %v7584_v30 }
 0x3de   : > { %v2923_v3 = vsub.f32 %v2905_v60, %v7316_v43  ;;  %v2837_v4 = vmul.f32 %v2805_v61, %v2755_v26  ;;  %v2853_v12 = vadd.f32 %v2821_v36, %v2755_v26  ;;  %v7623_v61 = vld [vmem:[%s6287_s21 + $0x4] ss:$0 sm:$0xff] }
 0x3e0   : > { %v2942_v62 = vmul.f32 %v7345_v27, %v2923_v3  ;;  %v2871_v48 = vsub.f32 %v2837_v4, %v2853_v12 }
 0x3e2   : > { %v7594_v1 = vadd.f32 %v2942_v62, %v7316_v43  ;;  %v2890_v6 = vmul.f32 %v7341_v9, %v2871_v48  ;;  %v3586_v43 = vunpack.c.0.s8 %v7550_v0  ;;  %v3652_v9 = vcvt.s32.f32 %v3588_v39 }
 0x3e3   : > { %v3651_v0 = vcvt.s32.f32 %v3587_v15  ;;  %v4254_v15 = vunpack.c.3.s8 %v7635_v40 }
 0x3e4   : > { %v2906_v37 = vadd.f32 %v2890_v6, %v2853_v12  ;;  %3163 = vmatmul.f32.gmra.mxu0 %v7594_v1  ;;  %3228 = vmatmul.f32.gmra.mxu1 %v7594_v1  ;;  %v3650_v17 = vcvt.s32.f32 %v3586_v43 }
 0x3e5   : > { %3293 = vmatmul.f32.gmra.mxu2 %v7594_v1  ;;  %3358 = vmatmul.f32.gmra.mxu3 %v7594_v1 }
 0x3e6   : > { %v2924_v57 = vsub.f32 %v2906_v37, %v7334_v42  ;;  %3726 = vmatpush.msrb.mxu0 %v3652_v9  ;;  %3857 = vmatpush.msrb.mxu2 %v3650_v17 }
 0x3e7   : > { %3922 = vmatpush.msrb.mxu3 %v3651_v0  ;;  %v4317_v0 = vcvt.s32.f32 %v4253_v33 }
 0x3e8   : > { %v2943_v50 = vmul.f32 %v7345_v27, %v2924_v57  ;;  %3727 = vmatpush.msrb.mxu0 %v3648_v59  ;;  %v4318_v59 = vcvt.s32.f32 %v4254_v15 }
 0x3e9   : > { %4449 = vmatpush.msra.mxu2 %v4317_v0 }
 0x3ea   : > { %v7612_v13 = vadd.f32 %v2943_v50, %v7334_v42  ;;  %4514 = vmatpush.msra.mxu3 %v4318_v59 }
 0x3ec   : > { %3166 = vmatmul.f32.gmra.mxu0 %v7612_v13  ;;  %3231 = vmatmul.f32.gmra.mxu1 %v7612_v13 }
 0x3ed   : > { %3296 = vmatmul.f32.gmra.mxu2 %v7612_v13  ;;  %3361 = vmatmul.f32.gmra.mxu3 %v7612_v13 }
 0x3f1   : > { %v3122_v7 = vpop.f32.mrf.mxu0  ;;  %v3187_v34 = vpop.f32.mrf.mxu1 }
 0x3f2   : > { %v3365_v27 = vmul.f32 %v3187_v34, %v3122_v7  ;;  %v3381_v10 = vadd.f32 %v3187_v34, %v3122_v7 }
 0x3f8   : > { %v3252_v16 = vpop.f32.mrf.mxu2  ;;  %v3317_v21 = vpop.f32.mrf.mxu3 }
 0x3f9   : > { %v3397_v18 = vmul.f32 %v3365_v27, %v3252_v16  ;;  %v3413_v42 = vadd.f32 %v3381_v10, %v3252_v16  ;;  %v3125_v55 = vpop.f32.mrf.mxu0  ;;  %v3190_v51 = vpop.f32.mrf.mxu1 }
 0x3fa   : > { %v3366_v2 = vmul.f32 %v3190_v51, %v3125_v55  ;;  %v3382_v19 = vadd.f32 %v3190_v51, %v3125_v55  ;;  %v7653_v55 = vld [vmem:[%s6279_s8 + $0x368] sm:$0xff]  ;;  %v4249_v51 = vunpack.c.2.s8 %v7632_v22 }
 0x3fb   : > { %v3429_v49 = vmul.f32 %v3397_v18, %v3317_v21  ;;  %v3445_v38 = vadd.f32 %v3413_v42, %v3317_v21  ;;  %v7650_v42 = vld [vmem:[%s6279_s8 + $0x360] sm:$0xff]  ;;  %v4248_v33 = vunpack.c.2.s8 %v7653_v55 }
 0x3fd   : > { %v3463_v20 = vsub.f32 %v3429_v49, %v3445_v38  ;;  %v4250_v49 = vunpack.c.2.s8 %v7635_v40 }
 0x3ff   : > { %v3482_v31 = vmul.f32 %v7619_v14, %v3463_v20 }
 0x400   : > { %v3255_v35 = vpop.f32.mrf.mxu2  ;;  %v3320_v45 = vpop.f32.mrf.mxu3 }
 0x401   : > { %v3498_v60 = vadd.f32 %v3482_v31, %v3445_v38  ;;  %v3398_v36 = vmul.f32 %v3366_v2, %v3255_v35  ;;  %v3414_v26 = vadd.f32 %v3382_v19, %v3255_v35  ;;  %v3128_v3 = vpop.f32.mrf.mxu0  ;;  %v3193_v4 = vpop.f32.mrf.mxu1  ;;  %v4251_v31 = vunpack.c.3.s8 %v7650_v42 }
 0x402   : > { %v3367_v63 = vmul.f32 %v3193_v4, %v3128_v3  ;;  %v3383_v37 = vadd.f32 %v3193_v4, %v3128_v3  ;;  %v4252_v2 = vunpack.c.3.s8 %v7653_v55 }
 0x403   : > { %v3516_v12 = vsub.f32 %v3498_v60, %v7350_v47  ;;  %v3430_v62 = vmul.f32 %v3398_v36, %v3320_v45  ;;  %v3446_v48 = vadd.f32 %v3414_v26, %v3320_v45  ;;  %v4313_v36 = vcvt.s32.f32 %v4249_v51 }
 0x404   : > { %v4315_v26 = vcvt.s32.f32 %v4251_v31  ;;  %v4316_v3 = vcvt.s32.f32 %v4252_v2  ;;  %v4243_v2 = vunpack.c.1.s8 %v7650_v42 }
 0x405   : > { %v3535_v6 = vmul.f32 %v7623_v61, %v3516_v12  ;;  %v3464_v32 = vsub.f32 %v3430_v62, %v3446_v48  ;;  %4450 = vmatpush.msra.mxu2 %v4313_v36 }
 0x406   : > { %4319 = vmatpush.msra.mxu0 %v4315_v26  ;;  %4384 = vmatpush.msra.mxu1 %v4316_v3 }
 0x407   : > { %v7628_v5 = vadd.f32 %v3535_v6, %v7350_v47  ;;  %v3483_v39 = vmul.f32 %v7619_v14, %v3464_v32 }
 0x408   : > { %v3258_v43 = vpop.f32.mrf.mxu2  ;;  %v3323_v9 = vpop.f32.mrf.mxu3 }
 0x409   : > { %v3499_v29 = vadd.f32 %v3483_v39, %v3446_v48  ;;  %v3399_v57 = vmul.f32 %v3367_v63, %v3258_v43  ;;  %v3415_v17 = vadd.f32 %v3383_v37, %v3258_v43  ;;  %3728 = vmatmul.f32.vlgmr.msrb.gmra.mxu0 %v7628_v5  ;;  %3793 = vmatmul.f32.vlgmr.msrb.gmra.mxu1 %v7628_v5  ;;  %v3131_v47 = vpop.f32.mrf.mxu0  ;;  %v3196_v56 = vpop.f32.mrf.mxu1  ;;  %v4314_v48 = vcvt.s32.f32 %v4250_v49 }
 0x40a   : > { %3858 = vmatmul.f32.vlgmr.msrb.gmra.mxu2 %v7628_v5  ;;  %3923 = vmatmul.f32.vlgmr.msrb.gmra.mxu3 %v7628_v5  ;;  %v3368_v10 = vmul.f32 %v3196_v56, %v3131_v47  ;;  %v3384_v16 = vadd.f32 %v3196_v56, %v3131_v47 }
 0x40b   : > { %v3517_v50 = vsub.f32 %v3499_v29, %v7368_v53  ;;  %v3431_v52 = vmul.f32 %v3399_v57, %v3323_v9  ;;  %v3447_v7 = vadd.f32 %v3415_v17, %v3323_v9  ;;  %4515 = vmatpush.msra.mxu3 %v4314_v48  ;;  %v4247_v9 = vunpack.c.2.s8 %v7650_v42 }
 0x40c   : > { %v4245_v57 = vunpack.c.1.s8 %v7632_v22  ;;  %v4246_v17 = vunpack.c.1.s8 %v7635_v40 }
 0x40d   : > { %v3536_v34 = vmul.f32 %v7623_v61, %v3517_v50  ;;  %v3465_v27 = vsub.f32 %v3431_v52, %v3447_v7  ;;  %v4311_v50 = vcvt.s32.f32 %v4247_v9  ;;  %v4312_v52 = vcvt.s32.f32 %v4248_v33 }
 0x40f   : > { %v7646_v21 = vadd.f32 %v3536_v34, %v7368_v53  ;;  %v3484_v18 = vmul.f32 %v7619_v14, %v3465_v27  ;;  %4320 = vmatpush.msra.mxu0 %v4311_v50  ;;  %4385 = vmatpush.msra.mxu1 %v4312_v52 }
 0x410   : > { %v3261_v38 = vpop.f32.mrf.mxu2  ;;  %v3326_v20 = vpop.f32.mrf.mxu3 }
 0x411   : > { %v3500_v19 = vadd.f32 %v3484_v18, %v3447_v7  ;;  %v3400_v35 = vmul.f32 %v3368_v10, %v3261_v38  ;;  %v3416_v53 = vadd.f32 %v3384_v16, %v3261_v38  ;;  %3731 = vmatmul.f32.gmra.mxu0 %v7646_v21  ;;  %3796 = vmatmul.f32.gmra.mxu1 %v7646_v21  ;;  %v3134_v45 = vpop.f32.mrf.mxu0  ;;  %v3199_v60 = vpop.f32.mrf.mxu1  ;;  %v4309_v7 = vcvt.s32.f32 %v4245_v57 }
 0x412   : > { %3861 = vmatmul.f32.gmra.mxu2 %v7646_v21  ;;  %3926 = vmatmul.f32.gmra.mxu3 %v7646_v21  ;;  %v3369_v39 = vmul.f32 %v3199_v60, %v3134_v45  ;;  %v3385_v63 = vadd.f32 %v3199_v60, %v3134_v45  ;;  %v4310_v16 = vcvt.s32.f32 %v4246_v17  ;;  %v4241_v45 = vunpack.c.0.s8 %v7632_v22  ;;  %v7700_v17 = vld [vmem:[%s6279_s8 + $0x350] sm:$0xff] }
 0x413   : > { %v3518_v4 = vsub.f32 %v3500_v19, %v7388_v54  ;;  %v3432_v12 = vmul.f32 %v3400_v35, %v3326_v20  ;;  %v3448_v62 = vadd.f32 %v3416_v53, %v3326_v20  ;;  %4451 = vmatpush.msra.mxu2 %v4309_v7  ;;  %v4244_v19 = vunpack.c.1.s8 %v7653_v55 }
 0x414   : > { %4516 = vmatpush.msra.mxu3 %v4310_v16  ;;  %v4242_v60 = vunpack.c.0.s8 %v7635_v40  ;;  %v4305_v48 = vcvt.s32.f32 %v4241_v45  ;;  %v4240_v57 = vunpack.c.0.s8 %v7653_v55  ;;  %v7721_v45 = vld [vmem:[%s6279_s8 + $0x348] sm:$0xff] }
 0x415   : > { %v3537_v6 = vmul.f32 %v7623_v61, %v3518_v4  ;;  %v3466_v32 = vsub.f32 %v3432_v12, %v3448_v62  ;;  %v4307_v12 = vcvt.s32.f32 %v4243_v2 }
 0x416   : > { %4452 = vmatpush.msra.mxu2 %v4305_v48 }
 0x417   : > { %v7666_v37 = vadd.f32 %v3537_v6, %v7388_v54  ;;  %v3485_v43 = vmul.f32 %v7619_v14, %v3466_v32  ;;  %4321 = vmatpush.msra.mxu0 %v4307_v12  ;;  %v4306_v32 = vcvt.s32.f32 %v4242_v60  ;;  %v4233_v60 = vunpack.c.2.s8 %v7700_v17 }
 0x418   : > { %v3264_v15 = vpop.f32.mrf.mxu2  ;;  %v3329_v29 = vpop.f32.mrf.mxu3 }
 0x419   : > { %v3501_v47 = vadd.f32 %v3485_v43, %v3448_v62  ;;  %v3401_v56 = vmul.f32 %v3369_v39, %v3264_v15  ;;  %v3417_v0 = vadd.f32 %v3385_v63, %v3264_v15  ;;  %3734 = vmatmul.f32.gmra.mxu0 %v7666_v37  ;;  %3799 = vmatmul.f32.gmra.mxu1 %v7666_v37  ;;  %v3137_v54 = vpop.f32.mrf.mxu0  ;;  %v3202_v59 = vpop.f32.mrf.mxu1  ;;  %v4308_v62 = vcvt.s32.f32 %v4244_v19 }
 0x41a   : > { %3864 = vmatmul.f32.gmra.mxu2 %v7666_v37  ;;  %3929 = vmatmul.f32.gmra.mxu3 %v7666_v37  ;;  %v3370_v49 = vmul.f32 %v3202_v59, %v3137_v54  ;;  %v3386_v38 = vadd.f32 %v3202_v59, %v3137_v54  ;;  %v4237_v54 = vunpack.c.3.s8 %v7700_v17 }
 0x41b   : > { %v3519_v34 = vsub.f32 %v3501_v47, %v7402_v24  ;;  %v3433_v27 = vmul.f32 %v3401_v56, %v3329_v29  ;;  %v3449_v10 = vadd.f32 %v3417_v0, %v3329_v29  ;;  %4386 = vmatpush.msra.mxu1 %v4308_v62  ;;  %4517 = vmatpush.msra.mxu3 %v4306_v32  ;;  %v4239_v29 = vunpack.c.0.s8 %v7650_v42  ;;  %v7703_v47 = vld [vmem:[%s6279_s8 + $0x358] sm:$0xff] }
 0x41c   : > { %v4238_v59 = vunpack.c.3.s8 %v7703_v47 }
 0x41d   : > { %v3538_v18 = vmul.f32 %v7623_v61, %v3519_v34  ;;  %v3467_v51 = vsub.f32 %v3433_v27, %v3449_v10  ;;  %v4303_v55 = vcvt.s32.f32 %v4239_v29  ;;  %v4304_v34 = vcvt.s32.f32 %v4240_v57 }
 0x41e   : > { %v4301_v27 = vcvt.s32.f32 %v4237_v54 }
 0x41f   : > { %v7680_v20 = vadd.f32 %v3538_v18, %v7402_v24  ;;  %v3486_v31 = vmul.f32 %v7619_v14, %v3467_v51  ;;  %4322 = vmatpush.msra.mxu0 %v4303_v55  ;;  %v4302_v51 = vcvt.s32.f32 %v4238_v59  ;;  %4387 = vmatpush.msra.mxu1 %v4304_v34 }
 0x420   : > { %v3267_v35 = vpop.f32.mrf.mxu2  ;;  %v3332_v53 = vpop.f32.mrf.mxu3  ;;  %4453 = vmatpush.msra.mxu2 %v4301_v27 }
 0x421   : > { %v3502_v36 = vadd.f32 %v3486_v31, %v3449_v10  ;;  %v3402_v26 = vmul.f32 %v3370_v49, %v3267_v35  ;;  %v3418_v3 = vadd.f32 %v3386_v38, %v3267_v35  ;;  %3737 = vmatmul.f32.gmra.mxu0 %v7680_v20  ;;  %3802 = vmatmul.f32.gmra.mxu1 %v7680_v20  ;;  %v3140_v24 = vpop.f32.mrf.mxu0  ;;  %v3205_v4 = vpop.f32.mrf.mxu1 }
 0x422   : > { %3867 = vmatmul.f32.gmra.mxu2 %v7680_v20  ;;  %3932 = vmatmul.f32.gmra.mxu3 %v7680_v20  ;;  %v3371_v43 = vmul.f32 %v3205_v4, %v3140_v24  ;;  %v3387_v9 = vadd.f32 %v3205_v4, %v3140_v24  ;;  %v4236_v4 = vunpack.c.3.s8 %v7721_v45 }
 0x423   : > { %v3520_v22 = vsub.f32 %v3502_v36, %v7416_v46  ;;  %v3434_v40 = vmul.f32 %v3402_v26, %v3332_v53  ;;  %v3450_v6 = vadd.f32 %v3418_v3, %v3332_v53  ;;  %4518 = vmatpush.msra.mxu3 %v4302_v51  ;;  %v7718_v53 = vld [vmem:[%s6279_s8 + $0x340] sm:$0xff]  ;;  %v4234_v36 = vunpack.c.2.s8 %v7703_v47 }
 0x424   : > { %v4235_v24 = vunpack.c.3.s8 %v7718_v53  ;;  %v4300_v32 = vcvt.s32.f32 %v4236_v4  ;;  %v4231_v59 = vunpack.c.2.s8 %v7718_v53  ;;  %v4227_v4 = vunpack.c.1.s8 %v7718_v53 }
 0x425   : > { %v3539_v39 = vmul.f32 %v7623_v61, %v3520_v22  ;;  %v3468_v63 = vsub.f32 %v3434_v40, %v3450_v6  ;;  %v4297_v40 = vcvt.s32.f32 %v4233_v60 }
 0x426   : > { %4388 = vmatpush.msra.mxu1 %v4300_v32 }
 0x427   : > { %v7694_v33 = vadd.f32 %v3539_v39, %v7416_v46  ;;  %v3487_v15 = vmul.f32 %v7619_v14, %v3468_v63  ;;  %4454 = vmatpush.msra.mxu2 %v4297_v40 }
 0x428   : > { %v3270_v56 = vpop.f32.mrf.mxu2  ;;  %v3335_v0 = vpop.f32.mrf.mxu3 }
 0x429   : > { %v3503_v50 = vadd.f32 %v3487_v15, %v3450_v6  ;;  %v3403_v52 = vmul.f32 %v3371_v43, %v3270_v56  ;;  %v3419_v46 = vadd.f32 %v3387_v9, %v3270_v56  ;;  %3740 = vmatmul.f32.gmra.mxu0 %v7694_v33  ;;  %3805 = vmatmul.f32.gmra.mxu1 %v7694_v33  ;;  %v3143_v42 = vpop.f32.mrf.mxu0  ;;  %v3208_v7 = vpop.f32.mrf.mxu1  ;;  %v4299_v6 = vcvt.s32.f32 %v4235_v24 }
 0x42a   : > { %3870 = vmatmul.f32.gmra.mxu2 %v7694_v33  ;;  %3935 = vmatmul.f32.gmra.mxu3 %v7694_v33  ;;  %v3372_v31 = vmul.f32 %v3208_v7, %v3143_v42  ;;  %v3388_v2 = vadd.f32 %v3208_v7, %v3143_v42  ;;  %v4298_v9 = vcvt.s32.f32 %v4234_v36  ;;  %v4229_v42 = vunpack.c.1.s8 %v7700_v17 }
 0x42b   : > { %v3521_v10 = vsub.f32 %v3503_v50, %v7436_v58  ;;  %v3435_v16 = vmul.f32 %v3403_v52, %v3335_v0  ;;  %v3451_v18 = vadd.f32 %v3419_v46, %v3335_v0  ;;  %4323 = vmatpush.msra.mxu0 %v4299_v6  ;;  %v4232_v50 = vunpack.c.2.s8 %v7721_v45 }
 0x42c   : > { %4519 = vmatpush.msra.mxu3 %v4298_v9  ;;  %v4230_v7 = vunpack.c.1.s8 %v7703_v47  ;;  %v4293_v51 = vcvt.s32.f32 %v4229_v42  ;;  %v4224_v42 = vunpack.c.0.s8 %v7721_v45 }
 0x42d   : > { %v3540_v49 = vmul.f32 %v7623_v61, %v3521_v10  ;;  %v3469_v38 = vsub.f32 %v3435_v16, %v3451_v18  ;;  %v4295_v16 = vcvt.s32.f32 %v4231_v59 }
 0x42e   : > { %4455 = vmatpush.msra.mxu2 %v4293_v51 }
 0x42f   : > { %v7714_v19 = vadd.f32 %v3540_v49, %v7436_v58  ;;  %v3488_v35 = vmul.f32 %v7619_v14, %v3469_v38  ;;  %4324 = vmatpush.msra.mxu0 %v4295_v16 }
 0x430   : > { %v3273_v26 = vpop.f32.mrf.mxu2  ;;  %v3338_v3 = vpop.f32.mrf.mxu3 }
 0x431   : > { %v3504_v12 = vadd.f32 %v3488_v35, %v3451_v18  ;;  %v3404_v62 = vmul.f32 %v3372_v31, %v3273_v26  ;;  %v3420_v58 = vadd.f32 %v3388_v2, %v3273_v26  ;;  %3743 = vmatmul.f32.gmra.mxu0 %v7714_v19  ;;  %3808 = vmatmul.f32.gmra.mxu1 %v7714_v19  ;;  %v3146_v48 = vpop.f32.mrf.mxu0  ;;  %v3211_v22 = vpop.f32.mrf.mxu1  ;;  %v4296_v18 = vcvt.s32.f32 %v4232_v50 }
 0x432   : > { %3873 = vmatmul.f32.gmra.mxu2 %v7714_v19  ;;  %3938 = vmatmul.f32.gmra.mxu3 %v7714_v19  ;;  %v3373_v57 = vmul.f32 %v3211_v22, %v3146_v48  ;;  %v3389_v56 = vadd.f32 %v3211_v22, %v3146_v48  ;;  %v4294_v2 = vcvt.s32.f32 %v4230_v7  ;;  %v4225_v48 = vunpack.c.0.s8 %v7700_v17  ;;  %v7768_v7 = vld [vmem:[%s6279_s8 + $0x330] sm:$0xff] }
 0x433   : > { %v3522_v39 = vsub.f32 %v3504_v12, %v7456_v11  ;;  %v3436_v63 = vmul.f32 %v3404_v62, %v3338_v3  ;;  %v3452_v43 = vadd.f32 %v3420_v58, %v3338_v3  ;;  %4389 = vmatpush.msra.mxu1 %v4296_v18  ;;  %v4228_v12 = vunpack.c.1.s8 %v7721_v45 }
 0x434   : > { %4520 = vmatpush.msra.mxu3 %v4294_v2  ;;  %v4226_v22 = vunpack.c.0.s8 %v7703_v47  ;;  %v4289_v9 = vcvt.s32.f32 %v4225_v48  ;;  %v7789_v48 = vld [vmem:[%s6279_s8 + $0x328] sm:$0xff] }
 0x435   : > { %v3541_v15 = vmul.f32 %v7623_v61, %v3522_v39  ;;  %v3470_v29 = vsub.f32 %v3436_v63, %v3452_v43  ;;  %v4291_v63 = vcvt.s32.f32 %v4227_v4 }
 0x436   : > { %4456 = vmatpush.msra.mxu2 %v4289_v9 }
 0x437   : > { %v7734_v0 = vadd.f32 %v3541_v15, %v7456_v11  ;;  %v3489_v54 = vmul.f32 %v7619_v14, %v3470_v29  ;;  %4325 = vmatpush.msra.mxu0 %v4291_v63  ;;  %v4290_v29 = vcvt.s32.f32 %v4226_v22  ;;  %v4217_v22 = vunpack.c.2.s8 %v7768_v7 }
 0x438   : > { %v3276_v52 = vpop.f32.mrf.mxu2  ;;  %v3341_v46 = vpop.f32.mrf.mxu3 }
 0x439   : > { %v3505_v55 = vadd.f32 %v3489_v54, %v3452_v43  ;;  %v3405_v34 = vmul.f32 %v3373_v57, %v3276_v52  ;;  %v3421_v27 = vadd.f32 %v3389_v56, %v3276_v52  ;;  %3746 = vmatmul.f32.gmra.mxu0 %v7734_v0  ;;  %3811 = vmatmul.f32.gmra.mxu1 %v7734_v0  ;;  %v3149_v11 = vpop.f32.mrf.mxu0  ;;  %v3214_v10 = vpop.f32.mrf.mxu1  ;;  %v4292_v43 = vcvt.s32.f32 %v4228_v12 }
 0x43a   : > { %3876 = vmatmul.f32.gmra.mxu2 %v7734_v0  ;;  %3941 = vmatmul.f32.gmra.mxu3 %v7734_v0  ;;  %v3374_v36 = vmul.f32 %v3214_v10, %v3149_v11  ;;  %v3390_v26 = vadd.f32 %v3214_v10, %v3149_v11  ;;  %v4221_v11 = vunpack.c.3.s8 %v7768_v7 }
 0x43b   : > { %v3523_v49 = vsub.f32 %v3505_v55, %v7470_v25  ;;  %v3437_v38 = vmul.f32 %v3405_v34, %v3341_v46  ;;  %v3453_v31 = vadd.f32 %v3421_v27, %v3341_v46  ;;  %4390 = vmatpush.msra.mxu1 %v4292_v43  ;;  %4521 = vmatpush.msra.mxu3 %v4290_v29  ;;  %v4223_v46 = vunpack.c.0.s8 %v7718_v53  ;;  %v7771_v55 = vld [vmem:[%s6279_s8 + $0x338] sm:$0xff] }
 0x43c   : > { %v4222_v10 = vunpack.c.3.s8 %v7771_v55 }
 0x43d   : > { %v3542_v35 = vmul.f32 %v7623_v61, %v3523_v49  ;;  %v3471_v60 = vsub.f32 %v3437_v38, %v3453_v31  ;;  %v4287_v45 = vcvt.s32.f32 %v4223_v46  ;;  %v4288_v49 = vcvt.s32.f32 %v4224_v42 }
 0x43e   : > { %v4285_v38 = vcvt.s32.f32 %v4221_v11 }
 0x43f   : > { %v7748_v3 = vadd.f32 %v3542_v35, %v7470_v25  ;;  %v3490_v24 = vmul.f32 %v7619_v14, %v3471_v60  ;;  %4326 = vmatpush.msra.mxu0 %v4287_v45  ;;  %v4286_v60 = vcvt.s32.f32 %v4222_v10  ;;  %4391 = vmatpush.msra.mxu1 %v4288_v49 }
 0x440   : > { %v3279_v62 = vpop.f32.mrf.mxu2  ;;  %v3344_v58 = vpop.f32.mrf.mxu3  ;;  %4457 = vmatpush.msra.mxu2 %v4285_v38 }
 0x441   : > { %v3506_v40 = vadd.f32 %v3490_v24, %v3453_v31  ;;  %v3406_v6 = vmul.f32 %v3374_v36, %v3279_v62  ;;  %v3422_v32 = vadd.f32 %v3390_v26, %v3279_v62  ;;  %3749 = vmatmul.f32.gmra.mxu0 %v7748_v3  ;;  %3814 = vmatmul.f32.gmra.mxu1 %v7748_v3  ;;  %v3152_v25 = vpop.f32.mrf.mxu0  ;;  %v3217_v39 = vpop.f32.mrf.mxu1 }
 0x442   : > { %3879 = vmatmul.f32.gmra.mxu2 %v7748_v3  ;;  %3944 = vmatmul.f32.gmra.mxu3 %v7748_v3  ;;  %v3375_v54 = vmul.f32 %v3217_v39, %v3152_v25  ;;  %v3391_v59 = vadd.f32 %v3217_v39, %v3152_v25  ;;  %v4220_v39 = vunpack.c.3.s8 %v7789_v48 }
 0x443   : > { %v3524_v17 = vsub.f32 %v3506_v40, %v7484_v41  ;;  %v3438_v47 = vmul.f32 %v3406_v6, %v3344_v58  ;;  %v3454_v15 = vadd.f32 %v3422_v32, %v3344_v58  ;;  %4522 = vmatpush.msra.mxu3 %v4286_v60  ;;  %v7786_v58 = vld [vmem:[%s6279_s8 + $0x320] sm:$0xff]  ;;  %v4218_v40 = vunpack.c.2.s8 %v7771_v55 }
 0x444   : > { %v4219_v25 = vunpack.c.3.s8 %v7786_v58  ;;  %v4284_v29 = vcvt.s32.f32 %v4220_v39  ;;  %v4215_v10 = vunpack.c.2.s8 %v7786_v58  ;;  %v4211_v39 = vunpack.c.1.s8 %v7786_v58 }
 0x445   : > { %v3543_v57 = vmul.f32 %v7623_v61, %v3524_v17  ;;  %v3472_v56 = vsub.f32 %v3438_v47, %v3454_v15  ;;  %v4281_v47 = vcvt.s32.f32 %v4217_v22 }
 0x446   : > { %4392 = vmatpush.msra.mxu1 %v4284_v29 }
 0x447   : > { %v7762_v50 = vadd.f32 %v3543_v57, %v7484_v41  ;;  %v3491_v52 = vmul.f32 %v7619_v14, %v3472_v56  ;;  %4458 = vmatpush.msra.mxu2 %v4281_v47  ;;  %v4207_v47 = vunpack.c.0.s8 %v7786_v58 }
 0x448   : > { %v3282_v34 = vpop.f32.mrf.mxu2  ;;  %v3347_v27 = vpop.f32.mrf.mxu3 }
 0x449   : > { %v3507_v16 = vadd.f32 %v3491_v52, %v3454_v15  ;;  %v3407_v18 = vmul.f32 %v3375_v54, %v3282_v34  ;;  %v3423_v41 = vadd.f32 %v3391_v59, %v3282_v34  ;;  %3752 = vmatmul.f32.gmra.mxu0 %v7762_v50  ;;  %3817 = vmatmul.f32.gmra.mxu1 %v7762_v50  ;;  %v3155_v53 = vpop.f32.mrf.mxu0  ;;  %v3220_v51 = vpop.f32.mrf.mxu1  ;;  %v4283_v15 = vcvt.s32.f32 %v4219_v25 }
 0x44a   : > { %3882 = vmatmul.f32.gmra.mxu2 %v7762_v50  ;;  %3947 = vmatmul.f32.gmra.mxu3 %v7762_v50  ;;  %v3376_v24 = vmul.f32 %v3220_v51, %v3155_v53  ;;  %v3392_v4 = vadd.f32 %v3220_v51, %v3155_v53  ;;  %v4282_v59 = vcvt.s32.f32 %v4218_v40  ;;  %v4213_v53 = vunpack.c.1.s8 %v7768_v7 }
 0x44b   : > { %v3525_v31 = vsub.f32 %v3507_v16, %v7504_v44  ;;  %v3439_v2 = vmul.f32 %v3407_v18, %v3347_v27  ;;  %v3455_v35 = vadd.f32 %v3423_v41, %v3347_v27  ;;  %4327 = vmatpush.msra.mxu0 %v4283_v15  ;;  %v4216_v16 = vunpack.c.2.s8 %v7789_v48 }
 0x44c   : > { %4523 = vmatpush.msra.mxu3 %v4282_v59  ;;  %v4214_v51 = vunpack.c.1.s8 %v7771_v55  ;;  %v4277_v60 = vcvt.s32.f32 %v4213_v53  ;;  %v4208_v15 = vunpack.c.0.s8 %v7789_v48  ;;  %v4275_v59 = vcvt.s32.f32 %v4211_v39 }
 0x44d   : > { %v3544_v36 = vmul.f32 %v7623_v61, %v3525_v31  ;;  %v3473_v26 = vsub.f32 %v3439_v2, %v3455_v35  ;;  %v4279_v2 = vcvt.s32.f32 %v4215_v10 }
 0x44e   : > { %4459 = vmatpush.msra.mxu2 %v4277_v60 }
 0x44f   : > { %v7782_v12 = vadd.f32 %v3544_v36, %v7504_v44  ;;  %v3492_v62 = vmul.f32 %v7619_v14, %v3473_v26  ;;  %4328 = vmatpush.msra.mxu0 %v4279_v2 }
 0x450   : > { %v3285_v6 = vpop.f32.mrf.mxu2  ;;  %v3350_v32 = vpop.f32.mrf.mxu3 }
 0x451   : > { %v3508_v63 = vadd.f32 %v3492_v62, %v3455_v35  ;;  %v3408_v43 = vmul.f32 %v3376_v24, %v3285_v6  ;;  %v3424_v44 = vadd.f32 %v3392_v4, %v3285_v6  ;;  %3755 = vmatmul.f32.gmra.mxu0 %v7782_v12  ;;  %3820 = vmatmul.f32.gmra.mxu1 %v7782_v12  ;;  %v3158_v9 = vpop.f32.mrf.mxu0  ;;  %v3223_v17 = vpop.f32.mrf.mxu1  ;;  %v4280_v35 = vcvt.s32.f32 %v4216_v16 }
 0x452   : > { %3885 = vmatmul.f32.gmra.mxu2 %v7782_v12  ;;  %3950 = vmatmul.f32.gmra.mxu3 %v7782_v12  ;;  %v3377_v42 = vmul.f32 %v3223_v17, %v3158_v9  ;;  %v3393_v34 = vadd.f32 %v3223_v17, %v3158_v9  ;;  %v4278_v4 = vcvt.s32.f32 %v4214_v51  ;;  %v4209_v9 = vunpack.c.0.s8 %v7768_v7  ;;  %v7831_v7 = vld [vmem:[%s6279_s8 + $0x318] sm:$0xff] }
 0x453   : > { %v3526_v57 = vsub.f32 %v3508_v63, %v7524_v23  ;;  %v3440_v56 = vmul.f32 %v3408_v43, %v3350_v32  ;;  %v3456_v54 = vadd.f32 %v3424_v44, %v3350_v32  ;;  %4393 = vmatpush.msra.mxu1 %v4280_v35  ;;  %v4212_v63 = vunpack.c.1.s8 %v7789_v48  ;;  %4329 = vmatpush.msra.mxu0 %v4275_v59 }
 0x454   : > { %4524 = vmatpush.msra.mxu3 %v4278_v4  ;;  %v4210_v17 = vunpack.c.0.s8 %v7771_v55  ;;  %v4273_v48 = vcvt.s32.f32 %v4209_v9  ;;  %v4206_v51 = vunpack.c.3.s8 %v7831_v7 }
 0x455   : > { %v3545_v52 = vmul.f32 %v7623_v61, %v3526_v57  ;;  %v3474_v46 = vsub.f32 %v3440_v56, %v3456_v54  ;;  %v4276_v58 = vcvt.s32.f32 %v4212_v63 }
 0x456   : > { %v4274_v16 = vcvt.s32.f32 %v4210_v17  ;;  %4460 = vmatpush.msra.mxu2 %v4273_v48  ;;  %v4270_v35 = vcvt.s32.f32 %v4206_v51 }
 0x457   : > { %v7802_v27 = vadd.f32 %v3545_v52, %v7524_v23  ;;  %v3493_v11 = vmul.f32 %v7619_v14, %v3474_v46  ;;  %v7828_v52 = vld [vmem:[%s6279_s8 + $0x310] sm:$0xff]  ;;  %v7836_v46 = vld [vmem:[%s6279_s8 + $0x300] sm:$0xff]  ;;  %4394 = vmatpush.msra.mxu1 %v4276_v58 }
 0x458   : > { %v3288_v18 = vpop.f32.mrf.mxu2  ;;  %v3353_v41 = vpop.f32.mrf.mxu3  ;;  %v4205_v53 = vunpack.c.3.s8 %v7828_v52  ;;  %4525 = vmatpush.msra.mxu3 %v4274_v16  ;;  %v4201_v60 = vunpack.c.2.s8 %v7828_v52 }
 0x459   : > { %v3509_v45 = vadd.f32 %v3493_v11, %v3456_v54  ;;  %v3409_v49 = vmul.f32 %v3377_v42, %v3288_v18  ;;  %v3425_v38 = vadd.f32 %v3393_v34, %v3288_v18  ;;  %3758 = vmatmul.f32.gmra.mxu0 %v7802_v27  ;;  %3823 = vmatmul.f32.gmra.mxu1 %v7802_v27  ;;  %v3161_v23 = vpop.f32.mrf.mxu0  ;;  %v3226_v31 = vpop.f32.mrf.mxu1  ;;  %v7839_v42 = vld [vmem:[%s6279_s8 + $0x308] sm:$0xff]  ;;  %v4271_v18 = vcvt.s32.f32 %v4207_v47 }
 0x45a   : > { %3888 = vmatmul.f32.gmra.mxu2 %v7802_v27  ;;  %3953 = vmatmul.f32.gmra.mxu3 %v7802_v27  ;;  %v3378_v40 = vmul.f32 %v3226_v31, %v3161_v23  ;;  %v3394_v6 = vadd.f32 %v3226_v31, %v3161_v23  ;;  %v4204_v23 = vunpack.c.3.s8 %v7839_v42  ;;  %v4269_v2 = vcvt.s32.f32 %v4205_v53 }
 0x45b   : > { %v3527_v36 = vsub.f32 %v3509_v45, %v7538_v28  ;;  %v3441_v26 = vmul.f32 %v3409_v49, %v3353_v41  ;;  %v3457_v24 = vadd.f32 %v3425_v38, %v3353_v41  ;;  %v4272_v41 = vcvt.s32.f32 %v4208_v15  ;;  %4330 = vmatpush.msra.mxu0 %v4271_v18  ;;  %4526 = vmatpush.msra.mxu3 %v4270_v35 }
 0x45c   : > { %v4203_v38 = vunpack.c.3.s8 %v7836_v46  ;;  %v4268_v4 = vcvt.s32.f32 %v4204_v23  ;;  %4461 = vmatpush.msra.mxu2 %v4269_v2  ;;  %v4200_v39 = vunpack.c.2.s8 %v7839_v42  ;;  %v4197_v23 = vunpack.c.1.s8 %v7828_v52 }
 0x45d   : > { %v3546_v62 = vmul.f32 %v7623_v61, %v3527_v36  ;;  %v3475_v22 = vsub.f32 %v3441_v26, %v3457_v24  ;;  %4395 = vmatpush.msra.mxu1 %v4272_v41  ;;  %v4195_v2 = vunpack.c.1.s8 %v7836_v46  ;;  %v4196_v35 = vunpack.c.1.s8 %v7839_v42 }
 0x45f   : > { %v7816_v32 = vadd.f32 %v3546_v62, %v7538_v28  ;;  %v3494_v25 = vmul.f32 %v7619_v14, %v3475_v22  ;;  %4396 = vmatpush.msra.mxu1 %v4268_v4  ;;  %v4260_v4 = vcvt.s32.f32 %v4196_v35 }
 0x460   : > { %v3291_v43 = vpop.f32.mrf.mxu2  ;;  %v3356_v44 = vpop.f32.mrf.mxu3 }
 0x461   : > { %v3510_v28 = vadd.f32 %v3494_v25, %v3457_v24  ;;  %v3410_v29 = vmul.f32 %v3378_v40, %v3291_v43  ;;  %v3426_v57 = vadd.f32 %v3394_v6, %v3291_v43  ;;  %3761 = vmatmul.f32.gmra.mxu0 %v7816_v32  ;;  %3826 = vmatmul.f32.gmra.mxu1 %v7816_v32  ;;  %v3164_v56 = vpop.f32.mrf.mxu0  ;;  %v3229_v54 = vpop.f32.mrf.mxu1  ;;  %v4267_v24 = vcvt.s32.f32 %v4203_v38 }
 0x462   : > { %3891 = vmatmul.f32.gmra.mxu2 %v7816_v32  ;;  %3956 = vmatmul.f32.gmra.mxu3 %v7816_v32  ;;  %v3379_v55 = vmul.f32 %v3229_v54, %v3164_v56  ;;  %v3395_v31 = vadd.f32 %v3229_v54, %v3164_v56  ;;  %v4265_v40 = vcvt.s32.f32 %v4201_v60  ;;  %v4202_v6 = vunpack.c.2.s8 %v7831_v7 }
 0x463   : > { %v3528_v34 = vsub.f32 %v3510_v28, %v7571_v8  ;;  %v3442_v11 = vmul.f32 %v3410_v29, %v3356_v44  ;;  %v3458_v10 = vadd.f32 %v3426_v57, %v3356_v44  ;;  %v4199_v25 = vunpack.c.2.s8 %v7836_v46  ;;  %4331 = vmatpush.msra.mxu0 %v4267_v24 }
 0x464   : > { %v4264_v28 = vcvt.s32.f32 %v4200_v39  ;;  %4462 = vmatpush.msra.mxu2 %v4265_v40 }
 0x465   : > { %v3547_v45 = vmul.f32 %v7623_v61, %v3528_v34  ;;  %v3476_v49 = vsub.f32 %v3442_v11, %v3458_v10  ;;  %v4263_v9 = vcvt.s32.f32 %v4199_v25  ;;  %v4192_v25 = vunpack.c.0.s8 %v7839_v42 }
 0x466   : > { %4397 = vmatpush.msra.mxu1 %v4264_v28 }
 0x467   : > { %v7849_v36 = vadd.f32 %v3547_v45, %v7571_v8  ;;  %v3495_v26 = vmul.f32 %v7619_v14, %v3476_v49  ;;  %v4266_v8 = vcvt.s32.f32 %v4202_v6  ;;  %4332 = vmatpush.msra.mxu0 %v4263_v9 }
 0x468   : > { %v3294_v62 = vpop.f32.mrf.mxu2  ;;  %v3359_v22 = vpop.f32.mrf.mxu3  ;;  %4398 = vmatpush.msra.mxu1 %v4260_v4 }
 0x469   : > { %v3511_v63 = vadd.f32 %v3495_v26, %v3458_v10  ;;  %v3411_v43 = vmul.f32 %v3379_v55, %v3294_v62  ;;  %v3427_v44 = vadd.f32 %v3395_v31, %v3294_v62  ;;  %3764 = vmatmul.f32.gmra.mxu0 %v7849_v36  ;;  %3829 = vmatmul.f32.gmra.mxu1 %v7849_v36  ;;  %v3167_v29 = vpop.f32.mrf.mxu0  ;;  %v3232_v57 = vpop.f32.mrf.mxu1  ;;  %v4198_v31 = vunpack.c.1.s8 %v7831_v7 }
 0x46a   : > { %3894 = vmatmul.f32.gmra.mxu2 %v7849_v36  ;;  %3959 = vmatmul.f32.gmra.mxu3 %v7849_v36  ;;  %v3380_v58 = vmul.f32 %v3232_v57, %v3167_v29  ;;  %v3396_v48 = vadd.f32 %v3232_v57, %v3167_v29  ;;  %v4261_v26 = vcvt.s32.f32 %v4197_v23  ;;  %v4194_v62 = vunpack.c.0.s8 %v7831_v7  ;;  %v7897_v57 = vld [vmem:[%s6285_s14 + $0x5] ss:$0 sm:$0xff] }
 0x46b   : > { %v3529_v17 = vsub.f32 %v3511_v63, %v7584_v30  ;;  %v3443_v47 = vmul.f32 %v3411_v43, %v3359_v22  ;;  %v3459_v15 = vadd.f32 %v3427_v44, %v3359_v22  ;;  %4527 = vmatpush.msra.mxu3 %v4266_v8  ;;  %v4262_v24 = vcvt.s32.f32 %v4198_v31 }
 0x46c   : > { %v4191_v22 = vunpack.c.0.s8 %v7836_v46  ;;  %4463 = vmatpush.msra.mxu2 %v4261_v26  ;;  %v4256_v43 = vcvt.s32.f32 %v4192_v25  ;;  %v7910_v26 = vld [vmem:[%s6279_s8 + $0x3f0] sm:$0xff] }
 0x46d   : > { %v3548_v56 = vmul.f32 %v7623_v61, %v3529_v17  ;;  %v3477_v54 = vsub.f32 %v3443_v47, %v3459_v15  ;;  %4528 = vmatpush.msra.mxu3 %v4262_v24  ;;  %v7913_v24 = vld [vmem:[%s6279_s8 + $0x3f8] sm:$0xff]  ;;  %v4860_v4 = vunpack.c.3.s8 %v7910_v26 }
 0x46e   : > { %v4255_v39 = vcvt.s32.f32 %v4191_v22  ;;  %4399 = vmatpush.msra.mxu1 %v4256_v43 }
 0x46f   : > { %v7862_v59 = vadd.f32 %v3548_v56, %v7584_v30  ;;  %v3496_v55 = vmul.f32 %v7619_v14, %v3477_v54 }
 0x470   : > { %v3297_v34 = vpop.f32.mrf.mxu2  ;;  %v3362_v18 = vpop.f32.mrf.mxu3 }
 0x471   : > { %v3512_v11 = vadd.f32 %v3496_v55, %v3459_v15  ;;  %v3412_v10 = vmul.f32 %v3380_v58, %v3297_v34  ;;  %v3428_v16 = vadd.f32 %v3396_v48, %v3297_v34  ;;  %3767 = vmatmul.f32.gmra.mxu0 %v7862_v59  ;;  %3832 = vmatmul.f32.gmra.mxu1 %v7862_v59 }
 0x472   : > { %3897 = vmatmul.f32.gmra.mxu2 %v7862_v59  ;;  %3962 = vmatmul.f32.gmra.mxu3 %v7862_v59 }
 0x473   : > { %v3530_v30 = vsub.f32 %v3512_v11, %v7594_v1  ;;  %v3444_v41 = vmul.f32 %v3412_v10, %v3362_v18  ;;  %v3460_v53 = vadd.f32 %v3428_v16, %v3362_v18  ;;  %v7901_v10 = vld [vmem:[%s6287_s21 + $0x5] ss:$0 sm:$0xff] }
 0x475   : > { %v3549_v51 = vmul.f32 %v7623_v61, %v3530_v30  ;;  %v3478_v45 = vsub.f32 %v3444_v41, %v3460_v53 }
 0x477   : > { %v7872_v49 = vadd.f32 %v3549_v51, %v7594_v1  ;;  %v3497_v38 = vmul.f32 %v7619_v14, %v3478_v45  ;;  %v4193_v1 = vunpack.c.0.s8 %v7828_v52  ;;  %v4259_v14 = vcvt.s32.f32 %v4195_v2 }
 0x478   : > { %v4258_v52 = vcvt.s32.f32 %v4194_v62  ;;  %v4861_v62 = vunpack.c.3.s8 %v7913_v24 }
 0x479   : > { %v3513_v60 = vadd.f32 %v3497_v38, %v3460_v53  ;;  %3770 = vmatmul.f32.gmra.mxu0 %v7872_v49  ;;  %3835 = vmatmul.f32.gmra.mxu1 %v7872_v49  ;;  %v4257_v6 = vcvt.s32.f32 %v4193_v1 }
 0x47a   : > { %3900 = vmatmul.f32.gmra.mxu2 %v7872_v49  ;;  %3965 = vmatmul.f32.gmra.mxu3 %v7872_v49 }
 0x47b   : > { %v3531_v40 = vsub.f32 %v3513_v60, %v7612_v13  ;;  %4333 = vmatpush.msra.mxu0 %v4259_v14  ;;  %4464 = vmatpush.msra.mxu2 %v4257_v6 }
 0x47c   : > { %4529 = vmatpush.msra.mxu3 %v4258_v52  ;;  %v4924_v52 = vcvt.s32.f32 %v4860_v4 }
 0x47d   : > { %v3550_v63 = vmul.f32 %v7623_v61, %v3531_v40  ;;  %4334 = vmatpush.msra.mxu0 %v4255_v39  ;;  %v4925_v39 = vcvt.s32.f32 %v4861_v62 }
 0x47e   : > { %5056 = vmatpush.msrb.mxu2 %v4924_v52 }
 0x47f   : > { %v7890_v7 = vadd.f32 %v3550_v63, %v7612_v13  ;;  %5121 = vmatpush.msrb.mxu3 %v4925_v39 }
 0x481   : > { %3773 = vmatmul.f32.gmra.mxu0 %v7890_v7  ;;  %3838 = vmatmul.f32.gmra.mxu1 %v7890_v7 }
 0x482   : > { %3903 = vmatmul.f32.gmra.mxu2 %v7890_v7  ;;  %3968 = vmatmul.f32.gmra.mxu3 %v7890_v7 }
 0x486   : > { %v3729_v46 = vpop.f32.mrf.mxu0  ;;  %v3794_v42 = vpop.f32.mrf.mxu1 }
 0x487   : > { %v3972_v61 = vmul.f32 %v3794_v42, %v3729_v46  ;;  %v3988_v44 = vadd.f32 %v3794_v42, %v3729_v46 }
 0x48d   : > { %v3859_v8 = vpop.f32.mrf.mxu2  ;;  %v3924_v9 = vpop.f32.mrf.mxu3 }
 0x48e   : > { %v4004_v17 = vmul.f32 %v3972_v61, %v3859_v8  ;;  %v4020_v13 = vadd.f32 %v3988_v44, %v3859_v8  ;;  %v3732_v47 = vpop.f32.mrf.mxu0  ;;  %v3797_v15 = vpop.f32.mrf.mxu1 }
 0x48f   : > { %v3973_v55 = vmul.f32 %v3797_v15, %v3732_v47  ;;  %v3989_v58 = vadd.f32 %v3797_v15, %v3732_v47  ;;  %v7931_v47 = vld [vmem:[%s6279_s8 + $0x3e8] sm:$0xff]  ;;  %v4856_v15 = vunpack.c.2.s8 %v7910_v26 }
 0x490   : > { %v4036_v28 = vmul.f32 %v4004_v17, %v3924_v9  ;;  %v4052_v29 = vadd.f32 %v4020_v13, %v3924_v9  ;;  %v7928_v13 = vld [vmem:[%s6279_s8 + $0x3e0] sm:$0xff]  ;;  %v4855_v4 = vunpack.c.2.s8 %v7931_v47 }
 0x492   : > { %v4070_v56 = vsub.f32 %v4036_v28, %v4052_v29  ;;  %v4857_v28 = vunpack.c.2.s8 %v7913_v24 }
 0x494   : > { %v4089_v54 = vmul.f32 %v7897_v57, %v4070_v56 }
 0x495   : > { %v3862_v48 = vpop.f32.mrf.mxu2  ;;  %v3927_v34 = vpop.f32.mrf.mxu3 }
 0x496   : > { %v4105_v11 = vadd.f32 %v4089_v54, %v4052_v29  ;;  %v4005_v16 = vmul.f32 %v3973_v55, %v3862_v48  ;;  %v4021_v18 = vadd.f32 %v3989_v58, %v3862_v48  ;;  %v3735_v30 = vpop.f32.mrf.mxu0  ;;  %v3800_v41 = vpop.f32.mrf.mxu1  ;;  %v4858_v54 = vunpack.c.3.s8 %v7928_v13 }
 0x497   : > { %v3974_v35 = vmul.f32 %v3800_v41, %v3735_v30  ;;  %v3990_v60 = vadd.f32 %v3800_v41, %v3735_v30  ;;  %v4859_v55 = vunpack.c.3.s8 %v7931_v47 }
 0x498   : > { %v4123_v53 = vsub.f32 %v4105_v11, %v7628_v5  ;;  %v4037_v51 = vmul.f32 %v4005_v16, %v3927_v34  ;;  %v4053_v45 = vadd.f32 %v4021_v18, %v3927_v34  ;;  %v4920_v16 = vcvt.s32.f32 %v4856_v15 }
 0x499   : > { %v4922_v18 = vcvt.s32.f32 %v4858_v54  ;;  %v4923_v30 = vcvt.s32.f32 %v4859_v55  ;;  %v4850_v55 = vunpack.c.1.s8 %v7928_v13 }
 0x49a   : > { %v4142_v38 = vmul.f32 %v7901_v10, %v4123_v53  ;;  %v4071_v23 = vsub.f32 %v4037_v51, %v4053_v45  ;;  %5057 = vmatpush.msrb.mxu2 %v4920_v16 }
 0x49b   : > { %4926 = vmatpush.msrb.mxu0 %v4922_v18  ;;  %4991 = vmatpush.msrb.mxu1 %v4923_v30 }
 0x49c   : > { %v7906_v31 = vadd.f32 %v4142_v38, %v7628_v5  ;;  %v4090_v2 = vmul.f32 %v7897_v57, %v4071_v23 }
 0x49d   : > { %v3865_v1 = vpop.f32.mrf.mxu2  ;;  %v3930_v14 = vpop.f32.mrf.mxu3 }
 0x49e   : > { %v4106_v22 = vadd.f32 %v4090_v2, %v4053_v45  ;;  %v4006_v40 = vmul.f32 %v3974_v35, %v3865_v1  ;;  %v4022_v6 = vadd.f32 %v3990_v60, %v3865_v1  ;;  %4335 = vmatmul.f32.vlgmr.msra.gmra.mxu0 %v7906_v31  ;;  %4400 = vmatmul.f32.vlgmr.msra.gmra.mxu1 %v7906_v31  ;;  %v3738_v5 = vpop.f32.mrf.mxu0  ;;  %v3803_v25 = vpop.f32.mrf.mxu1  ;;  %v4921_v45 = vcvt.s32.f32 %v4857_v28 }
 0x49f   : > { %4465 = vmatmul.f32.vlgmr.msra.gmra.mxu2 %v7906_v31  ;;  %4530 = vmatmul.f32.vlgmr.msra.gmra.mxu3 %v7906_v31  ;;  %v3975_v44 = vmul.f32 %v3803_v25, %v3738_v5  ;;  %v3991_v8 = vadd.f32 %v3803_v25, %v3738_v5 }
 0x4a0   : > { %v4124_v63 = vsub.f32 %v4106_v22, %v7646_v21  ;;  %v4038_v43 = vmul.f32 %v4006_v40, %v3930_v14  ;;  %v4054_v46 = vadd.f32 %v4022_v6, %v3930_v14  ;;  %5122 = vmatpush.msrb.mxu3 %v4921_v45  ;;  %v4854_v14 = vunpack.c.2.s8 %v7928_v13 }
 0x4a1   : > { %v4852_v40 = vunpack.c.1.s8 %v7910_v26  ;;  %v4853_v6 = vunpack.c.1.s8 %v7913_v24 }
 0x4a2   : > { %v4143_v42 = vmul.f32 %v7901_v10, %v4124_v63  ;;  %v4072_v61 = vsub.f32 %v4038_v43, %v4054_v46  ;;  %v4918_v63 = vcvt.s32.f32 %v4854_v14  ;;  %v4919_v43 = vcvt.s32.f32 %v4855_v4 }
 0x4a4   : > { %v7924_v9 = vadd.f32 %v4143_v42, %v7646_v21  ;;  %v4091_v17 = vmul.f32 %v7897_v57, %v4072_v61  ;;  %4927 = vmatpush.msrb.mxu0 %v4918_v63  ;;  %4992 = vmatpush.msrb.mxu1 %v4919_v43 }
 0x4a5   : > { %v3868_v29 = vpop.f32.mrf.mxu2  ;;  %v3933_v56 = vpop.f32.mrf.mxu3 }
 0x4a6   : > { %v4107_v58 = vadd.f32 %v4091_v17, %v4054_v46  ;;  %v4007_v48 = vmul.f32 %v3975_v44, %v3868_v29  ;;  %v4023_v21 = vadd.f32 %v3991_v8, %v3868_v29  ;;  %4338 = vmatmul.f32.gmra.mxu0 %v7924_v9  ;;  %4403 = vmatmul.f32.gmra.mxu1 %v7924_v9  ;;  %v3741_v34 = vpop.f32.mrf.mxu0  ;;  %v3806_v11 = vpop.f32.mrf.mxu1  ;;  %v4916_v46 = vcvt.s32.f32 %v4852_v40 }
 0x4a7   : > { %4468 = vmatmul.f32.gmra.mxu2 %v7924_v9  ;;  %4533 = vmatmul.f32.gmra.mxu3 %v7924_v9  ;;  %v3976_v2 = vmul.f32 %v3806_v11, %v3741_v34  ;;  %v3992_v35 = vadd.f32 %v3806_v11, %v3741_v34  ;;  %v4917_v8 = vcvt.s32.f32 %v4853_v6  ;;  %v4848_v34 = vunpack.c.0.s8 %v7910_v26  ;;  %v7978_v6 = vld [vmem:[%s6279_s8 + $0x3d0] sm:$0xff] }
 0x4a8   : > { %v4125_v41 = vsub.f32 %v4107_v58, %v7666_v37  ;;  %v4039_v53 = vmul.f32 %v4007_v48, %v3933_v56  ;;  %v4055_v51 = vadd.f32 %v4023_v21, %v3933_v56  ;;  %5058 = vmatpush.msrb.mxu2 %v4916_v46  ;;  %v4851_v58 = vunpack.c.1.s8 %v7931_v47 }
 0x4a9   : > { %5123 = vmatpush.msrb.mxu3 %v4917_v8  ;;  %v4849_v11 = vunpack.c.0.s8 %v7913_v24  ;;  %v4912_v45 = vcvt.s32.f32 %v4848_v34  ;;  %v4847_v40 = vunpack.c.0.s8 %v7931_v47  ;;  %v7999_v34 = vld [vmem:[%s6279_s8 + $0x3c8] sm:$0xff] }
 0x4aa   : > { %v4144_v38 = vmul.f32 %v7901_v10, %v4125_v41  ;;  %v4073_v23 = vsub.f32 %v4039_v53, %v4055_v51  ;;  %v4914_v53 = vcvt.s32.f32 %v4850_v55 }
 0x4ab   : > { %5059 = vmatpush.msrb.mxu2 %v4912_v45 }
 0x4ac   : > { %v7944_v60 = vadd.f32 %v4144_v38, %v7666_v37  ;;  %v4092_v1 = vmul.f32 %v7897_v57, %v4073_v23  ;;  %4928 = vmatpush.msrb.mxu0 %v4914_v53  ;;  %v4913_v23 = vcvt.s32.f32 %v4849_v11  ;;  %v4840_v11 = vunpack.c.2.s8 %v7978_v6 }
 0x4ad   : > { %v3871_v62 = vpop.f32.mrf.mxu2  ;;  %v3936_v22 = vpop.f32.mrf.mxu3 }
 0x4ae   : > { %v4108_v5 = vadd.f32 %v4092_v1, %v4055_v51  ;;  %v4008_v25 = vmul.f32 %v3976_v2, %v3871_v62  ;;  %v4024_v52 = vadd.f32 %v3992_v35, %v3871_v62  ;;  %4341 = vmatmul.f32.gmra.mxu0 %v7944_v60  ;;  %4406 = vmatmul.f32.gmra.mxu1 %v7944_v60  ;;  %v3744_v37 = vpop.f32.mrf.mxu0  ;;  %v3809_v39 = vpop.f32.mrf.mxu1  ;;  %v4915_v51 = vcvt.s32.f32 %v4851_v58 }
 0x4af   : > { %4471 = vmatmul.f32.gmra.mxu2 %v7944_v60  ;;  %4536 = vmatmul.f32.gmra.mxu3 %v7944_v60  ;;  %v3977_v28 = vmul.f32 %v3809_v39, %v3744_v37  ;;  %v3993_v29 = vadd.f32 %v3809_v39, %v3744_v37  ;;  %v4844_v37 = vunpack.c.3.s8 %v7978_v6 }
 0x4b0   : > { %v4126_v42 = vsub.f32 %v4108_v5, %v7680_v20  ;;  %v4040_v61 = vmul.f32 %v4008_v25, %v3936_v22  ;;  %v4056_v44 = vadd.f32 %v4024_v52, %v3936_v22  ;;  %4993 = vmatpush.msrb.mxu1 %v4915_v51  ;;  %5124 = vmatpush.msrb.mxu3 %v4913_v23  ;;  %v4846_v22 = vunpack.c.0.s8 %v7928_v13  ;;  %v7981_v5 = vld [vmem:[%s6279_s8 + $0x3d8] sm:$0xff] }
 0x4b1   : > { %v4845_v39 = vunpack.c.3.s8 %v7981_v5 }
 0x4b2   : > { %v4145_v17 = vmul.f32 %v7901_v10, %v4126_v42  ;;  %v4074_v15 = vsub.f32 %v4040_v61, %v4056_v44  ;;  %v4910_v47 = vcvt.s32.f32 %v4846_v22  ;;  %v4911_v42 = vcvt.s32.f32 %v4847_v40 }
 0x4b3   : > { %v4908_v61 = vcvt.s32.f32 %v4844_v37 }
 0x4b4   : > { %v7958_v56 = vadd.f32 %v4145_v17, %v7680_v20  ;;  %v4093_v54 = vmul.f32 %v7897_v57, %v4074_v15  ;;  %4929 = vmatpush.msrb.mxu0 %v4910_v47  ;;  %v4909_v15 = vcvt.s32.f32 %v4845_v39  ;;  %4994 = vmatpush.msrb.mxu1 %v4911_v42 }
 0x4b5   : > { %v3874_v48 = vpop.f32.mrf.mxu2  ;;  %v3939_v21 = vpop.f32.mrf.mxu3  ;;  %5060 = vmatpush.msrb.mxu2 %v4908_v61 }
 0x4b6   : > { %v4109_v16 = vadd.f32 %v4093_v54, %v4056_v44  ;;  %v4009_v18 = vmul.f32 %v3977_v28, %v3874_v48  ;;  %v4025_v30 = vadd.f32 %v3993_v29, %v3874_v48  ;;  %4344 = vmatmul.f32.gmra.mxu0 %v7958_v56  ;;  %4409 = vmatmul.f32.gmra.mxu1 %v7958_v56  ;;  %v3747_v20 = vpop.f32.mrf.mxu0  ;;  %v3812_v41 = vpop.f32.mrf.mxu1 }
 0x4b7   : > { %4474 = vmatmul.f32.gmra.mxu2 %v7958_v56  ;;  %4539 = vmatmul.f32.gmra.mxu3 %v7958_v56  ;;  %v3978_v1 = vmul.f32 %v3812_v41, %v3747_v20  ;;  %v3994_v14 = vadd.f32 %v3812_v41, %v3747_v20  ;;  %v4843_v41 = vunpack.c.3.s8 %v7999_v34 }
 0x4b8   : > { %v4127_v26 = vsub.f32 %v4109_v16, %v7694_v33  ;;  %v4041_v24 = vmul.f32 %v4009_v18, %v3939_v21  ;;  %v4057_v38 = vadd.f32 %v4025_v30, %v3939_v21  ;;  %5125 = vmatpush.msrb.mxu3 %v4909_v15  ;;  %v7996_v21 = vld [vmem:[%s6279_s8 + $0x3c0] sm:$0xff]  ;;  %v4841_v16 = vunpack.c.2.s8 %v7981_v5 }
 0x4b9   : > { %v4842_v20 = vunpack.c.3.s8 %v7996_v21  ;;  %v4907_v23 = vcvt.s32.f32 %v4843_v41  ;;  %v4838_v39 = vunpack.c.2.s8 %v7996_v21  ;;  %v4834_v41 = vunpack.c.1.s8 %v7996_v21 }
 0x4ba   : > { %v4146_v2 = vmul.f32 %v7901_v10, %v4127_v26  ;;  %v4075_v35 = vsub.f32 %v4041_v24, %v4057_v38  ;;  %v4904_v24 = vcvt.s32.f32 %v4840_v11 }
 0x4bb   : > { %4995 = vmatpush.msrb.mxu1 %v4907_v23 }
 0x4bc   : > { %v7972_v4 = vadd.f32 %v4146_v2, %v7694_v33  ;;  %v4094_v62 = vmul.f32 %v7897_v57, %v4075_v35  ;;  %5061 = vmatpush.msrb.mxu2 %v4904_v24 }
 0x4bd   : > { %v3877_v25 = vpop.f32.mrf.mxu2  ;;  %v3942_v52 = vpop.f32.mrf.mxu3 }
 0x4be   : > { %v4110_v63 = vadd.f32 %v4094_v62, %v4057_v38  ;;  %v4010_v43 = vmul.f32 %v3978_v1, %v3877_v25  ;;  %v4026_v33 = vadd.f32 %v3994_v14, %v3877_v25  ;;  %4347 = vmatmul.f32.gmra.mxu0 %v7972_v4  ;;  %4412 = vmatmul.f32.gmra.mxu1 %v7972_v4  ;;  %v3750_v13 = vpop.f32.mrf.mxu0  ;;  %v3815_v46 = vpop.f32.mrf.mxu1  ;;  %v4906_v38 = vcvt.s32.f32 %v4842_v20 }
 0x4bf   : > { %4477 = vmatmul.f32.gmra.mxu2 %v7972_v4  ;;  %4542 = vmatmul.f32.gmra.mxu3 %v7972_v4  ;;  %v3979_v54 = vmul.f32 %v3815_v46, %v3750_v13  ;;  %v3995_v55 = vadd.f32 %v3815_v46, %v3750_v13  ;;  %v4905_v14 = vcvt.s32.f32 %v4841_v16  ;;  %v4836_v13 = vunpack.c.1.s8 %v7978_v6 }
 0x4c0   : > { %v4128_v44 = vsub.f32 %v4110_v63, %v7714_v19  ;;  %v4042_v8 = vmul.f32 %v4010_v43, %v3942_v52  ;;  %v4058_v17 = vadd.f32 %v4026_v33, %v3942_v52  ;;  %4930 = vmatpush.msrb.mxu0 %v4906_v38  ;;  %v4839_v63 = vunpack.c.2.s8 %v7999_v34 }
 0x4c1   : > { %5126 = vmatpush.msrb.mxu3 %v4905_v14  ;;  %v4837_v46 = vunpack.c.1.s8 %v7981_v5  ;;  %v4900_v15 = vcvt.s32.f32 %v4836_v13  ;;  %v4831_v13 = vunpack.c.0.s8 %v7999_v34 }
 0x4c2   : > { %v4147_v28 = vmul.f32 %v7901_v10, %v4128_v44  ;;  %v4076_v29 = vsub.f32 %v4042_v8, %v4058_v17  ;;  %v4902_v8 = vcvt.s32.f32 %v4838_v39 }
 0x4c3   : > { %5062 = vmatpush.msrb.mxu2 %v4900_v15 }
 0x4c4   : > { %v7992_v58 = vadd.f32 %v4147_v28, %v7714_v19  ;;  %v4095_v48 = vmul.f32 %v7897_v57, %v4076_v29  ;;  %4931 = vmatpush.msrb.mxu0 %v4902_v8 }
 0x4c5   : > { %v3880_v18 = vpop.f32.mrf.mxu2  ;;  %v3945_v30 = vpop.f32.mrf.mxu3 }
 0x4c6   : > { %v4111_v53 = vadd.f32 %v4095_v48, %v4058_v17  ;;  %v4011_v51 = vmul.f32 %v3979_v54, %v3880_v18  ;;  %v4027_v19 = vadd.f32 %v3995_v55, %v3880_v18  ;;  %4350 = vmatmul.f32.gmra.mxu0 %v7992_v58  ;;  %4415 = vmatmul.f32.gmra.mxu1 %v7992_v58  ;;  %v3753_v45 = vpop.f32.mrf.mxu0  ;;  %v3818_v26 = vpop.f32.mrf.mxu1  ;;  %v4903_v17 = vcvt.s32.f32 %v4839_v63 }
 0x4c7   : > { %4480 = vmatmul.f32.gmra.mxu2 %v7992_v58  ;;  %4545 = vmatmul.f32.gmra.mxu3 %v7992_v58  ;;  %v3980_v40 = vmul.f32 %v3818_v26, %v3753_v45  ;;  %v3996_v25 = vadd.f32 %v3818_v26, %v3753_v45  ;;  %v4901_v55 = vcvt.s32.f32 %v4837_v46  ;;  %v4832_v45 = vunpack.c.0.s8 %v7978_v6  ;;  %v8046_v46 = vld [vmem:[%s6279_s8 + $0x3b0] sm:$0xff] }
 0x4c8   : > { %v4129_v2 = vsub.f32 %v4111_v53, %v7734_v0  ;;  %v4043_v35 = vmul.f32 %v4011_v51, %v3945_v30  ;;  %v4059_v1 = vadd.f32 %v4027_v19, %v3945_v30  ;;  %4996 = vmatpush.msrb.mxu1 %v4903_v17  ;;  %v4835_v53 = vunpack.c.1.s8 %v7999_v34 }
 0x4c9   : > { %5127 = vmatpush.msrb.mxu3 %v4901_v55  ;;  %v4833_v26 = vunpack.c.0.s8 %v7981_v5  ;;  %v4896_v14 = vcvt.s32.f32 %v4832_v45  ;;  %v8067_v45 = vld [vmem:[%s6279_s8 + $0x3a8] sm:$0xff] }
 0x4ca   : > { %v4148_v62 = vmul.f32 %v7901_v10, %v4129_v2  ;;  %v4077_v22 = vsub.f32 %v4043_v35, %v4059_v1  ;;  %v4898_v35 = vcvt.s32.f32 %v4834_v41 }
 0x4cb   : > { %5063 = vmatpush.msrb.mxu2 %v4896_v14 }
 0x4cc   : > { %v8012_v52 = vadd.f32 %v4148_v62, %v7734_v0  ;;  %v4096_v37 = vmul.f32 %v7897_v57, %v4077_v22  ;;  %4932 = vmatpush.msrb.mxu0 %v4898_v35  ;;  %v4897_v22 = vcvt.s32.f32 %v4833_v26  ;;  %v4824_v26 = vunpack.c.2.s8 %v8046_v46 }
 0x4cd   : > { %v3883_v43 = vpop.f32.mrf.mxu2  ;;  %v3948_v33 = vpop.f32.mrf.mxu3 }
 0x4ce   : > { %v4112_v47 = vadd.f32 %v4096_v37, %v4059_v1  ;;  %v4012_v42 = vmul.f32 %v3980_v40, %v3883_v43  ;;  %v4028_v61 = vadd.f32 %v3996_v25, %v3883_v43  ;;  %4353 = vmatmul.f32.gmra.mxu0 %v8012_v52  ;;  %4418 = vmatmul.f32.gmra.mxu1 %v8012_v52  ;;  %v3756_v0 = vpop.f32.mrf.mxu0  ;;  %v3821_v44 = vpop.f32.mrf.mxu1  ;;  %v4899_v1 = vcvt.s32.f32 %v4835_v53 }
 0x4cf   : > { %4483 = vmatmul.f32.gmra.mxu2 %v8012_v52  ;;  %4548 = vmatmul.f32.gmra.mxu3 %v8012_v52  ;;  %v3981_v16 = vmul.f32 %v3821_v44, %v3756_v0  ;;  %v3997_v18 = vadd.f32 %v3821_v44, %v3756_v0  ;;  %v4828_v0 = vunpack.c.3.s8 %v8046_v46 }
 0x4d0   : > { %v4130_v28 = vsub.f32 %v4112_v47, %v7748_v3  ;;  %v4044_v29 = vmul.f32 %v4012_v42, %v3948_v33  ;;  %v4060_v54 = vadd.f32 %v4028_v61, %v3948_v33  ;;  %4997 = vmatpush.msrb.mxu1 %v4899_v1  ;;  %5128 = vmatpush.msrb.mxu3 %v4897_v22  ;;  %v4830_v33 = vunpack.c.0.s8 %v7996_v21  ;;  %v8049_v47 = vld [vmem:[%s6279_s8 + $0x3b8] sm:$0xff] }
 0x4d1   : > { %v4829_v44 = vunpack.c.3.s8 %v8049_v47 }
 0x4d2   : > { %v4149_v48 = vmul.f32 %v7901_v10, %v4130_v28  ;;  %v4078_v11 = vsub.f32 %v4044_v29, %v4060_v54  ;;  %v4894_v34 = vcvt.s32.f32 %v4830_v33  ;;  %v4895_v28 = vcvt.s32.f32 %v4831_v13 }
 0x4d3   : > { %v4892_v29 = vcvt.s32.f32 %v4828_v0 }
 0x4d4   : > { %v8026_v30 = vadd.f32 %v4149_v48, %v7748_v3  ;;  %v4097_v20 = vmul.f32 %v7897_v57, %v4078_v11  ;;  %4933 = vmatpush.msrb.mxu0 %v4894_v34  ;;  %v4893_v11 = vcvt.s32.f32 %v4829_v44  ;;  %4998 = vmatpush.msrb.mxu1 %v4895_v28 }
 0x4d5   : > { %v3886_v51 = vpop.f32.mrf.mxu2  ;;  %v3951_v19 = vpop.f32.mrf.mxu3  ;;  %5064 = vmatpush.msrb.mxu2 %v4892_v29 }
 0x4d6   : > { %v4113_v24 = vadd.f32 %v4097_v20, %v4060_v54  ;;  %v4013_v38 = vmul.f32 %v3981_v16, %v3886_v51  ;;  %v4029_v23 = vadd.f32 %v3997_v18, %v3886_v51  ;;  %4356 = vmatmul.f32.gmra.mxu0 %v8026_v30  ;;  %4421 = vmatmul.f32.gmra.mxu1 %v8026_v30  ;;  %v3759_v3 = vpop.f32.mrf.mxu0  ;;  %v3824_v2 = vpop.f32.mrf.mxu1 }
 0x4d7   : > { %4486 = vmatmul.f32.gmra.mxu2 %v8026_v30  ;;  %4551 = vmatmul.f32.gmra.mxu3 %v8026_v30  ;;  %v3982_v37 = vmul.f32 %v3824_v2, %v3759_v3  ;;  %v3998_v39 = vadd.f32 %v3824_v2, %v3759_v3  ;;  %v4827_v2 = vunpack.c.3.s8 %v8067_v45 }
 0x4d8   : > { %v4131_v6 = vsub.f32 %v4113_v24, %v7762_v50  ;;  %v4045_v5 = vmul.f32 %v4013_v38, %v3951_v19  ;;  %v4061_v62 = vadd.f32 %v4029_v23, %v3951_v19  ;;  %5129 = vmatpush.msrb.mxu3 %v4893_v11  ;;  %v8064_v19 = vld [vmem:[%s6279_s8 + $0x3a0] sm:$0xff]  ;;  %v4825_v24 = vunpack.c.2.s8 %v8049_v47 }
 0x4d9   : > { %v4826_v3 = vunpack.c.3.s8 %v8064_v19  ;;  %v4891_v22 = vcvt.s32.f32 %v4827_v2  ;;  %v4822_v44 = vunpack.c.2.s8 %v8064_v19  ;;  %v4818_v2 = vunpack.c.1.s8 %v8064_v19 }
 0x4da   : > { %v4150_v40 = vmul.f32 %v7901_v10, %v4131_v6  ;;  %v4079_v25 = vsub.f32 %v4045_v5, %v4061_v62  ;;  %v4888_v5 = vcvt.s32.f32 %v4824_v26 }
 0x4db   : > { %4999 = vmatpush.msrb.mxu1 %v4891_v22 }
 0x4dc   : > { %v8040_v63 = vadd.f32 %v4150_v40, %v7762_v50  ;;  %v4098_v43 = vmul.f32 %v7897_v57, %v4079_v25  ;;  %5065 = vmatpush.msrb.mxu2 %v4888_v5  ;;  %v4814_v5 = vunpack.c.0.s8 %v8064_v19 }
 0x4dd   : > { %v3889_v42 = vpop.f32.mrf.mxu2  ;;  %v3954_v61 = vpop.f32.mrf.mxu3 }
 0x4de   : > { %v4114_v8 = vadd.f32 %v4098_v43, %v4061_v62  ;;  %v4014_v17 = vmul.f32 %v3982_v37, %v3889_v42  ;;  %v4030_v50 = vadd.f32 %v3998_v39, %v3889_v42  ;;  %4359 = vmatmul.f32.gmra.mxu0 %v8040_v63  ;;  %4424 = vmatmul.f32.gmra.mxu1 %v8040_v63  ;;  %v3762_v21 = vpop.f32.mrf.mxu0  ;;  %v3827_v15 = vpop.f32.mrf.mxu1  ;;  %v4890_v62 = vcvt.s32.f32 %v4826_v3 }
 0x4df   : > { %4489 = vmatmul.f32.gmra.mxu2 %v8040_v63  ;;  %4554 = vmatmul.f32.gmra.mxu3 %v8040_v63  ;;  %v3983_v20 = vmul.f32 %v3827_v15, %v3762_v21  ;;  %v3999_v41 = vadd.f32 %v3827_v15, %v3762_v21  ;;  %v4889_v39 = vcvt.s32.f32 %v4825_v24  ;;  %v4820_v21 = vunpack.c.1.s8 %v8046_v46 }
 0x4e0   : > { %v4132_v54 = vsub.f32 %v4114_v8, %v7782_v12  ;;  %v4046_v55 = vmul.f32 %v4014_v17, %v3954_v61  ;;  %v4062_v48 = vadd.f32 %v4030_v50, %v3954_v61  ;;  %4934 = vmatpush.msrb.mxu0 %v4890_v62  ;;  %v4823_v8 = vunpack.c.2.s8 %v8067_v45 }
 0x4e1   : > { %5130 = vmatpush.msrb.mxu3 %v4889_v39  ;;  %v4821_v15 = vunpack.c.1.s8 %v8049_v47  ;;  %v4884_v11 = vcvt.s32.f32 %v4820_v21  ;;  %v4815_v62 = vunpack.c.0.s8 %v8067_v45  ;;  %v4882_v39 = vcvt.s32.f32 %v4818_v2 }
 0x4e2   : > { %v4151_v16 = vmul.f32 %v7901_v10, %v4132_v54  ;;  %v4080_v18 = vsub.f32 %v4046_v55, %v4062_v48  ;;  %v4886_v55 = vcvt.s32.f32 %v4822_v44 }
 0x4e3   : > { %5066 = vmatpush.msrb.mxu2 %v4884_v11 }
 0x4e4   : > { %v8060_v53 = vadd.f32 %v4151_v16, %v7782_v12  ;;  %v4099_v51 = vmul.f32 %v7897_v57, %v4080_v18  ;;  %4935 = vmatpush.msrb.mxu0 %v4886_v55 }
 0x4e5   : > { %v3892_v38 = vpop.f32.mrf.mxu2  ;;  %v3957_v23 = vpop.f32.mrf.mxu3 }
 0x4e6   : > { %v4115_v35 = vadd.f32 %v4099_v51, %v4062_v48  ;;  %v4015_v1 = vmul.f32 %v3983_v20, %v3892_v38  ;;  %v4031_v12 = vadd.f32 %v3999_v41, %v3892_v38  ;;  %4362 = vmatmul.f32.gmra.mxu0 %v8060_v53  ;;  %4427 = vmatmul.f32.gmra.mxu1 %v8060_v53  ;;  %v3765_v14 = vpop.f32.mrf.mxu0  ;;  %v3830_v6 = vpop.f32.mrf.mxu1  ;;  %v4887_v48 = vcvt.s32.f32 %v4823_v8 }
 0x4e7   : > { %4492 = vmatmul.f32.gmra.mxu2 %v8060_v53  ;;  %4557 = vmatmul.f32.gmra.mxu3 %v8060_v53  ;;  %v3984_v13 = vmul.f32 %v3830_v6, %v3765_v14  ;;  %v4000_v42 = vadd.f32 %v3830_v6, %v3765_v14  ;;  %v4885_v41 = vcvt.s32.f32 %v4821_v15  ;;  %v4816_v14 = vunpack.c.0.s8 %v8046_v46  ;;  %v8109_v46 = vld [vmem:[%s6279_s8 + $0x398] sm:$0xff] }
 0x4e8   : > { %v4133_v40 = vsub.f32 %v4115_v35, %v7802_v27  ;;  %v4047_v25 = vmul.f32 %v4015_v1, %v3957_v23  ;;  %v4063_v37 = vadd.f32 %v4031_v12, %v3957_v23  ;;  %5000 = vmatpush.msrb.mxu1 %v4887_v48  ;;  %v4819_v35 = vunpack.c.1.s8 %v8067_v45  ;;  %4936 = vmatpush.msrb.mxu0 %v4882_v39 }
 0x4e9   : > { %5131 = vmatpush.msrb.mxu3 %v4885_v41  ;;  %v4817_v6 = vunpack.c.0.s8 %v8049_v47  ;;  %v4880_v45 = vcvt.s32.f32 %v4816_v14  ;;  %v4813_v15 = vunpack.c.3.s8 %v8109_v46 }
 0x4ea   : > { %v4152_v43 = vmul.f32 %v7901_v10, %v4133_v40  ;;  %v4081_v33 = vsub.f32 %v4047_v25, %v4063_v37  ;;  %v4883_v19 = vcvt.s32.f32 %v4819_v35 }
 0x4eb   : > { %v4881_v8 = vcvt.s32.f32 %v4817_v6  ;;  %5067 = vmatpush.msrb.mxu2 %v4880_v45  ;;  %v4877_v48 = vcvt.s32.f32 %v4813_v15 }
 0x4ec   : > { %v8080_v61 = vadd.f32 %v4152_v43, %v7802_v27  ;;  %v4100_v0 = vmul.f32 %v7897_v57, %v4081_v33  ;;  %v8106_v43 = vld [vmem:[%s6279_s8 + $0x390] sm:$0xff]  ;;  %v8114_v33 = vld [vmem:[%s6279_s8 + $0x380] sm:$0xff]  ;;  %5001 = vmatpush.msrb.mxu1 %v4883_v19 }
 0x4ed   : > { %v3895_v17 = vpop.f32.mrf.mxu2  ;;  %v3960_v50 = vpop.f32.mrf.mxu3  ;;  %v4812_v21 = vunpack.c.3.s8 %v8106_v43  ;;  %5132 = vmatpush.msrb.mxu3 %v4881_v8  ;;  %v4808_v11 = vunpack.c.2.s8 %v8106_v43 }
 0x4ee   : > { %v4116_v34 = vadd.f32 %v4100_v0, %v4063_v37  ;;  %v4016_v28 = vmul.f32 %v3984_v13, %v3895_v17  ;;  %v4032_v29 = vadd.f32 %v4000_v42, %v3895_v17  ;;  %4365 = vmatmul.f32.gmra.mxu0 %v8080_v61  ;;  %4430 = vmatmul.f32.gmra.mxu1 %v8080_v61  ;;  %v3768_v27 = vpop.f32.mrf.mxu0  ;;  %v3833_v54 = vpop.f32.mrf.mxu1  ;;  %v8117_v13 = vld [vmem:[%s6279_s8 + $0x388] sm:$0xff]  ;;  %v4878_v17 = vcvt.s32.f32 %v4814_v5 }
 0x4ef   : > { %4495 = vmatmul.f32.gmra.mxu2 %v8080_v61  ;;  %4560 = vmatmul.f32.gmra.mxu3 %v8080_v61  ;;  %v3985_v24 = vmul.f32 %v3833_v54, %v3768_v27  ;;  %v4001_v38 = vadd.f32 %v3833_v54, %v3768_v27  ;;  %v4811_v27 = vunpack.c.3.s8 %v8117_v13  ;;  %v4876_v55 = vcvt.s32.f32 %v4812_v21 }
 0x4f0   : > { %v4134_v16 = vsub.f32 %v4116_v34, %v7816_v32  ;;  %v4048_v18 = vmul.f32 %v4016_v28, %v3960_v50  ;;  %v4064_v20 = vadd.f32 %v4032_v29, %v3960_v50  ;;  %v4879_v50 = vcvt.s32.f32 %v4815_v62  ;;  %4937 = vmatpush.msrb.mxu0 %v4878_v17  ;;  %5133 = vmatpush.msrb.mxu3 %v4877_v48 }
 0x4f1   : > { %v4810_v29 = vunpack.c.3.s8 %v8114_v33  ;;  %v4875_v41 = vcvt.s32.f32 %v4811_v27  ;;  %5068 = vmatpush.msrb.mxu2 %v4876_v55  ;;  %v4807_v2 = vunpack.c.2.s8 %v8117_v13  ;;  %v4804_v27 = vunpack.c.1.s8 %v8106_v43 }
 0x4f2   : > { %v4153_v51 = vmul.f32 %v7901_v10, %v4134_v16  ;;  %v4082_v26 = vsub.f32 %v4048_v18, %v4064_v20  ;;  %5002 = vmatpush.msrb.mxu1 %v4879_v50  ;;  %v4802_v55 = vunpack.c.1.s8 %v8114_v33  ;;  %v4803_v48 = vunpack.c.1.s8 %v8117_v13 }
 0x4f4   : > { %v8094_v23 = vadd.f32 %v4153_v51, %v7816_v32  ;;  %v4101_v3 = vmul.f32 %v7897_v57, %v4082_v26  ;;  %5003 = vmatpush.msrb.mxu1 %v4875_v41  ;;  %v4867_v41 = vcvt.s32.f32 %v4803_v48 }
 0x4f5   : > { %v3898_v1 = vpop.f32.mrf.mxu2  ;;  %v3963_v12 = vpop.f32.mrf.mxu3 }
 0x4f6   : > { %v4117_v32 = vadd.f32 %v4101_v3, %v4064_v20  ;;  %v4017_v22 = vmul.f32 %v3985_v24, %v3898_v1  ;;  %v4033_v40 = vadd.f32 %v4001_v38, %v3898_v1  ;;  %4368 = vmatmul.f32.gmra.mxu0 %v8094_v23  ;;  %4433 = vmatmul.f32.gmra.mxu1 %v8094_v23  ;;  %v3771_v25 = vpop.f32.mrf.mxu0  ;;  %v3836_v37 = vpop.f32.mrf.mxu1  ;;  %v4874_v20 = vcvt.s32.f32 %v4810_v29 }
 0x4f7   : > { %4498 = vmatmul.f32.gmra.mxu2 %v8094_v23  ;;  %4563 = vmatmul.f32.gmra.mxu3 %v8094_v23  ;;  %v3986_v47 = vmul.f32 %v3836_v37, %v3771_v25  ;;  %v4002_v54 = vadd.f32 %v3836_v37, %v3771_v25  ;;  %v4872_v24 = vcvt.s32.f32 %v4808_v11  ;;  %v4809_v38 = vunpack.c.2.s8 %v8109_v46 }
 0x4f8   : > { %v4135_v42 = vsub.f32 %v4117_v32, %v7849_v36  ;;  %v4049_v0 = vmul.f32 %v4017_v22, %v3963_v12  ;;  %v4065_v44 = vadd.f32 %v4033_v40, %v3963_v12  ;;  %v4806_v3 = vunpack.c.2.s8 %v8114_v33  ;;  %4938 = vmatpush.msrb.mxu0 %v4874_v20 }
 0x4f9   : > { %v4871_v32 = vcvt.s32.f32 %v4807_v2  ;;  %5069 = vmatpush.msrb.mxu2 %v4872_v24 }
 0x4fa   : > { %v4154_v34 = vmul.f32 %v7901_v10, %v4135_v42  ;;  %v4083_v28 = vsub.f32 %v4049_v0, %v4065_v44  ;;  %v4870_v14 = vcvt.s32.f32 %v4806_v3  ;;  %v4799_v3 = vunpack.c.0.s8 %v8117_v13 }
 0x4fb   : > { %5004 = vmatpush.msrb.mxu1 %v4871_v32 }
 0x4fc   : > { %v8127_v16 = vadd.f32 %v4154_v34, %v7849_v36  ;;  %v4102_v18 = vmul.f32 %v7897_v57, %v4083_v28  ;;  %v4873_v36 = vcvt.s32.f32 %v4809_v38  ;;  %4939 = vmatpush.msrb.mxu0 %v4870_v14 }
 0x4fd   : > { %v3901_v51 = vpop.f32.mrf.mxu2  ;;  %v3966_v26 = vpop.f32.mrf.mxu3  ;;  %5005 = vmatpush.msrb.mxu1 %v4867_v41 }
 0x4fe   : > { %v4118_v35 = vadd.f32 %v4102_v18, %v4065_v44  ;;  %v4018_v1 = vmul.f32 %v3986_v47, %v3901_v51  ;;  %v4034_v12 = vadd.f32 %v4002_v54, %v3901_v51  ;;  %4371 = vmatmul.f32.gmra.mxu0 %v8127_v16  ;;  %4436 = vmatmul.f32.gmra.mxu1 %v8127_v16  ;;  %v3774_v22 = vpop.f32.mrf.mxu0  ;;  %v3839_v40 = vpop.f32.mrf.mxu1  ;;  %v4805_v54 = vunpack.c.1.s8 %v8109_v46 }
 0x4ff   : > { %4501 = vmatmul.f32.gmra.mxu2 %v8127_v16  ;;  %4566 = vmatmul.f32.gmra.mxu3 %v8127_v16  ;;  %v3987_v19 = vmul.f32 %v3839_v40, %v3774_v22  ;;  %v4003_v45 = vadd.f32 %v3839_v40, %v3774_v22  ;;  %v4868_v18 = vcvt.s32.f32 %v4804_v27  ;;  %v4801_v51 = vunpack.c.0.s8 %v8109_v46  ;;  %v8175_v40 = vld [vmem:[%s6285_s14 + $0x6] ss:$0 sm:$0xff] }
 0x500   : > { %v4136_v6 = vsub.f32 %v4118_v35, %v7862_v59  ;;  %v4050_v5 = vmul.f32 %v4018_v1, %v3966_v26  ;;  %v4066_v62 = vadd.f32 %v4034_v12, %v3966_v26  ;;  %5134 = vmatpush.msrb.mxu3 %v4873_v36  ;;  %v4869_v20 = vcvt.s32.f32 %v4805_v54 }
 0x501   : > { %v4798_v26 = vunpack.c.0.s8 %v8114_v33  ;;  %5070 = vmatpush.msrb.mxu2 %v4868_v18  ;;  %v4863_v1 = vcvt.s32.f32 %v4799_v3 }
 0x502   : > { %v4155_v25 = vmul.f32 %v7901_v10, %v4136_v6  ;;  %v4084_v37 = vsub.f32 %v4050_v5, %v4066_v62  ;;  %5135 = vmatpush.msrb.mxu3 %v4869_v20 }
 0x503   : > { %v4862_v2 = vcvt.s32.f32 %v4798_v26  ;;  %5006 = vmatpush.msrb.mxu1 %v4863_v1 }
 0x504   : > { %v8140_v39 = vadd.f32 %v4155_v25, %v7862_v59  ;;  %v4103_v47 = vmul.f32 %v7897_v57, %v4084_v37 }
 0x505   : > { %v3904_v42 = vpop.f32.mrf.mxu2  ;;  %v3969_v17 = vpop.f32.mrf.mxu3 }
 0x506   : > { %v4119_v0 = vadd.f32 %v4103_v47, %v4066_v62  ;;  %v4019_v44 = vmul.f32 %v3987_v19, %v3904_v42  ;;  %v4035_v8 = vadd.f32 %v4003_v45, %v3904_v42  ;;  %4374 = vmatmul.f32.gmra.mxu0 %v8140_v39  ;;  %4439 = vmatmul.f32.gmra.mxu1 %v8140_v39 }
 0x507   : > { %4504 = vmatmul.f32.gmra.mxu2 %v8140_v39  ;;  %4569 = vmatmul.f32.gmra.mxu3 %v8140_v39 }
 0x508   : > { %v4137_v59 = vsub.f32 %v4119_v0, %v7872_v49  ;;  %v4051_v50 = vmul.f32 %v4019_v44, %v3969_v17  ;;  %v4067_v21 = vadd.f32 %v4035_v8, %v3969_v17  ;;  %v8179_v44 = vld [vmem:[%s6287_s21 + $0x6] ss:$0 sm:$0xff] }
 0x50a   : > { %v4156_v15 = vmul.f32 %v7901_v10, %v4137_v59  ;;  %v4085_v34 = vsub.f32 %v4051_v50, %v4067_v21 }
 0x50c   : > { %v8150_v28 = vadd.f32 %v4156_v15, %v7872_v49  ;;  %v4104_v29 = vmul.f32 %v7897_v57, %v4085_v34  ;;  %v4800_v49 = vunpack.c.0.s8 %v8106_v43  ;;  %v4866_v57 = vcvt.s32.f32 %v4802_v55 }
 0x50d   : > { %v4865_v43 = vcvt.s32.f32 %v4801_v51 }
 0x50e   : > { %v4120_v11 = vadd.f32 %v4104_v29, %v4067_v21  ;;  %4377 = vmatmul.f32.gmra.mxu0 %v8150_v28  ;;  %4442 = vmatmul.f32.gmra.mxu1 %v8150_v28  ;;  %v4864_v38 = vcvt.s32.f32 %v4800_v49 }
 0x50f   : > { %4507 = vmatmul.f32.gmra.mxu2 %v8150_v28  ;;  %4572 = vmatmul.f32.gmra.mxu3 %v8150_v28 }
 0x510   : > { %v4138_v24 = vsub.f32 %v4120_v11, %v7890_v7  ;;  %4940 = vmatpush.msrb.mxu0 %v4866_v57  ;;  %5071 = vmatpush.msrb.mxu2 %v4864_v38 }
 0x511   : > { %5136 = vmatpush.msrb.mxu3 %v4865_v43 }
 0x512   : > { %v4157_v35 = vmul.f32 %v7901_v10, %v4138_v24  ;;  %4941 = vmatpush.msrb.mxu0 %v4862_v2 }
 0x514   : > { %v8168_v46 = vadd.f32 %v4157_v35, %v7890_v7 }
 0x516   : > { %4380 = vmatmul.f32.gmra.mxu0 %v8168_v46  ;;  %4445 = vmatmul.f32.gmra.mxu1 %v8168_v46 }
 0x517   : > { %4510 = vmatmul.f32.gmra.mxu2 %v8168_v46  ;;  %4575 = vmatmul.f32.gmra.mxu3 %v8168_v46 }
 0x51b   : > { %v4336_v33 = vpop.f32.mrf.mxu0  ;;  %v4401_v13 = vpop.f32.mrf.mxu1 }
 0x51c   : > { %v4579_v10 = vmul.f32 %v4401_v13, %v4336_v33  ;;  %v4595_v12 = vadd.f32 %v4401_v13, %v4336_v33 }
 0x522   : > { %v4466_v36 = vpop.f32.mrf.mxu2  ;;  %v4531_v14 = vpop.f32.mrf.mxu3 }
 0x523   : > { %v4611_v6 = vmul.f32 %v4579_v10, %v4466_v36  ;;  %v4627_v7 = vadd.f32 %v4595_v12, %v4466_v36  ;;  %v4339_v5 = vpop.f32.mrf.mxu0  ;;  %v4404_v62 = vpop.f32.mrf.mxu1 }
 0x524   : > { %v4580_v47 = vmul.f32 %v4404_v62, %v4339_v5  ;;  %v4596_v19 = vadd.f32 %v4404_v62, %v4339_v5 }
 0x525   : > { %v4643_v32 = vmul.f32 %v4611_v6, %v4531_v14  ;;  %v4659_v22 = vadd.f32 %v4627_v7, %v4531_v14 }
 0x527   : > { %v4677_v25 = vsub.f32 %v4643_v32, %v4659_v22 }
 0x529   : > { %v4696_v37 = vmul.f32 %v8175_v40, %v4677_v25 }
 0x52a   : > { %v4469_v45 = vpop.f32.mrf.mxu2  ;;  %v4534_v42 = vpop.f32.mrf.mxu3 }
 0x52b   : > { %v4712_v0 = vadd.f32 %v4696_v37, %v4659_v22  ;;  %v4612_v8 = vmul.f32 %v4580_v47, %v4469_v45  ;;  %v4628_v17 = vadd.f32 %v4596_v19, %v4469_v45  ;;  %v4342_v59 = vpop.f32.mrf.mxu0  ;;  %v4407_v50 = vpop.f32.mrf.mxu1 }
 0x52c   : > { %v4581_v48 = vmul.f32 %v4407_v50, %v4342_v59  ;;  %v4597_v11 = vadd.f32 %v4407_v50, %v4342_v59 }
 0x52d   : > { %v4730_v21 = vsub.f32 %v4712_v0, %v7906_v31  ;;  %v4644_v15 = vmul.f32 %v4612_v8, %v4534_v42  ;;  %v4660_v34 = vadd.f32 %v4628_v17, %v4534_v42 }
 0x52f   : > { %v4749_v29 = vmul.f32 %v8179_v44, %v4730_v21  ;;  %v4678_v27 = vsub.f32 %v4644_v15, %v4660_v34 }
 0x531   : > { %v8184_v54 = vadd.f32 %v4749_v29, %v7906_v31  ;;  %v4697_v55 = vmul.f32 %v8175_v40, %v4678_v27 }
 0x532   : > { %v4472_v18 = vpop.f32.mrf.mxu2  ;;  %v4537_v20 = vpop.f32.mrf.mxu3 }
 0x533   : > { %v4713_v49 = vadd.f32 %v4697_v55, %v4660_v34  ;;  %v4613_v57 = vmul.f32 %v4581_v48, %v4472_v18  ;;  %v4629_v41 = vadd.f32 %v4597_v11, %v4472_v18  ;;  %4942 = vmatmul.f32.vlgmr.msrb.gmra.mxu0 %v8184_v54  ;;  %5007 = vmatmul.f32.vlgmr.msrb.gmra.mxu1 %v8184_v54  ;;  %v4345_v51 = vpop.f32.mrf.mxu0  ;;  %v4410_v26 = vpop.f32.mrf.mxu1 }
 0x534   : > { %5072 = vmatmul.f32.vlgmr.msrb.gmra.mxu2 %v8184_v54  ;;  %5137 = vmatmul.f32.vlgmr.msrb.gmra.mxu3 %v8184_v54  ;;  %v4582_v1 = vmul.f32 %v4410_v26, %v4345_v51  ;;  %v4598_v33 = vadd.f32 %v4410_v26, %v4345_v51 }
 0x535   : > { %v4731_v31 = vsub.f32 %v4713_v49, %v7924_v9  ;;  %v4645_v24 = vmul.f32 %v4613_v57, %v4537_v20  ;;  %v4661_v38 = vadd.f32 %v4629_v41, %v4537_v20 }
 0x537   : > { %v4750_v3 = vmul.f32 %v8179_v44, %v4731_v31  ;;  %v4679_v43 = vsub.f32 %v4645_v24, %v4661_v38 }
 0x539   : > { %v8194_v2 = vadd.f32 %v4750_v3, %v7924_v9  ;;  %v4698_v35 = vmul.f32 %v8175_v40, %v4679_v43 }
 0x53a   : > { %v4475_v13 = vpop.f32.mrf.mxu2  ;;  %v4540_v10 = vpop.f32.mrf.mxu3 }
 0x53b   : > { %v4714_v12 = vadd.f32 %v4698_v35, %v4661_v38  ;;  %v4614_v36 = vmul.f32 %v4582_v1, %v4475_v13  ;;  %v4630_v14 = vadd.f32 %v4598_v33, %v4475_v13  ;;  %4945 = vmatmul.f32.gmra.mxu0 %v8194_v2  ;;  %5010 = vmatmul.f32.gmra.mxu1 %v8194_v2  ;;  %v4348_v6 = vpop.f32.mrf.mxu0  ;;  %v4413_v7 = vpop.f32.mrf.mxu1 }
 0x53c   : > { %5075 = vmatmul.f32.gmra.mxu2 %v8194_v2  ;;  %5140 = vmatmul.f32.gmra.mxu3 %v8194_v2  ;;  %v4583_v47 = vmul.f32 %v4413_v7, %v4348_v6  ;;  %v4599_v19 = vadd.f32 %v4413_v7, %v4348_v6 }
 0x53d   : > { %v4732_v9 = vsub.f32 %v4714_v12, %v7944_v60  ;;  %v4646_v5 = vmul.f32 %v4614_v36, %v4540_v10  ;;  %v4662_v62 = vadd.f32 %v4630_v14, %v4540_v10 }
 0x53f   : > { %v4751_v32 = vmul.f32 %v8179_v44, %v4732_v9  ;;  %v4680_v22 = vsub.f32 %v4646_v5, %v4662_v62 }
 0x541   : > { %v8204_v25 = vadd.f32 %v4751_v32, %v7944_v60  ;;  %v4699_v37 = vmul.f32 %v8175_v40, %v4680_v22 }
 0x542   : > { %v4478_v45 = vpop.f32.mrf.mxu2  ;;  %v4543_v42 = vpop.f32.mrf.mxu3 }
 0x543   : > { %v4715_v0 = vadd.f32 %v4699_v37, %v4662_v62  ;;  %v4615_v8 = vmul.f32 %v4583_v47, %v4478_v45  ;;  %v4631_v17 = vadd.f32 %v4599_v19, %v4478_v45  ;;  %4948 = vmatmul.f32.gmra.mxu0 %v8204_v25  ;;  %5013 = vmatmul.f32.gmra.mxu1 %v8204_v25  ;;  %v4351_v59 = vpop.f32.mrf.mxu0  ;;  %v4416_v50 = vpop.f32.mrf.mxu1 }
 0x544   : > { %5078 = vmatmul.f32.gmra.mxu2 %v8204_v25  ;;  %5143 = vmatmul.f32.gmra.mxu3 %v8204_v25  ;;  %v4584_v48 = vmul.f32 %v4416_v50, %v4351_v59  ;;  %v4600_v11 = vadd.f32 %v4416_v50, %v4351_v59 }
 0x545   : > { %v4733_v60 = vsub.f32 %v4715_v0, %v7958_v56  ;;  %v4647_v21 = vmul.f32 %v4615_v8, %v4543_v42  ;;  %v4663_v15 = vadd.f32 %v4631_v17, %v4543_v42 }
 0x547   : > { %v4752_v34 = vmul.f32 %v8179_v44, %v4733_v60  ;;  %v4681_v29 = vsub.f32 %v4647_v21, %v4663_v15 }
 0x549   : > { %v8214_v27 = vadd.f32 %v4752_v34, %v7958_v56  ;;  %v4700_v55 = vmul.f32 %v8175_v40, %v4681_v29 }
 0x54a   : > { %v4481_v18 = vpop.f32.mrf.mxu2  ;;  %v4546_v20 = vpop.f32.mrf.mxu3 }
 0x54b   : > { %v4716_v49 = vadd.f32 %v4700_v55, %v4663_v15  ;;  %v4616_v57 = vmul.f32 %v4584_v48, %v4481_v18  ;;  %v4632_v41 = vadd.f32 %v4600_v11, %v4481_v18  ;;  %4951 = vmatmul.f32.gmra.mxu0 %v8214_v27  ;;  %5016 = vmatmul.f32.gmra.mxu1 %v8214_v27  ;;  %v4354_v51 = vpop.f32.mrf.mxu0  ;;  %v4419_v26 = vpop.f32.mrf.mxu1 }
 0x54c   : > { %5081 = vmatmul.f32.gmra.mxu2 %v8214_v27  ;;  %5146 = vmatmul.f32.gmra.mxu3 %v8214_v27  ;;  %v4585_v1 = vmul.f32 %v4419_v26, %v4354_v51  ;;  %v4601_v33 = vadd.f32 %v4419_v26, %v4354_v51 }
 0x54d   : > { %v4734_v56 = vsub.f32 %v4716_v49, %v7972_v4  ;;  %v4648_v31 = vmul.f32 %v4616_v57, %v4546_v20  ;;  %v4664_v24 = vadd.f32 %v4632_v41, %v4546_v20 }
 0x54f   : > { %v4753_v38 = vmul.f32 %v8179_v44, %v4734_v56  ;;  %v4682_v3 = vsub.f32 %v4648_v31, %v4664_v24 }
 0x551   : > { %v8224_v43 = vadd.f32 %v4753_v38, %v7972_v4  ;;  %v4701_v35 = vmul.f32 %v8175_v40, %v4682_v3 }
 0x552   : > { %v4484_v13 = vpop.f32.mrf.mxu2  ;;  %v4549_v10 = vpop.f32.mrf.mxu3 }
 0x553   : > { %v4717_v12 = vadd.f32 %v4701_v35, %v4664_v24  ;;  %v4617_v36 = vmul.f32 %v4585_v1, %v4484_v13  ;;  %v4633_v14 = vadd.f32 %v4601_v33, %v4484_v13  ;;  %4954 = vmatmul.f32.gmra.mxu0 %v8224_v43  ;;  %5019 = vmatmul.f32.gmra.mxu1 %v8224_v43  ;;  %v4357_v6 = vpop.f32.mrf.mxu0  ;;  %v4422_v7 = vpop.f32.mrf.mxu1 }
 0x554   : > { %5084 = vmatmul.f32.gmra.mxu2 %v8224_v43  ;;  %5149 = vmatmul.f32.gmra.mxu3 %v8224_v43  ;;  %v4586_v47 = vmul.f32 %v4422_v7, %v4357_v6  ;;  %v4602_v19 = vadd.f32 %v4422_v7, %v4357_v6 }
 0x555   : > { %v4735_v4 = vsub.f32 %v4717_v12, %v7992_v58  ;;  %v4649_v9 = vmul.f32 %v4617_v36, %v4549_v10  ;;  %v4665_v5 = vadd.f32 %v4633_v14, %v4549_v10 }
 0x557   : > { %v4754_v62 = vmul.f32 %v8179_v44, %v4735_v4  ;;  %v4683_v32 = vsub.f32 %v4649_v9, %v4665_v5 }
 0x559   : > { %v8234_v22 = vadd.f32 %v4754_v62, %v7992_v58  ;;  %v4702_v37 = vmul.f32 %v8175_v40, %v4683_v32 }
 0x55a   : > { %v4487_v45 = vpop.f32.mrf.mxu2  ;;  %v4552_v42 = vpop.f32.mrf.mxu3 }
 0x55b   : > { %v4718_v0 = vadd.f32 %v4702_v37, %v4665_v5  ;;  %v4618_v8 = vmul.f32 %v4586_v47, %v4487_v45  ;;  %v4634_v17 = vadd.f32 %v4602_v19, %v4487_v45  ;;  %4957 = vmatmul.f32.gmra.mxu0 %v8234_v22  ;;  %5022 = vmatmul.f32.gmra.mxu1 %v8234_v22  ;;  %v4360_v59 = vpop.f32.mrf.mxu0  ;;  %v4425_v50 = vpop.f32.mrf.mxu1 }
 0x55c   : > { %5087 = vmatmul.f32.gmra.mxu2 %v8234_v22  ;;  %5152 = vmatmul.f32.gmra.mxu3 %v8234_v22  ;;  %v4587_v48 = vmul.f32 %v4425_v50, %v4360_v59  ;;  %v4603_v11 = vadd.f32 %v4425_v50, %v4360_v59 }
 0x55d   : > { %v4736_v58 = vsub.f32 %v4718_v0, %v8012_v52  ;;  %v4650_v60 = vmul.f32 %v4618_v8, %v4552_v42  ;;  %v4666_v21 = vadd.f32 %v4634_v17, %v4552_v42 }
 0x55f   : > { %v4755_v15 = vmul.f32 %v8179_v44, %v4736_v58  ;;  %v4684_v34 = vsub.f32 %v4650_v60, %v4666_v21 }
 0x561   : > { %v8244_v29 = vadd.f32 %v4755_v15, %v8012_v52  ;;  %v4703_v55 = vmul.f32 %v8175_v40, %v4684_v34 }
 0x562   : > { %v4490_v18 = vpop.f32.mrf.mxu2  ;;  %v4555_v20 = vpop.f32.mrf.mxu3 }
 0x563   : > { %v4719_v49 = vadd.f32 %v4703_v55, %v4666_v21  ;;  %v4619_v57 = vmul.f32 %v4587_v48, %v4490_v18  ;;  %v4635_v41 = vadd.f32 %v4603_v11, %v4490_v18  ;;  %4960 = vmatmul.f32.gmra.mxu0 %v8244_v29  ;;  %5025 = vmatmul.f32.gmra.mxu1 %v8244_v29  ;;  %v4363_v51 = vpop.f32.mrf.mxu0  ;;  %v4428_v26 = vpop.f32.mrf.mxu1 }
 0x564   : > { %5090 = vmatmul.f32.gmra.mxu2 %v8244_v29  ;;  %5155 = vmatmul.f32.gmra.mxu3 %v8244_v29  ;;  %v4588_v1 = vmul.f32 %v4428_v26, %v4363_v51  ;;  %v4604_v33 = vadd.f32 %v4428_v26, %v4363_v51 }
 0x565   : > { %v4737_v52 = vsub.f32 %v4719_v49, %v8026_v30  ;;  %v4651_v56 = vmul.f32 %v4619_v57, %v4555_v20  ;;  %v4667_v31 = vadd.f32 %v4635_v41, %v4555_v20 }
 0x567   : > { %v4756_v24 = vmul.f32 %v8179_v44, %v4737_v52  ;;  %v4685_v38 = vsub.f32 %v4651_v56, %v4667_v31 }
 0x569   : > { %v8254_v3 = vadd.f32 %v4756_v24, %v8026_v30  ;;  %v4704_v35 = vmul.f32 %v8175_v40, %v4685_v38 }
 0x56a   : > { %v4493_v13 = vpop.f32.mrf.mxu2  ;;  %v4558_v10 = vpop.f32.mrf.mxu3 }
 0x56b   : > { %v4720_v12 = vadd.f32 %v4704_v35, %v4667_v31  ;;  %v4620_v36 = vmul.f32 %v4588_v1, %v4493_v13  ;;  %v4636_v14 = vadd.f32 %v4604_v33, %v4493_v13  ;;  %4963 = vmatmul.f32.gmra.mxu0 %v8254_v3  ;;  %5028 = vmatmul.f32.gmra.mxu1 %v8254_v3  ;;  %v4366_v6 = vpop.f32.mrf.mxu0  ;;  %v4431_v7 = vpop.f32.mrf.mxu1 }
 0x56c   : > { %5093 = vmatmul.f32.gmra.mxu2 %v8254_v3  ;;  %5158 = vmatmul.f32.gmra.mxu3 %v8254_v3  ;;  %v4589_v47 = vmul.f32 %v4431_v7, %v4366_v6  ;;  %v4605_v19 = vadd.f32 %v4431_v7, %v4366_v6 }
 0x56d   : > { %v4738_v30 = vsub.f32 %v4720_v12, %v8040_v63  ;;  %v4652_v4 = vmul.f32 %v4620_v36, %v4558_v10  ;;  %v4668_v9 = vadd.f32 %v4636_v14, %v4558_v10 }
 0x56f   : > { %v4757_v5 = vmul.f32 %v8179_v44, %v4738_v30  ;;  %v4686_v62 = vsub.f32 %v4652_v4, %v4668_v9 }
 0x571   : > { %v8264_v32 = vadd.f32 %v4757_v5, %v8040_v63  ;;  %v4705_v37 = vmul.f32 %v8175_v40, %v4686_v62 }
 0x572   : > { %v4496_v45 = vpop.f32.mrf.mxu2  ;;  %v4561_v42 = vpop.f32.mrf.mxu3 }
 0x573   : > { %v4721_v0 = vadd.f32 %v4705_v37, %v4668_v9  ;;  %v4621_v8 = vmul.f32 %v4589_v47, %v4496_v45  ;;  %v4637_v17 = vadd.f32 %v4605_v19, %v4496_v45  ;;  %4966 = vmatmul.f32.gmra.mxu0 %v8264_v32  ;;  %5031 = vmatmul.f32.gmra.mxu1 %v8264_v32  ;;  %v4369_v59 = vpop.f32.mrf.mxu0  ;;  %v4434_v50 = vpop.f32.mrf.mxu1 }
 0x574   : > { %5096 = vmatmul.f32.gmra.mxu2 %v8264_v32  ;;  %5161 = vmatmul.f32.gmra.mxu3 %v8264_v32  ;;  %v4590_v48 = vmul.f32 %v4434_v50, %v4369_v59  ;;  %v4606_v11 = vadd.f32 %v4434_v50, %v4369_v59 }
 0x575   : > { %v4739_v63 = vsub.f32 %v4721_v0, %v8060_v53  ;;  %v4653_v58 = vmul.f32 %v4621_v8, %v4561_v42  ;;  %v4669_v60 = vadd.f32 %v4637_v17, %v4561_v42 }
 0x577   : > { %v4758_v21 = vmul.f32 %v8179_v44, %v4739_v63  ;;  %v4687_v15 = vsub.f32 %v4653_v58, %v4669_v60 }
 0x579   : > { %v8274_v34 = vadd.f32 %v4758_v21, %v8060_v53  ;;  %v4706_v55 = vmul.f32 %v8175_v40, %v4687_v15 }
 0x57a   : > { %v4499_v18 = vpop.f32.mrf.mxu2  ;;  %v4564_v20 = vpop.f32.mrf.mxu3 }
 0x57b   : > { %v4722_v49 = vadd.f32 %v4706_v55, %v4669_v60  ;;  %v4622_v57 = vmul.f32 %v4590_v48, %v4499_v18  ;;  %v4638_v41 = vadd.f32 %v4606_v11, %v4499_v18  ;;  %4969 = vmatmul.f32.gmra.mxu0 %v8274_v34  ;;  %5034 = vmatmul.f32.gmra.mxu1 %v8274_v34  ;;  %v4372_v51 = vpop.f32.mrf.mxu0  ;;  %v4437_v26 = vpop.f32.mrf.mxu1 }
 0x57c   : > { %5099 = vmatmul.f32.gmra.mxu2 %v8274_v34  ;;  %5164 = vmatmul.f32.gmra.mxu3 %v8274_v34  ;;  %v4591_v1 = vmul.f32 %v4437_v26, %v4372_v51  ;;  %v4607_v33 = vadd.f32 %v4437_v26, %v4372_v51 }
 0x57d   : > { %v4740_v53 = vsub.f32 %v4722_v49, %v8080_v61  ;;  %v4654_v52 = vmul.f32 %v4622_v57, %v4564_v20  ;;  %v4670_v56 = vadd.f32 %v4638_v41, %v4564_v20 }
 0x57f   : > { %v4759_v31 = vmul.f32 %v8179_v44, %v4740_v53  ;;  %v4688_v24 = vsub.f32 %v4654_v52, %v4670_v56 }
 0x581   : > { %v8284_v38 = vadd.f32 %v4759_v31, %v8080_v61  ;;  %v4707_v35 = vmul.f32 %v8175_v40, %v4688_v24 }
 0x582   : > { %v4502_v13 = vpop.f32.mrf.mxu2  ;;  %v4567_v10 = vpop.f32.mrf.mxu3 }
 0x583   : > { %v4723_v12 = vadd.f32 %v4707_v35, %v4670_v56  ;;  %v4623_v36 = vmul.f32 %v4591_v1, %v4502_v13  ;;  %v4639_v14 = vadd.f32 %v4607_v33, %v4502_v13  ;;  %4972 = vmatmul.f32.gmra.mxu0 %v8284_v38  ;;  %5037 = vmatmul.f32.gmra.mxu1 %v8284_v38  ;;  %v4375_v6 = vpop.f32.mrf.mxu0  ;;  %v4440_v7 = vpop.f32.mrf.mxu1 }
 0x584   : > { %5102 = vmatmul.f32.gmra.mxu2 %v8284_v38  ;;  %5167 = vmatmul.f32.gmra.mxu3 %v8284_v38  ;;  %v4592_v47 = vmul.f32 %v4440_v7, %v4375_v6  ;;  %v4608_v19 = vadd.f32 %v4440_v7, %v4375_v6 }
 0x585   : > { %v4741_v61 = vsub.f32 %v4723_v12, %v8094_v23  ;;  %v4655_v30 = vmul.f32 %v4623_v36, %v4567_v10  ;;  %v4671_v4 = vadd.f32 %v4639_v14, %v4567_v10 }
 0x587   : > { %v4760_v9 = vmul.f32 %v8179_v44, %v4741_v61  ;;  %v4689_v5 = vsub.f32 %v4655_v30, %v4671_v4 }
 0x589   : > { %v8294_v62 = vadd.f32 %v4760_v9, %v8094_v23  ;;  %v4708_v37 = vmul.f32 %v8175_v40, %v4689_v5 }
 0x58a   : > { %v4505_v45 = vpop.f32.mrf.mxu2  ;;  %v4570_v42 = vpop.f32.mrf.mxu3 }
 0x58b   : > { %v4724_v0 = vadd.f32 %v4708_v37, %v4671_v4  ;;  %v4624_v8 = vmul.f32 %v4592_v47, %v4505_v45  ;;  %v4640_v17 = vadd.f32 %v4608_v19, %v4505_v45  ;;  %4975 = vmatmul.f32.gmra.mxu0 %v8294_v62  ;;  %5040 = vmatmul.f32.gmra.mxu1 %v8294_v62  ;;  %v4378_v59 = vpop.f32.mrf.mxu0  ;;  %v4443_v23 = vpop.f32.mrf.mxu1 }
 0x58c   : > { %5105 = vmatmul.f32.gmra.mxu2 %v8294_v62  ;;  %5170 = vmatmul.f32.gmra.mxu3 %v8294_v62  ;;  %v4593_v48 = vmul.f32 %v4443_v23, %v4378_v59  ;;  %v4609_v11 = vadd.f32 %v4443_v23, %v4378_v59 }
 0x58d   : > { %v4742_v50 = vsub.f32 %v4724_v0, %v8127_v16  ;;  %v4656_v63 = vmul.f32 %v4624_v8, %v4570_v42  ;;  %v4672_v58 = vadd.f32 %v4640_v17, %v4570_v42 }
 0x58f   : > { %v4761_v60 = vmul.f32 %v8179_v44, %v4742_v50  ;;  %v4690_v21 = vsub.f32 %v4656_v63, %v4672_v58  ;;  %v8341_v63 = vld [vmem:[%s6285_s14 + $0x7] ss:$0 sm:$0xff] }
 0x591   : > { %v8304_v15 = vadd.f32 %v4761_v60, %v8127_v16  ;;  %v4709_v55 = vmul.f32 %v8175_v40, %v4690_v21 }
 0x592   : > { %v4508_v18 = vpop.f32.mrf.mxu2  ;;  %v4573_v20 = vpop.f32.mrf.mxu3 }
 0x593   : > { %v4725_v49 = vadd.f32 %v4709_v55, %v4672_v58  ;;  %v4625_v57 = vmul.f32 %v4593_v48, %v4508_v18  ;;  %v4641_v41 = vadd.f32 %v4609_v11, %v4508_v18  ;;  %4978 = vmatmul.f32.gmra.mxu0 %v8304_v15  ;;  %5043 = vmatmul.f32.gmra.mxu1 %v8304_v15  ;;  %v4381_v53 = vpop.f32.mrf.mxu0  ;;  %v4446_v52 = vpop.f32.mrf.mxu1 }
 0x594   : > { %5108 = vmatmul.f32.gmra.mxu2 %v8304_v15  ;;  %5173 = vmatmul.f32.gmra.mxu3 %v8304_v15  ;;  %v4594_v1 = vmul.f32 %v4446_v52, %v4381_v53  ;;  %v4610_v33 = vadd.f32 %v4446_v52, %v4381_v53 }
 0x595   : > { %v4743_v16 = vsub.f32 %v4725_v49, %v8140_v39  ;;  %v4657_v51 = vmul.f32 %v4625_v57, %v4573_v20  ;;  %v4673_v26 = vadd.f32 %v4641_v41, %v4573_v20  ;;  %v8345_v20 = vld [vmem:[%s6287_s21 + $0x7] ss:$0 sm:$0xff] }
 0x597   : > { %v4762_v56 = vmul.f32 %v8179_v44, %v4743_v16  ;;  %v4691_v31 = vsub.f32 %v4657_v51, %v4673_v26 }
 0x599   : > { %v8314_v24 = vadd.f32 %v4762_v56, %v8140_v39  ;;  %v4710_v35 = vmul.f32 %v8175_v40, %v4691_v31 }
 0x59a   : > { %v4511_v13 = vpop.f32.mrf.mxu2  ;;  %v4576_v14 = vpop.f32.mrf.mxu3 }
 0x59b   : > { %v4726_v10 = vadd.f32 %v4710_v35, %v4673_v26  ;;  %v4626_v12 = vmul.f32 %v4594_v1, %v4511_v13  ;;  %v4642_v36 = vadd.f32 %v4610_v33, %v4511_v13  ;;  %4981 = vmatmul.f32.gmra.mxu0 %v8314_v24  ;;  %5046 = vmatmul.f32.gmra.mxu1 %v8314_v24 }
 0x59c   : > { %5111 = vmatmul.f32.gmra.mxu2 %v8314_v24  ;;  %5176 = vmatmul.f32.gmra.mxu3 %v8314_v24 }
 0x59d   : > { %v4744_v39 = vsub.f32 %v4726_v10, %v8150_v28  ;;  %v4658_v6 = vmul.f32 %v4626_v12, %v4576_v14  ;;  %v4674_v7 = vadd.f32 %v4642_v36, %v4576_v14 }
 0x59f   : > { %v4763_v61 = vmul.f32 %v8179_v44, %v4744_v39  ;;  %v4692_v30 = vsub.f32 %v4658_v6, %v4674_v7 }
 0x5a1   : > { %v8324_v4 = vadd.f32 %v4763_v61, %v8150_v28  ;;  %v4711_v9 = vmul.f32 %v8175_v40, %v4692_v30 }
 0x5a3   : > { %v4727_v5 = vadd.f32 %v4711_v9, %v4674_v7  ;;  %4984 = vmatmul.f32.gmra.mxu0 %v8324_v4  ;;  %5049 = vmatmul.f32.gmra.mxu1 %v8324_v4 }
 0x5a4   : > { %5114 = vmatmul.f32.gmra.mxu2 %v8324_v4  ;;  %5179 = vmatmul.f32.gmra.mxu3 %v8324_v4 }
 0x5a5   : > { %v4745_v37 = vsub.f32 %v4727_v5, %v8168_v46 }
 0x5a7   : > { %v4764_v47 = vmul.f32 %v8179_v44, %v4745_v37 }
 0x5a9   : > { %v8334_v19 = vadd.f32 %v4764_v47, %v8168_v46 }
 0x5ab   : > { %4987 = vmatmul.f32.gmra.mxu0 %v8334_v19  ;;  %5052 = vmatmul.f32.gmra.mxu1 %v8334_v19 }
 0x5ac   : > { %5117 = vmatmul.f32.gmra.mxu2 %v8334_v19  ;;  %5182 = vmatmul.f32.gmra.mxu3 %v8334_v19 }
 0x5b0   : > { %v4943_v28 = vpop.f32.mrf.mxu0  ;;  %v5008_v40 = vpop.f32.mrf.mxu1 }
 0x5b1   : > { %v5186_v45 = vmul.f32 %v5008_v40, %v4943_v28  ;;  %v5202_v42 = vadd.f32 %v5008_v40, %v4943_v28 }
 0x5b7   : > { %v5073_v0 = vpop.f32.mrf.mxu2  ;;  %v5138_v8 = vpop.f32.mrf.mxu3 }
 0x5b8   : > { %v5218_v44 = vmul.f32 %v5186_v45, %v5073_v0  ;;  %v5234_v17 = vadd.f32 %v5202_v42, %v5073_v0  ;;  %v4946_v46 = vpop.f32.mrf.mxu0  ;;  %v5011_v59 = vpop.f32.mrf.mxu1 }
 0x5b9   : > { %v5187_v21 = vmul.f32 %v5011_v59, %v4946_v46  ;;  %v5203_v55 = vadd.f32 %v5011_v59, %v4946_v46 }
 0x5ba   : > { %v5250_v23 = vmul.f32 %v5218_v44, %v5138_v8  ;;  %v5266_v50 = vadd.f32 %v5234_v17, %v5138_v8 }
 0x5bc   : > { %v5284_v58 = vsub.f32 %v5250_v23, %v5266_v50 }
 0x5be   : > { %v5303_v60 = vmul.f32 %v8341_v63, %v5284_v58 }
 0x5bf   : > { %v5076_v48 = vpop.f32.mrf.mxu2  ;;  %v5141_v11 = vpop.f32.mrf.mxu3 }
 0x5c0   : > { %v5319_v18 = vadd.f32 %v5303_v60, %v5266_v50  ;;  %v5219_v49 = vmul.f32 %v5187_v21, %v5076_v48  ;;  %v5235_v57 = vadd.f32 %v5203_v55, %v5076_v48  ;;  %v4949_v41 = vpop.f32.mrf.mxu0  ;;  %v5014_v16 = vpop.f32.mrf.mxu1 }
 0x5c1   : > { %v5188_v1 = vmul.f32 %v5014_v16, %v4949_v41  ;;  %v5204_v33 = vadd.f32 %v5014_v16, %v4949_v41 }
 0x5c2   : > { %v5337_v51 = vsub.f32 %v5319_v18, %v8184_v54  ;;  %v5251_v26 = vmul.f32 %v5219_v49, %v5141_v11  ;;  %v5267_v53 = vadd.f32 %v5235_v57, %v5141_v11 }
 0x5c4   : > { %v5356_v52 = vmul.f32 %v8345_v20, %v5337_v51  ;;  %v5285_v56 = vsub.f32 %v5251_v26, %v5267_v53 }
 0x5c6   : > { %v5372_v31 = vadd.f32 %v5356_v52, %v8184_v54  ;;  %v5304_v35 = vmul.f32 %v8341_v63, %v5285_v56 }
 0x5c7   : > { %v5079_v13 = vpop.f32.mrf.mxu2  ;;  %v5144_v10 = vpop.f32.mrf.mxu3 }
 0x5c8   : > { %5388 = vst [vmem:[#allocation10] sm:$0xff] %v5372_v31  ;;  %v5320_v12 = vadd.f32 %v5304_v35, %v5267_v53  ;;  %v5220_v36 = vmul.f32 %v5188_v1, %v5079_v13  ;;  %v5236_v14 = vadd.f32 %v5204_v33, %v5079_v13  ;;  %v4952_v39 = vpop.f32.mrf.mxu0  ;;  %v5017_v6 = vpop.f32.mrf.mxu1 }
 0x5c9   : > { %v5189_v47 = vmul.f32 %v5017_v6, %v4952_v39  ;;  %v5205_v28 = vadd.f32 %v5017_v6, %v4952_v39 }
 0x5ca   : > { %v5338_v7 = vsub.f32 %v5320_v12, %v8194_v2  ;;  %v5252_v61 = vmul.f32 %v5220_v36, %v5144_v10  ;;  %v5268_v30 = vadd.f32 %v5236_v14, %v5144_v10 }
 0x5cc   : > { %v5357_v9 = vmul.f32 %v8345_v20, %v5338_v7  ;;  %v5286_v5 = vsub.f32 %v5252_v61, %v5268_v30 }
 0x5ce   : > { %v5373_v54 = vadd.f32 %v5357_v9, %v8194_v2  ;;  %v5305_v37 = vmul.f32 %v8341_v63, %v5286_v5 }
 0x5cf   : > { %v5082_v40 = vpop.f32.mrf.mxu2  ;;  %v5147_v45 = vpop.f32.mrf.mxu3 }
 0x5d0   : > { %5389 = vst [vmem:[#allocation10 + $0x8] sm:$0xff] %v5373_v54  ;;  %v5321_v42 = vadd.f32 %v5305_v37, %v5268_v30  ;;  %v5221_v0 = vmul.f32 %v5189_v47, %v5082_v40  ;;  %v5237_v8 = vadd.f32 %v5205_v28, %v5082_v40  ;;  %v4955_v44 = vpop.f32.mrf.mxu0  ;;  %v5020_v17 = vpop.f32.mrf.mxu1 }
 0x5d1   : > { %v5190_v21 = vmul.f32 %v5020_v17, %v4955_v44  ;;  %v5206_v55 = vadd.f32 %v5020_v17, %v4955_v44 }
 0x5d2   : > { %v5339_v46 = vsub.f32 %v5321_v42, %v8204_v25  ;;  %v5253_v59 = vmul.f32 %v5221_v0, %v5147_v45  ;;  %v5269_v23 = vadd.f32 %v5237_v8, %v5147_v45 }
 0x5d4   : > { %v5358_v50 = vmul.f32 %v8345_v20, %v5339_v46  ;;  %v5287_v58 = vsub.f32 %v5253_v59, %v5269_v23 }
 0x5d6   : > { %v5374_v2 = vadd.f32 %v5358_v50, %v8204_v25  ;;  %v5306_v60 = vmul.f32 %v8341_v63, %v5287_v58 }
 0x5d7   : > { %v5085_v48 = vpop.f32.mrf.mxu2  ;;  %v5150_v11 = vpop.f32.mrf.mxu3 }
 0x5d8   : > { %5390 = vst [vmem:[#allocation10 + $0x10] sm:$0xff] %v5374_v2  ;;  %v5322_v18 = vadd.f32 %v5306_v60, %v5269_v23  ;;  %v5222_v49 = vmul.f32 %v5190_v21, %v5085_v48  ;;  %v5238_v57 = vadd.f32 %v5206_v55, %v5085_v48  ;;  %v4958_v41 = vpop.f32.mrf.mxu0  ;;  %v5023_v16 = vpop.f32.mrf.mxu1 }
 0x5d9   : > { %v5191_v35 = vmul.f32 %v5023_v16, %v4958_v41  ;;  %v5207_v1 = vadd.f32 %v5023_v16, %v4958_v41 }
 0x5da   : > { %v5340_v51 = vsub.f32 %v5322_v18, %v8214_v27  ;;  %v5254_v26 = vmul.f32 %v5222_v49, %v5150_v11  ;;  %v5270_v53 = vadd.f32 %v5238_v57, %v5150_v11 }
 0x5dc   : > { %v5359_v52 = vmul.f32 %v8345_v20, %v5340_v51  ;;  %v5288_v56 = vsub.f32 %v5254_v26, %v5270_v53 }
 0x5de   : > { %v5375_v25 = vadd.f32 %v5359_v52, %v8214_v27  ;;  %v5307_v31 = vmul.f32 %v8341_v63, %v5288_v56 }
 0x5df   : > { %v5088_v33 = vpop.f32.mrf.mxu2  ;;  %v5153_v13 = vpop.f32.mrf.mxu3 }
 0x5e0   : > { %5391 = vst [vmem:[#allocation10 + $0x18] sm:$0xff] %v5375_v25  ;;  %v5323_v10 = vadd.f32 %v5307_v31, %v5270_v53  ;;  %v5223_v12 = vmul.f32 %v5191_v35, %v5088_v33  ;;  %v5239_v36 = vadd.f32 %v5207_v1, %v5088_v33  ;;  %v4961_v14 = vpop.f32.mrf.mxu0  ;;  %v5026_v39 = vpop.f32.mrf.mxu1 }
 0x5e1   : > { %v5192_v54 = vmul.f32 %v5026_v39, %v4961_v14  ;;  %v5208_v37 = vadd.f32 %v5026_v39, %v4961_v14 }
 0x5e2   : > { %v5341_v6 = vsub.f32 %v5323_v10, %v8224_v43  ;;  %v5255_v7 = vmul.f32 %v5223_v12, %v5153_v13  ;;  %v5271_v61 = vadd.f32 %v5239_v36, %v5153_v13 }
 0x5e4   : > { %v5360_v30 = vmul.f32 %v8345_v20, %v5341_v6  ;;  %v5289_v9 = vsub.f32 %v5255_v7, %v5271_v61 }
 0x5e6   : > { %v5376_v27 = vadd.f32 %v5360_v30, %v8224_v43  ;;  %v5308_v5 = vmul.f32 %v8341_v63, %v5289_v9 }
 0x5e7   : > { %v5091_v47 = vpop.f32.mrf.mxu2  ;;  %v5156_v28 = vpop.f32.mrf.mxu3 }
 0x5e8   : > { %5392 = vst [vmem:[#allocation10 + $0x20] sm:$0xff] %v5376_v27  ;;  %v5324_v40 = vadd.f32 %v5308_v5, %v5271_v61  ;;  %v5224_v45 = vmul.f32 %v5192_v54, %v5091_v47  ;;  %v5240_v42 = vadd.f32 %v5208_v37, %v5091_v47  ;;  %v4964_v0 = vpop.f32.mrf.mxu0  ;;  %v5029_v8 = vpop.f32.mrf.mxu1 }
 0x5e9   : > { %v5193_v58 = vmul.f32 %v5029_v8, %v4964_v0  ;;  %v5209_v2 = vadd.f32 %v5029_v8, %v4964_v0 }
 0x5ea   : > { %v5342_v44 = vsub.f32 %v5324_v40, %v8234_v22  ;;  %v5256_v17 = vmul.f32 %v5224_v45, %v5156_v28  ;;  %v5272_v46 = vadd.f32 %v5240_v42, %v5156_v28 }
 0x5ec   : > { %v5361_v59 = vmul.f32 %v8345_v20, %v5342_v44  ;;  %v5290_v23 = vsub.f32 %v5256_v17, %v5272_v46 }
 0x5ee   : > { %v5377_v43 = vadd.f32 %v5361_v59, %v8234_v22  ;;  %v5309_v50 = vmul.f32 %v8341_v63, %v5290_v23 }
 0x5ef   : > { %v5094_v60 = vpop.f32.mrf.mxu2  ;;  %v5159_v21 = vpop.f32.mrf.mxu3 }
 0x5f0   : > { %5393 = vst [vmem:[#allocation10 + $0x28] sm:$0xff] %v5377_v43  ;;  %v5325_v55 = vadd.f32 %v5309_v50, %v5272_v46  ;;  %v5225_v48 = vmul.f32 %v5193_v58, %v5094_v60  ;;  %v5241_v11 = vadd.f32 %v5209_v2, %v5094_v60  ;;  %v4967_v18 = vpop.f32.mrf.mxu0  ;;  %v5032_v49 = vpop.f32.mrf.mxu1 }
 0x5f1   : > { %v5194_v52 = vmul.f32 %v5032_v49, %v4967_v18  ;;  %v5210_v56 = vadd.f32 %v5032_v49, %v4967_v18 }
 0x5f2   : > { %v5343_v57 = vsub.f32 %v5325_v55, %v8244_v29  ;;  %v5257_v41 = vmul.f32 %v5225_v48, %v5159_v21  ;;  %v5273_v16 = vadd.f32 %v5241_v11, %v5159_v21 }
 0x5f4   : > { %v5362_v51 = vmul.f32 %v8345_v20, %v5343_v57  ;;  %v5291_v26 = vsub.f32 %v5257_v41, %v5273_v16 }
 0x5f6   : > { %v5378_v22 = vadd.f32 %v5362_v51, %v8244_v29  ;;  %v5310_v53 = vmul.f32 %v8341_v63, %v5291_v26 }
 0x5f7   : > { %v5097_v25 = vpop.f32.mrf.mxu2  ;;  %v5162_v31 = vpop.f32.mrf.mxu3 }
 0x5f8   : > { %5394 = vst [vmem:[#allocation10 + $0x30] sm:$0xff] %v5378_v22  ;;  %v5326_v35 = vadd.f32 %v5310_v53, %v5273_v16  ;;  %v5226_v1 = vmul.f32 %v5194_v52, %v5097_v25  ;;  %v5242_v33 = vadd.f32 %v5210_v56, %v5097_v25  ;;  %v4970_v13 = vpop.f32.mrf.mxu0  ;;  %v5035_v10 = vpop.f32.mrf.mxu1 }
 0x5f9   : > { %v5195_v61 = vmul.f32 %v5035_v10, %v4970_v13  ;;  %v5211_v30 = vadd.f32 %v5035_v10, %v4970_v13 }
 0x5fa   : > { %v5344_v12 = vsub.f32 %v5326_v35, %v8254_v3  ;;  %v5258_v36 = vmul.f32 %v5226_v1, %v5162_v31  ;;  %v5274_v14 = vadd.f32 %v5242_v33, %v5162_v31 }
 0x5fc   : > { %v5363_v39 = vmul.f32 %v8345_v20, %v5344_v12  ;;  %v5292_v6 = vsub.f32 %v5258_v36, %v5274_v14 }
 0x5fe   : > { %v5379_v29 = vadd.f32 %v5363_v39, %v8254_v3  ;;  %v5311_v7 = vmul.f32 %v8341_v63, %v5292_v6 }
 0x5ff   : > { %v5100_v9 = vpop.f32.mrf.mxu2  ;;  %v5165_v27 = vpop.f32.mrf.mxu3 }
 0x600   : > { %5395 = vst [vmem:[#allocation10 + $0x38] sm:$0xff] %v5379_v29  ;;  %v5327_v5 = vadd.f32 %v5311_v7, %v5274_v14  ;;  %v5227_v54 = vmul.f32 %v5195_v61, %v5100_v9  ;;  %v5243_v37 = vadd.f32 %v5211_v30, %v5100_v9  ;;  %v4973_v47 = vpop.f32.mrf.mxu0  ;;  %v5038_v28 = vpop.f32.mrf.mxu1 }
 0x601   : > { %v5196_v17 = vmul.f32 %v5038_v28, %v4973_v47  ;;  %v5212_v46 = vadd.f32 %v5038_v28, %v4973_v47 }
 0x602   : > { %v5345_v40 = vsub.f32 %v5327_v5, %v8264_v32  ;;  %v5259_v45 = vmul.f32 %v5227_v54, %v5165_v27  ;;  %v5275_v42 = vadd.f32 %v5243_v37, %v5165_v27 }
 0x604   : > { %v5364_v0 = vmul.f32 %v8345_v20, %v5345_v40  ;;  %v5293_v8 = vsub.f32 %v5259_v45, %v5275_v42 }
 0x606   : > { %v5380_v3 = vadd.f32 %v5364_v0, %v8264_v32  ;;  %v5312_v44 = vmul.f32 %v8341_v63, %v5293_v8 }
 0x607   : > { %v5103_v59 = vpop.f32.mrf.mxu2  ;;  %v5168_v23 = vpop.f32.mrf.mxu3 }
 0x608   : > { %5396 = vst [vmem:[#allocation10 + $0x40] sm:$0xff] %v5380_v3  ;;  %v5328_v43 = vadd.f32 %v5312_v44, %v5275_v42  ;;  %v5228_v50 = vmul.f32 %v5196_v17, %v5103_v59  ;;  %v5244_v58 = vadd.f32 %v5212_v46, %v5103_v59  ;;  %v4976_v2 = vpop.f32.mrf.mxu0  ;;  %v5041_v60 = vpop.f32.mrf.mxu1 }
 0x609   : > { %v5197_v57 = vmul.f32 %v5041_v60, %v4976_v2  ;;  %v5213_v41 = vadd.f32 %v5041_v60, %v4976_v2 }
 0x60a   : > { %v5346_v21 = vsub.f32 %v5328_v43, %v8274_v34  ;;  %v5260_v55 = vmul.f32 %v5228_v50, %v5168_v23  ;;  %v5276_v48 = vadd.f32 %v5244_v58, %v5168_v23 }
 0x60c   : > { %v5365_v11 = vmul.f32 %v8345_v20, %v5346_v21  ;;  %v5294_v18 = vsub.f32 %v5260_v55, %v5276_v48 }
 0x60e   : > { %v5381_v32 = vadd.f32 %v5365_v11, %v8274_v34  ;;  %v5313_v49 = vmul.f32 %v8341_v63, %v5294_v18 }
 0x60f   : > { %v5106_v16 = vpop.f32.mrf.mxu2  ;;  %v5171_v51 = vpop.f32.mrf.mxu3 }
 0x610   : > { %5397 = vst [vmem:[#allocation10 + $0x48] sm:$0xff] %v5381_v32  ;;  %v5329_v26 = vadd.f32 %v5313_v49, %v5276_v48  ;;  %v5229_v22 = vmul.f32 %v5197_v57, %v5106_v16  ;;  %v5245_v53 = vadd.f32 %v5213_v41, %v5106_v16  ;;  %v4979_v52 = vpop.f32.mrf.mxu0  ;;  %v5044_v56 = vpop.f32.mrf.mxu1 }
 0x611   : > { %v5198_v10 = vmul.f32 %v5044_v56, %v4979_v52  ;;  %v5214_v12 = vadd.f32 %v5044_v56, %v4979_v52 }
 0x612   : > { %v5347_v25 = vsub.f32 %v5329_v26, %v8284_v38  ;;  %v5261_v31 = vmul.f32 %v5229_v22, %v5171_v51  ;;  %v5277_v35 = vadd.f32 %v5245_v53, %v5171_v51 }
 0x614   : > { %v5366_v1 = vmul.f32 %v8345_v20, %v5347_v25  ;;  %v5295_v33 = vsub.f32 %v5261_v31, %v5277_v35 }
 0x616   : > { %v5382_v34 = vadd.f32 %v5366_v1, %v8284_v38  ;;  %v5314_v13 = vmul.f32 %v8341_v63, %v5295_v33 }
 0x617   : > { %v5109_v36 = vpop.f32.mrf.mxu2  ;;  %v5174_v14 = vpop.f32.mrf.mxu3 }
 0x618   : > { %5398 = vst [vmem:[#allocation10 + $0x50] sm:$0xff] %v5382_v34  ;;  %v5330_v39 = vadd.f32 %v5314_v13, %v5277_v35  ;;  %v5230_v6 = vmul.f32 %v5198_v10, %v5109_v36  ;;  %v5246_v29 = vadd.f32 %v5214_v12, %v5109_v36  ;;  %v4982_v7 = vpop.f32.mrf.mxu0  ;;  %v5047_v61 = vpop.f32.mrf.mxu1 }
 0x619   : > { %v5199_v47 = vmul.f32 %v5047_v61, %v4982_v7  ;;  %v5215_v28 = vadd.f32 %v5047_v61, %v4982_v7 }
 0x61a   : > { %v5348_v30 = vsub.f32 %v5330_v39, %v8294_v62  ;;  %v5262_v9 = vmul.f32 %v5230_v6, %v5174_v14  ;;  %v5278_v27 = vadd.f32 %v5246_v29, %v5174_v14 }
 0x61c   : > { %v5367_v5 = vmul.f32 %v8345_v20, %v5348_v30  ;;  %v5296_v54 = vsub.f32 %v5262_v9, %v5278_v27 }
 0x61e   : > { %v5383_v38 = vadd.f32 %v5367_v5, %v8294_v62  ;;  %v5315_v37 = vmul.f32 %v8341_v63, %v5296_v54 }
 0x61f   : > { %v5112_v40 = vpop.f32.mrf.mxu2  ;;  %v5177_v45 = vpop.f32.mrf.mxu3 }
 0x620   : > { %5399 = vst [vmem:[#allocation10 + $0x58] sm:$0xff] %v5383_v38  ;;  %v5331_v42 = vadd.f32 %v5315_v37, %v5278_v27  ;;  %v5231_v0 = vmul.f32 %v5199_v47, %v5112_v40  ;;  %v5247_v8 = vadd.f32 %v5215_v28, %v5112_v40  ;;  %v4985_v3 = vpop.f32.mrf.mxu0  ;;  %v5050_v44 = vpop.f32.mrf.mxu1 }
 0x621   : > { %v5200_v58 = vmul.f32 %v5050_v44, %v4985_v3  ;;  %v5216_v2 = vadd.f32 %v5050_v44, %v4985_v3 }
 0x622   : > { %v5349_v17 = vsub.f32 %v5331_v42, %v8304_v15  ;;  %v5263_v46 = vmul.f32 %v5231_v0, %v5177_v45  ;;  %v5279_v59 = vadd.f32 %v5247_v8, %v5177_v45 }
 0x624   : > { %v5368_v23 = vmul.f32 %v8345_v20, %v5349_v17  ;;  %v5297_v43 = vsub.f32 %v5263_v46, %v5279_v59 }
 0x626   : > { %v5384_v62 = vadd.f32 %v5368_v23, %v8304_v15  ;;  %v5316_v50 = vmul.f32 %v8341_v63, %v5297_v43 }
 0x627   : > { %v5115_v60 = vpop.f32.mrf.mxu2  ;;  %v5180_v21 = vpop.f32.mrf.mxu3 }
 0x628   : > { %5400 = vst [vmem:[#allocation10 + $0x60] sm:$0xff] %v5384_v62  ;;  %v5332_v55 = vadd.f32 %v5316_v50, %v5279_v59  ;;  %v5232_v48 = vmul.f32 %v5200_v58, %v5115_v60  ;;  %v5248_v11 = vadd.f32 %v5216_v2, %v5115_v60  ;;  %v4988_v57 = vpop.f32.mrf.mxu0  ;;  %v5053_v41 = vpop.f32.mrf.mxu1 }
 0x629   : > { %v5201_v22 = vmul.f32 %v5053_v41, %v4988_v57  ;;  %v5217_v53 = vadd.f32 %v5053_v41, %v4988_v57 }
 0x62a   : > { %v5350_v18 = vsub.f32 %v5332_v55, %v8314_v24  ;;  %v5264_v32 = vmul.f32 %v5232_v48, %v5180_v21  ;;  %v5280_v49 = vadd.f32 %v5248_v11, %v5180_v21 }
 0x62c   : > { %v5369_v16 = vmul.f32 %v8345_v20, %v5350_v18  ;;  %v5298_v51 = vsub.f32 %v5264_v32, %v5280_v49 }
 0x62e   : > { %v5385_v15 = vadd.f32 %v5369_v16, %v8314_v24  ;;  %v5317_v26 = vmul.f32 %v8341_v63, %v5298_v51 }
 0x62f   : > { %v5118_v52 = vpop.f32.mrf.mxu2  ;;  %v5183_v35 = vpop.f32.mrf.mxu3 }
 0x630   : > { %5401 = vst [vmem:[#allocation10 + $0x68] sm:$0xff] %v5385_v15  ;;  %v5333_v56 = vadd.f32 %v5317_v26, %v5280_v49  ;;  %v5233_v25 = vmul.f32 %v5201_v22, %v5118_v52  ;;  %v5249_v31 = vadd.f32 %v5217_v53, %v5118_v52 }
 0x632   : > { %v5351_v1 = vsub.f32 %v5333_v56, %v8324_v4  ;;  %v5265_v33 = vmul.f32 %v5233_v25, %v5183_v35  ;;  %v5281_v34 = vadd.f32 %v5249_v31, %v5183_v35 }
 0x634   : > { %v5370_v13 = vmul.f32 %v8345_v20, %v5351_v1  ;;  %v5299_v10 = vsub.f32 %v5265_v33, %v5281_v34 }
 0x636   : > { %v5386_v24 = vadd.f32 %v5370_v13, %v8324_v4  ;;  %v5318_v12 = vmul.f32 %v8341_v63, %v5299_v10 }
 0x638   : > { %5402 = vst [vmem:[#allocation10 + $0x70] sm:$0xff] %v5386_v24  ;;  %v5334_v36 = vadd.f32 %v5318_v12, %v5281_v34 }
 0x63a   : > { %v5352_v14 = vsub.f32 %v5334_v36, %v8334_v19 }
 0x63c   : > { %v5371_v39 = vmul.f32 %v8345_v20, %v5352_v14 }
 0x63e   : > { %v5387_v6 = vadd.f32 %v5371_v39, %v8334_v19 }
 0x640   : > { %5403 = vst [vmem:[#allocation10 + $0x78] sm:$0xff] %v5387_v6 }
 0x641   : > { %5755 = dma.vmem_to_hbm [thread:$0]  (%p5780_p2), %s5413_s17, 2048, %s5415_s10, [#allocation4], %s6112_s30, %s6112_s30, %s6113_s20  }
 0x642   : > { %6076 = dma.done.wait (%p5780_p2), [#allocation4], 2048  }
 0x643   : > { %6078 = vsyncadd (%p5780_p2), [#allocation4], 4294965248 }
 0x644 PF: > { %s8459_s12 = sld [smem:[#allocation16_spill]]  ;;  %s8463_s21 = smov %s6085_s22 }
 0x645   : > { %s8460_s7 = sld [smem:[#allocation15_spill]]  ;;  %s8465_s24 = smov %s6097_s25 }
 0x646   : > { %s8461_s23 = sld [smem:[#allocation18_spill]] }
 0x647   : > { %s8462_s16 = sld [smem:[#allocation17_spill]] }
 0x64a   : > { %s19_s26 = sadd.s32 1, %s8459_s12  }
 0x64b   : > { %p16_p3 = scmp.ge.s32.totalorder %s19_s26, 4   ;;  %s8464_s22 = smov %s8460_s7 }
 0x64d   : > { %s8466_s25 = smov %s8462_s16  ;;  %18 = sbr.rel (!%p16_p3) target bundleno = 8 (0x8), region = 137 }
 0x652   :  { %5431 = vsyncpa [#allocation3], 1 }
 0x653   :  { %5433 = vsyncpa [#allocation3 + $0x1], 1 }
 0x654   :  { %5434 = vsyncpa [#allocation6], 1 }
 0x655   :  { %5435 = vsyncpa [#allocation4], 1 }
 0x656   :  { %5437 = vsyncpa [#allocation4 + $0x1], 1 }

</bundles_post_ra>
